<compile_context>
chip_gen: v5e
topology: v5e:2x2
jax: 0.10.0
libtpu: 0.0.40
codegen_flags: <defaults>
</compile_context>

<pallas_src>
import functools

import jax
import jax.numpy as jnp
from jax import lax
from jax.experimental import pallas as pl
from jax.experimental.pallas import tpu as pltpu


def _round_up(x, m):
    return (x + m - 1) // m * m


# ---------------------------------------------------------------------------
# Kernel A: conv1 (3x3, Cin=1, MXU im2col) + BN + ReLU + ZeroPad2d(1,0,1,0)
#           + AvgPool2d(2, stride=1), all fused, 112-row blocks per sample.
# ---------------------------------------------------------------------------
def _conv1_kernel(p_ref, w_ref, s_ref, b_ref, o_ref):
    # p_ref: (nb, 784, 16) f32  im2col patches (row = h*28+w, col = kh*3+kw, padded)
    # w_ref: (16, 128)     f32  conv taps (rows kh*3+kw, zero-padded 9->16)
    # s_ref/b_ref: (1,128) f32  folded BN scale / shift (conv bias included)
    # o_ref: (nb, 784, 128) bf16 pooled activations (row = h*28+w)
    w = w_ref[...]
    scale = s_ref[...]
    shift = b_ref[...]
    # w-coordinate (column index within the image row) for each of the 112 flat rows.
    col = lax.broadcasted_iota(jnp.int32, (112, 1), 0) % 28
    zrow = jnp.zeros((1, 128), jnp.float32)
    nb = o_ref.shape[0]
    for s in range(nb):
        carry = jnp.zeros((28, 128), jnp.float32)      # last image row of prev. block
        for blk in range(7):                           # 7 blocks x 4 image rows
            r0 = blk * 112
            y = jnp.dot(p_ref[s, r0:r0 + 112, :], w,
                        preferred_element_type=jnp.float32)        # (112,128)
            y = jnp.maximum(y * scale + shift, 0.0)
            # left neighbour (w-1), zero at w==0 (ZeroPad2d left column)
            left = jnp.concatenate([zrow, y[:111]], axis=0)
            yw = y + jnp.where(col != 0, left, 0.0)
            # up neighbour (h-1), zero for the first image row (ZeroPad2d top row)
            up = jnp.concatenate([carry, yw[:84]], axis=0)
            o_ref[s, r0:r0 + 112, :] = ((yw + up) * 0.25).astype(o_ref.dtype)
            carry = yw[84:]


def conv1_stage(patches, w1, s1, sh1):
    b = patches.shape[0]
    nb = 1 if b <= 4 else 4                        # batch-block the grid at large B
    b_pad = _round_up(b, nb)
    if b_pad != b:
        patches = jnp.pad(patches, ((0, b_pad - b), (0, 0), (0, 0)))
    flops = 2 * b_pad * 784 * 16 * 128
    bytes_accessed = (b_pad * 784 * 16 * 4 + 16 * 128 * 4 + 2 * 128 * 4 +
                      b_pad * 784 * 128 * 2)
    out = pl.pallas_call(
        _conv1_kernel,
        out_shape=jax.ShapeDtypeStruct((b_pad, 784, 128), jnp.bfloat16),
        grid=(b_pad // nb,),
        in_specs=[
            pl.BlockSpec((nb, 784, 16), lambda i: (i, 0, 0)),
            pl.BlockSpec((16, 128), lambda i: (0, 0)),
            pl.BlockSpec((1, 128), lambda i: (0, 0)),
            pl.BlockSpec((1, 128), lambda i: (0, 0)),
        ],
        out_specs=pl.BlockSpec((nb, 784, 128), lambda i: (i, 0, 0)),
        compiler_params=pltpu.CompilerParams(dimension_semantics=("parallel",)),
        cost_estimate=pl.CostEstimate(flops=int(flops), transcendentals=0,
                                      bytes_accessed=int(bytes_accessed)),
    )(patches, w1, s1, sh1)
    return out[:b]


# ---------------------------------------------------------------------------
# Kernel B: M-tiled matmul + folded-BN affine + ReLU (conv2 as space-to-depth GEMM)
# ---------------------------------------------------------------------------
def _matmul_bn_relu_kernel(x_ref, w_ref, s_ref, b_ref, o_ref):
    y = jnp.dot(x_ref[...], w_ref[...], preferred_element_type=jnp.float32)
    o_ref[...] = jnp.maximum(y * s_ref[...] + b_ref[...], 0.0).astype(o_ref.dtype)


def matmul_bn_relu(x, w, scale, shift, *, out_dtype=jnp.bfloat16, tile_m=1024):
    m, k = x.shape
    n = w.shape[1]
    tm = min(tile_m, _round_up(m, 16))
    # Force >=2 grid steps on M so both v7x TensorCores get work at small batch.
    if m > 16 and _round_up(m, tm) // tm < 2:
        tm = _round_up((m + 1) // 2, 16)
    m_pad = _round_up(m, tm)
    if m_pad != m:
        x = jnp.pad(x, ((0, m_pad - m), (0, 0)))
    flops = 2 * m_pad * k * n
    bytes_accessed = (m_pad * k * x.dtype.itemsize + k * n * w.dtype.itemsize +
                      2 * n * 4 + m_pad * n * jnp.dtype(out_dtype).itemsize)
    out = pl.pallas_call(
        _matmul_bn_relu_kernel,
        out_shape=jax.ShapeDtypeStruct((m_pad, n), out_dtype),
        grid=(m_pad // tm,),
        in_specs=[
            pl.BlockSpec((tm, k), lambda i: (i, 0)),
            pl.BlockSpec((k, n), lambda i: (0, 0)),   # weight resident across M grid
            pl.BlockSpec((1, n), lambda i: (0, 0)),
            pl.BlockSpec((1, n), lambda i: (0, 0)),
        ],
        out_specs=pl.BlockSpec((tm, n), lambda i: (i, 0)),
        compiler_params=pltpu.CompilerParams(dimension_semantics=("parallel",)),
        cost_estimate=pl.CostEstimate(flops=int(flops), transcendentals=0,
                                      bytes_accessed=int(bytes_accessed)),
    )(x, w, scale, shift)
    return out[:m]


# ---------------------------------------------------------------------------
# Kernel C: fused conv3 (3x3/stride-2 GEMM) + BN + ReLU + FC1, per-sample grid.
# ---------------------------------------------------------------------------
def _conv3_fc_kernel(p_ref, w3_ref, s3_ref, b3_ref, wf_ref, bf_ref, o_ref):
    # p_ref:  (9, 2304) bf16  conv3 im2col patches for one sample (row p = ho*3+wo)
    # w3_ref: (2304, 256) bf16; s3/b3: (1,256) f32
    # wf_ref: (2304, 128) bf16  FC weight, rows ordered (p, c); bf_ref: (1,128) f32
    # o_ref:  (1, 128) f32 raw logits (cols 26..127 are padding)
    h = jnp.dot(p_ref[...], w3_ref[...], preferred_element_type=jnp.float32)  # (9,256)
    h = jnp.maximum(h * s3_ref[...] + b3_ref[...], 0.0).astype(jnp.bfloat16)
    acc = bf_ref[...]                                                          # (1,128)
    for p in range(9):
        acc = acc + jnp.dot(h[p:p + 1, :], wf_ref[p * 256:(p + 1) * 256, :],
                            preferred_element_type=jnp.float32)
    o_ref[...] = acc


def conv3_fc(patches, w3, s3, sh3, wf, bf):
    b = patches.shape[0]
    flops = b * (2 * 9 * 2304 * 256 + 2 * 2304 * 128)
    bytes_accessed = (b * 9 * 2304 * 2 + (2304 * 256 + 2304 * 128) * 2 +
                      (256 * 2 + 128 * 2) * 4 + b * 128 * 4)
    return pl.pallas_call(
        _conv3_fc_kernel,
        out_shape=jax.ShapeDtypeStruct((b, 1, 128), jnp.float32),
        grid=(b,),
        in_specs=[
            pl.BlockSpec((None, 9, 2304), lambda i: (i, 0, 0)),
            pl.BlockSpec((2304, 256), lambda i: (0, 0)),
            pl.BlockSpec((1, 256), lambda i: (0, 0)),
            pl.BlockSpec((1, 256), lambda i: (0, 0)),
            pl.BlockSpec((2304, 128), lambda i: (0, 0)),
            pl.BlockSpec((1, 128), lambda i: (0, 0)),
        ],
        out_specs=pl.BlockSpec((None, 1, 128), lambda i: (i, 0, 0)),
        compiler_params=pltpu.CompilerParams(dimension_semantics=("parallel",)),
        cost_estimate=pl.CostEstimate(flops=int(flops), transcendentals=0,
                                      bytes_accessed=int(bytes_accessed)),
    )(patches, w3, s3, sh3, wf, bf)


# ---------------------------------------------------------------------------
# Layout-only XLA glue
# ---------------------------------------------------------------------------
def conv1_patches(x_nchw):
    # NCHW (B,1,28,28) -> (B, 784, 16) f32 im2col patches, col order (kh*3+kw).
    b = x_nchw.shape[0]
    x = jnp.transpose(x_nchw, (0, 2, 3, 1)).astype(jnp.float32)     # (B,28,28,1)
    xp = jnp.pad(x, ((0, 0), (1, 1), (1, 1), (0, 0)))               # conv1 padding=1
    cols = [xp[:, di:di + 28, dj:dj + 28, 0] for di in range(3) for dj in range(3)]
    p = jnp.stack(cols, axis=-1).reshape(b, 784, 9)
    return jnp.pad(p, ((0, 0), (0, 0), (0, 7)))                     # K 9 -> 16


def space_to_depth_2x2(y):
    # [B, 28, 28, C] -> [B*14*14, 4*C], column order (kh, kw, c) matching conv2 weights.
    b, h, w, c = y.shape
    y = y.reshape(b, h // 2, 2, w // 2, 2, c)
    y = jnp.transpose(y, (0, 1, 3, 2, 4, 5))
    return y.reshape(b * (h // 2) * (w // 2), 4 * c)


def im2col(x, kh, kw, stride):
    # NHWC -> [B*Ho*Wo, kh*kw*C], column order (kh, kw, c).
    b, h, w, c = x.shape
    ho = (h - kh) // stride + 1
    wo = (w - kw) // stride + 1
    cols = []
    for i in range(kh):
        for j in range(kw):
            cols.append(x[:, i:i + (ho - 1) * stride + 1:stride,
                          j:j + (wo - 1) * stride + 1:stride, :])
    patches = jnp.stack(cols, axis=3)                  # [B, Ho, Wo, kh*kw, C]
    return patches.reshape(b * ho * wo, kh * kw * c)


# ---------------------------------------------------------------------------
# Parameters (deterministic synthetic, PyTorch layouts) and kernel-ready prep
# ---------------------------------------------------------------------------
def init_raw_params(key):
    ks = jax.random.split(key, 11)

    def nrm(k, shape, s=0.1):
        return jax.random.normal(k, shape, dtype=jnp.float32) * s

    def bn(k, c):
        k0, k1, k2, k3 = jax.random.split(k, 4)
        gamma = 1.0 + nrm(k0, (c,))
        beta = nrm(k1, (c,))
        mean = nrm(k2, (c,))
        var = jax.random.uniform(k3, (c,), dtype=jnp.float32, minval=0.5, maxval=1.5)
        return (gamma, beta, mean, var)

    return {
        "w1": nrm(ks[0], (128, 1, 3, 3)), "b1": nrm(ks[1], (128,)), "bn1": bn(ks[2], 128),
        "w2": nrm(ks[3], (192, 128, 2, 2)), "b2": nrm(ks[4], (192,)), "bn2": bn(ks[5], 192),
        "w3": nrm(ks[6], (256, 192, 3, 3)), "b3": nrm(ks[7], (256,)), "bn3": bn(ks[8], 256),
        "wf": nrm(ks[9], (26, 2304)), "bf": nrm(ks[10], (26,)),
    }


def _fold_bn(conv_bias, bn_stats, eps=1e-5):
    gamma, beta, mean, var = bn_stats
    scale = gamma / jnp.sqrt(var + eps)
    shift = beta + (conv_bias - mean) * scale
    return scale, shift


def prepare_params(rp):
    p = {}
    # conv1 taps [16, 128] (kh*3+kw padded to 16, Cout), f32 — MXU im2col path.
    w1 = jnp.transpose(rp["w1"], (2, 3, 1, 0)).reshape(9, 128)
    p["w1"] = jnp.pad(w1, ((0, 7), (0, 0)))
    s1, sh1 = _fold_bn(rp["b1"], rp["bn1"])
    p["s1"], p["sh1"] = s1.reshape(1, 128), sh1.reshape(1, 128)

    # conv2: [2*2*128, 192] -> Cout padded to 256 (lane-dense output), bf16.
    w2 = jnp.transpose(rp["w2"], (2, 3, 1, 0)).reshape(512, 192)
    p["w2"] = jnp.pad(w2, ((0, 0), (0, 64))).astype(jnp.bfloat16)
    s2, sh2 = _fold_bn(rp["b2"], rp["bn2"])
    p["s2"] = jnp.pad(s2, (0, 64)).reshape(1, 256)
    p["sh2"] = jnp.pad(sh2, (0, 64)).reshape(1, 256)

    # conv3: plain 3x3 / stride-2 GEMM weight, Cin padded 192 -> 256, rows (kh, kw, cin).
    w3 = jnp.pad(rp["w3"], ((0, 0), (0, 64), (0, 0), (0, 0)))        # [256,256,3,3]
    w3 = jnp.transpose(w3, (2, 3, 1, 0)).reshape(9 * 256, 256)       # [2304,256]
    p["w3"] = w3.astype(jnp.bfloat16)
    s3, sh3 = _fold_bn(rp["b3"], rp["bn3"])
    p["s3"], p["sh3"] = s3.reshape(1, 256), sh3.reshape(1, 256)

    # FC: reorder rows from PyTorch (c, h, w) flatten order to (p=h*3+w, c) order,
    # pad out-cols 26 -> 128 (lane-dense); bias is added directly in the fused kernel.
    wf = jnp.transpose(rp["wf"].reshape(26, 256, 3, 3), (2, 3, 1, 0)).reshape(2304, 26)
    p["wf"] = jnp.pad(wf, ((0, 0), (0, 102))).astype(jnp.bfloat16)
    p["bf"] = jnp.pad(rp["bf"], (0, 102)).reshape(1, 128)
    return p


# ---------------------------------------------------------------------------
# Forward pass (eval mode) — returns raw logits [B, 26]
# ---------------------------------------------------------------------------
@jax.jit
def forward(x_nchw, params):
    b = x_nchw.shape[0]

    # CNN1 (fused Pallas kernel): conv 3x3 + BN + ReLU + ZeroPad + AvgPool(2, 1)
    p1 = conv1_patches(x_nchw)                                        # [B,784,16] f32
    y = conv1_stage(p1, params["w1"], params["s1"], params["sh1"])    # [B,784,128] bf16
    y = y.reshape(b, 28, 28, 128)

    # CNN2: 2x2 / stride-2 conv == space-to-depth + matmul; BN + ReLU fused in-kernel.
    y = space_to_depth_2x2(y)                                         # [B*196, 512]
    y = matmul_bn_relu(y, params["w2"], params["s2"], params["sh2"],
                       tile_m=1024)                                   # [B*196, 256] bf16
    y = y.reshape(b, 14, 14, 256)

    # AvgPool2d(2): tiny XLA reshape-mean (layout glue only).
    y = y.reshape(b, 7, 2, 7, 2, 256).astype(jnp.float32).mean(axis=(2, 4))
    y = y.astype(jnp.bfloat16)                                        # [B,7,7,256]

    # CNN3 (3x3 / stride-2) + FC1 fused in one Pallas kernel -> raw logits.
    pat = im2col(y, 3, 3, 2).reshape(b, 9, 2304)                      # [B,9,2304] bf16
    logits = conv3_fc(pat, params["w3"], params["s3"], params["sh3"],
                      params["wf"], params["bf"])                     # [B,1,128] f32
    return logits.reshape(b, 128)[:, :26]


# ---------------------------------------------------------------------------
# Pure-JAX reference of the original module (f32) for a numerical sanity check
# ---------------------------------------------------------------------------
def reference_forward(x, rp):
    def conv(z, w, bias, stride, pad):
        out = lax.conv_general_dilated(
            z, w, window_strides=(stride, stride),
            padding=[(pad, pad), (pad, pad)],
            dimension_numbers=("NCHW", "OIHW", "NCHW"))
        return out + bias.reshape(1, -1, 1, 1)

    def bn(z, stats, eps=1e-5):
        gamma, beta, mean, var = (t.reshape(1, -1, 1, 1) for t in stats)
        return (z - mean) / jnp.sqrt(var + eps) * gamma + beta

    def avgpool(z, k, s):
        out = lax.reduce_window(z, 0.0, lax.add, (1, 1, k, k), (1, 1, s, s), "VALID")
        return out / float(k * k)

    y = jax.nn.relu(bn(conv(x, rp["w1"], rp["b1"], 1, 1), rp["bn1"]))
    y = jnp.pad(y, ((0, 0), (0, 0), (1, 0), (1, 0)))      # ZeroPad2d(left=1, top=1)
    y = avgpool(y, 2, 1)
    y = jax.nn.relu(bn(conv(y, rp["w2"], rp["b2"], 2, 0), rp["bn2"]))
    y = avgpool(y, 2, 2)
    y = jax.nn.relu(bn(conv(y, rp["w3"], rp["b3"], 2, 0), rp["bn3"]))
    y = y.reshape(y.shape[0], -1)
    return y @ rp["wf"].T + rp["bf"]


if __name__ == "__main__":
    key = jax.random.PRNGKey(0)
    kp, kx = jax.random.split(key)
    raw = init_raw_params(kp)
    params = prepare_params(raw)

    # EMNIST-shaped input: batch=2, 1 channel, 28x28 (required by FC1 in_features=2304)
    x = jax.random.normal(kx, (2, 1, 28, 28), dtype=jnp.float32)

    out = jax.block_until_ready(forward(x, params))
    assert out.shape == (2, 26), out.shape
    assert bool(jnp.all(jnp.isfinite(out)))

    ref = reference_forward(x, raw)
    err = jnp.linalg.norm(out - ref) / jnp.maximum(jnp.linalg.norm(ref), 1e-6)
    assert float(err) < 3e-2, f"mismatch vs reference: rel_l2={float(err):.4f}"

    print("KERNEL_OK")
</pallas_src>

<mosaic_0001>
module attributes {stable_mosaic.version = 11 : i64} {
  func.func @_conv1_kernel(%arg0: i32, %arg1: memref<1x784x16xf32, #tpu.memory_space<vmem>>, %arg2: memref<16x128xf32, #tpu.memory_space<vmem>>, %arg3: memref<1x128xf32, #tpu.memory_space<vmem>>, %arg4: memref<1x128xf32, #tpu.memory_space<vmem>>, %arg5: memref<1x784x128xbf16, #tpu.memory_space<vmem>>) attributes {dimension_semantics = [#tpu.dimension_semantics<parallel>], iteration_bounds = array<i64: 2>, scalar_prefetch = 0 : i64, scratch_operands = 0 : i64, tpu.core_type = #tpu.core_type<tc>, window_params = [{transform_indices = @transform_0, window_bounds = array<i64: 1, 784, 16>}, {pipeline_mode = #tpu.pipeline_mode<synchronous>, transform_indices = @transform_1, window_bounds = array<i64: 16, 128>}, {pipeline_mode = #tpu.pipeline_mode<synchronous>, transform_indices = @transform_2, window_bounds = array<i64: 1, 128>}, {pipeline_mode = #tpu.pipeline_mode<synchronous>, transform_indices = @transform_3, window_bounds = array<i64: 1, 128>}, {transform_indices = @transform_4, window_bounds = array<i64: 1, 784, 128>}]} {
    %c0 = arith.constant 0 : index
    %c0_0 = arith.constant 0 : index
    %0 = vector.load %arg2[%c0, %c0_0] : memref<16x128xf32, #tpu.memory_space<vmem>>, vector<16x128xf32>
    %c0_1 = arith.constant 0 : index
    %c0_2 = arith.constant 0 : index
    %1 = vector.load %arg3[%c0_1, %c0_2] : memref<1x128xf32, #tpu.memory_space<vmem>>, vector<1x128xf32>
    %c0_3 = arith.constant 0 : index
    %c0_4 = arith.constant 0 : index
    %2 = vector.load %arg4[%c0_3, %c0_4] : memref<1x128xf32, #tpu.memory_space<vmem>>, vector<1x128xf32>
    %3 = tpu.iota {dimensions = array<i32: 0>} : vector<112x1xi32>
    %c28_i32 = arith.constant 28 : i32
    %c0_i32 = arith.constant 0 : i32
    %4 = arith.cmpi eq, %c28_i32, %c0_i32 : i32
    %c1_i32 = arith.constant 1 : i32
    %5 = arith.select %4, %c1_i32, %c28_i32 : i32
    %6 = vector.broadcast %5 : i32 to vector<112x1xi32>
    %7 = arith.remsi %3, %6 : vector<112x1xi32>
    %c0_i32_5 = arith.constant 0 : i32
    %8 = vector.broadcast %c0_i32_5 : i32 to vector<112x1xi32>
    %9 = arith.cmpi ne, %7, %8 : vector<112x1xi32>
    %c0_i32_6 = arith.constant 0 : i32
    %10 = vector.broadcast %c0_i32_6 : i32 to vector<112x1xi32>
    %11 = arith.cmpi slt, %7, %10 : vector<112x1xi32>
    %c0_i32_7 = arith.constant 0 : i32
    %12 = arith.cmpi slt, %5, %c0_i32_7 : i32
    %13 = vector.broadcast %12 : i1 to vector<112x1xi1>
    %14 = vector.broadcast %13 : vector<112x1xi1> to vector<112x1xi1>
    %15 = arith.xori %11, %14 : vector<112x1xi1>
    %16 = arith.andi %15, %9 : vector<112x1xi1>
    %17 = vector.broadcast %5 : i32 to vector<112x1xi32>
    %18 = arith.addi %7, %17 : vector<112x1xi32>
    %19 = arith.select %16, %18, %7 : vector<112x1xi1>, vector<112x1xi32>
    %cst = arith.constant 0.000000e+00 : f32
    %20 = vector.broadcast %cst : f32 to vector<1x128xf32>
    %cst_8 = arith.constant 0.000000e+00 : f32
    %21 = vector.broadcast %cst_8 : f32 to vector<28x128xf32>
    %c0_9 = arith.constant 0 : index
    %c0_10 = arith.constant 0 : index
    %c0_11 = arith.constant 0 : index
    %22 = vector.load %arg1[%c0_9, %c0_10, %c0_11] : memref<1x784x16xf32, #tpu.memory_space<vmem>>, vector<1x112x16xf32>
    %23 = vector.shape_cast %22 : vector<1x112x16xf32> to vector<112x16xf32>
    %cst_12 = arith.constant dense<0.000000e+00> : vector<112x128xf32>
    %24 = tpu.matmul %23, %0, %cst_12 {dimension_numbers = #tpu.dot_dimension_numbers<[1], [0], [0], [1], [0, 0, 1, 1], [], []>} : vector<112x16xf32>, vector<16x128xf32>, vector<112x128xf32> -> vector<112x128xf32>
    %25 = vector.broadcast %1 : vector<1x128xf32> to vector<112x128xf32>
    %26 = arith.mulf %24, %25 : vector<112x128xf32>
    %27 = vector.broadcast %2 : vector<1x128xf32> to vector<112x128xf32>
    %28 = arith.addf %26, %27 : vector<112x128xf32>
    %cst_13 = arith.constant 0.000000e+00 : f32
    %29 = vector.broadcast %cst_13 : f32 to vector<112x128xf32>
    %30 = arith.maximumf %28, %29 : vector<112x128xf32>
    %31 = vector.extract_strided_slice %30 {offsets = [0, 0], sizes = [111, 128], strides = [1, 1]} : vector<112x128xf32> to vector<111x128xf32>
    %32 = tpu.concatenate %20, %31 in 0 : vector<1x128xf32>, vector<111x128xf32> -> vector<112x128xf32>
    %c0_i32_14 = arith.constant 0 : i32
    %33 = vector.broadcast %c0_i32_14 : i32 to vector<112x1xi32>
    %34 = arith.cmpi ne, %19, %33 : vector<112x1xi32>
    %cst_15 = arith.constant 0.000000e+00 : f32
    %35 = vector.shape_cast %34 : vector<112x1xi1> to vector<112x1xi1>
    %36 = vector.broadcast %35 : vector<112x1xi1> to vector<112x128xi1>
    %37 = vector.broadcast %cst_15 : f32 to vector<112x128xf32>
    %38 = arith.select %36, %32, %37 : vector<112x128xi1>, vector<112x128xf32>
    %39 = arith.addf %30, %38 : vector<112x128xf32>
    %40 = vector.extract_strided_slice %39 {offsets = [0, 0], sizes = [84, 128], strides = [1, 1]} : vector<112x128xf32> to vector<84x128xf32>
    %41 = tpu.concatenate %21, %40 in 0 : vector<28x128xf32>, vector<84x128xf32> -> vector<112x128xf32>
    %42 = arith.addf %39, %41 : vector<112x128xf32>
    %cst_16 = arith.constant 2.500000e-01 : f32
    %43 = vector.broadcast %cst_16 : f32 to vector<112x128xf32>
    %44 = arith.mulf %42, %43 : vector<112x128xf32>
    %45 = arith.truncf %44 : vector<112x128xf32> to vector<112x128xbf16>
    %c0_17 = arith.constant 0 : index
    %c0_18 = arith.constant 0 : index
    %c0_19 = arith.constant 0 : index
    %46 = vector.load %arg5[%c0_17, %c0_18, %c0_19] : memref<1x784x128xbf16, #tpu.memory_space<vmem>>, vector<1x112x128xbf16>
    %47 = vector.shape_cast %46 : vector<1x112x128xbf16> to vector<112x128xbf16>
    %48 = vector.shape_cast %45 : vector<112x128xbf16> to vector<1x112x128xbf16>
    tpu.vector_store %arg5[%c0_17, %c0_18, %c0_19], %48 {strides = array<i32>} : memref<1x784x128xbf16, #tpu.memory_space<vmem>>, vector<1x112x128xbf16>,
    %49 = vector.extract_strided_slice %39 {offsets = [84, 0], sizes = [28, 128], strides = [1, 1]} : vector<112x128xf32> to vector<28x128xf32>
    %c0_20 = arith.constant 0 : index
    %c112 = arith.constant 112 : index
    %c0_21 = arith.constant 0 : index
    %50 = vector.load %arg1[%c0_20, %c112, %c0_21] : memref<1x784x16xf32, #tpu.memory_space<vmem>>, vector<1x112x16xf32>
    %51 = vector.shape_cast %50 : vector<1x112x16xf32> to vector<112x16xf32>
    %cst_22 = arith.constant dense<0.000000e+00> : vector<112x128xf32>
    %52 = tpu.matmul %51, %0, %cst_22 {dimension_numbers = #tpu.dot_dimension_numbers<[1], [0], [0], [1], [0, 0, 1, 1], [], []>} : vector<112x16xf32>, vector<16x128xf32>, vector<112x128xf32> -> vector<112x128xf32>
    %53 = vector.broadcast %1 : vector<1x128xf32> to vector<112x128xf32>
    %54 = arith.mulf %52, %53 : vector<112x128xf32>
    %55 = vector.broadcast %2 : vector<1x128xf32> to vector<112x128xf32>
    %56 = arith.addf %54, %55 : vector<112x128xf32>
    %cst_23 = arith.constant 0.000000e+00 : f32
    %57 = vector.broadcast %cst_23 : f32 to vector<112x128xf32>
    %58 = arith.maximumf %56, %57 : vector<112x128xf32>
    %59 = vector.extract_strided_slice %58 {offsets = [0, 0], sizes = [111, 128], strides = [1, 1]} : vector<112x128xf32> to vector<111x128xf32>
    %60 = tpu.concatenate %20, %59 in 0 : vector<1x128xf32>, vector<111x128xf32> -> vector<112x128xf32>
    %c0_i32_24 = arith.constant 0 : i32
    %61 = vector.broadcast %c0_i32_24 : i32 to vector<112x1xi32>
    %62 = arith.cmpi ne, %19, %61 : vector<112x1xi32>
    %cst_25 = arith.constant 0.000000e+00 : f32
    %63 = vector.shape_cast %62 : vector<112x1xi1> to vector<112x1xi1>
    %64 = vector.broadcast %63 : vector<112x1xi1> to vector<112x128xi1>
    %65 = vector.broadcast %cst_25 : f32 to vector<112x128xf32>
    %66 = arith.select %64, %60, %65 : vector<112x128xi1>, vector<112x128xf32>
    %67 = arith.addf %58, %66 : vector<112x128xf32>
    %68 = vector.extract_strided_slice %67 {offsets = [0, 0], sizes = [84, 128], strides = [1, 1]} : vector<112x128xf32> to vector<84x128xf32>
    %69 = tpu.concatenate %49, %68 in 0 : vector<28x128xf32>, vector<84x128xf32> -> vector<112x128xf32>
    %70 = arith.addf %67, %69 : vector<112x128xf32>
    %cst_26 = arith.constant 2.500000e-01 : f32
    %71 = vector.broadcast %cst_26 : f32 to vector<112x128xf32>
    %72 = arith.mulf %70, %71 : vector<112x128xf32>
    %73 = arith.truncf %72 : vector<112x128xf32> to vector<112x128xbf16>
    %c0_27 = arith.constant 0 : index
    %c112_28 = arith.constant 112 : index
    %c0_29 = arith.constant 0 : index
    %74 = vector.load %arg5[%c0_27, %c112_28, %c0_29] : memref<1x784x128xbf16, #tpu.memory_space<vmem>>, vector<1x112x128xbf16>
    %75 = vector.shape_cast %74 : vector<1x112x128xbf16> to vector<112x128xbf16>
    %76 = vector.shape_cast %73 : vector<112x128xbf16> to vector<1x112x128xbf16>
    tpu.vector_store %arg5[%c0_27, %c112_28, %c0_29], %76 {strides = array<i32>} : memref<1x784x128xbf16, #tpu.memory_space<vmem>>, vector<1x112x128xbf16>,
    %77 = vector.extract_strided_slice %67 {offsets = [84, 0], sizes = [28, 128], strides = [1, 1]} : vector<112x128xf32> to vector<28x128xf32>
    %c0_30 = arith.constant 0 : index
    %c224 = arith.constant 224 : index
    %c0_31 = arith.constant 0 : index
    %78 = vector.load %arg1[%c0_30, %c224, %c0_31] : memref<1x784x16xf32, #tpu.memory_space<vmem>>, vector<1x112x16xf32>
    %79 = vector.shape_cast %78 : vector<1x112x16xf32> to vector<112x16xf32>
    %cst_32 = arith.constant dense<0.000000e+00> : vector<112x128xf32>
    %80 = tpu.matmul %79, %0, %cst_32 {dimension_numbers = #tpu.dot_dimension_numbers<[1], [0], [0], [1], [0, 0, 1, 1], [], []>} : vector<112x16xf32>, vector<16x128xf32>, vector<112x128xf32> -> vector<112x128xf32>
    %81 = vector.broadcast %1 : vector<1x128xf32> to vector<112x128xf32>
    %82 = arith.mulf %80, %81 : vector<112x128xf32>
    %83 = vector.broadcast %2 : vector<1x128xf32> to vector<112x128xf32>
    %84 = arith.addf %82, %83 : vector<112x128xf32>
    %cst_33 = arith.constant 0.000000e+00 : f32
    %85 = vector.broadcast %cst_33 : f32 to vector<112x128xf32>
    %86 = arith.maximumf %84, %85 : vector<112x128xf32>
    %87 = vector.extract_strided_slice %86 {offsets = [0, 0], sizes = [111, 128], strides = [1, 1]} : vector<112x128xf32> to vector<111x128xf32>
    %88 = tpu.concatenate %20, %87 in 0 : vector<1x128xf32>, vector<111x128xf32> -> vector<112x128xf32>
    %c0_i32_34 = arith.constant 0 : i32
    %89 = vector.broadcast %c0_i32_34 : i32 to vector<112x1xi32>
    %90 = arith.cmpi ne, %19, %89 : vector<112x1xi32>
    %cst_35 = arith.constant 0.000000e+00 : f32
    %91 = vector.shape_cast %90 : vector<112x1xi1> to vector<112x1xi1>
    %92 = vector.broadcast %91 : vector<112x1xi1> to vector<112x128xi1>
    %93 = vector.broadcast %cst_35 : f32 to vector<112x128xf32>
    %94 = arith.select %92, %88, %93 : vector<112x128xi1>, vector<112x128xf32>
    %95 = arith.addf %86, %94 : vector<112x128xf32>
    %96 = vector.extract_strided_slice %95 {offsets = [0, 0], sizes = [84, 128], strides = [1, 1]} : vector<112x128xf32> to vector<84x128xf32>
    %97 = tpu.concatenate %77, %96 in 0 : vector<28x128xf32>, vector<84x128xf32> -> vector<112x128xf32>
    %98 = arith.addf %95, %97 : vector<112x128xf32>
    %cst_36 = arith.constant 2.500000e-01 : f32
    %99 = vector.broadcast %cst_36 : f32 to vector<112x128xf32>
    %100 = arith.mulf %98, %99 : vector<112x128xf32>
    %101 = arith.truncf %100 : vector<112x128xf32> to vector<112x128xbf16>
    %c0_37 = arith.constant 0 : index
    %c224_38 = arith.constant 224 : index
    %c0_39 = arith.constant 0 : index
    %102 = vector.load %arg5[%c0_37, %c224_38, %c0_39] : memref<1x784x128xbf16, #tpu.memory_space<vmem>>, vector<1x112x128xbf16>
    %103 = vector.shape_cast %102 : vector<1x112x128xbf16> to vector<112x128xbf16>
    %104 = vector.shape_cast %101 : vector<112x128xbf16> to vector<1x112x128xbf16>
    tpu.vector_store %arg5[%c0_37, %c224_38, %c0_39], %104 {strides = array<i32>} : memref<1x784x128xbf16, #tpu.memory_space<vmem>>, vector<1x112x128xbf16>,
    %105 = vector.extract_strided_slice %95 {offsets = [84, 0], sizes = [28, 128], strides = [1, 1]} : vector<112x128xf32> to vector<28x128xf32>
    %c0_40 = arith.constant 0 : index
    %c336 = arith.constant 336 : index
    %c0_41 = arith.constant 0 : index
    %106 = vector.load %arg1[%c0_40, %c336, %c0_41] : memref<1x784x16xf32, #tpu.memory_space<vmem>>, vector<1x112x16xf32>
    %107 = vector.shape_cast %106 : vector<1x112x16xf32> to vector<112x16xf32>
    %cst_42 = arith.constant dense<0.000000e+00> : vector<112x128xf32>
    %108 = tpu.matmul %107, %0, %cst_42 {dimension_numbers = #tpu.dot_dimension_numbers<[1], [0], [0], [1], [0, 0, 1, 1], [], []>} : vector<112x16xf32>, vector<16x128xf32>, vector<112x128xf32> -> vector<112x128xf32>
    %109 = vector.broadcast %1 : vector<1x128xf32> to vector<112x128xf32>
    %110 = arith.mulf %108, %109 : vector<112x128xf32>
    %111 = vector.broadcast %2 : vector<1x128xf32> to vector<112x128xf32>
    %112 = arith.addf %110, %111 : vector<112x128xf32>
    %cst_43 = arith.constant 0.000000e+00 : f32
    %113 = vector.broadcast %cst_43 : f32 to vector<112x128xf32>
    %114 = arith.maximumf %112, %113 : vector<112x128xf32>
    %115 = vector.extract_strided_slice %114 {offsets = [0, 0], sizes = [111, 128], strides = [1, 1]} : vector<112x128xf32> to vector<111x128xf32>
    %116 = tpu.concatenate %20, %115 in 0 : vector<1x128xf32>, vector<111x128xf32> -> vector<112x128xf32>
    %c0_i32_44 = arith.constant 0 : i32
    %117 = vector.broadcast %c0_i32_44 : i32 to vector<112x1xi32>
    %118 = arith.cmpi ne, %19, %117 : vector<112x1xi32>
    %cst_45 = arith.constant 0.000000e+00 : f32
    %119 = vector.shape_cast %118 : vector<112x1xi1> to vector<112x1xi1>
    %120 = vector.broadcast %119 : vector<112x1xi1> to vector<112x128xi1>
    %121 = vector.broadcast %cst_45 : f32 to vector<112x128xf32>
    %122 = arith.select %120, %116, %121 : vector<112x128xi1>, vector<112x128xf32>
    %123 = arith.addf %114, %122 : vector<112x128xf32>
    %124 = vector.extract_strided_slice %123 {offsets = [0, 0], sizes = [84, 128], strides = [1, 1]} : vector<112x128xf32> to vector<84x128xf32>
    %125 = tpu.concatenate %105, %124 in 0 : vector<28x128xf32>, vector<84x128xf32> -> vector<112x128xf32>
    %126 = arith.addf %123, %125 : vector<112x128xf32>
    %cst_46 = arith.constant 2.500000e-01 : f32
    %127 = vector.broadcast %cst_46 : f32 to vector<112x128xf32>
    %128 = arith.mulf %126, %127 : vector<112x128xf32>
    %129 = arith.truncf %128 : vector<112x128xf32> to vector<112x128xbf16>
    %c0_47 = arith.constant 0 : index
    %c336_48 = arith.constant 336 : index
    %c0_49 = arith.constant 0 : index
    %130 = vector.load %arg5[%c0_47, %c336_48, %c0_49] : memref<1x784x128xbf16, #tpu.memory_space<vmem>>, vector<1x112x128xbf16>
    %131 = vector.shape_cast %130 : vector<1x112x128xbf16> to vector<112x128xbf16>
    %132 = vector.shape_cast %129 : vector<112x128xbf16> to vector<1x112x128xbf16>
    tpu.vector_store %arg5[%c0_47, %c336_48, %c0_49], %132 {strides = array<i32>} : memref<1x784x128xbf16, #tpu.memory_space<vmem>>, vector<1x112x128xbf16>,
    %133 = vector.extract_strided_slice %123 {offsets = [84, 0], sizes = [28, 128], strides = [1, 1]} : vector<112x128xf32> to vector<28x128xf32>
    %c0_50 = arith.constant 0 : index
    %c448 = arith.constant 448 : index
    %c0_51 = arith.constant 0 : index
    %134 = vector.load %arg1[%c0_50, %c448, %c0_51] : memref<1x784x16xf32, #tpu.memory_space<vmem>>, vector<1x112x16xf32>
    %135 = vector.shape_cast %134 : vector<1x112x16xf32> to vector<112x16xf32>
    %cst_52 = arith.constant dense<0.000000e+00> : vector<112x128xf32>
    %136 = tpu.matmul %135, %0, %cst_52 {dimension_numbers = #tpu.dot_dimension_numbers<[1], [0], [0], [1], [0, 0, 1, 1], [], []>} : vector<112x16xf32>, vector<16x128xf32>, vector<112x128xf32> -> vector<112x128xf32>
    %137 = vector.broadcast %1 : vector<1x128xf32> to vector<112x128xf32>
    %138 = arith.mulf %136, %137 : vector<112x128xf32>
    %139 = vector.broadcast %2 : vector<1x128xf32> to vector<112x128xf32>
    %140 = arith.addf %138, %139 : vector<112x128xf32>
    %cst_53 = arith.constant 0.000000e+00 : f32
    %141 = vector.broadcast %cst_53 : f32 to vector<112x128xf32>
    %142 = arith.maximumf %140, %141 : vector<112x128xf32>
    %143 = vector.extract_strided_slice %142 {offsets = [0, 0], sizes = [111, 128], strides = [1, 1]} : vector<112x128xf32> to vector<111x128xf32>
    %144 = tpu.concatenate %20, %143 in 0 : vector<1x128xf32>, vector<111x128xf32> -> vector<112x128xf32>
    %c0_i32_54 = arith.constant 0 : i32
    %145 = vector.broadcast %c0_i32_54 : i32 to vector<112x1xi32>
    %146 = arith.cmpi ne, %19, %145 : vector<112x1xi32>
    %cst_55 = arith.constant 0.000000e+00 : f32
    %147 = vector.shape_cast %146 : vector<112x1xi1> to vector<112x1xi1>
    %148 = vector.broadcast %147 : vector<112x1xi1> to vector<112x128xi1>
    %149 = vector.broadcast %cst_55 : f32 to vector<112x128xf32>
    %150 = arith.select %148, %144, %149 : vector<112x128xi1>, vector<112x128xf32>
    %151 = arith.addf %142, %150 : vector<112x128xf32>
    %152 = vector.extract_strided_slice %151 {offsets = [0, 0], sizes = [84, 128], strides = [1, 1]} : vector<112x128xf32> to vector<84x128xf32>
    %153 = tpu.concatenate %133, %152 in 0 : vector<28x128xf32>, vector<84x128xf32> -> vector<112x128xf32>
    %154 = arith.addf %151, %153 : vector<112x128xf32>
    %cst_56 = arith.constant 2.500000e-01 : f32
    %155 = vector.broadcast %cst_56 : f32 to vector<112x128xf32>
    %156 = arith.mulf %154, %155 : vector<112x128xf32>
    %157 = arith.truncf %156 : vector<112x128xf32> to vector<112x128xbf16>
    %c0_57 = arith.constant 0 : index
    %c448_58 = arith.constant 448 : index
    %c0_59 = arith.constant 0 : index
    %158 = vector.load %arg5[%c0_57, %c448_58, %c0_59] : memref<1x784x128xbf16, #tpu.memory_space<vmem>>, vector<1x112x128xbf16>
    %159 = vector.shape_cast %158 : vector<1x112x128xbf16> to vector<112x128xbf16>
    %160 = vector.shape_cast %157 : vector<112x128xbf16> to vector<1x112x128xbf16>
    tpu.vector_store %arg5[%c0_57, %c448_58, %c0_59], %160 {strides = array<i32>} : memref<1x784x128xbf16, #tpu.memory_space<vmem>>, vector<1x112x128xbf16>,
    %161 = vector.extract_strided_slice %151 {offsets = [84, 0], sizes = [28, 128], strides = [1, 1]} : vector<112x128xf32> to vector<28x128xf32>
    %c0_60 = arith.constant 0 : index
    %c560 = arith.constant 560 : index
    %c0_61 = arith.constant 0 : index
    %162 = vector.load %arg1[%c0_60, %c560, %c0_61] : memref<1x784x16xf32, #tpu.memory_space<vmem>>, vector<1x112x16xf32>
    %163 = vector.shape_cast %162 : vector<1x112x16xf32> to vector<112x16xf32>
    %cst_62 = arith.constant dense<0.000000e+00> : vector<112x128xf32>
    %164 = tpu.matmul %163, %0, %cst_62 {dimension_numbers = #tpu.dot_dimension_numbers<[1], [0], [0], [1], [0, 0, 1, 1], [], []>} : vector<112x16xf32>, vector<16x128xf32>, vector<112x128xf32> -> vector<112x128xf32>
    %165 = vector.broadcast %1 : vector<1x128xf32> to vector<112x128xf32>
    %166 = arith.mulf %164, %165 : vector<112x128xf32>
    %167 = vector.broadcast %2 : vector<1x128xf32> to vector<112x128xf32>
    %168 = arith.addf %166, %167 : vector<112x128xf32>
    %cst_63 = arith.constant 0.000000e+00 : f32
    %169 = vector.broadcast %cst_63 : f32 to vector<112x128xf32>
    %170 = arith.maximumf %168, %169 : vector<112x128xf32>
    %171 = vector.extract_strided_slice %170 {offsets = [0, 0], sizes = [111, 128], strides = [1, 1]} : vector<112x128xf32> to vector<111x128xf32>
    %172 = tpu.concatenate %20, %171 in 0 : vector<1x128xf32>, vector<111x128xf32> -> vector<112x128xf32>
    %c0_i32_64 = arith.constant 0 : i32
    %173 = vector.broadcast %c0_i32_64 : i32 to vector<112x1xi32>
    %174 = arith.cmpi ne, %19, %173 : vector<112x1xi32>
    %cst_65 = arith.constant 0.000000e+00 : f32
    %175 = vector.shape_cast %174 : vector<112x1xi1> to vector<112x1xi1>
    %176 = vector.broadcast %175 : vector<112x1xi1> to vector<112x128xi1>
    %177 = vector.broadcast %cst_65 : f32 to vector<112x128xf32>
    %178 = arith.select %176, %172, %177 : vector<112x128xi1>, vector<112x128xf32>
    %179 = arith.addf %170, %178 : vector<112x128xf32>
    %180 = vector.extract_strided_slice %179 {offsets = [0, 0], sizes = [84, 128], strides = [1, 1]} : vector<112x128xf32> to vector<84x128xf32>
    %181 = tpu.concatenate %161, %180 in 0 : vector<28x128xf32>, vector<84x128xf32> -> vector<112x128xf32>
    %182 = arith.addf %179, %181 : vector<112x128xf32>
    %cst_66 = arith.constant 2.500000e-01 : f32
    %183 = vector.broadcast %cst_66 : f32 to vector<112x128xf32>
    %184 = arith.mulf %182, %183 : vector<112x128xf32>
    %185 = arith.truncf %184 : vector<112x128xf32> to vector<112x128xbf16>
    %c0_67 = arith.constant 0 : index
    %c560_68 = arith.constant 560 : index
    %c0_69 = arith.constant 0 : index
    %186 = vector.load %arg5[%c0_67, %c560_68, %c0_69] : memref<1x784x128xbf16, #tpu.memory_space<vmem>>, vector<1x112x128xbf16>
    %187 = vector.shape_cast %186 : vector<1x112x128xbf16> to vector<112x128xbf16>
    %188 = vector.shape_cast %185 : vector<112x128xbf16> to vector<1x112x128xbf16>
    tpu.vector_store %arg5[%c0_67, %c560_68, %c0_69], %188 {strides = array<i32>} : memref<1x784x128xbf16, #tpu.memory_space<vmem>>, vector<1x112x128xbf16>,
    %189 = vector.extract_strided_slice %179 {offsets = [84, 0], sizes = [28, 128], strides = [1, 1]} : vector<112x128xf32> to vector<28x128xf32>
    %c0_70 = arith.constant 0 : index
    %c672 = arith.constant 672 : index
    %c0_71 = arith.constant 0 : index
    %190 = vector.load %arg1[%c0_70, %c672, %c0_71] : memref<1x784x16xf32, #tpu.memory_space<vmem>>, vector<1x112x16xf32>
    %191 = vector.shape_cast %190 : vector<1x112x16xf32> to vector<112x16xf32>
    %cst_72 = arith.constant dense<0.000000e+00> : vector<112x128xf32>
    %192 = tpu.matmul %191, %0, %cst_72 {dimension_numbers = #tpu.dot_dimension_numbers<[1], [0], [0], [1], [0, 0, 1, 1], [], []>} : vector<112x16xf32>, vector<16x128xf32>, vector<112x128xf32> -> vector<112x128xf32>
    %193 = vector.broadcast %1 : vector<1x128xf32> to vector<112x128xf32>
    %194 = arith.mulf %192, %193 : vector<112x128xf32>
    %195 = vector.broadcast %2 : vector<1x128xf32> to vector<112x128xf32>
    %196 = arith.addf %194, %195 : vector<112x128xf32>
    %cst_73 = arith.constant 0.000000e+00 : f32
    %197 = vector.broadcast %cst_73 : f32 to vector<112x128xf32>
    %198 = arith.maximumf %196, %197 : vector<112x128xf32>
    %199 = vector.extract_strided_slice %198 {offsets = [0, 0], sizes = [111, 128], strides = [1, 1]} : vector<112x128xf32> to vector<111x128xf32>
    %200 = tpu.concatenate %20, %199 in 0 : vector<1x128xf32>, vector<111x128xf32> -> vector<112x128xf32>
    %c0_i32_74 = arith.constant 0 : i32
    %201 = vector.broadcast %c0_i32_74 : i32 to vector<112x1xi32>
    %202 = arith.cmpi ne, %19, %201 : vector<112x1xi32>
    %cst_75 = arith.constant 0.000000e+00 : f32
    %203 = vector.shape_cast %202 : vector<112x1xi1> to vector<112x1xi1>
    %204 = vector.broadcast %203 : vector<112x1xi1> to vector<112x128xi1>
    %205 = vector.broadcast %cst_75 : f32 to vector<112x128xf32>
    %206 = arith.select %204, %200, %205 : vector<112x128xi1>, vector<112x128xf32>
    %207 = arith.addf %198, %206 : vector<112x128xf32>
    %208 = vector.extract_strided_slice %207 {offsets = [0, 0], sizes = [84, 128], strides = [1, 1]} : vector<112x128xf32> to vector<84x128xf32>
    %209 = tpu.concatenate %189, %208 in 0 : vector<28x128xf32>, vector<84x128xf32> -> vector<112x128xf32>
    %210 = arith.addf %207, %209 : vector<112x128xf32>
    %cst_76 = arith.constant 2.500000e-01 : f32
    %211 = vector.broadcast %cst_76 : f32 to vector<112x128xf32>
    %212 = arith.mulf %210, %211 : vector<112x128xf32>
    %213 = arith.truncf %212 : vector<112x128xf32> to vector<112x128xbf16>
    %c0_77 = arith.constant 0 : index
    %c672_78 = arith.constant 672 : index
    %c0_79 = arith.constant 0 : index
    %214 = vector.load %arg5[%c0_77, %c672_78, %c0_79] : memref<1x784x128xbf16, #tpu.memory_space<vmem>>, vector<1x112x128xbf16>
    %215 = vector.shape_cast %214 : vector<1x112x128xbf16> to vector<112x128xbf16>
    %216 = vector.shape_cast %213 : vector<112x128xbf16> to vector<1x112x128xbf16>
    tpu.vector_store %arg5[%c0_77, %c672_78, %c0_79], %216 {strides = array<i32>} : memref<1x784x128xbf16, #tpu.memory_space<vmem>>, vector<1x112x128xbf16>,
    return
  }
  func.func @transform_0(%arg0: i32) -> (i32, i32, i32) {
    %c0_i32 = arith.constant 0 : i32
    %c0_i32_0 = arith.constant 0 : i32
    %c0_i32_1 = arith.constant 0 : i32
    return %arg0, %c0_i32, %c0_i32_0 : i32, i32, i32
  }
  func.func @transform_1(%arg0: i32) -> (i32, i32) {
    %c0_i32 = arith.constant 0 : i32
    %c0_i32_0 = arith.constant 0 : i32
    %c0_i32_1 = arith.constant 0 : i32
    return %c0_i32, %c0_i32_0 : i32, i32
  }
  func.func @transform_2(%arg0: i32) -> (i32, i32) {
    %c0_i32 = arith.constant 0 : i32
    %c0_i32_0 = arith.constant 0 : i32
    %c0_i32_1 = arith.constant 0 : i32
    return %c0_i32, %c0_i32_0 : i32, i32
  }
  func.func @transform_3(%arg0: i32) -> (i32, i32) {
    %c0_i32 = arith.constant 0 : i32
    %c0_i32_0 = arith.constant 0 : i32
    %c0_i32_1 = arith.constant 0 : i32
    return %c0_i32, %c0_i32_0 : i32, i32
  }
  func.func @transform_4(%arg0: i32) -> (i32, i32, i32) {
    %c0_i32 = arith.constant 0 : i32
    %c0_i32_0 = arith.constant 0 : i32
    %c0_i32_1 = arith.constant 0 : i32
    return %arg0, %c0_i32, %c0_i32_0 : i32, i32, i32
  }
}

module attributes {stable_mosaic.version = 11 : i64} {
  func.func @_matmul_bn_relu_kernel(%arg0: i32, %arg1: memref<208x512xbf16, #tpu.memory_space<vmem>>, %arg2: memref<512x256xbf16, #tpu.memory_space<vmem>>, %arg3: memref<1x256xf32, #tpu.memory_space<vmem>>, %arg4: memref<1x256xf32, #tpu.memory_space<vmem>>, %arg5: memref<208x256xbf16, #tpu.memory_space<vmem>>) attributes {dimension_semantics = [#tpu.dimension_semantics<parallel>], iteration_bounds = array<i64: 2>, scalar_prefetch = 0 : i64, scratch_operands = 0 : i64, tpu.core_type = #tpu.core_type<tc>, window_params = [{transform_indices = @transform_0, window_bounds = array<i64: 208, 512>}, {pipeline_mode = #tpu.pipeline_mode<synchronous>, transform_indices = @transform_1, window_bounds = array<i64: 512, 256>}, {pipeline_mode = #tpu.pipeline_mode<synchronous>, transform_indices = @transform_2, window_bounds = array<i64: 1, 256>}, {pipeline_mode = #tpu.pipeline_mode<synchronous>, transform_indices = @transform_3, window_bounds = array<i64: 1, 256>}, {transform_indices = @transform_4, window_bounds = array<i64: 208, 256>}]} {
    %c0 = arith.constant 0 : index
    %c0_0 = arith.constant 0 : index
    %0 = vector.load %arg1[%c0, %c0_0] : memref<208x512xbf16, #tpu.memory_space<vmem>>, vector<208x512xbf16>
    %c0_1 = arith.constant 0 : index
    %c0_2 = arith.constant 0 : index
    %1 = vector.load %arg2[%c0_1, %c0_2] : memref<512x256xbf16, #tpu.memory_space<vmem>>, vector<512x256xbf16>
    %cst = arith.constant dense<0.000000e+00> : vector<208x256xf32>
    %2 = tpu.matmul %0, %1, %cst {dimension_numbers = #tpu.dot_dimension_numbers<[1], [0], [0], [1], [0, 0, 1, 1], [], []>} : vector<208x512xbf16>, vector<512x256xbf16>, vector<208x256xf32> -> vector<208x256xf32>
    %c0_3 = arith.constant 0 : index
    %c0_4 = arith.constant 0 : index
    %3 = vector.load %arg3[%c0_3, %c0_4] : memref<1x256xf32, #tpu.memory_space<vmem>>, vector<1x256xf32>
    %4 = vector.broadcast %3 : vector<1x256xf32> to vector<208x256xf32>
    %5 = arith.mulf %2, %4 : vector<208x256xf32>
    %c0_5 = arith.constant 0 : index
    %c0_6 = arith.constant 0 : index
    %6 = vector.load %arg4[%c0_5, %c0_6] : memref<1x256xf32, #tpu.memory_space<vmem>>, vector<1x256xf32>
    %7 = vector.broadcast %6 : vector<1x256xf32> to vector<208x256xf32>
    %8 = arith.addf %5, %7 : vector<208x256xf32>
    %cst_7 = arith.constant 0.000000e+00 : f32
    %9 = vector.broadcast %cst_7 : f32 to vector<208x256xf32>
    %10 = arith.maximumf %8, %9 : vector<208x256xf32>
    %11 = arith.truncf %10 : vector<208x256xf32> to vector<208x256xbf16>
    %c0_8 = arith.constant 0 : index
    %c0_9 = arith.constant 0 : index
    %12 = vector.load %arg5[%c0_8, %c0_9] : memref<208x256xbf16, #tpu.memory_space<vmem>>, vector<208x256xbf16>
    tpu.vector_store %arg5[%c0_8, %c0_9], %11 {strides = array<i32>} : memref<208x256xbf16, #tpu.memory_space<vmem>>, vector<208x256xbf16>,
    return
  }
  func.func @transform_0(%arg0: i32) -> (i32, i32) {
    %c0_i32 = arith.constant 0 : i32
    %c0_i32_0 = arith.constant 0 : i32
    return %arg0, %c0_i32 : i32, i32
  }
  func.func @transform_1(%arg0: i32) -> (i32, i32) {
    %c0_i32 = arith.constant 0 : i32
    %c0_i32_0 = arith.constant 0 : i32
    %c0_i32_1 = arith.constant 0 : i32
    return %c0_i32, %c0_i32_0 : i32, i32
  }
  func.func @transform_2(%arg0: i32) -> (i32, i32) {
    %c0_i32 = arith.constant 0 : i32
    %c0_i32_0 = arith.constant 0 : i32
    %c0_i32_1 = arith.constant 0 : i32
    return %c0_i32, %c0_i32_0 : i32, i32
  }
  func.func @transform_3(%arg0: i32) -> (i32, i32) {
    %c0_i32 = arith.constant 0 : i32
    %c0_i32_0 = arith.constant 0 : i32
    %c0_i32_1 = arith.constant 0 : i32
    return %c0_i32, %c0_i32_0 : i32, i32
  }
  func.func @transform_4(%arg0: i32) -> (i32, i32) {
    %c0_i32 = arith.constant 0 : i32
    %c0_i32_0 = arith.constant 0 : i32
    return %arg0, %c0_i32 : i32, i32
  }
}

module attributes {stable_mosaic.version = 11 : i64} {
  func.func @_conv3_fc_kernel(%arg0: i32, %arg1: memref<1x9x2304xbf16, #tpu.memory_space<vmem>>, %arg2: memref<2304x256xbf16, #tpu.memory_space<vmem>>, %arg3: memref<1x256xf32, #tpu.memory_space<vmem>>, %arg4: memref<1x256xf32, #tpu.memory_space<vmem>>, %arg5: memref<2304x128xbf16, #tpu.memory_space<vmem>>, %arg6: memref<1x128xf32, #tpu.memory_space<vmem>>, %arg7: memref<1x1x128xf32, #tpu.memory_space<vmem>>) attributes {dimension_semantics = [#tpu.dimension_semantics<parallel>], iteration_bounds = array<i64: 2>, scalar_prefetch = 0 : i64, scratch_operands = 0 : i64, tpu.core_type = #tpu.core_type<tc>, window_params = [{transform_indices = @transform_0, window_bounds = array<i64: 1, 9, 2304>}, {pipeline_mode = #tpu.pipeline_mode<synchronous>, transform_indices = @transform_1, window_bounds = array<i64: 2304, 256>}, {pipeline_mode = #tpu.pipeline_mode<synchronous>, transform_indices = @transform_2, window_bounds = array<i64: 1, 256>}, {pipeline_mode = #tpu.pipeline_mode<synchronous>, transform_indices = @transform_3, window_bounds = array<i64: 1, 256>}, {pipeline_mode = #tpu.pipeline_mode<synchronous>, transform_indices = @transform_4, window_bounds = array<i64: 2304, 128>}, {pipeline_mode = #tpu.pipeline_mode<synchronous>, transform_indices = @transform_5, window_bounds = array<i64: 1, 128>}, {transform_indices = @transform_6, window_bounds = array<i64: 1, 1, 128>}]} {
    %c0 = arith.constant 0 : index
    %c0_0 = arith.constant 0 : index
    %c0_1 = arith.constant 0 : index
    %0 = vector.load %arg1[%c0, %c0_0, %c0_1] : memref<1x9x2304xbf16, #tpu.memory_space<vmem>>, vector<1x9x2304xbf16>
    %1 = vector.shape_cast %0 : vector<1x9x2304xbf16> to vector<9x2304xbf16>
    %c0_2 = arith.constant 0 : index
    %c0_3 = arith.constant 0 : index
    %2 = vector.load %arg2[%c0_2, %c0_3] : memref<2304x256xbf16, #tpu.memory_space<vmem>>, vector<2304x256xbf16>
    %cst = arith.constant dense<0.000000e+00> : vector<9x256xf32>
    %3 = tpu.matmul %1, %2, %cst {dimension_numbers = #tpu.dot_dimension_numbers<[1], [0], [0], [1], [0, 0, 1, 1], [], []>} : vector<9x2304xbf16>, vector<2304x256xbf16>, vector<9x256xf32> -> vector<9x256xf32>
    %c0_4 = arith.constant 0 : index
    %c0_5 = arith.constant 0 : index
    %4 = vector.load %arg3[%c0_4, %c0_5] : memref<1x256xf32, #tpu.memory_space<vmem>>, vector<1x256xf32>
    %5 = vector.broadcast %4 : vector<1x256xf32> to vector<9x256xf32>
    %6 = arith.mulf %3, %5 : vector<9x256xf32>
    %c0_6 = arith.constant 0 : index
    %c0_7 = arith.constant 0 : index
    %7 = vector.load %arg4[%c0_6, %c0_7] : memref<1x256xf32, #tpu.memory_space<vmem>>, vector<1x256xf32>
    %8 = vector.broadcast %7 : vector<1x256xf32> to vector<9x256xf32>
    %9 = arith.addf %6, %8 : vector<9x256xf32>
    %cst_8 = arith.constant 0.000000e+00 : f32
    %10 = vector.broadcast %cst_8 : f32 to vector<9x256xf32>
    %11 = arith.maximumf %9, %10 : vector<9x256xf32>
    %12 = arith.truncf %11 : vector<9x256xf32> to vector<9x256xbf16>
    %c0_9 = arith.constant 0 : index
    %c0_10 = arith.constant 0 : index
    %13 = vector.load %arg6[%c0_9, %c0_10] : memref<1x128xf32, #tpu.memory_space<vmem>>, vector<1x128xf32>
    %14 = vector.extract_strided_slice %12 {offsets = [0, 0], sizes = [1, 256], strides = [1, 1]} : vector<9x256xbf16> to vector<1x256xbf16>
    %c0_11 = arith.constant 0 : index
    %c0_12 = arith.constant 0 : index
    %15 = vector.load %arg5[%c0_11, %c0_12] : memref<2304x128xbf16, #tpu.memory_space<vmem>>, vector<256x128xbf16>
    %cst_13 = arith.constant dense<0.000000e+00> : vector<1x128xf32>
    %16 = tpu.matmul %14, %15, %cst_13 {dimension_numbers = #tpu.dot_dimension_numbers<[1], [0], [0], [1], [0, 0, 1, 1], [], []>} : vector<1x256xbf16>, vector<256x128xbf16>, vector<1x128xf32> -> vector<1x128xf32>
    %17 = arith.addf %13, %16 : vector<1x128xf32>
    %18 = vector.extract_strided_slice %12 {offsets = [1, 0], sizes = [1, 256], strides = [1, 1]} : vector<9x256xbf16> to vector<1x256xbf16>
    %c256 = arith.constant 256 : index
    %c0_14 = arith.constant 0 : index
    %19 = vector.load %arg5[%c256, %c0_14] : memref<2304x128xbf16, #tpu.memory_space<vmem>>, vector<256x128xbf16>
    %cst_15 = arith.constant dense<0.000000e+00> : vector<1x128xf32>
    %20 = tpu.matmul %18, %19, %cst_15 {dimension_numbers = #tpu.dot_dimension_numbers<[1], [0], [0], [1], [0, 0, 1, 1], [], []>} : vector<1x256xbf16>, vector<256x128xbf16>, vector<1x128xf32> -> vector<1x128xf32>
    %21 = arith.addf %17, %20 : vector<1x128xf32>
    %22 = vector.extract_strided_slice %12 {offsets = [2, 0], sizes = [1, 256], strides = [1, 1]} : vector<9x256xbf16> to vector<1x256xbf16>
    %c512 = arith.constant 512 : index
    %c0_16 = arith.constant 0 : index
    %23 = vector.load %arg5[%c512, %c0_16] : memref<2304x128xbf16, #tpu.memory_space<vmem>>, vector<256x128xbf16>
    %cst_17 = arith.constant dense<0.000000e+00> : vector<1x128xf32>
    %24 = tpu.matmul %22, %23, %cst_17 {dimension_numbers = #tpu.dot_dimension_numbers<[1], [0], [0], [1], [0, 0, 1, 1], [], []>} : vector<1x256xbf16>, vector<256x128xbf16>, vector<1x128xf32> -> vector<1x128xf32>
    %25 = arith.addf %21, %24 : vector<1x128xf32>
    %26 = vector.extract_strided_slice %12 {offsets = [3, 0], sizes = [1, 256], strides = [1, 1]} : vector<9x256xbf16> to vector<1x256xbf16>
    %c768 = arith.constant 768 : index
    %c0_18 = arith.constant 0 : index
    %27 = vector.load %arg5[%c768, %c0_18] : memref<2304x128xbf16, #tpu.memory_space<vmem>>, vector<256x128xbf16>
    %cst_19 = arith.constant dense<0.000000e+00> : vector<1x128xf32>
    %28 = tpu.matmul %26, %27, %cst_19 {dimension_numbers = #tpu.dot_dimension_numbers<[1], [0], [0], [1], [0, 0, 1, 1], [], []>} : vector<1x256xbf16>, vector<256x128xbf16>, vector<1x128xf32> -> vector<1x128xf32>
    %29 = arith.addf %25, %28 : vector<1x128xf32>
    %30 = vector.extract_strided_slice %12 {offsets = [4, 0], sizes = [1, 256], strides = [1, 1]} : vector<9x256xbf16> to vector<1x256xbf16>
    %c1024 = arith.constant 1024 : index
    %c0_20 = arith.constant 0 : index
    %31 = vector.load %arg5[%c1024, %c0_20] : memref<2304x128xbf16, #tpu.memory_space<vmem>>, vector<256x128xbf16>
    %cst_21 = arith.constant dense<0.000000e+00> : vector<1x128xf32>
    %32 = tpu.matmul %30, %31, %cst_21 {dimension_numbers = #tpu.dot_dimension_numbers<[1], [0], [0], [1], [0, 0, 1, 1], [], []>} : vector<1x256xbf16>, vector<256x128xbf16>, vector<1x128xf32> -> vector<1x128xf32>
    %33 = arith.addf %29, %32 : vector<1x128xf32>
    %34 = vector.extract_strided_slice %12 {offsets = [5, 0], sizes = [1, 256], strides = [1, 1]} : vector<9x256xbf16> to vector<1x256xbf16>
    %c1280 = arith.constant 1280 : index
    %c0_22 = arith.constant 0 : index
    %35 = vector.load %arg5[%c1280, %c0_22] : memref<2304x128xbf16, #tpu.memory_space<vmem>>, vector<256x128xbf16>
    %cst_23 = arith.constant dense<0.000000e+00> : vector<1x128xf32>
    %36 = tpu.matmul %34, %35, %cst_23 {dimension_numbers = #tpu.dot_dimension_numbers<[1], [0], [0], [1], [0, 0, 1, 1], [], []>} : vector<1x256xbf16>, vector<256x128xbf16>, vector<1x128xf32> -> vector<1x128xf32>
    %37 = arith.addf %33, %36 : vector<1x128xf32>
    %38 = vector.extract_strided_slice %12 {offsets = [6, 0], sizes = [1, 256], strides = [1, 1]} : vector<9x256xbf16> to vector<1x256xbf16>
    %c1536 = arith.constant 1536 : index
    %c0_24 = arith.constant 0 : index
    %39 = vector.load %arg5[%c1536, %c0_24] : memref<2304x128xbf16, #tpu.memory_space<vmem>>, vector<256x128xbf16>
    %cst_25 = arith.constant dense<0.000000e+00> : vector<1x128xf32>
    %40 = tpu.matmul %38, %39, %cst_25 {dimension_numbers = #tpu.dot_dimension_numbers<[1], [0], [0], [1], [0, 0, 1, 1], [], []>} : vector<1x256xbf16>, vector<256x128xbf16>, vector<1x128xf32> -> vector<1x128xf32>
    %41 = arith.addf %37, %40 : vector<1x128xf32>
    %42 = vector.extract_strided_slice %12 {offsets = [7, 0], sizes = [1, 256], strides = [1, 1]} : vector<9x256xbf16> to vector<1x256xbf16>
    %c1792 = arith.constant 1792 : index
    %c0_26 = arith.constant 0 : index
    %43 = vector.load %arg5[%c1792, %c0_26] : memref<2304x128xbf16, #tpu.memory_space<vmem>>, vector<256x128xbf16>
    %cst_27 = arith.constant dense<0.000000e+00> : vector<1x128xf32>
    %44 = tpu.matmul %42, %43, %cst_27 {dimension_numbers = #tpu.dot_dimension_numbers<[1], [0], [0], [1], [0, 0, 1, 1], [], []>} : vector<1x256xbf16>, vector<256x128xbf16>, vector<1x128xf32> -> vector<1x128xf32>
    %45 = arith.addf %41, %44 : vector<1x128xf32>
    %46 = vector.extract_strided_slice %12 {offsets = [8, 0], sizes = [1, 256], strides = [1, 1]} : vector<9x256xbf16> to vector<1x256xbf16>
    %c2048 = arith.constant 2048 : index
    %c0_28 = arith.constant 0 : index
    %47 = vector.load %arg5[%c2048, %c0_28] : memref<2304x128xbf16, #tpu.memory_space<vmem>>, vector<256x128xbf16>
    %cst_29 = arith.constant dense<0.000000e+00> : vector<1x128xf32>
    %48 = tpu.matmul %46, %47, %cst_29 {dimension_numbers = #tpu.dot_dimension_numbers<[1], [0], [0], [1], [0, 0, 1, 1], [], []>} : vector<1x256xbf16>, vector<256x128xbf16>, vector<1x128xf32> -> vector<1x128xf32>
    %49 = arith.addf %45, %48 : vector<1x128xf32>
    %c0_30 = arith.constant 0 : index
    %c0_31 = arith.constant 0 : index
    %c0_32 = arith.constant 0 : index
    %50 = vector.load %arg7[%c0_30, %c0_31, %c0_32] : memref<1x1x128xf32, #tpu.memory_space<vmem>>, vector<1x1x128xf32>
    %51 = vector.shape_cast %50 : vector<1x1x128xf32> to vector<1x128xf32>
    %52 = vector.shape_cast %49 : vector<1x128xf32> to vector<1x1x128xf32>
    tpu.vector_store %arg7[%c0_30, %c0_31, %c0_32], %52 {strides = array<i32>} : memref<1x1x128xf32, #tpu.memory_space<vmem>>, vector<1x1x128xf32>,
    return
  }
  func.func @transform_0(%arg0: i32) -> (i32, i32, i32) {
    %c0_i32 = arith.constant 0 : i32
    %c0_i32_0 = arith.constant 0 : i32
    %c0_i32_1 = arith.constant 0 : i32
    return %arg0, %c0_i32, %c0_i32_0 : i32, i32, i32
  }
  func.func @transform_1(%arg0: i32) -> (i32, i32) {
    %c0_i32 = arith.constant 0 : i32
    %c0_i32_0 = arith.constant 0 : i32
    %c0_i32_1 = arith.constant 0 : i32
    return %c0_i32, %c0_i32_0 : i32, i32
  }
  func.func @transform_2(%arg0: i32) -> (i32, i32) {
    %c0_i32 = arith.constant 0 : i32
    %c0_i32_0 = arith.constant 0 : i32
    %c0_i32_1 = arith.constant 0 : i32
    return %c0_i32, %c0_i32_0 : i32, i32
  }
  func.func @transform_3(%arg0: i32) -> (i32, i32) {
    %c0_i32 = arith.constant 0 : i32
    %c0_i32_0 = arith.constant 0 : i32
    %c0_i32_1 = arith.constant 0 : i32
    return %c0_i32, %c0_i32_0 : i32, i32
  }
  func.func @transform_4(%arg0: i32) -> (i32, i32) {
    %c0_i32 = arith.constant 0 : i32
    %c0_i32_0 = arith.constant 0 : i32
    %c0_i32_1 = arith.constant 0 : i32
    return %c0_i32, %c0_i32_0 : i32, i32
  }
  func.func @transform_5(%arg0: i32) -> (i32, i32) {
    %c0_i32 = arith.constant 0 : i32
    %c0_i32_0 = arith.constant 0 : i32
    %c0_i32_1 = arith.constant 0 : i32
    return %c0_i32, %c0_i32_0 : i32, i32
  }
  func.func @transform_6(%arg0: i32) -> (i32, i32, i32) {
    %c0_i32 = arith.constant 0 : i32
    %c0_i32_0 = arith.constant 0 : i32
    %c0_i32_1 = arith.constant 0 : i32
    return %arg0, %c0_i32, %c0_i32_0 : i32, i32, i32
  }
}

</mosaic_0001>

<bundles_post_ra>
// kernel: forward.3
= control target key start
LH: loop header
LB: loop body
LE: loop exit
PB: predicated region body
PF: predicated region fallthrough
CT: control target
= control target key end

     0   :  { %s3765_s15 = smov 0   ;;  %s6181_s0 = inlined_call_operand.vmem [shape: f32[2,784,16], index: 0, kind: input, shape index: {}]   ;;  %s6182_s1 = inlined_call_operand.vmem [shape: f32[16,128], index: 1, kind: input, shape index: {}]   ;;  %s6183_s2 = inlined_call_operand.vmem [shape: f32[1,128], index: 2, kind: input, shape index: {}]   ;;  %s6184_s3 = inlined_call_operand.vmem [shape: f32[1,128], index: 3, kind: input, shape index: {}]   ;;  %s6185_s4 = inlined_call_operand.vmem [shape: bf16[2,784,128], index: 4, kind: output, shape index: {}]  }
   0x1 LB: > { %s3306_s16 = sadd.s32 4294967295, %s3737_s15   ;;  %p3310_p0 = scmp.ge.s32.totalorder %s3737_s15, 1  ;;  %s3737_s15 = sphi %s3765_s15, %s14_s15  }
   0x2   : > { %p162_p1 = scmp.lt.s32.totalorder %s3737_s15, 3 }
   0x4   : > { %p163_p2 = pnand %p3310_p0, %p162_p1 }
   0x6   : > { %166 = sbr.rel (%p163_p2) target bundleno = 524 (0x20c), region = 36 }
   0xb   : > { %v199_v0 = vld [vmem:[%s6182_s1 + $0x8] sm:$0xff]  ;;  %v198_v1 = vld [vmem:[%s6182_s1] sm:$0xff]  ;;  %p188_p3 = scmp.lt.s32.totalorder %s3306_s16, 1  ;;  %vm749_vm0 = vcmask 130048   ;;  %v202_v42 = vlaneseq  ;;  %v6211_v56 = vmov 0  }
   0xc   : > { %806 = vmatpush.msra.mxu0 %v199_v0  ;;  %3706 = vmatpush.msra.mxu3 %v199_v0 }
   0xd   : > { %1197 = vmatpush.msra.mxu1 %v199_v0  ;;  %1551 = vmatpush.msra.mxu2 %v199_v0  ;;  %s6548_s16 = smov (!%p188_p3, %s3306_s16), 1  ;;  %v3867_v43 = vshrl.u32 %v202_v42, 7 }
   0xe   : > { %807 = vmatpush.msra.mxu0 %v198_v1  ;;  %3707 = vmatpush.msra.mxu3 %v198_v1  ;;  %s3712_s21 = smul.u32 784, %s6548_s16 }
   0xf   : > { %1198 = vmatpush.msra.mxu1 %v198_v1  ;;  %1552 = vmatpush.msra.mxu2 %v198_v1  ;;  %v220_v44 = vand.u32 65535, %v3867_v43  ;;  %v221_v49 = vshrl.u32 %v3867_v43, 16  ;;  %v3881_v59 = vadd.s32 8, %v3867_v43  ;;  %s3713_s29 = smul.u32 392, %s6548_s16 }
  0x10   : > { %2259 = vmatpush.msrb.mxu0 %v199_v0  ;;  %s3785_s24 = scalar_lea.vmem %s6181_s0, %s3712_s21  ;;  %3708 = vmatpush.msrb.mxu3 %v199_v0 }
  0x11   : > { %2967 = vmatpush.msrb.mxu2 %v199_v0  ;;  %2613 = vmatpush.msrb.mxu1 %v199_v0  ;;  %v735_v2 = vld [vmem:[%s3785_s24] sm:$0xff]  ;;  %v746_v3 = vld [vmem:[%s3785_s24 + $0x58] sm:$0xff]  ;;  %v1127_v4 = vld [vmem:[%s3785_s24 + $0x70] sm:$0xff]  ;;  %v224_v50 = vmul.u32 37449, %v220_v44  ;;  %v223_v51 = vmul.u32 9362, %v220_v44  ;;  %v225_v52 = vmul.u32 9362, %v221_v49  ;;  %s4230_s6 = scalar_lea.vmem %s6185_s4, %s3713_s29 }
  0x12   : > { %2260 = vmatpush.msrb.mxu0 %v198_v1  ;;  %3324 = vmatmul.msk.f32.vlgmr.msra.gmra.mxu3 %vm749_vm0, %v746_v3  ;;  %v1481_v5 = vld [vmem:[%s3785_s24 + $0xe0] sm:$0xff]  ;;  %v736_v6 = vld [vmem:[%s3785_s24 + $0x8] sm:$0xff]  ;;  %v1128_v8 = vld [vmem:[%s3785_s24 + $0x78] sm:$0xff]  ;;  %v226_v54 = vmul.u32 37449, %v221_v49  ;;  %v252_v63 = vand.u32 65535, %v3881_v59 }
  0x13   : > { %2968 = vmatpush.msrb.mxu2 %v198_v1  ;;  %3313 = vmatmul.msk.f32.vlgmr.msra.gmra.mxu0 %vm749_vm0, %v735_v2  ;;  %v747_v7 = vld [vmem:[%s3785_s24 + $0x60] sm:$0xff]  ;;  %v1482_v9 = vld [vmem:[%s3785_s24 + $0xe8] sm:$0xff]  ;;  %v737_v10 = vld [vmem:[%s3785_s24 + $0x10] sm:$0xff]  ;;  %v227_v53 = vshll.u32 %v224_v50, 16  ;;  %v229_v55 = vshll.u32 %v225_v52, 16  ;;  %v228_v2 = vshrl.u32 %v224_v50, 16 }
  0x14   : > { %3327 = vmatmul.msk.f32.vlgmr.msra.gmra.mxu1 %vm749_vm0, %v1127_v4  ;;  %3341 = vmatmul.msk.f32.vlgmr.msra.gmra.mxu2 %vm749_vm0, %v1481_v5  ;;  %v748_v11 = vld [vmem:[%s3785_s24 + $0x68] sm:$0xff]  ;;  %v1129_v12 = vld [vmem:[%s3785_s24 + $0x80] sm:$0xff]  ;;  %v1483_v13 = vld [vmem:[%s3785_s24 + $0xf0] sm:$0xff]  ;;  %v253_v4 = vshrl.u32 %v3881_v59, 16 }
  0x15   : > { %3709 = vmatpush.msrb.mxu3 %v198_v1  ;;  %2614 = vmatpush.msrb.mxu1 %v198_v1  ;;  %v738_v14 = vld [vmem:[%s3785_s24 + $0x18] sm:$0xff]  ;;  %v1138_v15 = vld [vmem:[%s3785_s24 + $0xc8] sm:$0xff]  ;;  %v739_v18 = vld [vmem:[%s3785_s24 + $0x20] sm:$0xff]  ;;  %vm231_vm1 = vc.u32 %v223_v51, %v227_v53  ;;  %v233_v58 = vadd.s32 %v227_v53, %v223_v51 }
  0x16   : > { %v1130_v16 = vld [vmem:[%s3785_s24 + $0x88] sm:$0xff]  ;;  %v1484_v17 = vld [vmem:[%s3785_s24 + $0xf8] sm:$0xff]  ;;  %v1139_v19 = vld [vmem:[%s3785_s24 + $0xd0] sm:$0xff]  ;;  %v232_v57 = vsel %vm231_vm1, 1, %v6211_v56 }
  0x17   : > { %3710 = vmatpush.msra.mxu3 %v199_v0  ;;  %v1131_v20 = vld [vmem:[%s3785_s24 + $0x90] sm:$0xff]  ;;  %v1485_v21 = vld [vmem:[%s3785_s24 + $0x100] sm:$0xff]  ;;  %v740_v22 = vld [vmem:[%s3785_s24 + $0x28] sm:$0xff]  ;;  %v234_v60 = vadd.s32 %v232_v57, %v226_v54  ;;  %vm235_vm2 = vc.u32 %v233_v58, %v229_v55 }
  0x18   : > { %v1140_v23 = vld [vmem:[%s3785_s24 + $0xd8] sm:$0xff]  ;;  %v1486_v25 = vld [vmem:[%s3785_s24 + $0x108] sm:$0xff]  ;;  %v741_v26 = vld [vmem:[%s3785_s24 + $0x30] sm:$0xff]  ;;  %v236_v3 = vsel %vm235_vm2, 1, %v6211_v56 }
  0x19   : > { %3711 = vmatpush.msra.mxu3 %v198_v1  ;;  %v1132_v24 = vld [vmem:[%s3785_s24 + $0x98] sm:$0xff]  ;;  %v1133_v28 = vld [vmem:[%s3785_s24 + $0xa0] sm:$0xff]  ;;  %v1487_v29 = vld [vmem:[%s3785_s24 + $0x110] sm:$0xff]  ;;  %v238_v5 = vadd.s32 %v236_v3, %v234_v60 }
  0x1a   : > { %3325 = vmatmul.msk.f32.gmra.mxu3 %vm749_vm0, %v747_v7  ;;  %v1492_v27 = vld [vmem:[%s3785_s24 + $0x138] sm:$0xff]  ;;  %v1493_v31 = vld [vmem:[%s3785_s24 + $0x140] sm:$0xff]  ;;  %v1134_v32 = vld [vmem:[%s3785_s24 + $0xa8] sm:$0xff]  ;;  %v230_v7 = vshrl.u32 %v225_v52, 16 }
  0x1b   : > { %3314 = vmatmul.msk.f32.gmra.mxu0 %vm749_vm0, %v736_v6  ;;  %v742_v30 = vld [vmem:[%s3785_s24 + $0x38] sm:$0xff]  ;;  %v743_v34 = vld [vmem:[%s3785_s24 + $0x40] sm:$0xff]  ;;  %v1494_v35 = vld [vmem:[%s3785_s24 + $0x148] sm:$0xff]  ;;  %v256_v6 = vmul.u32 37449, %v252_v63 }
  0x1c   : > { %3328 = vmatmul.msk.f32.gmra.mxu1 %vm749_vm0, %v1128_v8  ;;  %3342 = vmatmul.msk.f32.gmra.mxu2 %vm749_vm0, %v1482_v9  ;;  %v1488_v33 = vld [vmem:[%s3785_s24 + $0x118] sm:$0xff]  ;;  %v1135_v36 = vld [vmem:[%s3785_s24 + $0xb0] sm:$0xff]  ;;  %v1489_v37 = vld [vmem:[%s3785_s24 + $0x120] sm:$0xff]  ;;  %v237_v8 = vadd.s32 %v233_v58, %v229_v55  ;;  %v255_v9 = vmul.u32 9362, %v252_v63 }
  0x1d   : > { %v744_v38 = vld [vmem:[%s3785_s24 + $0x48] sm:$0xff]  ;;  %v1835_v39 = vld [vmem:[%s3785_s24 + $0x150] sm:$0xff]  ;;  %v1136_v40 = vld [vmem:[%s3785_s24 + $0xb8] sm:$0xff] }
  0x1e   : > { %v1490_v41 = vld [vmem:[%s3785_s24 + $0x128] sm:$0xff]  ;;  %v745_v45 = vld [vmem:[%s3785_s24 + $0x50] sm:$0xff]  ;;  %v1836_v46 = vld [vmem:[%s3785_s24 + $0x158] sm:$0xff]  ;;  %vm241_vm3 = vc.u32 %v237_v8, 2454267026  ;;  %v3944_v8 = vadd.s32 104, %v3867_v43 }
  0x1f   : > { %v1137_v47 = vld [vmem:[%s3785_s24 + $0xc0] sm:$0xff]  ;;  %v1491_v48 = vld [vmem:[%s3785_s24 + $0x130] sm:$0xff] }
  0x20   : > { %v1837_v61 = vld [vmem:[%s3785_s24 + $0x160] sm:$0xff]  ;;  %v1839_v50 = vld [vmem:[%s3785_s24 + $0x170] sm:$0xff] }
  0x21   : > { %v2189_v62 = vld [vmem:[%s3785_s24 + $0x1c0] sm:$0xff]  ;;  %v2191_v51 = vld [vmem:[%s3785_s24 + $0x1d0] sm:$0xff] }
  0x22   : > { %3326 = vmatmul.msk.f32.gmra.mxu3 %vm749_vm0, %v748_v11  ;;  %v239_v11 = vadd.s32 %v238_v5, %v228_v2  ;;  %v2545_v55 = vld [vmem:[%s3785_s24 + $0x240] sm:$0xff]  ;;  %v2899_v57 = vld [vmem:[%s3785_s24 + $0x2b0] sm:$0xff] }
  0x23   : > { %3315 = vmatmul.msk.f32.gmra.mxu0 %vm749_vm0, %v737_v10  ;;  %v257_v10 = vmul.u32 9362, %v253_v4 }
  0x24   : > { %3329 = vmatmul.msk.f32.gmra.mxu1 %vm749_vm0, %v1129_v12  ;;  %3343 = vmatmul.msk.f32.gmra.mxu2 %vm749_vm0, %v1483_v13  ;;  %v259_v12 = vshll.u32 %v256_v6, 16  ;;  %v258_v13 = vmul.u32 37449, %v253_v4 }
  0x26   : > { %vm263_vm4 = vc.u32 %v255_v9, %v259_v12 }
  0x2a   : > { %3338 = vmatmul.msk.f32.vlgmr.msrb.gmra.mxu3 %vm749_vm0, %v1138_v15  ;;  %v3895_v15 = vadd.s32 16, %v3867_v43 }
  0x2b   : > { %3316 = vmatmul.msk.f32.gmra.mxu0 %vm749_vm0, %v738_v14  ;;  %1905 = vmatpush.msrb.mxu3 %v199_v0  ;;  %v2543_v0 = vld [vmem:[%s3785_s24 + $0x230] sm:$0xff]  ;;  %v261_v14 = vshll.u32 %v257_v10, 16 }
  0x2c   : > { %3330 = vmatmul.msk.f32.gmra.mxu1 %vm749_vm0, %v1130_v16  ;;  %3344 = vmatmul.msk.f32.gmra.mxu2 %vm749_vm0, %v1484_v17  ;;  %v240_v16 = vadd.s32 %v239_v11, %v230_v7  ;;  %v242_v17 = vsel %vm241_vm3, 1, %v6211_v56 }
  0x2d   : > { %1906 = vmatpush.msrb.mxu3 %v198_v1  ;;  %v2897_v1 = vld [vmem:[%s3785_s24 + $0x2a0] sm:$0xff] }
  0x32   : > { %3339 = vmatmul.msk.f32.gmra.mxu3 %vm749_vm0, %v1139_v19  ;;  %v264_v19 = vsel %vm263_vm4, 1, %v6211_v56 }
  0x33   : > { %3317 = vmatmul.msk.f32.gmra.mxu0 %vm749_vm0, %v739_v18  ;;  %v265_v18 = vadd.s32 %v259_v12, %v255_v9  ;;  %v1840_v12 = vld [vmem:[%s3785_s24 + $0x178] sm:$0xff] }
  0x34   : > { %3331 = vmatmul.msk.f32.gmra.mxu1 %vm749_vm0, %v1131_v20  ;;  %3345 = vmatmul.msk.f32.gmra.mxu2 %vm749_vm0, %v1485_v21  ;;  %v284_v20 = vand.u32 65535, %v3895_v15  ;;  %v1838_v21 = vld [vmem:[%s3785_s24 + $0x168] sm:$0xff] }
  0x35   : > { %vm267_vm5 = vc.u32 %v265_v18, %v261_v14 }
  0x3a   : > { %3340 = vmatmul.msk.f32.gmra.mxu3 %vm749_vm0, %v1140_v23  ;;  %v243_v23 = vadd.s32 %v242_v17, %v240_v16  ;;  %v636_v16 = vand.u32 65535, %v3944_v8  ;;  %v2192_v17 = vld [vmem:[%s3785_s24 + $0x1d8] sm:$0xff] }
  0x3b   : > { %3318 = vmatmul.msk.f32.gmra.mxu0 %vm749_vm0, %v740_v22  ;;  %v2190_v22 = vld [vmem:[%s3785_s24 + $0x1c8] sm:$0xff] }
  0x3c   : > { %3332 = vmatmul.msk.f32.gmra.mxu1 %vm749_vm0, %v1132_v24  ;;  %3346 = vmatmul.msk.f32.gmra.mxu2 %vm749_vm0, %v1486_v25  ;;  %v266_v24 = vadd.s32 %v264_v19, %v258_v13  ;;  %v3903_v25 = vadd.s32 96, %v3867_v43 }
  0x42   : > { %3352 = vmatmul.msk.f32.vlgmr.msra.gmra.mxu3 %vm749_vm0, %v1492_v27  ;;  %v2898_v27 = vld [vmem:[%s3785_s24 + $0x2a8] sm:$0xff] }
  0x43   : > { %3319 = vmatmul.msk.f32.gmra.mxu0 %vm749_vm0, %v741_v26  ;;  %v2544_v26 = vld [vmem:[%s3785_s24 + $0x238] sm:$0xff] }
  0x44   : > { %3333 = vmatmul.msk.f32.gmra.mxu1 %vm749_vm0, %v1133_v28  ;;  %3347 = vmatmul.msk.f32.gmra.mxu2 %vm749_vm0, %v1487_v29  ;;  %v260_v28 = vshrl.u32 %v256_v6, 16  ;;  %v268_v29 = vsel %vm267_vm5, 1, %v6211_v56 }
  0x4a   : > { %3353 = vmatmul.msk.f32.gmra.mxu3 %vm749_vm0, %v1493_v31  ;;  %v244_v31 = vshrl.u32 %v243_v23, 4 }
  0x4b   : > { %3320 = vmatmul.msk.f32.gmra.mxu0 %vm749_vm0, %v742_v30  ;;  %v3908_v30 = vmul.u32 37449, %v284_v20 }
  0x4c   : > { %3334 = vmatmul.msk.f32.gmra.mxu1 %vm749_vm0, %v1134_v32  ;;  %3348 = vmatmul.msk.f32.gmra.mxu2 %vm749_vm0, %v1488_v33  ;;  %v270_v32 = vadd.s32 %v268_v29, %v266_v24  ;;  %v604_v33 = vand.u32 65535, %v3903_v25 }
  0x4d   : > { %v291_v42 = vshll.u32 %v3908_v30, 16  ;;  %v292_v19 = vshrl.u32 %v3908_v30, 16  ;;  %v637_v30 = vshrl.u32 %v3944_v8, 16 }
  0x52   : > { %3354 = vmatmul.msk.f32.gmra.mxu3 %vm749_vm0, %v1494_v35  ;;  %v269_v35 = vadd.s32 %v265_v18, %v261_v14 }
  0x53   : > { %3321 = vmatmul.msk.f32.gmra.mxu0 %vm749_vm0, %v743_v34  ;;  %v262_v34 = vshrl.u32 %v257_v10, 16 }
  0x54   : > { %3335 = vmatmul.msk.f32.gmra.mxu1 %vm749_vm0, %v1135_v36  ;;  %3349 = vmatmul.msk.f32.gmra.mxu2 %vm749_vm0, %v1489_v37  ;;  %v285_v36 = vshrl.u32 %v3895_v15, 16  ;;  %v287_v37 = vmul.u32 9362, %v284_v20  ;;  %vm273_vm6 = vc.u32 %v269_v35, 2454267026 }
  0x56   : > { %v3919_v49 = vmul.u32 9362, %v285_v36  ;;  %vm3926_vm7 = vc.u32 %v287_v37, %v291_v42  ;;  %v290_v63 = vmul.u32 37449, %v285_v36  ;;  %v297_v7 = vadd.s32 %v291_v42, %v287_v37 }
  0x57   : > { %v296_v4 = vsel %vm3926_vm7, 1, %v6211_v56  ;;  %v641_v37 = vmul.u32 9362, %v637_v30  ;;  %vm6242_vm7 = vcmask 1040384  }
  0x58   : > { %v298_v11 = vadd.s32 %v296_v4, %v290_v63  ;;  %v294_v20 = vshrl.u32 %v3919_v49, 16 }
  0x5a   : > { %3355 = vmatmul.msk.f32.vlgmr.msrb.gmra.mxu3 %vm749_vm0, %v1835_v39  ;;  %v271_v39 = vadd.s32 %v270_v32, %v260_v28 }
  0x5b   : > { %3322 = vmatmul.msk.f32.gmra.mxu0 %vm749_vm0, %v744_v38  ;;  %v245_v38 = vmul.u32 28, %v244_v31  ;;  %v3969_v31 = vadd.s32 24, %v3867_v43 }
  0x5c   : > { %3336 = vmatmul.msk.f32.gmra.mxu1 %vm749_vm0, %v1136_v40  ;;  %3350 = vmatmul.msk.f32.gmra.mxu2 %vm749_vm0, %v1490_v41  ;;  %v605_v40 = vshrl.u32 %v3903_v25, 16  ;;  %v608_v41 = vmul.u32 37449, %v604_v33  ;;  %v272_v44 = vadd.s32 %v271_v39, %v262_v34  ;;  %v640_v34 = vmul.u32 37449, %v636_v16 }
  0x5d   : > { %v3924_v52 = vsub.s32 %v3867_v43, %v245_v38 }
  0x5e   : > { %v610_v58 = vmul.u32 37449, %v605_v40  ;;  %v612_v2 = vshrl.u32 %v608_v41, 16  ;;  %v644_v54 = vshrl.u32 %v640_v34, 16 }
  0x5f   : > { %vm665_vm10 = vcmp.ne.s32.totalorder %v3924_v52, 0  ;;  %vm679_vm11 = vcmp.lt.s32.totalorder %v3924_v52, 0  ;;  %v3951_v18 = vadd.s32 28, %v3924_v52 }
  0x60   : > { %vm3961_vm14 = vmand %vm679_vm11, %vm665_vm10 }
  0x61   : > { %v721_v35 = vsel %vm3961_vm14, %v3951_v18, %v3924_v52 }
  0x62   : > { %3356 = vmatmul.msk.f32.gmra.mxu3 %vm749_vm0, %v1836_v46  ;;  %v607_v46 = vmul.u32 9362, %v604_v33  ;;  %v639_v33 = vmul.u32 9362, %v636_v16 }
  0x63   : > { %3323 = vmatmul.msk.f32.gmra.mxu0 %vm749_vm0, %v745_v45  ;;  %v274_v45 = vsel %vm273_vm6, 1, %v6211_v56 }
  0x64   : > { %3337 = vmatmul.msk.f32.gmra.mxu1 %vm749_vm0, %v1137_v47  ;;  %3351 = vmatmul.msk.f32.gmra.mxu2 %vm749_vm0, %v1491_v48  ;;  %v609_v47 = vmul.u32 9362, %v605_v40  ;;  %v611_v48 = vshll.u32 %v608_v41, 16  ;;  %v275_v53 = vadd.s32 %v274_v45, %v272_v44  ;;  %v642_v40 = vmul.u32 37449, %v637_v30  ;;  %v2548_v30 = vld [vmem:[%s3785_s24 + $0x258] sm:$0xff] }
  0x65   : > { %v643_v41 = vshll.u32 %v640_v34, 16  ;;  %v645_v45 = vshll.u32 %v641_v37, 16 }
  0x66   : > { %v613_v60 = vshll.u32 %v609_v47, 16  ;;  %vm615_vm8 = vc.u32 %v607_v46, %v611_v48  ;;  %v276_v5 = vshrl.u32 %v275_v53, 4  ;;  %v614_v9 = vshrl.u32 %v609_v47, 16 }
  0x67   : > { %vm647_vm1 = vc.u32 %v639_v33, %v643_v41 }
  0x68   : > { %v277_v24 = vmul.u32 28, %v276_v5 }
  0x6a   : > { %3357 = vmatmul.msk.f32.gmra.mxu3 %vm749_vm0, %v1837_v61  ;;  %v617_v61 = vadd.s32 %v611_v48, %v607_v46  ;;  %v3981_v42 = vsub.s32 %v3881_v59, %v277_v24  ;;  %v316_v46 = vand.u32 65535, %v3969_v31  ;;  %v649_v48 = vadd.s32 %v643_v41, %v639_v33  ;;  %v2901_v59 = vld [vmem:[%s3785_s24 + $0x2c0] sm:$0xff]  ;;  %v2194_v24 = vld [vmem:[%s3785_s24 + $0x1e8] sm:$0xff] }
  0x6b   : > { %3369 = vmatmul.msk.f32.vlgmr.msrb.gmra.mxu0 %vm749_vm0, %v2189_v62  ;;  %v616_v62 = vsel %vm615_vm8, 1, %v6211_v56 }
  0x6c   : > { %3383 = vmatmul.msk.f32.vlgmr.msrb.gmra.mxu1 %vm749_vm0, %v2543_v0  ;;  %3397 = vmatmul.msk.f32.vlgmr.msrb.gmra.mxu2 %vm749_vm0, %v2897_v1  ;;  %v618_v0 = vadd.s32 %v616_v62, %v610_v58  ;;  %vm619_vm9 = vc.u32 %v617_v61, %v613_v60  ;;  %v293_v1 = vshll.u32 %v3919_v49, 16  ;;  %v621_v10 = vadd.s32 %v617_v61, %v613_v60  ;;  %v2547_v58 = vld [vmem:[%s3785_s24 + $0x250] sm:$0xff] }
  0x6d   : > { %v620_v3 = vsel %vm619_vm9, 1, %v6211_v56  ;;  %v317_v49 = vshrl.u32 %v3969_v31, 16  ;;  %vm651_vm2 = vc.u32 %v649_v48, %v645_v45  ;;  %v653_v62 = vadd.s32 %v649_v48, %v645_v45 }
  0x6e   : > { %v622_v6 = vadd.s32 %v620_v3, %v618_v0  ;;  %vm299_vm12 = vc.u32 %v297_v7, %v293_v1  ;;  %v301_v14 = vadd.s32 %v297_v7, %v293_v1  ;;  %vm625_vm13 = vc.u32 %v621_v10, 2454267026  ;;  %v4008_v7 = vld [vmem:[%s6183_s2] ss:$0 sm:$0xff] }
  0x6f   : > { %v300_v28 = vsel %vm299_vm12, 1, %v6211_v56  ;;  %v652_v0 = vsel %vm651_vm2, 1, %v6211_v56  ;;  %v319_v1 = vmul.u32 9362, %v316_v46  ;;  %vm666_vm3 = vcmp.ne.s32.totalorder %v3981_v42, 0 }
  0x70   : > { %v623_v13 = vadd.s32 %v622_v6, %v612_v2  ;;  %v302_v29 = vadd.s32 %v300_v28, %v298_v11  ;;  %vm305_vm15 = vc.u32 %v301_v14, 2454267026  ;;  %v3996_v2 = vmul.u32 9362, %v317_v49  ;;  %v4021_v14 = vld [vmem:[%s6184_s3] ss:$0 sm:$0xff] }
  0x71   : > { %v306_v39 = vsel %vm305_vm15, 1, %v6211_v56  ;;  %vm680_vm4 = vcmp.lt.s32.totalorder %v3981_v42, 0  ;;  %v646_v3 = vshrl.u32 %v641_v37, 16  ;;  %vm657_vm5 = vc.u32 %v653_v62, 2454267026 }
  0x72   : > { %3358 = vmatmul.msk.f32.gmra.mxu3 %vm749_vm0, %v1838_v21  ;;  %v2546_v21 = vld [vmem:[%s3785_s24 + $0x248] sm:$0xff]  ;;  %v303_v36 = vadd.s32 %v302_v29, %v292_v19  ;;  %v322_v5 = vmul.u32 37449, %v317_v49  ;;  %v325_v11 = vshll.u32 %v3996_v2, 16  ;;  %vm4027_vm10 = vmand %vm680_vm4, %vm666_vm3  ;;  %vm4083_vm3 = vcmp.ne.s32.totalorder %v721_v35, 0 }
  0x73   : > { %3370 = vmatmul.msk.f32.gmra.mxu0 %vm749_vm0, %v2190_v22  ;;  %v2900_v22 = vld [vmem:[%s3785_s24 + $0x2b8] sm:$0xff]  ;;  %v326_v52 = vshrl.u32 %v3996_v2, 16  ;;  %v1843_v2 = vld [vmem:[%s3785_s24 + $0x190] sm:$0xff]  ;;  %vm6222_vm4 = vcmask 1043456  }
  0x74   : > { %3384 = vmatmul.msk.f32.gmra.mxu1 %vm749_vm0, %v2544_v26  ;;  %3398 = vmatmul.msk.f32.gmra.mxu2 %vm749_vm0, %v2898_v27  ;;  %v624_v26 = vadd.s32 %v623_v13, %v614_v9  ;;  %v626_v27 = vsel %vm625_vm13, 1, %v6211_v56  ;;  %v304_v44 = vadd.s32 %v303_v36, %v294_v20  ;;  %v708_v9 = vadd.s32 28, %v3981_v42 }
  0x75   : > { %v658_v13 = vsel %vm657_vm5, 1, %v6211_v56 }
  0x76   : > { %v627_v32 = vadd.s32 %v626_v27, %v624_v26  ;;  %v307_v53 = vadd.s32 %v306_v39, %v304_v44  ;;  %v4040_v27 = vadd.s32 32, %v3867_v43  ;;  %v722_v37 = vsel %vm4027_vm10, %v708_v9, %v3981_v42 }
  0x77   : > { %vm4099_vm14 = vcmp.ne.s32.totalorder %v722_v37, 0 }
  0x78   : > { %v628_v38 = vshrl.u32 %v627_v32, 4  ;;  %v308_v63 = vshrl.u32 %v307_v53, 4  ;;  %v2902_v32 = vld [vmem:[%s3785_s24 + $0x2c8] sm:$0xff]  ;;  %v348_v48 = vand.u32 65535, %v4040_v27  ;;  %v349_v49 = vshrl.u32 %v4040_v27, 16 }
  0x7a   : > { %3359 = vmatmul.msk.f32.gmra.mxu3 %vm749_vm0, %v1839_v50  ;;  %v629_v47 = vmul.u32 28, %v628_v38  ;;  %v1841_v50 = vld [vmem:[%s3785_s24 + $0x180] sm:$0xff]  ;;  %v309_v4 = vmul.u32 28, %v308_v63  ;;  %v4096_v18 = vmul.u32 9362, %v348_v48 }
  0x7b   : > { %3371 = vmatmul.msk.f32.gmra.mxu0 %vm749_vm0, %v2191_v51  ;;  %v2193_v51 = vld [vmem:[%s3785_s24 + $0x1e0] sm:$0xff] }
  0x7c   : > { %3385 = vmatmul.msk.f32.gmra.mxu1 %vm749_vm0, %v2545_v55  ;;  %3399 = vmatmul.msk.f32.gmra.mxu2 %vm749_vm0, %v2899_v57  ;;  %v648_v55 = vsel %vm647_vm1, 1, %v6211_v56  ;;  %v3988_v57 = vmul.u32 37449, %v316_v46  ;;  %v3993_v60 = vsub.s32 %v3903_v25, %v629_v47 }
  0x7d   : > { %v650_v61 = vadd.s32 %v648_v55, %v642_v40 }
  0x7e   : > { %v323_v6 = vshll.u32 %v3988_v57, 16  ;;  %vm677_vm6 = vcmp.ne.s32.totalorder %v3993_v60, 0  ;;  %vm691_vm8 = vcmp.lt.s32.totalorder %v3993_v60, 0  ;;  %v324_v45 = vshrl.u32 %v3988_v57, 16 }
  0x7f   : > { %v654_v25 = vadd.s32 %v652_v0, %v650_v61  ;;  %vm4053_vm15 = vmand %vm691_vm8, %vm677_vm6 }
  0x80   : > { %vm327_vm9 = vc.u32 %v319_v1, %v323_v6  ;;  %v329_v20 = vadd.s32 %v323_v6, %v319_v1 }
  0x81   : > { %v655_v10 = vadd.s32 %v654_v25, %v644_v54  ;;  %v328_v19 = vsel %vm327_vm9, 1, %v6211_v56  ;;  %v4112_v25 = vmul.u32 37449, %v348_v48 }
  0x82   : > { %3360 = vmatmul.msk.f32.gmra.mxu3 %vm749_vm0, %v1840_v12  ;;  %v4015_v12 = vsub.s32 %v3895_v15, %v309_v4  ;;  %v4032_v15 = vadd.s32 28, %v3993_v60  ;;  %v330_v26 = vadd.s32 %v328_v19, %v322_v5  ;;  %vm331_vm13 = vc.u32 %v329_v20, %v325_v11 }
  0x83   : > { %3372 = vmatmul.msk.f32.gmra.mxu0 %vm749_vm0, %v2192_v17  ;;  %v656_v17 = vadd.s32 %v655_v10, %v646_v3  ;;  %v333_v34 = vadd.s32 %v329_v20, %v325_v11  ;;  %v332_v40 = vsel %vm331_vm13, 1, %v6211_v56  ;;  %v2195_v3 = vld [vmem:[%s3785_s24 + $0x1f0] sm:$0xff]  ;;  %v4114_v4 = vmul.u32 9362, %v349_v49  ;;  %v2549_v11 = vld [vmem:[%s3785_s24 + $0x260] sm:$0xff] }
  0x84   : > { %3386 = vmatmul.msk.f32.gmra.mxu1 %vm749_vm0, %v2546_v21  ;;  %3400 = vmatmul.msk.f32.gmra.mxu2 %vm749_vm0, %v2900_v22  ;;  %v1842_v22 = vld [vmem:[%s3785_s24 + $0x188] sm:$0xff]  ;;  %vm667_vm11 = vcmp.ne.s32.totalorder %v4015_v12, 0  ;;  %vm681_vm12 = vcmp.lt.s32.totalorder %v4015_v12, 0  ;;  %v4058_v39 = vadd.s32 28, %v4015_v12  ;;  %v334_v46 = vadd.s32 %v332_v40, %v330_v26 }
  0x85   : > { %v659_v33 = vadd.s32 %v658_v13, %v656_v17  ;;  %vm4068_vm1 = vmand %vm681_vm12, %vm667_vm11  ;;  %vm337_vm2 = vc.u32 %v333_v34, 2454267026  ;;  %v733_v53 = vsel %vm4053_vm15, %v4032_v15, %v3993_v60  ;;  %v356_v34 = vshrl.u32 %v4112_v25, 16 }
  0x86   : > { %v723_v23 = vsel %vm4068_vm1, %v4058_v39, %v4015_v12  ;;  %v335_v61 = vadd.s32 %v334_v46, %v324_v45  ;;  %v4105_v62 = vsel %vm337_vm2, 1, %v6211_v56  ;;  %v2903_v12 = vld [vmem:[%s3785_s24 + $0x2d0] sm:$0xff]  ;;  %vm4150_vm5 = vcmp.ne.s32.totalorder %v733_v53, 0 }
  0x87   : > { %v660_v44 = vshrl.u32 %v659_v33, 4  ;;  %v355_v33 = vshll.u32 %v4112_v25, 16  ;;  %vm4164_vm9 = vcmp.ne.s32.totalorder %v723_v23, 0  ;;  %v6266_v46 = vmov 0 }
  0x88   : > { %v6267_v46 = vsel %vm4164_vm9, 4294967295, %v6266_v46 }
  0x89   : > { %v661_v54 = vmul.u32 28, %v660_v44  ;;  %6268 = vst [vmem:[#allocation5_spill] sm:$0xff] %v6267_v46  ;;  %vm359_vm2 = vc.u32 %v4096_v18, %v355_v33  ;;  %v2200_v46 = vld [vmem:[%s3785_s24 + $0x218] sm:$0xff] }
  0x8a   : > { %3361 = vmatmul.msk.f32.gmra.mxu3 %vm749_vm0, %v1841_v50 }
  0x8b   : > { %3373 = vmatmul.msk.f32.gmra.mxu0 %vm749_vm0, %v2193_v51  ;;  %v4124_v13 = vsub.s32 %v3944_v8, %v661_v54  ;;  %v1844_v54 = vld [vmem:[%s3785_s24 + $0x198] sm:$0xff] }
  0x8c   : > { %3387 = vmatmul.msk.f32.gmra.mxu1 %vm749_vm0, %v2547_v58  ;;  %3401 = vmatmul.msk.f32.gmra.mxu2 %vm749_vm0, %v2901_v59 }
  0x8d   : > { %vm678_vm6 = vcmp.ne.s32.totalorder %v4124_v13, 0  ;;  %vm692_vm8 = vcmp.lt.s32.totalorder %v4124_v13, 0 }
  0x8e   : > { %vm4199_vm10 = vmand %vm692_vm8, %vm678_vm6 }
  0x90   : > { %v809_v21 = vpop.f32.mrf.mxu0 }
  0x91   : > { %v854_v28 = vmul.f32 %v4008_v7, %v809_v21  ;;  %v1200_v29 = vpop.f32.mrf.mxu1 }
  0x92   : > { %v1242_v36 = vmul.f32 %v4008_v7, %v1200_v29  ;;  %3362 = vmatmul.msk.f32.gmra.mxu3 %vm749_vm0, %v1842_v22  ;;  %v4141_v22 = vmul.u32 37449, %v349_v49  ;;  %v336_v29 = vadd.s32 %v335_v61, %v326_v52  ;;  %v2904_v61 = vld [vmem:[%s3785_s24 + $0x2d8] sm:$0xff] }
  0x93   : > { %v871_v41 = vadd.f32 %v4021_v14, %v854_v28  ;;  %3374 = vmatmul.msk.f32.gmra.mxu0 %vm749_vm0, %v2194_v24 }
  0x94   : > { %v1256_v47 = vadd.f32 %v4021_v14, %v1242_v36  ;;  %3388 = vmatmul.msk.f32.gmra.mxu1 %vm749_vm0, %v2548_v30  ;;  %3402 = vmatmul.msk.f32.gmra.mxu2 %vm749_vm0, %v2902_v32  ;;  %v6262_v32 = vmov 0 }
  0x95   : > { %v885_v50 = vmax.f32 %v871_v41, 0.0  ;;  %v842_v57 = vpop.f32.mrf.mxu3  ;;  %v6263_v32 = vsel %vm4150_vm5, 4294967295, %v6262_v32 }
  0x96   : > { %v1270_v55 = vmax.f32 %v1256_v47, 0.0  ;;  %v865_v58 = vmul.f32 %v4008_v7, %v842_v57  ;;  %6264 = vst [vmem:[#allocation3_spill] sm:$0xff] %v6263_v32 }
  0x97   : > { %v914_v35 = vrot.slane %v885_v50, 7  ;;  %v1554_v59 = vpop.f32.mrf.mxu2 }
  0x98   : > { %v4107_v63 = vrot.slane %v1270_v55, 7  ;;  %v1596_v0 = vmul.f32 %v4008_v7, %v1554_v59  ;;  %v812_v1 = vpop.f32.mrf.mxu0  ;;  %v4118_v6 = vadd.f32 %v4021_v14, %v865_v58  ;;  %v2550_v59 = vld [vmem:[%s3785_s24 + $0x268] sm:$0xff] }
  0x99   : > { %v955_v5 = vsel %vm6242_vm7, 0.0, %v914_v35  ;;  %v855_v9 = vmul.f32 %v4008_v7, %v812_v1  ;;  %v1203_v10 = vpop.f32.mrf.mxu1 }
  0x9a   : > { %6261 = vst [vmem:[#allocation2_spill] sm:$0xff] %v4118_v6  ;;  %v998_v16 = vsel %vm4083_vm3, %v955_v5, 0.0  ;;  %v1339_v15 = vsel %vm6242_vm7, 0.0, %v4107_v63  ;;  %v4131_v17 = vadd.f32 %v4021_v14, %v1596_v0  ;;  %v1243_v19 = vmul.f32 %v4008_v7, %v1203_v10  ;;  %3363 = vmatmul.msk.f32.gmra.mxu3 %vm749_vm0, %v1843_v2 }
  0x9b   : > { %v4134_v20 = vadd.f32 %v998_v16, %v885_v50  ;;  %v1340_v21 = vsel %vm4083_vm3, %v1339_v15, 0.0  ;;  %v872_v8 = vadd.f32 %v4021_v14, %v855_v9  ;;  %3375 = vmatmul.msk.f32.gmra.mxu0 %vm749_vm0, %v2195_v3  ;;  %v6187_v24 = vmax.f32 %v4118_v6, 0.0 }
  0x9c   : > { %v1624_v26 = vmax.f32 %v4131_v17, 0.0  ;;  %v4146_v28 = vadd.f32 %v4021_v14, %v1243_v19  ;;  %3389 = vmatmul.msk.f32.gmra.mxu1 %vm749_vm0, %v2549_v11  ;;  %3403 = vmatmul.msk.f32.gmra.mxu2 %vm749_vm0, %v2903_v12  ;;  %v4157_v36 = vadd.f32 %v1340_v21, %v1270_v55  ;;  %v2196_v55 = vld [vmem:[%s3785_s24 + $0x1f8] sm:$0xff]  ;;  %v4186_v0 = vadd.s32 28, %v4124_v13 }
  0x9d   : > { %v886_v30 = vmax.f32 %v872_v8, 0.0  ;;  %v845_v39 = vpop.f32.mrf.mxu3  ;;  %v1038_v40 = vrot.slane %v4134_v20, 4  ;;  %v1085_v41 = vmul.f32 0.25, %v4134_v20  ;;  %v4170_v47 = vrot.slane %v6187_v24, 7 }
  0x9e   : > { %6265 = vst [vmem:[#allocation4_spill] sm:$0xff] %v4157_v36  ;;  %v1652_v37 = vrot.slane %v1624_v26, 7  ;;  %v1271_v38 = vmax.f32 %v4146_v28, 0.0  ;;  %v866_v44 = vmul.f32 %v4008_v7, %v845_v39  ;;  %v1392_v1 = vrot.slane %v4157_v36, 4 }
  0x9f   : > { %v915_v42 = vrot.slane %v886_v30, 7  ;;  %v1557_v45 = vpop.f32.mrf.mxu2  ;;  %v339_v17 = vadd.s32 %v4105_v62, %v336_v29  ;;  %v6281_v36 = vmov 0 }
  0xa0   : > { %v1693_v48 = vsel %vm6242_vm7, 0.0, %v1652_v37  ;;  %v4175_v49 = vrot.slane %v1271_v38, 7  ;;  %v1597_v50 = vmul.f32 %v4008_v7, %v1557_v45  ;;  %v815_v53 = vpop.f32.mrf.mxu0  ;;  %v883_v23 = vadd.f32 %v4021_v14, %v866_v44 }
  0xa1   : > { %v916_v57 = vsel %vm6242_vm7, %v914_v35, %v915_v42  ;;  %v856_v52 = vmul.f32 %v4008_v7, %v815_v53  ;;  %v1206_v58 = vpop.f32.mrf.mxu1  ;;  %v1694_v2 = vsel %vm4083_vm3, %v1693_v48, 0.0 }
  0xa2   : > { %v999_v3 = vsel %vm4099_vm14, %v916_v57, 0.0  ;;  %v1611_v35 = vadd.f32 %v4021_v14, %v1597_v50  ;;  %v1300_v10 = vsel %vm6242_vm7, %v4107_v63, %v4175_v49  ;;  %v897_v11 = vmax.f32 %v883_v23, 0.0  ;;  %3364 = vmatmul.msk.f32.gmra.mxu3 %vm749_vm0, %v1844_v54 }
  0xa3   : > { %v4203_v9 = vadd.f32 %v999_v3, %v886_v30  ;;  %v873_v12 = vadd.f32 %v4021_v14, %v856_v52  ;;  %3376 = vmatmul.msk.f32.gmra.mxu0 %vm749_vm0, %v2196_v55  ;;  %v1244_v15 = vmul.f32 %v4008_v7, %v1206_v58  ;;  %v4218_v63 = vsel %vm6222_vm4, 0.0, %v1038_v40  ;;  %v2197_v52 = vld [vmem:[%s3785_s24 + $0x200] sm:$0xff] }
  0xa4   : > { %v1625_v16 = vmax.f32 %v1611_v35, 0.0  ;;  %3390 = vmatmul.msk.f32.gmra.mxu1 %vm749_vm0, %v2550_v59  ;;  %3404 = vmatmul.msk.f32.gmra.mxu2 %vm749_vm0, %v2904_v61  ;;  %v937_v21 = vrot.slane %v897_v11, 7  ;;  %v734_v30 = vsel %vm4199_vm10, %v4186_v0, %v4124_v13  ;;  %v4225_v39 = vadd.f32 %v1694_v2, %v1624_v26  ;;  %v2551_v2 = vld [vmem:[%s3785_s24 + $0x270] sm:$0xff]  ;;  %v2905_v3 = vld [vmem:[%s3785_s24 + $0x2e0] sm:$0xff] }
  0xa5   : > { %v1086_v19 = vmul.f32 0.25, %v4203_v9  ;;  %v887_v8 = vmax.f32 %v873_v12, 0.0  ;;  %v1341_v62 = vsel %vm4099_vm14, %v1300_v10, 0.0  ;;  %v4235_v44 = vadd.f32 %v4021_v14, %v1244_v15  ;;  %v848_v45 = vpop.f32.mrf.mxu3 }
  0xa6   : > { %6271 = vst [vmem:[#allocation6_spill] sm:$0xff] %v4225_v39  ;;  %v1653_v29 = vrot.slane %v1625_v16, 7  ;;  %v938_v13 = vsel %vm6242_vm7, %v4170_v47, %v937_v21  ;;  %v867_v50 = vmul.f32 %v4008_v7, %v848_v45  ;;  %v4252_v58 = vadd.f32 %v1341_v62, %v1271_v38 }
  0xa7   : > { %v3416_v48 = vpack.c.bf16 %v1086_v19, %v1085_v41  ;;  %v4239_v26 = vrot.slane %v887_v8, 7  ;;  %v1560_v53 = vpop.f32.mrf.mxu2  ;;  %v1010_v54 = vsel %vm4150_vm5, %v938_v13, 0.0  ;;  %v1272_v57 = vmax.f32 %v4235_v44, 0.0  ;;  %v1845_v41 = vld [vmem:[%s3785_s24 + $0x1a0] sm:$0xff] }
  0xa8   : > { %v1654_v55 = vsel %vm6242_vm7, %v1652_v37, %v1653_v29  ;;  %v1598_v23 = vmul.f32 %v4008_v7, %v1560_v53  ;;  %6272 = vst [vmem:[#allocation7_spill] sm:$0xff] %v4252_v58  ;;  %v884_v0 = vadd.f32 %v4021_v14, %v867_v50  ;;  %v818_v37 = vpop.f32.mrf.mxu0  ;;  %v4261_v35 = vadd.f32 %v1010_v54, %v897_v11 }
  0xa9   : > { %3417 = vst [vmem:[%s4230_s6] sm:$0xff] %v3416_v48   ;;  %v1695_v59 = vsel %vm4099_vm14, %v1654_v55, 0.0  ;;  %v918_v61 = vsel %vm6242_vm7, %v915_v42, %v4239_v26  ;;  %v4265_v10 = vrot.slane %v1272_v57, 7  ;;  %v340_v42 = vshrl.u32 %v339_v17, 4  ;;  %v1209_v45 = vpop.f32.mrf.mxu1 }
  0xaa   : > { %v1000_v5 = vsel %vm4164_vm9, %v918_v61, 0.0  ;;  %v1612_v28 = vadd.f32 %v4021_v14, %v1598_v23  ;;  %v4268_v38 = vadd.f32 %v1695_v59, %v1625_v16  ;;  %v898_v15 = vmax.f32 %v884_v0, 0.0  ;;  %3365 = vmatmul.msk.f32.gmra.mxu3 %vm749_vm0, %v1845_v41  ;;  %v1846_v0 = vld [vmem:[%s3785_s24 + $0x1a8] sm:$0xff] }
  0xab   : > { %v4270_v12 = vadd.f32 %v1000_v5, %v887_v8  ;;  %3377 = vmatmul.msk.f32.gmra.mxu0 %vm749_vm0, %v2197_v52  ;;  %v6189_v11 = vrot.slane %v4225_v39, 4  ;;  %v6192_v19 = vrot.slane %v4203_v9, 4  ;;  %v857_v44 = vmul.f32 %v4008_v7, %v818_v37  ;;  %v2198_v37 = vld [vmem:[%s3785_s24 + $0x208] sm:$0xff] }
  0xac   : > { %6273 = vst [vmem:[#allocation8_spill] sm:$0xff] %v4268_v38  ;;  %v1626_v62 = vmax.f32 %v1612_v28, 0.0  ;;  %3391 = vmatmul.msk.f32.gmra.mxu1 %vm749_vm0, %v2551_v2  ;;  %3405 = vmatmul.msk.f32.gmra.mxu2 %vm749_vm0, %v2905_v3  ;;  %v6191_v16 = vrot.slane %v4252_v58, 4  ;;  %v1302_v17 = vsel %vm6242_vm7, %v4175_v49, %v4265_v10  ;;  %v939_v8 = vrot.slane %v898_v15, 7 }
  0xad   : > { %vm4283_vm11 = vcmp.ne.s32.totalorder %v734_v30, 0  ;;  %v6274_v48 = vmov 0  ;;  %v6186_v13 = vrot.slane %v4261_v35, 4  ;;  %v341_v53 = vmul.u32 28, %v340_v42  ;;  %v1233_v28 = vpop.f32.mrf.mxu3 }
  0xae   : > { %v6275_v48 = vsel %vm4283_vm11, 4294967295, %v6274_v48  ;;  %v4288_v50 = vrot.slane %v1626_v62, 7  ;;  %v874_v54 = vadd.f32 %v4021_v14, %v857_v44  ;;  %v6190_v55 = vrot.slane %v4268_v38, 4  ;;  %v2552_v44 = vld [vmem:[%s3785_s24 + $0x278] sm:$0xff] }
  0xaf   : > { %6276 = vst [vmem:[#allocation9_spill] sm:$0xff] %v6275_v48  ;;  %v940_v49 = vsel %vm6242_vm7, %v937_v21, %v939_v8  ;;  %v1245_v30 = vmul.f32 %v4008_v7, %v1209_v45  ;;  %v1342_v41 = vsel %vm4164_vm9, %v1302_v17, 0.0  ;;  %v342_v61 = vsub.s32 %v3969_v31, %v341_v53  ;;  %v1563_v42 = vpop.f32.mrf.mxu2  ;;  %v2906_v45 = vld [vmem:[%s3785_s24 + $0x2e8] sm:$0xff] }
  0xb0   : > { %v1011_v52 = vsel %vm4283_vm11, %v940_v49, 0.0  ;;  %v1656_v59 = vsel %vm6242_vm7, %v1653_v29, %v4288_v50  ;;  %v888_v3 = vmax.f32 %v874_v54, 0.0  ;;  %v1253_v29 = vmul.f32 %v4008_v7, %v1233_v28 }
  0xb1   : > { %v4304_v2 = vadd.f32 %v1011_v52, %v898_v15  ;;  %v1696_v21 = vsel %vm4164_vm9, %v1656_v59, 0.0  ;;  %v1259_v5 = vadd.f32 %v4021_v14, %v1245_v30  ;;  %vm668_vm12 = vcmp.ne.s32.totalorder %v342_v61, 0 }
  0xb2   : > { %vm682_vm13 = vcmp.lt.s32.totalorder %v342_v61, 0  ;;  %v710_v17 = vadd.s32 28, %v342_v61  ;;  %v4312_v31 = vadd.f32 %v1342_v41, %v1272_v57  ;;  %v4315_v8 = vrot.slane %v888_v3, 7  ;;  %3366 = vmatmul.msk.f32.gmra.mxu3 %vm749_vm0, %v1846_v0 }
  0xb3   : > { %v1375_v15 = vrot.slane %v4304_v2, 4  ;;  %vm696_vm15 = vmand %vm682_vm13, %vm668_vm12  ;;  %v1273_v53 = vmax.f32 %v1259_v5, 0.0  ;;  %3378 = vmatmul.msk.f32.gmra.mxu0 %vm749_vm0, %v2198_v37  ;;  %v1087_v54 = vmul.f32 0.25, %v4270_v12  ;;  %v4320_v49 = vadd.f32 %v1696_v21, %v1626_v62  ;;  %v821_v5 = vpop.f32.mrf.mxu0 }
  0xb4   : > { %v724_v30 = vsel %vm696_vm15, %v710_v17, %v342_v61  ;;  %v1599_v52 = vmul.f32 %v4008_v7, %v1563_v42  ;;  %3392 = vmatmul.msk.f32.gmra.mxu1 %vm749_vm0, %v2552_v44  ;;  %3406 = vmatmul.msk.f32.gmra.mxu2 %vm749_vm0, %v2906_v45  ;;  %v920_v41 = vsel %vm6242_vm7, %v4239_v26, %v4315_v8  ;;  %v6277_v59 = vmov 0 }
  0xb5   : > { %v1376_v57 = vsel %vm6222_vm4, %v6186_v13, %v1375_v15  ;;  %vm4331_vm1 = vcmp.ne.s32.totalorder %v724_v30, 0  ;;  %v4335_v62 = vrot.slane %v1273_v53, 7  ;;  %v4341_v37 = vadd.f32 %v4021_v14, %v1253_v29 }
  0xb6   : > { %v6278_v59 = vsel %vm4331_vm1, 4294967295, %v6277_v59  ;;  %v1001_v61 = vsel %vm4331_vm1, %v920_v41, 0.0  ;;  %v1427_v0 = vadd.f32 %v1376_v57, %v4312_v31  ;;  %v357_v21 = vshll.u32 %v4114_v4, 16  ;;  %v1212_v57 = vpop.f32.mrf.mxu1 }
  0xb7   : > { %6279 = vst [vmem:[#allocation10_spill] sm:$0xff] %v6278_v59  ;;  %v4344_v28 = vadd.f32 %v1001_v61, %v888_v3  ;;  %v1304_v26 = vsel %vm6242_vm7, %v4265_v10, %v4335_v62  ;;  %v1613_v42 = vadd.f32 %v4021_v14, %v1599_v52  ;;  %v1424_v3 = vsel %vm6222_vm4, %v1375_v15, %v1392_v1  ;;  %v1848_v59 = vld [vmem:[%s3785_s24 + $0x1b8] sm:$0xff] }
  0xb8   : > { %6280 = vst [vmem:[#allocation11_spill] sm:$0xff] %v4341_v37  ;;  %v1343_v45 = vsel %vm4331_vm1, %v1304_v26, 0.0  ;;  %v360_v17 = vsel %vm359_vm2, 1, %v6211_v56  ;;  %v6188_v41 = vmax.f32 %v4341_v37, 0.0  ;;  %v361_v15 = vadd.s32 %v355_v33, %v4096_v18 }
  0xb9   : > { %v1074_v29 = vadd.f32 %v4218_v63, %v4344_v28  ;;  %v4363_v30 = vadd.f32 %v1343_v45, %v1273_v53  ;;  %v1627_v52 = vmax.f32 %v1613_v42, 0.0  ;;  %v362_v61 = vadd.s32 %v360_v17, %v4141_v22  ;;  %v1847_v53 = vld [vmem:[%s3785_s24 + $0x1b0] sm:$0xff]  ;;  %v2553_v45 = vld [vmem:[%s3785_s24 + $0x280] sm:$0xff] }
  0xba   : > { %v858_v26 = vmul.f32 %v4008_v7, %v821_v5  ;;  %v1441_v10 = vmul.f32 0.25, %v1427_v0  ;;  %v2199_v42 = vld [vmem:[%s3785_s24 + $0x210] sm:$0xff]  ;;  %vm363_vm6 = vc.u32 %v361_v15, %v357_v21  ;;  %v365_v44 = vadd.s32 %v361_v15, %v357_v21  ;;  %3367 = vmatmul.msk.f32.gmra.mxu3 %vm749_vm0, %v1847_v53  ;;  %v1236_v15 = vpop.f32.mrf.mxu3 }
  0xbb   : > { %v1088_v13 = vmul.f32 0.25, %v1074_v29  ;;  %v1428_v24 = vadd.f32 %v1424_v3, %v4363_v30  ;;  %v4372_v63 = vrot.slane %v1627_v52, 7  ;;  %v1246_v18 = vmul.f32 %v4008_v7, %v1212_v57  ;;  %v2907_v22 = vld [vmem:[%s3785_s24 + $0x2f0] sm:$0xff]  ;;  %3379 = vmatmul.msk.f32.gmra.mxu0 %vm749_vm0, %v2199_v42  ;;  %v824_v53 = vpop.f32.mrf.mxu0 }
  0xbc   : > { %v4378_v23 = vadd.f32 %v4021_v14, %v858_v26  ;;  %v364_v3 = vsel %vm363_vm6, 1, %v6211_v56  ;;  %3393 = vmatmul.msk.f32.gmra.mxu1 %vm749_vm0, %v2553_v45  ;;  %v358_v17 = vshrl.u32 %v4114_v4, 16  ;;  %vm369_vm8 = vc.u32 %v365_v44, 2454267026  ;;  %3407 = vmatmul.msk.f32.gmra.mxu2 %vm749_vm0, %v2907_v22 }
  0xbd   : > { %v3421_v33 = vpack.c.bf16 %v1088_v13, %v1087_v54  ;;  %v1442_v5 = vmul.f32 0.25, %v1428_v24  ;;  %v1658_v0 = vsel %vm6242_vm7, %v4288_v50, %v4372_v63  ;;  %v366_v29 = vadd.s32 %v364_v3, %v362_v61  ;;  %v1566_v13 = vpop.f32.mrf.mxu2 }
  0xbe   : > { %v1697_v21 = vsel %vm4331_vm1, %v1658_v0, 0.0  ;;  %v4396_v50 = vrot.slane %v6188_v41, 7  ;;  %v6194_v54 = vmax.f32 %v4378_v23, 0.0  ;;  %v4400_v57 = vadd.f32 %v4021_v14, %v1246_v18 }
  0xbf   : > { %3658 = vst [vmem:[%s4230_s6 + $0x8] sm:$0xff] %v3421_v33   ;;  %v3456_v24 = vpack.c.bf16 %v1442_v5, %v1441_v10  ;;  %v367_v61 = vadd.s32 %v366_v29, %v356_v34  ;;  %v4410_v10 = vsel %vm6222_vm4, %v1038_v40, %v6192_v19  ;;  %v1254_v26 = vmul.f32 %v4008_v7, %v1236_v15  ;;  %v1215_v29 = vpop.f32.mrf.mxu1 }
  0xc0   : > { %v4414_v42 = vadd.f32 %v1697_v21, %v1627_v52  ;;  %v370_v45 = vsel %vm369_vm8, 1, %v6211_v56  ;;  %v6193_v18 = vmax.f32 %v4400_v57, 0.0  ;;  %v1600_v25 = vmul.f32 %v4008_v7, %v1566_v13 }
  0xc1   : > { %3665 = vst [vmem:[%s4230_s6 + $0x40] sm:$0xff] %v3456_v24   ;;  %v368_v22 = vadd.s32 %v367_v61, %v358_v17  ;;  %v1268_v20 = vadd.f32 %v4021_v14, %v1254_v26  ;;  %v4423_v40 = vadd.s32 40, %v3867_v43  ;;  %v4427_v33 = vrot.slane %v6194_v54, 7 }
  0xc2   : > { %v4434_v44 = vsel %vm6222_vm4, %v1392_v1, %v6191_v16  ;;  %v4437_v52 = vadd.f32 %v4021_v14, %v1600_v25  ;;  %v859_v5 = vmul.f32 %v4008_v7, %v824_v53  ;;  %v4445_v24 = vrot.slane %v6193_v18, 7  ;;  %3368 = vmatmul.msk.f32.gmra.mxu3 %vm749_vm0, %v1848_v59 }
  0xc3   : > { %v371_v0 = vadd.s32 %v370_v45, %v368_v22  ;;  %v1282_v3 = vmax.f32 %v1268_v20, 0.0  ;;  %v380_v21 = vand.u32 65535, %v4423_v40  ;;  %v381_v17 = vshrl.u32 %v4423_v40, 16  ;;  %3380 = vmatmul.msk.f32.gmra.mxu0 %vm749_vm0, %v2200_v46 }
  0xc4   : > { %v1628_v1 = vmax.f32 %v4437_v52, 0.0  ;;  %v4449_v15 = vadd.f32 %v4021_v14, %v859_v5  ;;  %v4460_v22 = vsel %vm6222_vm4, %v6189_v11, %v6190_v55  ;;  %v1247_v52 = vmul.f32 %v4008_v7, %v1215_v29 }
  0xc5   : > { %v372_v61 = vshrl.u32 %v371_v0, 4  ;;  %v4451_v26 = vrot.slane %v1282_v3, 7  ;;  %v383_v53 = vmul.u32 9362, %v380_v21  ;;  %v384_v45 = vmul.u32 37449, %v380_v21 }
  0xc6   : > { %v4453_v25 = vrot.slane %v1628_v1, 7  ;;  %v4462_v20 = vmul.u32 9362, %v381_v17  ;;  %v922_v0 = vsel %vm6242_vm7, %v4315_v8, %v4427_v33  ;;  %v1306_v13 = vsel %vm6242_vm7, %v4335_v62, %v4445_v24 }
  0xc7   : > { %v373_v5 = vmul.u32 28, %v372_v61  ;;  %v1322_v21 = vsel %vm6242_vm7, %v4396_v50, %v4451_v26  ;;  %v387_v41 = vshll.u32 %v384_v45, 16  ;;  %v386_v34 = vmul.u32 37449, %v381_v17  ;;  %v1239_v17 = vpop.f32.mrf.mxu3 }
  0xc8   : > { %v389_v4 = vshll.u32 %v4462_v20, 16  ;;  %v6201_v11 = vmax.f32 %v4449_v15, 0.0  ;;  %v1352_v61 = vsel %vm4150_vm5, %v1322_v21, 0.0  ;;  %v1660_v55 = vsel %vm6242_vm7, %v4372_v63, %v4453_v25 }
  0xc9   : > { %v374_v29 = vsub.s32 %v4040_v27, %v373_v5  ;;  %vm391_vm10 = vc.u32 %v383_v53, %v387_v41  ;;  %v393_v8 = vadd.s32 %v387_v41, %v383_v53  ;;  %v388_v16 = vshrl.u32 %v384_v45, 16  ;;  %v1569_v41 = vpop.f32.mrf.mxu2 }
  0xca   : > { %v392_v19 = vsel %vm391_vm10, 1, %v6211_v56  ;;  %v4484_v62 = vadd.f32 %v4021_v14, %v1247_v52  ;;  %v390_v5 = vshrl.u32 %v4462_v20, 16  ;;  %v4487_v53 = vadd.f32 %v1352_v61, %v1282_v3  ;;  %v2554_v20 = vld [vmem:[%s3785_s24 + $0x288] sm:$0xff]  ;;  %v2908_v3 = vld [vmem:[%s3785_s24 + $0x2f8] sm:$0xff] }
  0xcb   : > { %vm669_vm12 = vcmp.ne.s32.totalorder %v374_v29, 0  ;;  %vm683_vm13 = vcmp.lt.s32.totalorder %v374_v29, 0  ;;  %v711_v27 = vadd.s32 28, %v374_v29  ;;  %v394_v63 = vadd.s32 %v392_v19, %v386_v34  ;;  %3394 = vmatmul.msk.f32.gmra.mxu1 %vm749_vm0, %v2554_v20  ;;  %3408 = vmatmul.msk.f32.gmra.mxu2 %vm749_vm0, %v2908_v3 }
  0xcc   : > { %vm697_vm15 = vmand %vm683_vm13, %vm669_vm12  ;;  %vm395_vm2 = vc.u32 %v393_v8, %v389_v4  ;;  %v397_v45 = vadd.s32 %v393_v8, %v389_v4  ;;  %v4492_v18 = vrot.slane %v6201_v11, 7  ;;  %v1255_v54 = vmul.f32 %v4008_v7, %v1239_v17 }
  0xcd   : > { %v725_v21 = vsel %vm697_vm15, %v711_v27, %v374_v29  ;;  %v396_v52 = vsel %vm395_vm2, 1, %v6211_v56  ;;  %v6200_v34 = vmax.f32 %v4484_v62, 0.0  ;;  %v1601_v4 = vmul.f32 %v4008_v7, %v1569_v41 }
  0xce   : > { %vm4498_vm6 = vcmp.ne.s32.totalorder %v725_v21, 0  ;;  %v398_v19 = vadd.s32 %v396_v52, %v394_v63  ;;  %vm401_vm8 = vc.u32 %v397_v45, 2454267026  ;;  %v6284_v17 = vmax.f32 %v4378_v23, 0.0 }
  0xcf   : > { %v6282_v36 = vsel %vm4498_vm6, 4294967295, %v6281_v36  ;;  %v1002_v29 = vsel %vm4498_vm6, %v922_v0, 0.0  ;;  %v1344_v61 = vsel %vm4498_vm6, %v1306_v13, 0.0  ;;  %v1698_v8 = vsel %vm4498_vm6, %v1660_v55, 0.0 }
  0xd0   : > { %6283 = vst [vmem:[#allocation12_spill] sm:$0xff] %v6282_v36  ;;  %v4517_v59 = vadd.f32 %v1002_v29, %v6284_v17  ;;  %v6285_v46 = vmax.f32 %v4400_v57, 0.0  ;;  %v399_v0 = vadd.s32 %v398_v19, %v388_v16  ;;  %v6286_v41 = vrot.slane %v4270_v12, 4  ;;  %v827_v19 = vpop.f32.mrf.mxu0 }
  0xd1   : > { %v6287_v13 = vrot.slane %v4203_v9, 4  ;;  %v4530_v63 = vadd.f32 %v1698_v8, %v1628_v1  ;;  %v6288_v45 = vrot.slane %v4312_v31, 4  ;;  %v6289_v23 = vrot.slane %v4252_v58, 4 }
  0xd2   : > { %v4521_v27 = vadd.f32 %v1344_v61, %v6285_v46  ;;  %v1269_v57 = vadd.f32 %v4021_v14, %v1255_v54  ;;  %v4541_v16 = vadd.f32 %v4021_v14, %v1601_v4  ;;  %v6206_v52 = vrot.slane %v4487_v53, 4 }
  0xd3   : > { %v4528_v55 = vsel %vm6222_vm4, %v6287_v13, %v6286_v41  ;;  %v4537_v21 = vsel %vm6222_vm4, %v6289_v23, %v6288_v45  ;;  %v402_v9 = vsel %vm401_vm8, 1, %v6211_v56  ;;  %v4548_v1 = vsel %vm6242_vm7, %v4427_v33, %v4492_v18  ;;  %v1218_v33 = vpop.f32.mrf.mxu1 }
  0xd4   : > { %v4552_v20 = vrot.slane %v6200_v34, 7  ;;  %v1075_v54 = vadd.f32 %v4410_v10, %v4517_v59  ;;  %v400_v4 = vadd.s32 %v399_v0, %v390_v5  ;;  %v6290_v29 = vrot.slane %v4320_v49, 4 }
  0xd5   : > { %v6291_v61 = vrot.slane %v4268_v38, 4  ;;  %v1429_v46 = vadd.f32 %v4434_v44, %v4521_v27  ;;  %v1283_v41 = vmax.f32 %v1269_v57, 0.0  ;;  %v1629_v13 = vmax.f32 %v4541_v16, 0.0 }
  0xd6   : > { %v403_v10 = vadd.s32 %v402_v9, %v400_v4  ;;  %v4570_v5 = vadd.s32 48, %v3867_v43  ;;  %v860_v0 = vmul.f32 %v4008_v7, %v827_v19  ;;  %v4575_v23 = vadd.f32 %v4460_v22, %v4530_v63 }
  0xd7   : > { %v4562_v8 = vsel %vm6222_vm4, %v6291_v61, %v6290_v29  ;;  %v1323_v29 = vrot.slane %v1283_v41, 7  ;;  %v4577_v61 = vrot.slane %v1629_v13, 7  ;;  %v1248_v44 = vmul.f32 %v4008_v7, %v1218_v33 }
  0xd8   : > { %v404_v57 = vshrl.u32 %v403_v10, 4  ;;  %v412_v16 = vand.u32 65535, %v4570_v5  ;;  %v413_v45 = vshrl.u32 %v4570_v5, 16  ;;  %v4583_v9 = vadd.f32 %v4021_v14, %v860_v0 }
  0xd9   : > { %v4585_v4 = vmul.f32 0.25, %v1075_v54  ;;  %v4587_v19 = vmul.f32 0.25, %v1429_v46  ;;  %v1308_v22 = vsel %vm6242_vm7, %v4445_v24, %v4552_v20  ;;  %v1324_v17 = vsel %vm6242_vm7, %v4451_v26, %v1323_v29 }
  0xda   : > { %v405_v33 = vmul.u32 28, %v404_v57  ;;  %v1353_v10 = vsel %vm4283_vm11, %v1324_v17, 0.0  ;;  %v415_v3 = vmul.u32 9362, %v412_v16  ;;  %v416_v34 = vmul.u32 37449, %v412_v16 }
  0xdb   : > { %v4596_v11 = vadd.f32 %v1353_v10, %v1283_v41  ;;  %v1662_v54 = vsel %vm6242_vm7, %v4453_v25, %v4577_v61  ;;  %v4601_v46 = vmul.u32 9362, %v413_v45  ;;  %v4604_v0 = vadd.f32 %v4021_v14, %v1248_v44 }
  0xdc   : > { %v406_v24 = vsub.s32 %v4423_v40, %v405_v33  ;;  %v418_v26 = vmul.u32 37449, %v413_v45  ;;  %v419_v29 = vshll.u32 %v416_v34, 16  ;;  %v420_v16 = vshrl.u32 %v416_v34, 16 }
  0xdd   : > { %v1729_v17 = vrot.slane %v4596_v11, 4  ;;  %v421_v41 = vshll.u32 %v4601_v46, 16  ;;  %v422_v10 = vshrl.u32 %v4601_v46, 16  ;;  %v6292_v45 = vrot.slane %v4225_v39, 4 }
  0xde   : > { %vm670_vm10 = vcmp.ne.s32.totalorder %v406_v24, 0  ;;  %vm684_vm12 = vcmp.lt.s32.totalorder %v406_v24, 0  ;;  %v712_v25 = vadd.s32 28, %v406_v24  ;;  %vm423_vm13 = vc.u32 %v415_v3, %v419_v29 }
  0xdf   : > { %vm698_vm15 = vmand %vm684_vm12, %vm670_vm10  ;;  %v1730_v40 = vsel %vm6222_vm4, %v6206_v52, %v1729_v17  ;;  %v1778_v44 = vsel %vm6222_vm4, %v1729_v17, %v6292_v45  ;;  %v424_v33 = vsel %vm423_vm13, 1, %v6211_v56  ;;  %v425_v34 = vadd.s32 %v419_v29, %v415_v3 }
  0xe0   : > { %v726_v57 = vsel %vm698_vm15, %v712_v25, %v406_v24  ;;  %v1781_v46 = vadd.f32 %v1730_v40, %v4320_v49  ;;  %v1782_v36 = vadd.f32 %v1778_v44, %v4414_v42  ;;  %v426_v38 = vadd.s32 %v424_v33, %v418_v26 }
  0xe1   : > { %vm4620_vm2 = vcmp.ne.s32.totalorder %v726_v57, 0  ;;  %v6293_v58 = vmov 0  ;;  %vm427_vm8 = vc.u32 %v425_v34, %v421_v41  ;;  %v429_v52 = vadd.s32 %v425_v34, %v421_v41  ;;  %v2555_v34 = vld [vmem:[%s3785_s24 + $0x290] sm:$0xff] }
  0xe2   : > { %v6294_v58 = vsel %vm4620_vm2, 4294967295, %v6293_v58  ;;  %v6296_v17 = vmax.f32 %v4583_v9, 0.0  ;;  %v1003_v3 = vsel %vm4620_vm2, %v4548_v1, 0.0  ;;  %v1345_v24 = vsel %vm4620_vm2, %v1308_v22, 0.0  ;;  %v2201_v1 = vld [vmem:[%s3785_s24 + $0x220] sm:$0xff]  ;;  %3395 = vmatmul.msk.f32.gmra.mxu1 %vm749_vm0, %v2555_v34 }
  0xe3   : > { %6295 = vst [vmem:[#allocation13_spill] sm:$0xff] %v6294_v58  ;;  %v1795_v29 = vmul.f32 0.25, %v1781_v46  ;;  %v1796_v25 = vmul.f32 0.25, %v1782_v36  ;;  %v6297_v26 = vmax.f32 %v4449_v15, 0.0  ;;  %v6298_v40 = vmax.f32 %v4484_v62, 0.0  ;;  %v1572_v15 = vpop.f32.mrf.mxu2  ;;  %3381 = vmatmul.msk.f32.gmra.mxu0 %vm749_vm0, %v2201_v1  ;;  %v1587_v1 = vpop.f32.mrf.mxu3 }
  0xe4   : > { %v4626_v45 = vrot.slane %v6296_v17, 7  ;;  %v1699_v44 = vsel %vm4620_vm2, %v1662_v54, 0.0  ;;  %v428_v33 = vsel %vm427_vm8, 1, %v6211_v56  ;;  %v2909_v17 = vld [vmem:[%s3785_s24 + $0x300] sm:$0xff]  ;;  %vm433_vm10 = vc.u32 %v429_v52, 2454267026 }
  0xe5   : > { %v4635_v57 = vadd.f32 %v1003_v3, %v6297_v26  ;;  %v4639_v41 = vadd.f32 %v1345_v24, %v6298_v40  ;;  %v3491_v22 = vpack.c.bf16 %v1796_v25, %v1795_v29  ;;  %v4647_v46 = vadd.f32 %v1699_v44, %v1629_v13  ;;  %3409 = vmatmul.msk.f32.gmra.mxu2 %vm749_vm0, %v2909_v17  ;;  %v830_v17 = vpop.f32.mrf.mxu0 }
  0xe6   : > { %v430_v36 = vadd.s32 %v428_v33, %v426_v38  ;;  %v1797_v62 = vmul.f32 0.25, %v4575_v23  ;;  %v6299_v24 = vrot.slane %v4344_v28, 4  ;;  %v6300_v13 = vrot.slane %v4270_v12, 4 }
  0xe7   : > { %v1076_v54 = vadd.f32 %v4528_v55, %v4635_v57  ;;  %v1430_v3 = vadd.f32 %v4537_v21, %v4639_v41  ;;  %3672 = vst [vmem:[%s4230_s6 + $0x78] sm:$0xff] %v3491_v22   ;;  %v1784_v29 = vadd.f32 %v4562_v8, %v4647_v46  ;;  %v6208_v25 = vmax.f32 %v4604_v0, 0.0  ;;  %v1221_v22 = vpop.f32.mrf.mxu1 }
  0xe8   : > { %v4661_v38 = vsel %vm6222_vm4, %v6300_v13, %v6299_v24  ;;  %v431_v23 = vadd.s32 %v430_v36, %v420_v16  ;;  %v6301_v55 = vrot.slane %v4363_v30, 4  ;;  %v6302_v21 = vrot.slane %v4312_v31, 4 }
  0xe9   : > { %v1090_v12 = vmul.f32 0.25, %v1076_v54  ;;  %v1444_v40 = vmul.f32 0.25, %v1430_v3  ;;  %v434_v44 = vsel %vm433_vm10, 1, %v6211_v56  ;;  %v1602_v33 = vmul.f32 %v4008_v7, %v1572_v15 }
  0xea   : > { %v4673_v26 = vsel %vm6222_vm4, %v6302_v21, %v6301_v55  ;;  %v1798_v16 = vmul.f32 0.25, %v1784_v29  ;;  %v432_v34 = vadd.s32 %v431_v23, %v422_v10  ;;  %v4682_v31 = vsel %vm6242_vm7, %v4492_v18, %v4626_v45 }
  0xeb   : > { %v3426_v36 = vpack.c.bf16 %v1090_v12, %v4585_v4  ;;  %v3461_v52 = vpack.c.bf16 %v1444_v40, %v4587_v19  ;;  %v4687_v15 = vadd.f32 %v4021_v14, %v1602_v33  ;;  %v1607_v54 = vmul.f32 %v4008_v7, %v1587_v1  ;;  %v2910_v4 = vld [vmem:[%s3785_s24 + $0x308] sm:$0xff] }
  0xec   : > { %v3496_v3 = vpack.c.bf16 %v1798_v16, %v1797_v62  ;;  %v435_v10 = vadd.s32 %v434_v44, %v432_v34  ;;  %v4692_v24 = vrot.slane %v6208_v25, 7  ;;  %v4695_v18 = vadd.s32 56, %v3867_v43  ;;  %v2556_v62 = vld [vmem:[%s3785_s24 + $0x298] sm:$0xff] }
  0xed   : > { %3659 = vst [vmem:[%s4230_s6 + $0x10] sm:$0xff] %v3426_v36   ;;  %v6207_v19 = vmax.f32 %v4687_v15, 0.0  ;;  %v861_v13 = vmul.f32 %v4008_v7, %v830_v17  ;;  %v1249_v29 = vmul.f32 %v4008_v7, %v1221_v22  ;;  %v6303_v12 = vrot.slane %v4414_v42, 4  ;;  %3396 = vmatmul.msk.f32.gmra.mxu1 %vm749_vm0, %v2556_v62  ;;  %3410 = vmatmul.msk.f32.gmra.mxu2 %vm749_vm0, %v2910_v4  ;;  %v4782_v62 = vld [vmem:[%s6184_s3] ss:$0 sm:$0xff] }
  0xee   : > { %3666 = vst [vmem:[%s4230_s6 + $0x48] sm:$0xff] %v3461_v52   ;;  %v436_v23 = vshrl.u32 %v435_v10, 4  ;;  %v444_v55 = vand.u32 65535, %v4695_v18  ;;  %v445_v21 = vshrl.u32 %v4695_v18, 16  ;;  %v6304_v40 = vrot.slane %v4320_v49, 4  ;;  %v1575_v49 = vpop.f32.mrf.mxu2 }
  0xef   : > { %3673 = vst [vmem:[%s4230_s6 + $0x80] sm:$0xff] %v3496_v3   ;;  %v4715_v33 = vadd.f32 %v4021_v14, %v1607_v54  ;;  %v4718_v7 = vadd.f32 %v4021_v14, %v861_v13  ;;  %v4721_v1 = vadd.f32 %v4021_v14, %v1249_v29  ;;  %v1310_v34 = vsel %vm6242_vm7, %v4552_v20, %v4692_v24 }
  0xf0   : > { %v4712_v44 = vsel %vm6222_vm4, %v6304_v40, %v6303_v12  ;;  %v437_v16 = vmul.u32 28, %v436_v23  ;;  %v447_v17 = vmul.u32 9362, %v444_v55  ;;  %v448_v22 = vmul.u32 37449, %v444_v55 }
  0xf1   : > { %6305 = vst [vmem:[#allocation14_spill] sm:$0xff] %v4715_v33  ;;  %v4728_v36 = vrot.slane %v6207_v19, 7  ;;  %v4730_v52 = vmul.u32 9362, %v445_v21  ;;  %v450_v54 = vmul.u32 37449, %v445_v21  ;;  %v6306_v3 = vrot.slane %v4517_v59, 4 }
  0xf2   : > { %v6307_v14 = vrot.slane %v4344_v28, 4  ;;  %v438_v20 = vsub.s32 %v4570_v5, %v437_v16  ;;  %v451_v13 = vshll.u32 %v448_v22, 16  ;;  %v6210_v29 = vmax.f32 %v4718_v7, 0.0  ;;  %v4754_v5 = vld [vmem:[%s6183_s2] ss:$0 sm:$0xff] }
  0xf3   : > { %v6209_v23 = vmax.f32 %v4721_v1, 0.0  ;;  %v453_v21 = vshll.u32 %v4730_v52, 16  ;;  %v6308_v12 = vrot.slane %v4521_v27, 4  ;;  %v6309_v28 = vrot.slane %v4363_v30, 4 }
  0xf4   : > { %v4737_v10 = vsel %vm6222_vm4, %v6307_v14, %v6306_v3  ;;  %v1603_v16 = vmul.f32 %v4754_v5, %v1575_v49  ;;  %vm671_vm12 = vcmp.ne.s32.totalorder %v438_v20, 0  ;;  %vm685_vm13 = vcmp.lt.s32.totalorder %v438_v20, 0  ;;  %v2202_v14 = vld [vmem:[%s3785_s24 + $0x228] sm:$0xff] }
  0xf5   : > { %v4749_v40 = vsel %vm6222_vm4, %v6309_v28, %v6308_v12  ;;  %v713_v3 = vadd.s32 28, %v438_v20  ;;  %vm455_vm15 = vc.u32 %v447_v17, %v451_v13  ;;  %vm699_vm8 = vmand %vm685_vm13, %vm671_vm12  ;;  %v1664_v30 = vsel %vm6242_vm7, %v4577_v61, %v4728_v36  ;;  %3382 = vmatmul.msk.f32.gmra.mxu0 %vm749_vm0, %v2202_v14 }
  0xf6   : > { %v452_v12 = vshrl.u32 %v448_v22, 16  ;;  %v456_v28 = vsel %vm455_vm15, 1, %v6211_v56  ;;  %v457_v8 = vadd.s32 %v451_v13, %v447_v17  ;;  %v4768_v19 = vrot.slane %v6210_v29, 7 }
  0xf7   : > { %v727_v49 = vsel %vm699_vm8, %v713_v3, %v438_v20  ;;  %v458_v55 = vadd.s32 %v456_v28, %v450_v54  ;;  %v4772_v25 = vrot.slane %v6209_v23, 7  ;;  %v6310_v61 = vmov 0 }
  0xf8   : > { %vm4775_vm10 = vcmp.ne.s32.totalorder %v727_v49, 0  ;;  %vm459_vm12 = vc.u32 %v457_v8, %v453_v21  ;;  %v461_v17 = vadd.s32 %v457_v8, %v453_v21  ;;  %v4785_v22 = vadd.f32 %v4782_v62, %v1603_v16 }
  0xf9   : > { %v6311_v61 = vsel %vm4775_vm10, 4294967295, %v6310_v61  ;;  %v1004_v54 = vsel %vm4775_vm10, %v4682_v31, 0.0  ;;  %v1346_v4 = vsel %vm4775_vm10, %v1310_v34, 0.0  ;;  %v1700_v20 = vsel %vm4775_vm10, %v1664_v30, 0.0  ;;  %v1590_v31 = vpop.f32.mrf.mxu3 }
  0xfa   : > { %6312 = vst [vmem:[#allocation15_spill] sm:$0xff] %v6311_v61  ;;  %v460_v8 = vsel %vm459_vm12, 1, %v6211_v56  ;;  %v6313_v13 = vmax.f32 %v4583_v9, 0.0  ;;  %v6314_v3 = vmax.f32 %v4604_v0, 0.0  ;;  %v454_v14 = vshrl.u32 %v4730_v52, 16 }
  0xfb   : > { %v462_v28 = vadd.s32 %v460_v8, %v458_v55  ;;  %v6315_v49 = vmax.f32 %v4687_v15, 0.0  ;;  %vm465_vm0 = vc.u32 %v461_v17, 2454267026  ;;  %v1608_v30 = vmul.f32 %v4754_v5, %v1590_v31 }
  0xfc   : > { %v4797_v21 = vadd.f32 %v1004_v54, %v6313_v13  ;;  %v4801_v16 = vadd.f32 %v1346_v4, %v6314_v3  ;;  %v4810_v23 = vadd.s32 64, %v3867_v43  ;;  %v6316_v0 = vmax.f32 %v4715_v33, 0.0  ;;  %v833_v13 = vpop.f32.mrf.mxu0 }
  0xfd   : > { %v4806_v34 = vadd.f32 %v1700_v20, %v6315_v49  ;;  %v4821_v52 = vsel %vm6242_vm7, %v4626_v45, %v4768_v19  ;;  %v6317_v15 = vrot.slane %v4530_v63, 4  ;;  %v6318_v55 = vrot.slane %v4414_v42, 4 }
  0xfe   : > { %v1077_v9 = vadd.f32 %v4661_v38, %v4797_v21  ;;  %v4816_v54 = vrot.slane %v6316_v0, 7  ;;  %v463_v20 = vadd.s32 %v462_v28, %v452_v12  ;;  %v4834_v38 = vsel %vm6242_vm7, %v4692_v24, %v4772_v25  ;;  %v1224_v0 = vpop.f32.mrf.mxu1 }
  0xff   : > { %v4828_v17 = vsel %vm6222_vm4, %v6318_v55, %v6317_v15  ;;  %v1431_v3 = vadd.f32 %v4673_v26, %v4801_v16  ;;  %v466_v42 = vsel %vm465_vm0, 1, %v6211_v56  ;;  %v1622_v31 = vadd.f32 %v4782_v62, %v1608_v30 }
 0x100   : > { %v464_v12 = vadd.s32 %v463_v20, %v454_v14  ;;  %v476_v28 = vand.u32 65535, %v4810_v23  ;;  %v477_v24 = vshrl.u32 %v4810_v23, 16  ;;  %v4845_v15 = vmul.f32 0.25, %v1077_v9 }
 0x101   : > { %v1785_v55 = vadd.f32 %v4712_v44, %v4806_v34  ;;  %v1636_v45 = vmax.f32 %v1622_v31, 0.0  ;;  %v862_v26 = vmul.f32 %v4754_v5, %v833_v13  ;;  %v4850_v8 = vmul.f32 0.25, %v1431_v3 }
 0x102   : > { %v467_v4 = vadd.s32 %v466_v42, %v464_v12  ;;  %v479_v29 = vmul.u32 9362, %v476_v28  ;;  %v480_v56 = vmul.u32 37449, %v476_v28  ;;  %v481_v30 = vmul.u32 9362, %v477_v24 }
 0x103   : > { %v4852_v14 = vrot.slane %v1636_v45, 7  ;;  %v4855_v20 = vadd.f32 %v4782_v62, %v862_v26  ;;  %v1250_v9 = vmul.f32 %v4754_v5, %v1224_v0  ;;  %v482_v61 = vmul.u32 37449, %v477_v24 }
 0x104   : > { %v468_v49 = vshrl.u32 %v467_v4, 4  ;;  %v483_v58 = vshll.u32 %v480_v56, 16  ;;  %v485_v44 = vshll.u32 %v481_v30, 16  ;;  %v4858_v31 = vmul.f32 0.25, %v1785_v55 }
 0x105   : > { %v6319_v13 = vmax.f32 %v4785_v22, 0.0  ;;  %v1676_v3 = vsel %vm6242_vm7, %v4816_v54, %v4852_v14  ;;  %v4868_v12 = vadd.f32 %v4782_v62, %v1250_v9  ;;  %v484_v26 = vshrl.u32 %v480_v56, 16  ;;  %v1578_v9 = vpop.f32.mrf.mxu2 }
 0x106   : > { %v469_v28 = vmul.u32 28, %v468_v49  ;;  %vm487_vm13 = vc.u32 %v479_v29, %v483_v58  ;;  %v489_v4 = vadd.s32 %v483_v58, %v479_v29  ;;  %v1706_v24 = vsel %vm4150_vm5, %v1676_v3, 0.0 }
 0x107   : > { %v4862_v42 = vrot.slane %v6319_v13, 7  ;;  %v6320_v0 = vmov 0   ;;  %v6221_v13 = vmax.f32 %v4868_v12, 0.0  ;;  %v486_v58 = vshrl.u32 %v481_v30, 16 }
 0x108   : > { %v488_v55 = vsel %vm487_vm13, 1, %v6320_v0  ;;  %v470_v33 = vsub.s32 %v4695_v18, %v469_v28  ;;  %vm491_vm15 = vc.u32 %v489_v4, %v485_v44  ;;  %v493_v6 = vadd.s32 %v489_v4, %v485_v44  ;;  %v1593_v44 = vpop.f32.mrf.mxu3 }
 0x109   : > { %v490_v37 = vadd.s32 %v488_v55, %v482_v61  ;;  %v1666_v56 = vsel %vm6242_vm7, %v4728_v36, %v4862_v42  ;;  %v492_v29 = vsel %vm491_vm15, 1, %v6320_v0  ;;  %v6321_v49 = vrot.slane %v4635_v57, 4 }
 0x10a   : > { %v6322_v3 = vrot.slane %v4517_v59, 4  ;;  %vm672_vm8 = vcmp.ne.s32.totalorder %v470_v33, 0  ;;  %vm686_vm12 = vcmp.lt.s32.totalorder %v470_v33, 0  ;;  %v714_v18 = vadd.s32 28, %v470_v33 }
 0x10b   : > { %v494_v61 = vadd.s32 %v492_v29, %v490_v37  ;;  %vm700_vm0 = vmand %vm686_vm12, %vm672_vm8  ;;  %v4887_v28 = vadd.f32 %v1706_v24, %v1636_v45  ;;  %vm497_vm13 = vc.u32 %v493_v6, 2454267026  ;;  %v6323_v36 = vmax.f32 %v4855_v20, 0.0 }
 0x10c   : > { %v4885_v39 = vsel %vm6222_vm4, %v6322_v3, %v6321_v49  ;;  %v1604_v4 = vmul.f32 %v4754_v5, %v1578_v9  ;;  %v728_v55 = vsel %vm700_vm0, %v714_v18, %v470_v33  ;;  %v498_v49 = vsel %vm497_vm13, 1, %v6320_v0 }
 0x10d   : > { %v4891_v30 = vrot.slane %v6323_v36, 7  ;;  %v495_v59 = vadd.s32 %v494_v61, %v484_v26  ;;  %v4897_v3 = vrot.slane %v6221_v13, 7  ;;  %vm4899_vm15 = vcmp.ne.s32.totalorder %v728_v55, 0 }
 0x10e   : > { %v6324_v37 = vmov 0  ;;  %v4904_v6 = vadd.f32 %v4782_v62, %v1604_v4  ;;  %v1609_v45 = vmul.f32 %v4754_v5, %v1593_v44  ;;  %v4908_v24 = vadd.s32 72, %v3867_v43 }
 0x10f   : > { %v6325_v37 = vsel %vm4899_vm15, 4294967295, %v6324_v37  ;;  %v1005_v33 = vsel %vm4899_vm15, %v4821_v52, 0.0  ;;  %v1347_v26 = vsel %vm4899_vm15, %v4834_v38, 0.0  ;;  %v1701_v9 = vsel %vm4899_vm15, %v1666_v56, 0.0 }
 0x110   : > { %6326 = vst [vmem:[#allocation16_spill] sm:$0xff] %v6325_v37  ;;  %v496_v29 = vadd.s32 %v495_v59, %v486_v58  ;;  %v6327_v18 = vmax.f32 %v4718_v7, 0.0  ;;  %v6328_v44 = vmax.f32 %v4721_v1, 0.0  ;;  %v6329_v4 = vmax.f32 %v4785_v22, 0.0 }
 0x111   : > { %v1632_v52 = vmax.f32 %v4904_v6, 0.0  ;;  %v4933_v56 = vadd.f32 %v4782_v62, %v1609_v45  ;;  %v508_v7 = vand.u32 65535, %v4908_v24  ;;  %v930_v22 = vsel %vm6242_vm7, %v4768_v19, %v4891_v30 }
 0x112   : > { %v4920_v61 = vadd.f32 %v1005_v33, %v6327_v18  ;;  %v4924_v36 = vadd.f32 %v1347_v26, %v6328_v44  ;;  %v4928_v55 = vadd.f32 %v1701_v9, %v6329_v4  ;;  %v499_v13 = vadd.s32 %v498_v49, %v496_v29 }
 0x113   : > { %v509_v59 = vshrl.u32 %v4908_v24, 16  ;;  %v1314_v45 = vsel %vm6242_vm7, %v4772_v25, %v4897_v3  ;;  %v6330_v33 = vrot.slane %v4639_v41, 4  ;;  %v4954_v19 = vrot.slane %v1632_v52, 7 }
 0x114   : > { %v1078_v58 = vadd.f32 %v4737_v10, %v4920_v61  ;;  %v1432_v1 = vadd.f32 %v4749_v40, %v4924_v36  ;;  %v1786_v49 = vadd.f32 %v4828_v17, %v4928_v55  ;;  %v500_v6 = vshrl.u32 %v499_v13, 4 }
 0x115   : > { %v6331_v10 = vrot.slane %v4521_v27, 4  ;;  %v1637_v29 = vmax.f32 %v4933_v56, 0.0  ;;  %v511_v13 = vmul.u32 9362, %v508_v7  ;;  %v512_v44 = vmul.u32 37449, %v508_v7 }
 0x116   : > { %v1092_v26 = vmul.f32 0.25, %v1078_v58  ;;  %v1446_v9 = vmul.f32 0.25, %v1432_v1  ;;  %v1800_v18 = vmul.f32 0.25, %v1786_v49  ;;  %v501_v17 = vmul.u32 28, %v500_v6 }
 0x117   : > { %v1402_v40 = vsel %vm6222_vm4, %v6331_v10, %v6330_v33  ;;  %v1677_v38 = vrot.slane %v1637_v29, 7  ;;  %v513_v27 = vmul.u32 9362, %v509_v59  ;;  %v6332_v1 = vrot.slane %v4647_v46, 4 }
 0x118   : > { %v3431_v25 = vpack.c.bf16 %v1092_v26, %v4845_v15  ;;  %v3466_v4 = vpack.c.bf16 %v1446_v9, %v4850_v8  ;;  %v3501_v33 = vpack.c.bf16 %v1800_v18, %v4858_v31  ;;  %v502_v58 = vsub.s32 %v4810_v23, %v501_v17  ;;  %v836_v26 = vpop.f32.mrf.mxu0  ;;  %v1227_v9 = vpop.f32.mrf.mxu1 }
 0x119   : > { %v6333_v56 = vrot.slane %v4530_v63, 4  ;;  %v515_v6 = vshll.u32 %v512_v44, 16  ;;  %v6224_v7 = vrot.slane %v4920_v61, 4  ;;  %v1678_v8 = vsel %vm6242_vm7, %v4852_v14, %v1677_v38 }
 0x11a   : > { %3660 = vst [vmem:[%s4230_s6 + $0x18] sm:$0xff] %v3431_v25   ;;  %v514_v15 = vmul.u32 37449, %v509_v59  ;;  %v517_v10 = vshll.u32 %v513_v27, 16  ;;  %v6223_v31 = vrot.slane %v4924_v36, 4  ;;  %vm673_vm8 = vcmp.ne.s32.totalorder %v502_v58, 0 }
 0x11b   : > { %v1756_v49 = vsel %vm6222_vm4, %v6333_v56, %v6332_v1  ;;  %3667 = vst [vmem:[%s4230_s6 + $0x50] sm:$0xff] %v3466_v4   ;;  %vm687_vm12 = vcmp.lt.s32.totalorder %v502_v58, 0  ;;  %v715_v23 = vadd.s32 28, %v502_v58  ;;  %v1668_v63 = vsel %vm6242_vm7, %v4862_v42, %v4954_v19 }
 0x11c   : > { %3674 = vst [vmem:[%s4230_s6 + $0x88] sm:$0xff] %v3501_v33   ;;  %vm701_vm0 = vmand %vm687_vm12, %vm673_vm8  ;;  %v516_v18 = vshrl.u32 %v512_v44, 16  ;;  %vm519_vm13 = vc.u32 %v511_v13, %v515_v6  ;;  %v521_v17 = vadd.s32 %v515_v6, %v511_v13  ;;  %v1707_v38 = vsel %vm4283_vm11, %v1678_v8, 0.0 }
 0x11d   : > { %v729_v14 = vsel %vm701_vm0, %v715_v23, %v502_v58  ;;  %v520_v59 = vsel %vm519_vm13, 1, %v6320_v0  ;;  %v863_v25 = vmul.f32 %v4754_v5, %v836_v26  ;;  %v6334_v4 = vmov 0 }
 0x11e   : > { %vm4980_vm4 = vcmp.ne.s32.totalorder %v729_v14, 0  ;;  %v522_v33 = vadd.s32 %v520_v59, %v514_v15  ;;  %vm523_vm8 = vc.u32 %v521_v17, %v517_v10  ;;  %v1251_v1 = vmul.f32 %v4754_v5, %v1227_v9 }
 0x11f   : > { %v6335_v4 = vsel %vm4980_vm4, 4294967295, %v6334_v4  ;;  %v1006_v42 = vsel %vm4980_vm4, %v930_v22, 0.0  ;;  %v1348_v13 = vsel %vm4980_vm4, %v1314_v45, 0.0  ;;  %v1702_v44 = vsel %vm4980_vm4, %v1668_v63, 0.0 }
 0x120   : > { %6336 = vst [vmem:[#allocation17_spill] sm:$0xff] %v6335_v4  ;;  %v524_v58 = vsel %vm523_vm8, 1, %v6320_v0  ;;  %v6337_v56 = vmax.f32 %v4855_v20, 0.0  ;;  %v6338_v8 = vmax.f32 %v4868_v12, 0.0  ;;  %v5000_v26 = vadd.f32 %v1702_v44, %v1632_v52 }
 0x121   : > { %v525_v23 = vadd.s32 %v521_v17, %v517_v10  ;;  %v6225_v22 = vrot.slane %v4928_v55, 4  ;;  %v518_v9 = vshrl.u32 %v513_v27, 16  ;;  %v526_v45 = vadd.s32 %v524_v58, %v522_v33  ;;  %v1581_v27 = vpop.f32.mrf.mxu2 }
 0x122   : > { %v4994_v6 = vadd.f32 %v1006_v42, %v6337_v56  ;;  %v4998_v15 = vadd.f32 %v1348_v13, %v6338_v8  ;;  %v5004_v14 = vadd.f32 %v4782_v62, %v863_v25  ;;  %v5011_v12 = vadd.f32 %v4782_v62, %v1251_v1 }
 0x123   : > { %v5014_v10 = vadd.f32 %v1707_v38, %v1637_v29  ;;  %v527_v17 = vadd.s32 %v526_v45, %v516_v18  ;;  %vm529_vm12 = vc.u32 %v525_v23, 2454267026  ;;  %v6226_v25 = vrot.slane %v5000_v26, 4  ;;  %v1908_v18 = vpop.f32.mrf.mxu3 }
 0x124   : > { %v6228_v63 = vrot.slane %v4994_v6, 4  ;;  %v1079_v20 = vadd.f32 %v4885_v39, %v4994_v6  ;;  %v6227_v59 = vrot.slane %v4998_v15, 4  ;;  %v1433_v52 = vadd.f32 %v1402_v40, %v4998_v15 }
 0x125   : > { %v1787_v33 = vadd.f32 %v1756_v49, %v5000_v26  ;;  %v6339_v42 = vrot.slane %v4797_v21, 4  ;;  %v6340_v39 = vrot.slane %v4635_v57, 4  ;;  %vm6341_vm0 = vcmask 1043456  }
 0x126   : > { %v6342_v1 = vrot.slane %v4801_v16, 4  ;;  %v6343_v40 = vrot.slane %v4639_v41, 4  ;;  %vm6344_vm13 = vmmov %vm6341_vm0  ;;  %v5039_v38 = vmul.f32 0.25, %v1079_v20  ;;  %v528_v57 = vadd.s32 %v527_v17, %v518_v9 }
 0x127   : > { %v5023_v13 = vsel %vm6341_vm0, %v6340_v39, %v6339_v42  ;;  %vm6345_vm8 = vmmov %vm6341_vm0  ;;  %v530_v44 = vsel %vm529_vm12, 1, %v6320_v0  ;;  %v5047_v41 = vsel %vm6341_vm0, %v6223_v31, %v6227_v59  ;;  %v894_v58 = vmax.f32 %v5004_v14, 0.0 }
 0x128   : > { %v5030_v29 = vsel %vm6344_vm13, %v6343_v40, %v6342_v1  ;;  %v5037_v49 = vsel %vm6345_vm8, %v6224_v7, %v6228_v63  ;;  %6346 = vst [vmem:[#allocation18_spill] sm:$0xff] %v5047_v41  ;;  %v1279_v56 = vmax.f32 %v5011_v12, 0.0  ;;  %v1605_v8 = vmul.f32 %v4754_v5, %v1581_v27  ;;  %vm6347_vm12 = vmmov %vm6341_vm0 }
 0x129   : > { %v5052_v23 = vmul.f32 0.25, %v1433_v52  ;;  %v531_v45 = vadd.s32 %v530_v44, %v528_v57  ;;  %v1950_v9 = vmul.f32 %v4754_v5, %v1908_v18  ;;  %v5056_v20 = vadd.s32 80, %v3867_v43  ;;  %vm6351_vm13 = vmmov %vm6341_vm0 }
 0x12a   : > { %v5058_v17 = vrot.slane %v894_v58, 7  ;;  %v5060_v42 = vrot.slane %v1279_v56, 7  ;;  %v1619_v39 = vadd.f32 %v4782_v62, %v1605_v8  ;;  %v5064_v14 = vadd.s32 88, %v3867_v43 }
 0x12b   : > { %v532_v12 = vshrl.u32 %v531_v45, 4  ;;  %v5067_v27 = vadd.f32 %v4782_v62, %v1950_v9  ;;  %v540_v52 = vand.u32 65535, %v5056_v20  ;;  %v541_v1 = vshrl.u32 %v5056_v20, 16 }
 0x12c   : > { %v5076_v40 = vsel %vm6347_vm12, %v6225_v22, %v6226_v25  ;;  %v5078_v18 = vmul.f32 0.25, %v1787_v33  ;;  %v1633_v57 = vmax.f32 %v1619_v39, 0.0  ;;  %v6349_v43 = vrot.slane %v4806_v34, 4 }
 0x12d   : > { %6348 = vst [vmem:[#allocation19_spill] sm:$0xff] %v5076_v40  ;;  %v6350_v44 = vrot.slane %v4647_v46, 4  ;;  %v533_v45 = vmul.u32 28, %v532_v12  ;;  %v932_v9 = vsel %vm6242_vm7, %v4891_v30, %v5058_v17  ;;  %v6231_v31 = vmax.f32 %v5067_v27, 0.0 }
 0x12e   : > { %v544_v7 = vmul.u32 37449, %v540_v52  ;;  %v1316_v33 = vsel %vm6242_vm7, %v4897_v3, %v5060_v42  ;;  %v5092_v22 = vrot.slane %v1633_v57, 7  ;;  %v543_v39 = vmul.u32 9362, %v540_v52 }
 0x12f   : > { %v1758_v8 = vsel %vm6351_vm13, %v6350_v44, %v6349_v43  ;;  %v545_v25 = vmul.u32 9362, %v541_v1  ;;  %v534_v46 = vsub.s32 %v4908_v24, %v533_v45  ;;  %v5097_v12 = vrot.slane %v6231_v31, 7 }
 0x130   : > { %v547_v43 = vshll.u32 %v544_v7, 16  ;;  %v572_v30 = vand.u32 65535, %v5064_v14  ;;  %v546_v44 = vmul.u32 37449, %v541_v1  ;;  %v548_v59 = vshrl.u32 %v544_v7, 16 }
 0x131   : > { %v549_v63 = vshll.u32 %v545_v25, 16  ;;  %v573_v48 = vshrl.u32 %v5064_v14, 16  ;;  %vm674_vm8 = vcmp.ne.s32.totalorder %v534_v46, 0  ;;  %vm688_vm0 = vcmp.lt.s32.totalorder %v534_v46, 0 }
 0x132   : > { %v716_v3 = vadd.s32 28, %v534_v46  ;;  %v1670_v52 = vsel %vm6242_vm7, %v4954_v19, %v5092_v22  ;;  %vm702_vm12 = vmand %vm688_vm0, %vm674_vm8  ;;  %v2047_v24 = vsel %vm6242_vm7, 0.0, %v5097_v12  ;;  %v550_v45 = vshrl.u32 %v545_v25, 16 }
 0x133   : > { %vm551_vm13 = vc.u32 %v543_v39, %v547_v43  ;;  %v553_v31 = vadd.s32 %v547_v43, %v543_v39  ;;  %v575_v1 = vmul.u32 9362, %v572_v30  ;;  %v5107_v4 = vmul.u32 37449, %v572_v30 }
 0x134   : > { %v730_v32 = vsel %vm702_vm12, %v716_v3, %v534_v46  ;;  %v552_v7 = vsel %vm551_vm13, 1, %v6320_v0  ;;  %v2048_v46 = vsel %vm4083_vm3, %v2047_v24, 0.0  ;;  %v6354_v24 = vrot.slane %v4994_v6, 4 }
 0x135   : > { %vm5109_vm11 = vcmp.ne.s32.totalorder %v730_v32, 0  ;;  %v554_v40 = vadd.s32 %v552_v7, %v546_v44  ;;  %vm555_vm5 = vc.u32 %v553_v31, %v549_v63  ;;  %v557_v19 = vadd.s32 %v553_v31, %v549_v63 }
 0x136   : > { %v1007_v41 = vsel %vm5109_vm11, %v932_v9, 0.0  ;;  %v1349_v25 = vsel %vm5109_vm11, %v1316_v33, 0.0  ;;  %v1703_v39 = vsel %vm5109_vm11, %v1670_v52, 0.0  ;;  %v556_v31 = vsel %vm555_vm5, 1, %v6320_v0 }
 0x137   : > { %v5121_v43 = vadd.f32 %v1007_v41, %v894_v58  ;;  %v5123_v32 = vadd.f32 %v1349_v25, %v1279_v56  ;;  %v5125_v30 = vadd.f32 %v1703_v39, %v1633_v57  ;;  %v558_v63 = vadd.s32 %v556_v31, %v554_v40 }
 0x138   : > { %vm561_vm8 = vc.u32 %v557_v19, 2454267026  ;;  %v5128_v9 = vmul.u32 9362, %v573_v48  ;;  %v579_v33 = vshll.u32 %v5107_v4, 16  ;;  %vm6355_vm5 = vcmask 1043456  }
 0x139   : > { %v1055_v44 = vrot.slane %v5121_v43, 4  ;;  %v1080_v3 = vadd.f32 %v5023_v13, %v5121_v43  ;;  %v1409_v41 = vrot.slane %v5123_v32, 4  ;;  %v1434_v58 = vadd.f32 %v5030_v29, %v5123_v32  ;;  %vm6357_vm0 = vmmov %vm6355_vm5 }
 0x13a   : > { %v1763_v56 = vrot.slane %v5125_v30, 4  ;;  %v1788_v57 = vadd.f32 %v1758_v8, %v5125_v30  ;;  %v559_v40 = vadd.s32 %v558_v63, %v548_v59  ;;  %v562_v52 = vsel %vm561_vm8, 1, %v6320_v0  ;;  %vm6359_vm12 = vmmov %vm6357_vm0 }
 0x13b   : > { %v1056_v7 = vsel %vm6355_vm5, %v6354_v24, %v1055_v44  ;;  %v1094_v19 = vmul.f32 0.25, %v1080_v3  ;;  %v6356_v13 = vrot.slane %v4998_v15, 4  ;;  %v1448_v25 = vmul.f32 0.25, %v1434_v58  ;;  %v839_v24 = vpop.f32.mrf.mxu0  ;;  %vm6362_vm13 = vmmov %vm6357_vm0 }
 0x13c   : > { %v1083_v39 = vadd.f32 %v1056_v7, %v4261_v35  ;;  %v6358_v8 = vrot.slane %v5000_v26, 4  ;;  %v1802_v31 = vmul.f32 0.25, %v1788_v57  ;;  %v560_v3 = vadd.s32 %v559_v40, %v550_v45  ;;  %v1584_v45 = vpop.f32.mrf.mxu2 }
 0x13d   : > { %v1410_v29 = vsel %vm6357_vm0, %v6356_v13, %v1409_v41  ;;  %v3436_v63 = vpack.c.bf16 %v1094_v19, %v5039_v38  ;;  %v3471_v15 = vpack.c.bf16 %v1448_v25, %v5052_v23  ;;  %v6360_v58 = vrot.slane %v4920_v61, 4 }
 0x13e   : > { %v1437_v59 = vadd.f32 %v1410_v29, %v4487_v53  ;;  %v1764_v6 = vsel %vm6359_vm12, %v6358_v8, %v1763_v56  ;;  %v6361_v7 = vrot.slane %v4797_v21, 4  ;;  %v1230_v29 = vpop.f32.mrf.mxu1  ;;  %v3506_v57 = vpack.c.bf16 %v1802_v31, %v5078_v18 }
 0x13f   : > { %v1791_v26 = vadd.f32 %v1764_v6, %v4887_v28  ;;  %v6363_v38 = vmax.f32 %v5067_v27, 0.0  ;;  %v578_v23 = vmul.u32 37449, %v573_v48  ;;  %v5172_v40 = vmul.f32 0.25, %v1083_v39  ;;  %3661 = vst [vmem:[%s4230_s6 + $0x20] sm:$0xff] %v3436_v63   ;;  %v1911_v63 = vpop.f32.mrf.mxu3 }
 0x140   : > { %v5164_v13 = vsel %vm6362_vm13, %v6361_v7, %v6360_v58  ;;  %v5175_v61 = vmul.f32 0.25, %v1437_v59  ;;  %v563_v21 = vadd.s32 %v562_v52, %v560_v3  ;;  %v581_v25 = vshll.u32 %v5128_v9, 16  ;;  %3668 = vst [vmem:[%s4230_s6 + $0x58] sm:$0xff] %v3471_v15  }
 0x141   : > { %v5170_v19 = vadd.f32 %v2048_v46, %v6363_v38  ;;  %vm583_vm8 = vc.u32 %v575_v1, %v579_v33  ;;  %v585_v8 = vadd.s32 %v579_v33, %v575_v1  ;;  %v864_v6 = vmul.f32 %v4754_v5, %v839_v24  ;;  %3675 = vst [vmem:[%s4230_s6 + $0x90] sm:$0xff] %v3506_v57  }
 0x142   : > { %v1252_v18 = vmul.f32 %v4754_v5, %v1230_v29  ;;  %v564_v27 = vshrl.u32 %v563_v21, 4  ;;  %v580_v48 = vshrl.u32 %v5107_v4, 16  ;;  %v584_v46 = vsel %vm583_vm8, 1, %v6320_v0 }
 0x143   : > { %v1606_v39 = vmul.f32 %v4754_v5, %v1584_v45  ;;  %v586_v59 = vadd.s32 %v584_v46, %v578_v23  ;;  %vm587_vm5 = vc.u32 %v585_v8, %v581_v25  ;;  %v589_v52 = vadd.s32 %v585_v8, %v581_v25 }
 0x144   : > { %v881_v31 = vadd.f32 %v4782_v62, %v864_v6  ;;  %v565_v15 = vmul.u32 28, %v564_v27  ;;  %v588_v1 = vsel %vm587_vm5, 1, %v6320_v0  ;;  %v1266_v33 = vadd.f32 %v4782_v62, %v1252_v18 }
 0x145   : > { %v1620_v3 = vadd.f32 %v4782_v62, %v1606_v39  ;;  %v582_v24 = vshrl.u32 %v5128_v9, 16  ;;  %v590_v4 = vadd.s32 %v588_v1, %v586_v59  ;;  %vm593_vm0 = vc.u32 %v589_v52, 2454267026  ;;  %v2262_v9 = vpop.f32.mrf.mxu0 }
 0x146   : > { %v895_v58 = vmax.f32 %v881_v31, 0.0  ;;  %v5190_v7 = vmul.f32 0.25, %v1791_v26  ;;  %v566_v29 = vsub.s32 %v5056_v20, %v565_v15  ;;  %v1280_v57 = vmax.f32 %v1266_v33, 0.0 }
 0x147   : > { %v1634_v38 = vmax.f32 %v1620_v3, 0.0  ;;  %v591_v23 = vadd.s32 %v590_v4, %v580_v48  ;;  %v594_v45 = vsel %vm593_vm0, 1, %v6320_v0  ;;  %v1951_v25 = vmul.f32 %v4754_v5, %v1911_v63 }
 0x148   : > { %v933_v21 = vrot.slane %v895_v58, 7  ;;  %vm675_vm12 = vcmp.ne.s32.totalorder %v566_v29, 0  ;;  %vm689_vm13 = vcmp.lt.s32.totalorder %v566_v29, 0  ;;  %v717_v8 = vadd.s32 28, %v566_v29 }
 0x149   : > { %v1317_v6 = vrot.slane %v1280_v57, 7  ;;  %v592_v18 = vadd.s32 %v591_v23, %v582_v24  ;;  %vm703_vm8 = vmand %vm689_vm13, %vm675_vm12  ;;  %v6364_v20 = vrot.slane %v4924_v36, 4  ;;  %v6365_v27 = vrot.slane %v4801_v16, 4 }
 0x14a   : > { %v934_v26 = vsel %vm6242_vm7, %v5058_v17, %v933_v21  ;;  %vm6366_vm5 = vcmask 1043456   ;;  %v1671_v0 = vrot.slane %v1634_v38, 7  ;;  %v731_v46 = vsel %vm703_vm8, %v717_v8, %v566_v29  ;;  %v1914_v29 = vpop.f32.mrf.mxu3 }
 0x14b   : > { %v1406_v48 = vsel %vm6366_vm5, %v6365_v27, %v6364_v20  ;;  %v1318_v39 = vsel %vm6242_vm7, %v5060_v42, %v1317_v6  ;;  %v6367_v59 = vrot.slane %v4928_v55, 4  ;;  %v6368_v52 = vrot.slane %v4806_v34, 4  ;;  %vm6369_vm0 = vmmov %vm6366_vm5 }
 0x14c   : > { %v5210_v63 = vadd.f32 %v4782_v62, %v1951_v25  ;;  %v595_v17 = vadd.s32 %v594_v45, %v592_v18  ;;  %vm5212_vm12 = vcmp.ne.s32.totalorder %v731_v46, 0  ;;  %v1672_v16 = vsel %vm6242_vm7, %v5092_v22, %v1671_v0  ;;  %v2616_v22 = vpop.f32.mrf.mxu1  ;;  %vm6372_vm13 = vmmov %vm6369_vm0 }
 0x14d   : > { %v1760_v31 = vsel %vm6369_vm0, %v6368_v52, %v6367_v59  ;;  %v2304_v15 = vmul.f32 %v4754_v5, %v2262_v9  ;;  %v1008_v55 = vsel %vm5212_vm12, %v934_v26, 0.0  ;;  %v1350_v34 = vsel %vm5212_vm12, %v1318_v39, 0.0  ;;  %vm6373_vm8 = vmmov %vm6369_vm0 }
 0x14e   : > { %v1704_v42 = vsel %vm5212_vm12, %v1672_v16, 0.0  ;;  %v1979_v1 = vmax.f32 %v5210_v63, 0.0  ;;  %v596_v33 = vshrl.u32 %v595_v17, 4  ;;  %v5226_v3 = vadd.f32 %v1008_v55, %v895_v58  ;;  %vm6374_vm5 = vmmov %vm6369_vm0 }
 0x14f   : > { %v5228_v24 = vadd.f32 %v1350_v34, %v1280_v57  ;;  %v5230_v4 = vadd.f32 %v1704_v42, %v1634_v38  ;;  %v936_v23 = vsel %vm6242_vm7, %v933_v21, %v4170_v47  ;;  %v1320_v45 = vsel %vm6242_vm7, %v1317_v6, %v4396_v50 }
 0x150   : > { %v1674_v25 = vsel %vm6242_vm7, %v1671_v0, %v4816_v54  ;;  %v5238_v8 = vrot.slane %v1979_v1, 7  ;;  %v597_v9 = vmul.u32 28, %v596_v33  ;;  %v1057_v58 = vrot.slane %v5226_v3, 4 }
 0x151   : > { %v1411_v57 = vrot.slane %v5228_v24, 4  ;;  %v5243_v38 = vadd.f32 %v4782_v62, %v2304_v15  ;;  %v1081_v18 = vadd.f32 %v5164_v13, %v5226_v3  ;;  %v1765_v47 = vrot.slane %v5230_v4, 4  ;;  %v6377_v15 = vld [vmem:[#allocation2_spill] sm:$0xff] }
 0x152   : > { %v2658_v50 = vmul.f32 %v4754_v5, %v2616_v22  ;;  %v1952_v21 = vmul.f32 %v4754_v5, %v1914_v29  ;;  %v598_v54 = vsub.s32 %v5064_v14, %v597_v9  ;;  %v1058_v6 = vsel %vm6372_vm13, %v1055_v44, %v1057_v58  ;;  %v6381_v3 = vld [vmem:[#allocation14_spill] sm:$0xff] }
 0x153   : > { %v1412_v26 = vsel %vm6373_vm8, %v1409_v41, %v1411_v57  ;;  %v1435_v13 = vadd.f32 %v1406_v48, %v5228_v24  ;;  %v1084_v20 = vadd.f32 %v1058_v6, %v4304_v2  ;;  %v1766_v14 = vsel %vm6374_vm5, %v1763_v56, %v1765_v47 }
 0x154   : > { %v1438_v27 = vadd.f32 %v1412_v26, %v4596_v11  ;;  %v2008_v43 = vsel %vm6242_vm7, %v5097_v12, %v5238_v8  ;;  %vm676_vm0 = vcmp.ne.s32.totalorder %v598_v54, 0  ;;  %vm690_vm13 = vcmp.lt.s32.totalorder %v598_v54, 0 }
 0x155   : > { %v718_v32 = vadd.s32 28, %v598_v54  ;;  %v1792_v44 = vadd.f32 %v1766_v14, %v5014_v10  ;;  %vm704_vm8 = vmand %vm690_vm13, %vm676_vm0  ;;  %v1095_v41 = vmul.f32 0.25, %v1081_v18  ;;  %v1098_v2 = vmul.f32 0.25, %v1084_v20  ;;  %v6384_v20 = vld [vmem:[#allocation19_spill] sm:$0xff] }
 0x156   : > { %v1452_v11 = vmul.f32 0.25, %v1438_v27  ;;  %v1789_v48 = vadd.f32 %v1760_v31, %v5230_v4  ;;  %v2049_v56 = vsel %vm4099_vm14, %v2008_v43, 0.0  ;;  %v2332_v12 = vmax.f32 %v5243_v38, 0.0  ;;  %v1917_v4 = vpop.f32.mrf.mxu3 }
 0x157   : > { %v732_v0 = vsel %vm704_vm8, %v718_v32, %v598_v54  ;;  %v1806_v30 = vmul.f32 0.25, %v1792_v44  ;;  %v3446_v39 = vpack.c.bf16 %v1098_v2, %v5172_v40  ;;  %v5282_v52 = vadd.f32 %v4782_v62, %v2658_v50  ;;  %v6383_v54 = vld [vmem:[#allocation18_spill] sm:$0xff] }
 0x158   : > { %vm5275_vm5 = vcmp.ne.s32.totalorder %v732_v0, 0  ;;  %v3481_v59 = vpack.c.bf16 %v1452_v11, %v5175_v61  ;;  %v6378_v55 = vmax.f32 %v6377_v15, 0.0  ;;  %v6379_v61 = vld [vmem:[#allocation11_spill] sm:$0xff]  ;;  %v1449_v33 = vmul.f32 0.25, %v1435_v13  ;;  %v2265_v13 = vpop.f32.mrf.mxu0 }
 0x159   : > { %v1009_v31 = vsel %vm5275_vm5, %v936_v23, 0.0  ;;  %v1351_v63 = vsel %vm5275_vm5, %v1320_v45, 0.0  ;;  %v1705_v17 = vsel %vm5275_vm5, %v1674_v25, 0.0  ;;  %v3516_v16 = vpack.c.bf16 %v1806_v30, %v5190_v7  ;;  %3663 = vst [vmem:[%s4230_s6 + $0x30] sm:$0xff] %v3446_v39   ;;  %v2970_v23 = vpop.f32.mrf.mxu2  ;;  %v6389_v30 = vld [vmem:[#allocation7_spill] sm:$0xff] }
 0x15a   : > { %v1023_v40 = vadd.f32 %v1009_v31, %v6378_v55  ;;  %v6380_v34 = vmax.f32 %v6379_v61, 0.0  ;;  %v6382_v22 = vmax.f32 %v6381_v3, 0.0  ;;  %3670 = vst [vmem:[%s4230_s6 + $0x68] sm:$0xff] %v3481_v59   ;;  %v1803_v45 = vmul.f32 0.25, %v1789_v48  ;;  %v6388_v48 = vld [vmem:[#allocation4_spill] sm:$0xff] }
 0x15b   : > { %v5299_v9 = vadd.f32 %v2049_v56, %v1979_v1  ;;  %v5303_v7 = vrot.slane %v2332_v12, 7  ;;  %v2686_v25 = vmax.f32 %v5282_v52, 0.0  ;;  %3677 = vst [vmem:[%s4230_s6 + $0xa0] sm:$0xff] %v3516_v16   ;;  %v5313_v43 = vadd.f32 %v4782_v62, %v1952_v21  ;;  %v6394_v16 = vld [vmem:[#allocation8_spill] sm:$0xff] }
 0x15c   : > { %v1365_v42 = vadd.f32 %v1351_v63, %v6380_v34  ;;  %v1719_v29 = vadd.f32 %v1705_v17, %v6382_v22  ;;  %v1082_v18 = vadd.f32 %v5037_v49, %v1023_v40  ;;  %v1371_v50 = vrot.slane %v1023_v40, 4  ;;  %v6393_v63 = vld [vmem:[#allocation6_spill] sm:$0xff] }
 0x15d   : > { %v2401_v1 = vsel %vm6242_vm7, 0.0, %v5303_v7  ;;  %vm6385_vm0 = vcmask 1043456   ;;  %v6386_v49 = vrot.slane %v4261_v35, 4  ;;  %v6391_v21 = vrot.slane %v4487_v53, 4 }
 0x15e   : > { %v1436_v6 = vadd.f32 %v6383_v54, %v1365_v42  ;;  %v1725_v26 = vrot.slane %v1365_v42, 4  ;;  %v1790_v27 = vadd.f32 %v6384_v20, %v1719_v29  ;;  %v2079_v14 = vrot.slane %v1719_v29, 4  ;;  %vm6387_vm13 = vmmov %vm6385_vm0 }
 0x15f   : > { %v1096_v32 = vmul.f32 0.25, %v1082_v18  ;;  %v1372_v44 = vsel %vm6385_vm0, %v1057_v58, %v1371_v50  ;;  %v1374_v2 = vsel %vm6387_vm13, %v1371_v50, %v6386_v49  ;;  %vm6390_vm8 = vmmov %vm6385_vm0  ;;  %v2619_v58 = vpop.f32.mrf.mxu1  ;;  %v6395_v34 = vrot.slane %v4887_v28, 4 }
 0x160   : > { %v1450_v11 = vmul.f32 0.25, %v1436_v6  ;;  %v1425_v0 = vadd.f32 %v1372_v44, %v6388_v48  ;;  %v1426_v56 = vadd.f32 %v1374_v2, %v6389_v30  ;;  %v1726_v39 = vsel %vm6390_vm8, %v1411_v57, %v1725_v26  ;;  %vm6392_vm7 = vmmov %vm6385_vm0 }
 0x161   : > { %v1728_v59 = vsel %vm6392_vm7, %v1725_v26, %v6391_v21  ;;  %v3441_v31 = vpack.c.bf16 %v1096_v32, %v1095_v41  ;;  %v1779_v17 = vadd.f32 %v1726_v39, %v6393_v63  ;;  %v1804_v61 = vmul.f32 0.25, %v1790_v27  ;;  %vm6396_vm7 = vmmov %vm6385_vm0  ;;  %v2973_v50 = vpop.f32.mrf.mxu2  ;;  %v2268_v32 = vpop.f32.mrf.mxu0 }
 0x162   : > { %v3476_v35 = vpack.c.bf16 %v1450_v11, %v1449_v33  ;;  %v1780_v15 = vadd.f32 %v1728_v59, %v6394_v16  ;;  %v1439_v55 = vmul.f32 0.25, %v1425_v0  ;;  %v1440_v40 = vmul.f32 0.25, %v1426_v56 }
 0x163   : > { %v2080_v24 = vsel %vm6385_vm0, %v1765_v47, %v2079_v14  ;;  %3662 = vst [vmem:[%s4230_s6 + $0x28] sm:$0xff] %v3441_v31   ;;  %v1793_v53 = vmul.f32 0.25, %v1779_v17  ;;  %v2082_v41 = vsel %vm6396_vm7, %v2079_v14, %v6395_v34  ;;  %v3511_v3 = vpack.c.bf16 %v1804_v61, %v1803_v45 }
 0x164   : > { %v1794_v57 = vmul.f32 0.25, %v1780_v15  ;;  %v2133_v42 = vadd.f32 %v2080_v24, %v5170_v19  ;;  %v3451_v33 = vpack.c.bf16 %v1440_v40, %v1439_v55  ;;  %3669 = vst [vmem:[%s4230_s6 + $0x60] sm:$0xff] %v3476_v35   ;;  %v2134_v22 = vadd.f32 %v2082_v41, %v5299_v9  ;;  %v1920_v24 = vpop.f32.mrf.mxu3 }
 0x165   : > { %v2714_v47 = vrot.slane %v2686_v25, 7  ;;  %v2402_v6 = vsel %vm4083_vm3, %v2401_v1, 0.0  ;;  %v1980_v26 = vmax.f32 %v5313_v43, 0.0  ;;  %v3012_v45 = vmul.f32 %v4754_v5, %v2970_v23  ;;  %3676 = vst [vmem:[%s4230_s6 + $0x98] sm:$0xff] %v3511_v3  }
 0x166   : > { %v3486_v29 = vpack.c.bf16 %v1794_v57, %v1793_v53  ;;  %v2147_v18 = vmul.f32 0.25, %v2133_v42  ;;  %3664 = vst [vmem:[%s4230_s6 + $0x38] sm:$0xff] %v3451_v33   ;;  %v2148_v54 = vmul.f32 0.25, %v2134_v22  ;;  %v2083_v20 = vrot.slane %v5014_v10, 4 }
 0x167   : > { %v2305_v27 = vmul.f32 %v4754_v5, %v2265_v13  ;;  %v2659_v14 = vmul.f32 %v4754_v5, %v2619_v58  ;;  %v2009_v49 = vrot.slane %v1980_v26, 7  ;;  %v3026_v2 = vadd.f32 %v4782_v62, %v3012_v45  ;;  %v2622_v56 = vpop.f32.mrf.mxu1 }
 0x168   : > { %3671 = vst [vmem:[%s4230_s6 + $0x70] sm:$0xff] %v3486_v29   ;;  %v3521_v44 = vpack.c.bf16 %v2148_v54, %v2147_v18  ;;  %v1953_v1 = vmul.f32 %v4754_v5, %v1917_v4  ;;  %v5355_v43 = vadd.f32 %v2402_v6, %v2332_v12  ;;  %vm6397_vm13 = vcmask 1040384  }
 0x169   : > { %v2755_v23 = vsel %vm6397_vm13, 0.0, %v2714_v47  ;;  %v2319_v10 = vadd.f32 %v4782_v62, %v2305_v27  ;;  %v5360_v13 = vadd.f32 %v4782_v62, %v2659_v14  ;;  %vm6398_vm8 = vmmov %vm6397_vm13  ;;  %v3040_v48 = vmax.f32 %v3026_v2, 0.0  ;;  %v2976_v41 = vpop.f32.mrf.mxu2  ;;  %v2271_v18 = vpop.f32.mrf.mxu0 }
 0x16a   : > { %3678 = vst [vmem:[%s4230_s6 + $0xa8] sm:$0xff] %v3521_v44   ;;  %v2010_v11 = vsel %vm6398_vm8, %v5238_v8, %v2009_v49  ;;  %v1967_v0 = vadd.f32 %v4782_v62, %v1953_v1  ;;  %v3013_v30 = vmul.f32 %v4754_v5, %v2973_v50  ;;  %v2306_v59 = vmul.f32 %v4754_v5, %v2268_v32  ;;  %vm6400_vm0 = vmmov %vm6398_vm8  ;;  %v5424_v44 = vld [vmem:[%s6183_s2] ss:$0 sm:$0xff] }
 0x16b   : > { %v2050_v12 = vsel %vm4164_vm9, %v2010_v11, 0.0  ;;  %v2333_v39 = vmax.f32 %v2319_v10, 0.0  ;;  %v2687_v21 = vmax.f32 %v5360_v13, 0.0  ;;  %v2756_v58 = vsel %vm4083_vm3, %v2755_v23, 0.0  ;;  %vm6402_vm13 = vmmov %vm6400_vm0 }
 0x16c   : > { %v3068_v31 = vrot.slane %v3040_v48, 7  ;;  %v1981_v35 = vmax.f32 %v1967_v0, 0.0  ;;  %v5374_v8 = vadd.f32 %v4782_v62, %v3013_v30  ;;  %v5376_v63 = vadd.f32 %v2050_v12, %v1980_v26  ;;  %vm6403_vm8 = vmmov %vm6400_vm0 }
 0x16d   : > { %v2361_v17 = vrot.slane %v2333_v39, 7  ;;  %v2715_v16 = vrot.slane %v2687_v21, 7  ;;  %v5382_v40 = vadd.f32 %v4782_v62, %v2306_v59  ;;  %v2660_v61 = vmul.f32 %v4754_v5, %v2622_v56 }
 0x16e   : > { %v3109_v15 = vsel %vm6400_vm0, 0.0, %v3068_v31  ;;  %v5379_v55 = vrot.slane %v1981_v35, 7  ;;  %v2100_v53 = vrot.slane %v5170_v19, 4  ;;  %v5388_v57 = vadd.f32 %v2756_v58, %v2686_v25 }
 0x16f   : > { %v3041_v34 = vmax.f32 %v5374_v8, 0.0  ;;  %v2101_v42 = vrot.slane %v5299_v9, 4  ;;  %v6245_v33 = vrot.slane %v5355_v43, 4  ;;  %v6401_v3 = vrot.slane %v4887_v28, 4  ;;  %v2625_v2 = vpop.f32.mrf.mxu1 }
 0x170   : > { %v2362_v5 = vsel %vm6402_vm13, %v5303_v7, %v2361_v17  ;;  %v3110_v52 = vsel %vm4083_vm3, %v3109_v15, 0.0  ;;  %v2716_v25 = vsel %vm6403_vm8, %v2714_v47, %v2715_v16  ;;  %v2012_v29 = vsel %vm6400_vm0, %v2009_v49, %v5379_v55  ;;  %vm6405_vm3 = vmmov %vm6396_vm7  ;;  %v1923_v15 = vpop.f32.mrf.mxu3 }
 0x171   : > { %v2084_v22 = vsel %vm6396_vm7, %v6401_v3, %v2083_v20  ;;  %v2051_v54 = vsel %vm4331_vm1, %v2012_v29, 0.0  ;;  %v3069_v28 = vrot.slane %v3041_v34, 7  ;;  %v2334_v6 = vmax.f32 %v5382_v40, 0.0  ;;  %vm6406_vm7 = vmmov %vm6400_vm0 }
 0x172   : > { %v2135_v4 = vadd.f32 %v2084_v22, %v5376_v63  ;;  %v5408_v26 = vadd.f32 %v4782_v62, %v2660_v61  ;;  %v6244_v7 = vrot.slane %v5388_v57, 4  ;;  %v2403_v51 = vsel %vm4099_vm14, %v2362_v5, 0.0  ;;  %vm6407_vm13 = vmmov %vm6400_vm0 }
 0x173   : > { %v5413_v45 = vadd.f32 %v2051_v54, %v1981_v35  ;;  %v2132_v47 = vsel %vm6405_vm3, %v2083_v20, %v2100_v53  ;;  %v5418_v27 = vadd.f32 %v3110_v52, %v3040_v48  ;;  %v2363_v14 = vrot.slane %v2334_v6, 7  ;;  %vm6408_vm8 = vmmov %vm6400_vm0 }
 0x174   : > { %v2688_v32 = vmax.f32 %v5408_v26, 0.0  ;;  %v1954_v49 = vmul.f32 %v5424_v44, %v1920_v24  ;;  %v2103_v1 = vrot.slane %v5376_v63, 4  ;;  %v2149_v23 = vmul.f32 0.25, %v2135_v4 }
 0x175   : > { %v2757_v10 = vsel %vm4099_vm14, %v2716_v25, 0.0  ;;  %v2136_v20 = vadd.f32 %v2132_v47, %v5413_v45  ;;  %v5431_v13 = vadd.f32 %v2403_v51, %v2333_v39  ;;  %v3070_v11 = vsel %vm6406_vm7, %v3068_v31, %v3069_v28  ;;  %v2274_v25 = vpop.f32.mrf.mxu0  ;;  %vm6411_vm7 = vmmov %vm6400_vm0 }
 0x176   : > { %v1968_v48 = vadd.f32 %v4782_v62, %v1954_v49  ;;  %v3014_v0 = vmul.f32 %v5424_v44, %v2976_v41  ;;  %v2364_v56 = vsel %vm6407_vm13, %v2361_v17, %v2363_v14  ;;  %v2717_v12 = vrot.slane %v2688_v32, 7  ;;  %v5447_v17 = vld [vmem:[%s6184_s3] ss:$0 sm:$0xff]  ;;  %v2979_v41 = vpop.f32.mrf.mxu2  ;;  %vm6412_vm13 = vmmov %vm6405_vm3 }
 0x177   : > { %v2150_v30 = vmul.f32 0.25, %v2136_v20  ;;  %v2307_v59 = vmul.f32 %v5424_v44, %v2271_v18  ;;  %v6243_v58 = vrot.slane %v5418_v27, 4  ;;  %v5439_v35 = vadd.f32 %v2757_v10, %v2687_v21  ;;  %v2628_v20 = vpop.f32.mrf.mxu1 }
 0x178   : > { %v1982_v8 = vmax.f32 %v1968_v48, 0.0  ;;  %v3028_v39 = vadd.f32 %v4782_v62, %v3014_v0  ;;  %v3111_v40 = vsel %vm4099_vm14, %v3070_v11, 0.0  ;;  %v2661_v24 = vmul.f32 %v5424_v44, %v2625_v2  ;;  %vm6409_vm14 = vmmov %vm6400_vm0 }
 0x179   : > { %v3526_v31 = vpack.c.bf16 %v2150_v30, %v2149_v23  ;;  %v2321_v61 = vadd.f32 %v5447_v17, %v2307_v59  ;;  %v2455_v21 = vrot.slane %v5431_v13, 4  ;;  %v2404_v62 = vsel %vm4164_vm9, %v2364_v56, 0.0 }
 0x17a   : > { %v2013_v3 = vrot.slane %v1982_v8, 7  ;;  %v3042_v22 = vmax.f32 %v3028_v39, 0.0  ;;  %v2718_v60 = vsel %vm6408_vm8, %v2715_v16, %v2717_v12  ;;  %v5457_v4 = vadd.f32 %v5447_v17, %v2661_v24  ;;  %vm6413_vm8 = vmmov %vm6400_vm0 }
 0x17b   : > { %3679 = vst [vmem:[%s4230_s6 + $0xb0] sm:$0xff] %v3526_v31   ;;  %v2335_v5 = vmax.f32 %v2321_v61, 0.0  ;;  %v1955_v52 = vmul.f32 %v5424_v44, %v1923_v15  ;;  %v5460_v29 = vadd.f32 %v3111_v40, %v3041_v34  ;;  %v3015_v26 = vmul.f32 %v5424_v44, %v2979_v41 }
 0x17c   : > { %v2014_v18 = vsel %vm6409_vm14, %v5379_v55, %v2013_v3  ;;  %v3071_v54 = vrot.slane %v3042_v22, 7  ;;  %v2689_v16 = vmax.f32 %v5457_v4, 0.0  ;;  %v5469_v23 = vadd.f32 %v2404_v62, %v2334_v6  ;;  %v1926_v62 = vpop.f32.mrf.mxu3  ;;  %vm6414_vm14 = vmmov %vm6400_vm0 }
 0x17d   : > { %v2052_v47 = vsel %vm4498_vm6, %v2014_v18, 0.0  ;;  %v2365_v49 = vrot.slane %v2335_v5, 7  ;;  %v1969_v2 = vadd.f32 %v5447_v17, %v1955_v52  ;;  %v2758_v34 = vsel %vm4164_vm9, %v2718_v60, 0.0 }
 0x17e   : > { %v3029_v10 = vadd.f32 %v5447_v17, %v3015_v26  ;;  %v2308_v55 = vmul.f32 %v5424_v44, %v2274_v25  ;;  %v2809_v11 = vrot.slane %v5439_v35, 4  ;;  %v5476_v48 = vadd.f32 %v2052_v47, %v1982_v8 }
 0x17f   : > { %v3072_v0 = vsel %vm6400_vm0, %v3069_v28, %v3071_v54  ;;  %v1983_v30 = vmax.f32 %v1969_v2, 0.0  ;;  %v2105_v56 = vrot.slane %v5413_v45, 4  ;;  %v2102_v6 = vsel %vm6405_vm3, %v2100_v53, %v2101_v42 }
 0x180   : > { %v2366_v59 = vsel %vm6411_vm7, %v2363_v14, %v2365_v49  ;;  %v2719_v39 = vrot.slane %v2689_v16, 7  ;;  %v3163_v15 = vrot.slane %v5460_v29, 4  ;;  %v5487_v31 = vadd.f32 %v2758_v34, %v2688_v32  ;;  %vm6418_vm7 = vmmov %vm6405_vm3 }
 0x181   : > { %v2015_v8 = vrot.slane %v1983_v30, 7  ;;  %v3043_v40 = vmax.f32 %v3029_v10, 0.0  ;;  %v2457_v28 = vrot.slane %v5469_v23, 4  ;;  %v3112_v61 = vsel %vm4164_vm9, %v3072_v0, 0.0  ;;  %vm6416_vm9 = vmmov %vm6400_vm0 }
 0x182   : > { %v2104_v19 = vsel %vm6412_vm13, %v2101_v42, %v2103_v1  ;;  %v2322_v53 = vadd.f32 %v5447_v17, %v2308_v55  ;;  %v2137_v14 = vadd.f32 %v2102_v6, %v5476_v48  ;;  %v2405_v32 = vsel %vm4331_vm1, %v2366_v59, 0.0  ;;  %v2277_v59 = vpop.f32.mrf.mxu0  ;;  %vm6419_vm13 = vmmov %vm6400_vm0 }
 0x183   : > { %v2016_v24 = vsel %vm6413_vm8, %v2013_v3, %v2015_v8  ;;  %v5502_v41 = vrot.slane %v3043_v40, 7  ;;  %v2720_v38 = vsel %vm6414_vm14, %v2717_v12, %v2719_v39  ;;  %v2662_v42 = vmul.f32 %v5424_v44, %v2628_v20  ;;  %v2982_v3 = vpop.f32.mrf.mxu2  ;;  %vm6420_vm8 = vmmov %vm6405_vm3 }
 0x184   : > { %v2053_v4 = vsel %vm4620_vm2, %v2016_v24, 0.0  ;;  %v2336_v9 = vmax.f32 %v2322_v53, 0.0  ;;  %v2811_v52 = vrot.slane %v5487_v31, 4  ;;  %v6246_v25 = vrot.slane %v5476_v48, 4  ;;  %vm6421_vm14 = vmmov %vm6405_vm3 }
 0x185   : > { %v5510_v18 = vadd.f32 %v3112_v61, %v3042_v22  ;;  %v5512_v26 = vadd.f32 %v2053_v4, %v1983_v30  ;;  %v3074_v47 = vsel %vm6416_vm9, %v3071_v54, %v5502_v41  ;;  %v2676_v12 = vadd.f32 %v5447_v17, %v2662_v42  ;;  %v2631_v61 = vpop.f32.mrf.mxu1  ;;  %vm6423_vm9 = vmmov %vm6405_vm3 }
 0x186   : > { %v2367_v2 = vrot.slane %v2336_v9, 7  ;;  %v1956_v34 = vmul.f32 %v5424_v44, %v1926_v62  ;;  %v2151_v10 = vmul.f32 0.25, %v2137_v14  ;;  %v5518_v55 = vadd.f32 %v2405_v32, %v2335_v5 }
 0x187   : > { %v2759_v20 = vsel %vm4331_vm1, %v2720_v38, 0.0  ;;  %v2138_v22 = vadd.f32 %v2104_v19, %v5512_v26  ;;  %v2690_v30 = vmax.f32 %v2676_v12, 0.0  ;;  %v3016_v54 = vmul.f32 %v5424_v44, %v2982_v3 }
 0x188   : > { %v2368_v0 = vsel %vm6400_vm0, %v2365_v49, %v2367_v2  ;;  %v1970_v6 = vadd.f32 %v5447_v17, %v1956_v34  ;;  %v3165_v53 = vrot.slane %v5510_v18, 4  ;;  %v3113_v5 = vsel %vm4331_vm1, %v3074_v47, 0.0  ;;  %vm6417_vm1 = vmmov %vm6400_vm0 }
 0x189   : > { %v2152_v14 = vmul.f32 0.25, %v2138_v22  ;;  %v2406_v32 = vsel %vm4498_vm6, %v2368_v0, 0.0  ;;  %v5531_v19 = vadd.f32 %v2759_v20, %v2689_v16  ;;  %v2721_v49 = vrot.slane %v2690_v30, 7  ;;  %v1929_v0 = vpop.f32.mrf.mxu3 }
 0x18a   : > { %v1984_v24 = vmax.f32 %v1970_v6, 0.0  ;;  %v5534_v62 = vadd.f32 %v5447_v17, %v3016_v54  ;;  %v2459_v38 = vrot.slane %v5518_v55, 4  ;;  %v2309_v42 = vmul.f32 %v5424_v44, %v2277_v59 }
 0x18b   : > { %v3531_v4 = vpack.c.bf16 %v2152_v14, %v2151_v10  ;;  %v2663_v3 = vmul.f32 %v5424_v44, %v2631_v61  ;;  %v5539_v12 = vadd.f32 %v3113_v5, %v3043_v40  ;;  %v5541_v50 = vadd.f32 %v2406_v32, %v2336_v9 }
 0x18c   : > { %v2722_v47 = vsel %vm6417_vm1, %v2719_v39, %v2721_v49  ;;  %v2017_v16 = vrot.slane %v1984_v24, 7  ;;  %v3044_v20 = vmax.f32 %v5534_v62, 0.0  ;;  %v2323_v22 = vadd.f32 %v5447_v17, %v2309_v42  ;;  %vm6424_vm1 = vmmov %vm6400_vm0 }
 0x18d   : > { %3680 = vst [vmem:[%s4230_s6 + $0xb8] sm:$0xff] %v3531_v4   ;;  %v2760_v34 = vsel %vm4498_vm6, %v2722_v47, 0.0  ;;  %v2677_v10 = vadd.f32 %v5447_v17, %v2663_v3  ;;  %v2813_v6 = vrot.slane %v5531_v19, 4  ;;  %v2456_v39 = vsel %vm6405_vm3, %v6245_v33, %v2455_v21  ;;  %v2985_v47 = vpop.f32.mrf.mxu2  ;;  %vm6425_vm3 = vmmov %vm6400_vm0 }
 0x18e   : > { %v5556_v40 = vadd.f32 %v2760_v34, %v2690_v30  ;;  %v2810_v9 = vsel %vm6418_vm7, %v6244_v7, %v2809_v11  ;;  %v2018_v54 = vsel %vm6419_vm13, %v2015_v8, %v2017_v16  ;;  %v3075_v59 = vrot.slane %v3044_v20, 7  ;;  %vm6426_vm13 = vmmov %vm6418_vm7 }
 0x18f   : > { %v2337_v61 = vmax.f32 %v2323_v22, 0.0  ;;  %v2691_v14 = vmax.f32 %v2677_v10, 0.0  ;;  %v2109_v5 = vrot.slane %v5512_v26, 4  ;;  %v2491_v32 = vadd.f32 %v2456_v39, %v5541_v50 }
 0x190   : > { %v2106_v30 = vsel %vm6420_vm8, %v2103_v1, %v2105_v56  ;;  %v1957_v62 = vmul.f32 %v5424_v44, %v1929_v0  ;;  %v3164_v8 = vsel %vm6421_vm14, %v6243_v58, %v3163_v15  ;;  %v2845_v63 = vadd.f32 %v2810_v9, %v5556_v40  ;;  %v2280_v9 = vpop.f32.mrf.mxu0  ;;  %vm6429_vm8 = vmmov %vm6400_vm0 }
 0x191   : > { %v2369_v42 = vrot.slane %v2337_v61, 7  ;;  %v5578_v3 = vrot.slane %v2691_v14, 7  ;;  %v2054_v1 = vsel %vm4775_vm10, %v2018_v54, 0.0  ;;  %v2458_v10 = vsel %vm6423_vm9, %v2455_v21, %v2457_v28  ;;  %vm6430_vm14 = vmmov %vm6418_vm7 }
 0x192   : > { %v3076_v0 = vsel %vm6400_vm0, %v5502_v41, %v3075_v59  ;;  %v1971_v7 = vadd.f32 %v5447_v17, %v1957_v62  ;;  %v2505_v33 = vmul.f32 0.25, %v2491_v32  ;;  %v3017_v21 = vmul.f32 %v5424_v44, %v2985_v47  ;;  %vm6431_vm9 = vmmov %vm6400_vm0 }
 0x193   : > { %v2370_v39 = vsel %vm6424_vm1, %v2367_v2, %v2369_v42  ;;  %v2724_v58 = vsel %vm6425_vm3, %v2721_v49, %v5578_v3  ;;  %v5600_v4 = vadd.f32 %v2054_v1, %v1984_v24  ;;  %v2812_v49 = vsel %vm6418_vm7, %v2809_v11, %v2811_v52  ;;  %v2634_v24 = vpop.f32.mrf.mxu1  ;;  %vm6433_vm1 = vmmov %vm6418_vm7 }
 0x194   : > { %v2407_v54 = vsel %vm4620_vm2, %v2370_v39, 0.0  ;;  %v2761_v34 = vsel %vm4620_vm2, %v2724_v58, 0.0  ;;  %v3114_v32 = vsel %vm4498_vm6, %v3076_v0, 0.0  ;;  %v1985_v62 = vmax.f32 %v1971_v7, 0.0  ;;  %v1932_v39 = vpop.f32.mrf.mxu3  ;;  %vm6427_vm6 = vmmov %vm6400_vm0 }
 0x195   : > { %v5602_v41 = vadd.f32 %v2407_v54, %v2337_v61  ;;  %v5604_v2 = vadd.f32 %v2761_v34, %v2691_v14  ;;  %v3031_v58 = vadd.f32 %v5447_v17, %v3017_v21  ;;  %v2310_v47 = vmul.f32 %v5424_v44, %v2280_v9  ;;  %vm6434_vm3 = vmmov %vm6433_vm1 }
 0x196   : > { %v2859_v1 = vmul.f32 0.25, %v2845_v63  ;;  %v2108_v11 = vsel %vm6426_vm13, %v2105_v56, %v6246_v25  ;;  %v2019_v34 = vrot.slane %v1985_v62, 7  ;;  %v2139_v9 = vadd.f32 %v2106_v30, %v5600_v4  ;;  %vm6437_vm7 = vmmov %vm6433_vm1 }
 0x197   : > { %v2492_v14 = vadd.f32 %v2458_v10, %v5602_v41  ;;  %v2846_v51 = vadd.f32 %v2812_v49, %v5604_v2  ;;  %v3045_v7 = vmax.f32 %v3031_v58, 0.0  ;;  %v2324_v0 = vadd.f32 %v5447_v17, %v2310_v47  ;;  %vm6439_vm13 = vmmov %vm6433_vm1 }
 0x198   : > { %v5625_v54 = vadd.f32 %v3114_v32, %v3044_v20  ;;  %v2664_v10 = vmul.f32 %v5424_v44, %v2634_v24  ;;  %v2020_v45 = vsel %vm6427_vm6, %v2017_v16, %v2019_v34  ;;  %v1958_v20 = vmul.f32 %v5424_v44, %v1932_v39  ;;  %v2988_v16 = vpop.f32.mrf.mxu2  ;;  %v2283_v39 = vpop.f32.mrf.mxu0  ;;  %vm6440_vm6 = vmmov %vm6400_vm0 }
 0x199   : > { %v2506_v63 = vmul.f32 0.25, %v2492_v14  ;;  %v2860_v21 = vmul.f32 0.25, %v2846_v51  ;;  %v5629_v61 = vrot.slane %v3045_v7, 7  ;;  %v2338_v56 = vmax.f32 %v2324_v0, 0.0 }
 0x19a   : > { %v2055_v47 = vsel %vm4899_vm15, %v2020_v45, 0.0  ;;  %v2678_v25 = vadd.f32 %v5447_v17, %v2664_v10  ;;  %v3199_v51 = vadd.f32 %v3164_v8, %v5625_v54  ;;  %v6444_v22 = vrot.slane %v5556_v40, 4 }
 0x19b   : > { %v3566_v49 = vpack.c.bf16 %v2506_v63, %v2505_v33  ;;  %v3601_v30 = vpack.c.bf16 %v2860_v21, %v2859_v1  ;;  %v5635_v32 = vadd.f32 %v2055_v47, %v1985_v62  ;;  %v3078_v24 = vsel %vm6429_vm8, %v3075_v59, %v5629_v61  ;;  %vm6442_vm8 = vmmov %vm6433_vm1 }
 0x19c   : > { %v5639_v14 = vrot.slane %v2338_v56, 7  ;;  %v3115_v33 = vsel %vm4620_vm2, %v3078_v24, 0.0  ;;  %v2692_v0 = vmax.f32 %v2678_v25, 0.0  ;;  %v1972_v63 = vadd.f32 %v5447_v17, %v1958_v20  ;;  %vm6432_vm2 = vmmov %vm6400_vm0 }
 0x19d   : > { %3687 = vst [vmem:[%s4230_s6 + $0xf0] sm:$0xff] %v3566_v49   ;;  %v2140_v1 = vadd.f32 %v2108_v11, %v5635_v32  ;;  %v5648_v62 = vadd.f32 %v3115_v33, %v3045_v7  ;;  %v3166_v59 = vsel %vm6430_vm14, %v3163_v15, %v3165_v53  ;;  %v3018_v11 = vmul.f32 %v5424_v44, %v2988_v16  ;;  %vm6443_vm14 = vmmov %vm6400_vm0 }
 0x19e   : > { %3694 = vst [vmem:[%s4230_s6 + $0x128] sm:$0xff] %v3601_v30   ;;  %v2372_v8 = vsel %vm6431_vm9, %v2369_v42, %v5639_v14  ;;  %v5659_v25 = vrot.slane %v2692_v0, 7  ;;  %v1986_v10 = vmax.f32 %v1972_v63, 0.0  ;;  %v2111_v7 = vrot.slane %v5600_v4, 4  ;;  %v2637_v30 = vpop.f32.mrf.mxu1  ;;  %vm6446_vm9 = vmmov %vm6400_vm0 }
 0x19f   : > { %v2408_v60 = vsel %vm4775_vm10, %v2372_v8, 0.0  ;;  %v2153_v21 = vmul.f32 0.25, %v2139_v9  ;;  %v2154_v45 = vmul.f32 0.25, %v2140_v1  ;;  %v3200_v49 = vadd.f32 %v3166_v59, %v5648_v62 }
 0x1a0   : > { %v5664_v15 = vadd.f32 %v2408_v60, %v2338_v56  ;;  %v2726_v42 = vsel %vm6432_vm2, %v5578_v3, %v5659_v25  ;;  %v5669_v47 = vrot.slane %v1986_v10, 7  ;;  %v3032_v20 = vadd.f32 %v5447_v17, %v3018_v11  ;;  %vm6447_vm2 = vmmov %vm6400_vm0 }
 0x1a1   : > { %v3213_v16 = vmul.f32 0.25, %v3199_v51  ;;  %v3536_v33 = vpack.c.bf16 %v2154_v45, %v2153_v21  ;;  %v3214_v9 = vmul.f32 0.25, %v3200_v49  ;;  %v2762_v63 = vsel %vm4775_vm10, %v2726_v42, 0.0  ;;  %v1935_v45 = vpop.f32.mrf.mxu3 }
 0x1a2   : > { %v2022_v56 = vsel %vm6400_vm0, %v2019_v34, %v5669_v47  ;;  %v3046_v1 = vmax.f32 %v3032_v20, 0.0  ;;  %v2311_v3 = vmul.f32 %v5424_v44, %v2283_v39  ;;  %v2460_v51 = vsel %vm6433_vm1, %v2457_v28, %v2459_v38  ;;  %vm6448_vm0 = vmmov %vm6433_vm1 }
 0x1a3   : > { %3681 = vst [vmem:[%s4230_s6 + $0xc0] sm:$0xff] %v3536_v33   ;;  %v3636_v60 = vpack.c.bf16 %v3214_v9, %v3213_v16  ;;  %v2493_v11 = vadd.f32 %v2460_v51, %v5664_v15  ;;  %v2814_v34 = vsel %vm6434_vm3, %v2811_v52, %v2813_v6  ;;  %v5694_v49 = vadd.f32 %v2762_v63, %v2692_v0 }
 0x1a4   : > { %v3079_v39 = vrot.slane %v3046_v1, 7  ;;  %v2325_v21 = vadd.f32 %v5447_v17, %v2311_v3  ;;  %v2056_v20 = vsel %vm4980_vm4, %v2022_v56, 0.0  ;;  %v6436_v28 = vrot.slane %v5476_v48, 4  ;;  %v2991_v56 = vpop.f32.mrf.mxu2 }
 0x1a5   : > { %3701 = vst [vmem:[%s4230_s6 + $0x160] sm:$0xff] %v3636_v60   ;;  %v2665_v33 = vmul.f32 %v5424_v44, %v2637_v30  ;;  %v6438_v3 = vrot.slane %v5539_v12, 4  ;;  %v1959_v30 = vmul.f32 %v5424_v44, %v1935_v45  ;;  %v2507_v52 = vmul.f32 0.25, %v2493_v11 }
 0x1a6   : > { %v2110_v16 = vsel %vm6437_vm7, %v6436_v28, %v2109_v5  ;;  %v2339_v63 = vmax.f32 %v2325_v21, 0.0  ;;  %v3080_v48 = vsel %vm6440_vm6, %v5629_v61, %v3079_v39  ;;  %v2286_v28 = vpop.f32.mrf.mxu0  ;;  %v5716_v9 = vadd.f32 %v2056_v20, %v1986_v10  ;;  %v2640_v60 = vpop.f32.mrf.mxu1  ;;  %vm6456_vm7 = vmmov %vm6448_vm0 }
 0x1a7   : > { %v3168_v0 = vsel %vm6439_vm13, %v3165_v53, %v6438_v3  ;;  %v2679_v51 = vadd.f32 %v5447_v17, %v2665_v33  ;;  %v6441_v59 = vrot.slane %v5541_v50, 4  ;;  %v1973_v61 = vadd.f32 %v5447_v17, %v1959_v30  ;;  %vm6460_vm6 = vmmov %vm6448_vm0 }
 0x1a8   : > { %v2373_v8 = vrot.slane %v2339_v63, 7  ;;  %v3019_v33 = vmul.f32 %v5424_v44, %v2991_v56  ;;  %v2847_v45 = vadd.f32 %v2814_v34, %v5694_v49  ;;  %v3116_v10 = vsel %vm4775_vm10, %v3080_v48, 0.0  ;;  %vm6445_vm10 = vmmov %vm6433_vm1 }
 0x1a9   : > { %v2462_v53 = vsel %vm6442_vm8, %v2459_v38, %v6441_v59  ;;  %v2693_v3 = vmax.f32 %v2679_v51, 0.0  ;;  %v2312_v20 = vmul.f32 %v5424_v44, %v2286_v28  ;;  %v1987_v51 = vmax.f32 %v1973_v61, 0.0  ;;  %vm6449_vm1 = vmmov %vm6447_vm2 }
 0x1aa   : > { %v2374_v11 = vsel %vm6443_vm14, %v5639_v14, %v2373_v8  ;;  %v3033_v30 = vadd.f32 %v5447_v17, %v3019_v33  ;;  %v2141_v56 = vadd.f32 %v2110_v16, %v5716_v9  ;;  %v2816_v14 = vsel %vm6445_vm10, %v2813_v6, %v6444_v22  ;;  %vm6450_vm3 = vmmov %vm6449_vm1 }
 0x1ab   : > { %v2409_v38 = vsel %vm4899_vm15, %v2374_v11, 0.0  ;;  %v2727_v59 = vrot.slane %v2693_v3, 7  ;;  %v2326_v34 = vadd.f32 %v5447_v17, %v2312_v20  ;;  %v5746_v28 = vrot.slane %v1987_v51, 7  ;;  %vm6457_vm13 = vmmov %vm6449_vm1 }
 0x1ac   : > { %v5736_v21 = vadd.f32 %v2409_v38, %v2339_v63  ;;  %v3047_v61 = vmax.f32 %v3033_v30, 0.0  ;;  %v2666_v33 = vmul.f32 %v5424_v44, %v2640_v60  ;;  %v5749_v11 = vadd.f32 %v3116_v10, %v3046_v1  ;;  %v1938_v60 = vpop.f32.mrf.mxu3  ;;  %vm6462_vm8 = vmmov %vm6448_vm0 }
 0x1ad   : > { %v2728_v48 = vsel %vm6446_vm9, %v5659_v25, %v2727_v59  ;;  %v2340_v38 = vmax.f32 %v2326_v34, 0.0  ;;  %v2024_v6 = vsel %vm6447_vm2, %v5669_v47, %v5746_v28  ;;  %v2861_v1 = vmul.f32 0.25, %v2847_v45  ;;  %v2994_v34 = vpop.f32.mrf.mxu2  ;;  %vm6463_vm14 = vmmov %vm6449_vm1 }
 0x1ae   : > { %v2494_v16 = vadd.f32 %v2462_v53, %v5736_v21  ;;  %v2763_v63 = vsel %vm4899_vm15, %v2728_v48, 0.0  ;;  %v5759_v25 = vrot.slane %v3047_v61, 7  ;;  %v5762_v20 = vadd.f32 %v5447_v17, %v2666_v33  ;;  %vm6464_vm10 = vmmov %vm6449_vm1 }
 0x1af   : > { %v5754_v24 = vadd.f32 %v2763_v63, %v2693_v3  ;;  %v2057_v53 = vsel %vm5109_vm11, %v2024_v6, 0.0  ;;  %v5766_v30 = vrot.slane %v2340_v38, 7  ;;  %v2112_v47 = vsel %vm6448_vm0, %v2109_v5, %v2111_v7  ;;  %vm6467_vm9 = vmmov %vm6448_vm0 }
 0x1b0   : > { %v2508_v10 = vmul.f32 0.25, %v2494_v16  ;;  %v5769_v22 = vadd.f32 %v2057_v53, %v1987_v51  ;;  %v3082_v45 = vsel %vm6449_vm1, %v3079_v39, %v5759_v25  ;;  %v2694_v51 = vmax.f32 %v5762_v20, 0.0  ;;  %vm6470_vm2 = vmmov %vm6448_vm0 }
 0x1b1   : > { %v2848_v3 = vadd.f32 %v2816_v14, %v5754_v24  ;;  %v3117_v33 = vsel %vm4899_vm15, %v3082_v45, 0.0  ;;  %v2376_v16 = vsel %vm6450_vm3, %v2373_v8, %v5766_v30  ;;  %v2289_v14 = vpop.f32.mrf.mxu0  ;;  %v3201_v63 = vadd.f32 %v3168_v0, %v5749_v11  ;;  %vm6453_vm15 = vmmov %vm6448_vm0 }
 0x1b2   : > { %v3571_v48 = vpack.c.bf16 %v2508_v10, %v2507_v52  ;;  %v2142_v26 = vadd.f32 %v2112_v47, %v5769_v22  ;;  %v5785_v5 = vadd.f32 %v3117_v33, %v3047_v61  ;;  %v2155_v39 = vmul.f32 0.25, %v2141_v56  ;;  %vm6471_vm0 = vmmov %vm6449_vm1 }
 0x1b3   : > { %v2862_v6 = vmul.f32 0.25, %v2848_v3  ;;  %v6451_v52 = vrot.slane %v5625_v54, 4  ;;  %v6452_v58 = vrot.slane %v5539_v12, 4  ;;  %v5793_v8 = vrot.slane %v2694_v51, 7  ;;  %vm6472_vm1 = vmmov %vm6471_vm0 }
 0x1b4   : > { %3688 = vst [vmem:[%s4230_s6 + $0xf8] sm:$0xff] %v3571_v48   ;;  %v1960_v20 = vmul.f32 %v5424_v44, %v1938_v60  ;;  %v2156_v0 = vmul.f32 0.25, %v2142_v26  ;;  %v2410_v61 = vsel %vm4980_vm4, %v2376_v16, 0.0  ;;  %v2115_v56 = vrot.slane %v5716_v9, 4  ;;  %vm6476_vm3 = vmmov %vm6470_vm2 }
 0x1b5   : > { %v3170_v10 = vsel %vm6453_vm15, %v6452_v58, %v6451_v52  ;;  %v3606_v53 = vpack.c.bf16 %v2862_v6, %v2861_v1  ;;  %v3173_v47 = vrot.slane %v5749_v11, 4  ;;  %v3020_v48 = vmul.f32 %v5424_v44, %v2994_v34  ;;  %v2643_v34 = vpop.f32.mrf.mxu1  ;;  %vm6478_vm15 = vmmov %vm6470_vm2 }
 0x1b6   : > { %v3202_v3 = vadd.f32 %v3170_v10, %v5785_v5  ;;  %v1974_v45 = vadd.f32 %v5447_v17, %v1960_v20  ;;  %v3215_v33 = vmul.f32 0.25, %v3201_v63  ;;  %v3541_v52 = vpack.c.bf16 %v2156_v0, %v2155_v39 }
 0x1b7   : > { %3695 = vst [vmem:[%s4230_s6 + $0x130] sm:$0xff] %v3606_v53   ;;  %v6454_v1 = vrot.slane %v5602_v41, 4  ;;  %v6455_v6 = vrot.slane %v5541_v50, 4  ;;  %v2467_v16 = vrot.slane %v5736_v21, 4  ;;  %v5810_v58 = vadd.f32 %v2410_v61, %v2340_v38 }
 0x1b8   : > { %v3216_v60 = vmul.f32 0.25, %v3202_v3  ;;  %v2730_v10 = vsel %vm6457_vm13, %v2727_v59, %v5793_v8  ;;  %v1988_v20 = vmax.f32 %v1974_v45, 0.0  ;;  %3682 = vst [vmem:[%s4230_s6 + $0xc8] sm:$0xff] %v3541_v52   ;;  %v6458_v39 = vrot.slane %v5604_v2, 4  ;;  %vm6480_vm13 = vmmov %vm6471_vm0 }
 0x1b9   : > { %v2464_v26 = vsel %vm6456_vm7, %v6455_v6, %v6454_v1  ;;  %v6459_v53 = vrot.slane %v5556_v40, 4  ;;  %v3034_v0 = vadd.f32 %v5447_v17, %v3020_v48  ;;  %v2313_v3 = vmul.f32 %v5424_v44, %v2289_v14  ;;  %v1941_v1 = vpop.f32.mrf.mxu3  ;;  %vm6479_vm7 = vmmov %vm6471_vm0 }
 0x1ba   : > { %v3641_v63 = vpack.c.bf16 %v3216_v60, %v3215_v33  ;;  %v2025_v59 = vrot.slane %v1988_v20, 7  ;;  %v6461_v45 = vrot.slane %v5635_v32, 4  ;;  %v2764_v40 = vsel %vm4980_vm4, %v2730_v10, 0.0  ;;  %v2997_v60 = vpop.f32.mrf.mxu2 }
 0x1bb   : > { %v2818_v50 = vsel %vm6460_vm6, %v6459_v53, %v6458_v39  ;;  %v3048_v52 = vmax.f32 %v3034_v0, 0.0  ;;  %v2327_v48 = vadd.f32 %v5447_v17, %v2313_v3  ;;  %v2667_v14 = vmul.f32 %v5424_v44, %v2643_v34  ;;  %vm6484_vm6 = vmmov %vm6470_vm2 }
 0x1bc   : > { %v2114_v33 = vsel %vm6462_vm8, %v2111_v7, %v6461_v45  ;;  %3702 = vst [vmem:[%s4230_s6 + $0x168] sm:$0xff] %v3641_v63   ;;  %v2495_v39 = vadd.f32 %v2464_v26, %v5810_v58  ;;  %v2026_v53 = vsel %vm6463_vm14, %v5746_v28, %v2025_v59  ;;  %v1961_v4 = vmul.f32 %v5424_v44, %v1941_v1  ;;  %v2292_v7 = vpop.f32.mrf.mxu0  ;;  %vm6485_vm8 = vmmov %vm6470_vm2 }
 0x1bd   : > { %v2058_v63 = vsel %vm5212_vm12, %v2026_v53, 0.0  ;;  %v3083_v10 = vrot.slane %v3048_v52, 7  ;;  %v2341_v0 = vmax.f32 %v2327_v48, 0.0  ;;  %v2681_v3 = vadd.f32 %v5447_v17, %v2667_v14  ;;  %vm6488_vm14 = vmmov %vm6470_vm2 }
 0x1be   : > { %v5842_v45 = vadd.f32 %v2764_v40, %v2694_v51  ;;  %v5844_v34 = vadd.f32 %v2058_v63, %v1988_v20  ;;  %v1975_v6 = vadd.f32 %v5447_v17, %v1961_v4  ;;  %v3021_v26 = vmul.f32 %v5424_v44, %v2997_v60 }
 0x1bf   : > { %v3084_v28 = vsel %vm6464_vm10, %v5759_v25, %v3083_v10  ;;  %v2377_v1 = vrot.slane %v2341_v0, 7  ;;  %v2695_v61 = vmax.f32 %v2681_v3, 0.0  ;;  %v2314_v38 = vmul.f32 %v5424_v44, %v2292_v7  ;;  %vm6489_vm10 = vmmov %vm6471_vm0 }
 0x1c0   : > { %v6465_v48 = vrot.slane %v5648_v62, 4  ;;  %v6466_v51 = vrot.slane %v5625_v54, 4  ;;  %v6468_v40 = vrot.slane %v5664_v15, 4  ;;  %v6469_v14 = vrot.slane %v5602_v41, 4 }
 0x1c1   : > { %v1989_v4 = vmax.f32 %v1975_v6, 0.0  ;;  %v2509_v25 = vmul.f32 0.25, %v2495_v39  ;;  %v2378_v63 = vsel %vm6471_vm0, %v5766_v30, %v2377_v1  ;;  %v5864_v7 = vrot.slane %v2695_v61, 7 }
 0x1c2   : > { %v3172_v20 = vsel %vm6467_vm9, %v6466_v51, %v6465_v48  ;;  %v2466_v60 = vsel %vm6470_vm2, %v6469_v14, %v6468_v40  ;;  %v3035_v3 = vadd.f32 %v5447_v17, %v3021_v26  ;;  %v3118_v54 = vsel %vm4980_vm4, %v3084_v28, 0.0  ;;  %vm6473_vm4 = vmmov %vm6471_vm0 }
 0x1c3   : > { %v2411_v48 = vsel %vm5109_vm11, %v2378_v63, 0.0  ;;  %v5871_v51 = vrot.slane %v1989_v4, 7  ;;  %v5874_v41 = vadd.f32 %v5447_v17, %v2314_v38  ;;  %v2849_v6 = vadd.f32 %v2818_v50, %v5842_v45  ;;  %v2646_v63 = vpop.f32.mrf.mxu1  ;;  %vm6490_vm9 = vmmov %vm6471_vm0 }
 0x1c4   : > { %v2143_v39 = vadd.f32 %v2114_v33, %v5844_v34  ;;  %v5878_v30 = vadd.f32 %v2411_v48, %v2341_v0  ;;  %v2732_v26 = vsel %vm6472_vm1, %v5793_v8, %v5864_v7  ;;  %v3049_v40 = vmax.f32 %v3035_v3, 0.0 }
 0x1c5   : > { %v2765_v42 = vsel %vm5109_vm11, %v2732_v26, 0.0  ;;  %v2028_v28 = vsel %vm6473_vm4, %v2025_v59, %v5871_v51  ;;  %v2342_v38 = vmax.f32 %v5874_v41, 0.0  ;;  %v5889_v50 = vadd.f32 %v3118_v54, %v3048_v52  ;;  %v1944_v52 = vpop.f32.mrf.mxu3  ;;  %vm6495_vm4 = vmmov %vm6470_vm2 }
 0x1c6   : > { %v2496_v33 = vadd.f32 %v2466_v60, %v5878_v30  ;;  %v5892_v0 = vadd.f32 %v2765_v42, %v2695_v61  ;;  %v6474_v8 = vrot.slane %v5694_v49, 4  ;;  %v6475_v48 = vrot.slane %v5604_v2, 4 }
 0x1c7   : > { %v2059_v59 = vsel %vm5275_vm5, %v2028_v28, 0.0  ;;  %v5901_v3 = vrot.slane %v3049_v40, 7  ;;  %v5903_v41 = vrot.slane %v2342_v38, 7  ;;  %v2863_v54 = vmul.f32 0.25, %v2849_v6 }
 0x1c8   : > { %v2820_v26 = vsel %vm6476_vm3, %v6475_v48, %v6474_v8  ;;  %v2510_v14 = vmul.f32 0.25, %v2496_v33  ;;  %v5906_v60 = vadd.f32 %v2059_v59, %v1989_v4  ;;  %v2157_v42 = vmul.f32 0.25, %v2143_v39  ;;  %v3000_v4 = vpop.f32.mrf.mxu2  ;;  %vm6496_vm3 = vmmov %vm6472_vm1 }
 0x1c9   : > { %v2850_v61 = vadd.f32 %v2820_v26, %v5892_v0  ;;  %v6477_v2 = vrot.slane %v5635_v32, 4  ;;  %v3086_v28 = vsel %vm6479_vm7, %v3083_v10, %v5901_v3  ;;  %v2668_v48 = vmul.f32 %v5424_v44, %v2646_v63  ;;  %vm6499_vm7 = vmmov %vm6470_vm2 }
 0x1ca   : > { %v3203_v6 = vadd.f32 %v3172_v20, %v5889_v50  ;;  %v3576_v33 = vpack.c.bf16 %v2510_v14, %v2509_v25  ;;  %v3119_v39 = vsel %vm5109_vm11, %v3086_v28, 0.0  ;;  %v2380_v32 = vsel %vm6480_vm13, %v2377_v1, %v5903_v41  ;;  %vm6482_vm11 = vmmov %vm6470_vm2  ;;  %v2295_v28 = vpop.f32.mrf.mxu0 }
 0x1cb   : > { %v2116_v8 = vsel %vm6478_vm15, %v6477_v2, %v2115_v56  ;;  %v2864_v53 = vmul.f32 0.25, %v2850_v61  ;;  %v5923_v59 = vadd.f32 %v5447_v17, %v2668_v48  ;;  %v1962_v10 = vmul.f32 %v5424_v44, %v1944_v52  ;;  %vm6497_vm15 = vmmov %vm6470_vm2 }
 0x1cc   : > { %v2144_v26 = vadd.f32 %v2116_v8, %v5906_v60  ;;  %3689 = vst [vmem:[%s4230_s6 + $0x100] sm:$0xff] %v3576_v33   ;;  %v2433_v25 = vrot.slane %v5906_v60, 4  ;;  %v5928_v14 = vadd.f32 %v3119_v39, %v3049_v40  ;;  %v2119_v61 = vrot.slane %v5844_v34, 4  ;;  %vm6503_vm13 = vmmov %vm6472_vm1 }
 0x1cd   : > { %v3611_v63 = vpack.c.bf16 %v2864_v53, %v2863_v54  ;;  %v6481_v37 = vrot.slane %v5648_v62, 4  ;;  %v2696_v2 = vmax.f32 %v5923_v59, 0.0  ;;  %v1976_v52 = vadd.f32 %v5447_v17, %v1962_v10  ;;  %v2649_v10 = vpop.f32.mrf.mxu1 }
 0x1ce   : > { %v2158_v20 = vmul.f32 0.25, %v2144_v26  ;;  %v2412_v40 = vsel %vm5212_vm12, %v2380_v32, 0.0  ;;  %v3217_v48 = vmul.f32 0.25, %v3203_v6  ;;  %v6483_v62 = vrot.slane %v5664_v15, 4 }
 0x1cf   : > { %v3174_v1 = vsel %vm6482_vm11, %v6481_v37, %v3173_v47  ;;  %3696 = vst [vmem:[%s4230_s6 + $0x138] sm:$0xff] %v3611_v63   ;;  %v5949_v39 = vrot.slane %v2696_v2, 7  ;;  %v1990_v59 = vmax.f32 %v1976_v52, 0.0  ;;  %v3022_v6 = vmul.f32 %v5424_v44, %v3000_v4  ;;  %vm6504_vm11 = vmmov %vm6472_vm1 }
 0x1d0   : > { %v3546_v54 = vpack.c.bf16 %v2158_v20, %v2157_v42  ;;  %v3204_v8 = vadd.f32 %v3174_v1, %v5928_v14  ;;  %v2468_v26 = vsel %vm6484_vm6, %v6483_v62, %v2467_v16  ;;  %v2434_v42 = vsel %vm6485_vm8, %v2119_v61, %v2433_v25  ;;  %v1947_v62 = vpop.f32.mrf.mxu3  ;;  %vm6506_vm6 = vmmov %vm6470_vm2 }
 0x1d1   : > { %v5959_v15 = vadd.f32 %v2412_v40, %v2342_v38  ;;  %v6486_v20 = vrot.slane %v5754_v24, 4  ;;  %v6487_v37 = vrot.slane %v5694_v49, 4  ;;  %v2734_v52 = vsel %vm6489_vm10, %v5864_v7, %v5949_v39  ;;  %vm6512_vm10 = vmmov %vm6470_vm2 }
 0x1d2   : > { %3683 = vst [vmem:[%s4230_s6 + $0xd0] sm:$0xff] %v3546_v54   ;;  %v3218_v32 = vmul.f32 0.25, %v3204_v8  ;;  %v2315_v54 = vmul.f32 %v5424_v44, %v2295_v28  ;;  %v2029_v4 = vrot.slane %v1990_v59, 7  ;;  %v3036_v8 = vadd.f32 %v5447_v17, %v3022_v6 }
 0x1d3   : > { %v2822_v1 = vsel %vm6488_vm14, %v6487_v37, %v6486_v20  ;;  %v2487_v38 = vadd.f32 %v2434_v42, %v5355_v43  ;;  %v2669_v49 = vmul.f32 %v5424_v44, %v2649_v10  ;;  %v1963_v6 = vmul.f32 %v5424_v44, %v1947_v62  ;;  %v3003_v42 = vpop.f32.mrf.mxu2  ;;  %v6492_v10 = vld [vmem:[#allocation3_spill] sm:$0xff]  ;;  %v2298_v62 = vpop.f32.mrf.mxu0  ;;  %vm6509_vm14 = vmmov %vm6472_vm1 }
 0x1d4   : > { %v3646_v33 = vpack.c.bf16 %v3218_v32, %v3217_v48  ;;  %v2329_v63 = vadd.f32 %v5447_v17, %v2315_v54  ;;  %v2030_v28 = vsel %vm6490_vm9, %v5871_v51, %v2029_v4  ;;  %v6491_v48 = vrot.slane %v5769_v22, 4  ;;  %vm6515_vm9 = vmmov %vm6470_vm2 }
 0x1d5   : > { %v3050_v32 = vmax.f32 %v3036_v8, 0.0  ;;  %v2497_v20 = vadd.f32 %v2468_v26, %v5959_v15  ;;  %v2766_v37 = vsel %vm5212_vm12, %v2734_v52, 0.0  ;;  %vm6493_vm0 = vnez %v6492_v10 }
 0x1d6   : > { %3703 = vst [vmem:[%s4230_s6 + $0x170] sm:$0xff] %v3646_v33   ;;  %v2118_v7 = vsel %vm6470_vm2, %v2115_v56, %v6491_v48  ;;  %v2060_v33 = vsel %vm6493_vm0, %v2030_v28, 0.0  ;;  %v2343_v54 = vmax.f32 %v2329_v63, 0.0  ;;  %v2683_v9 = vadd.f32 %v5447_v17, %v2669_v49 }
 0x1d7   : > { %v5989_v51 = vadd.f32 %v2060_v33, %v1990_v59  ;;  %v3087_v40 = vrot.slane %v3050_v32, 7  ;;  %v1977_v56 = vadd.f32 %v5447_v17, %v1963_v6  ;;  %v2501_v8 = vmul.f32 0.25, %v2487_v38 }
 0x1d8   : > { %v5994_v48 = vrot.slane %v2343_v54, 7  ;;  %v3023_v26 = vmul.f32 %v5424_v44, %v3003_v42  ;;  %v6494_v59 = vrot.slane %v5785_v5, 4  ;;  %v2697_v49 = vmax.f32 %v2683_v9, 0.0 }
 0x1d9   : > { %v2435_v52 = vrot.slane %v5989_v51, 4  ;;  %v3088_v28 = vsel %vm6472_vm1, %v5901_v3, %v3087_v40  ;;  %v6005_v6 = vadd.f32 %v2766_v37, %v2696_v2  ;;  %v1991_v33 = vmax.f32 %v1977_v56, 0.0 }
 0x1da   : > { %v3176_v63 = vsel %vm6495_vm4, %v3173_v47, %v6494_v59  ;;  %v2382_v38 = vsel %vm6496_vm3, %v5903_v41, %v5994_v48  ;;  %v3037_v42 = vadd.f32 %v5447_v17, %v3023_v26  ;;  %v2511_v53 = vmul.f32 0.25, %v2497_v20  ;;  %vm6517_vm4 = vmmov %vm6470_vm2 }
 0x1db   : > { %v2436_v3 = vsel %vm6497_vm15, %v2433_v25, %v2435_v52  ;;  %v3120_v11 = vsel %vm5212_vm12, %v3088_v28, 0.0  ;;  %v2413_v47 = vsel %vm5275_vm5, %v2382_v38, 0.0  ;;  %v6021_v41 = vrot.slane %v2697_v49, 7  ;;  %vm6502_vm12 = vmmov %vm6470_vm2 }
 0x1dc   : > { %v2488_v2 = vadd.f32 %v2436_v3, %v5431_v13  ;;  %v6019_v37 = vadd.f32 %v2413_v47, %v2343_v54  ;;  %v2031_v9 = vrot.slane %v1991_v33, 7  ;;  %v6498_v56 = vrot.slane %v5810_v58, 4  ;;  %vm6518_vm3 = vmmov %vm6470_vm2 }
 0x1dd   : > { %v6500_v25 = vrot.slane %v5842_v45, 4  ;;  %v6501_v36 = vrot.slane %v5754_v24, 4  ;;  %v3051_v26 = vmax.f32 %v3037_v42, 0.0  ;;  %v2316_v13 = vmul.f32 %v5424_v44, %v2298_v62  ;;  %vm6519_vm15 = vmmov %vm6472_vm1 }
 0x1de   : > { %v2470_v60 = vsel %vm6499_vm7, %v2467_v16, %v6498_v56  ;;  %v2851_v54 = vadd.f32 %v2822_v1, %v6005_v6  ;;  %v2502_v28 = vmul.f32 0.25, %v2488_v2  ;;  %v2736_v21 = vsel %vm6503_vm13, %v5949_v39, %v6021_v41  ;;  %v6507_v56 = vld [vmem:[#allocation9_spill] sm:$0xff]  ;;  %vm6522_vm7 = vmmov %vm6470_vm2 }
 0x1df   : > { %v2824_v20 = vsel %vm6502_vm12, %v6501_v36, %v6500_v25  ;;  %v2498_v59 = vadd.f32 %v2470_v60, %v6019_v37  ;;  %v6039_v16 = vadd.f32 %v3120_v11, %v3050_v32  ;;  %v2767_v24 = vsel %vm5275_vm5, %v2736_v21, 0.0  ;;  %v2652_v32 = vpop.f32.mrf.mxu1  ;;  %v3006_v11 = vpop.f32.mrf.mxu2  ;;  %vm6523_vm12 = vmmov %vm6472_vm1 }
 0x1e0   : > { %v2032_v38 = vsel %vm6504_vm11, %v2029_v4, %v2031_v9  ;;  %v6044_v42 = vrot.slane %v3051_v26, 7  ;;  %v3556_v62 = vpack.c.bf16 %v2502_v28, %v2501_v8  ;;  %v6046_v1 = vadd.f32 %v2767_v24, %v2697_v49  ;;  %vm6526_vm13 = vmmov %vm6470_vm2 }
 0x1e1   : > { %v2512_v3 = vmul.f32 0.25, %v2498_v59  ;;  %v6505_v47 = vrot.slane %v5769_v22, 4  ;;  %v2145_v2 = vadd.f32 %v2118_v7, %v5989_v51  ;;  %vm6508_vm8 = vnez %v6507_v56  ;;  %vm6527_vm11 = vmmov %vm6472_vm1 }
 0x1e2   : > { %v2061_v4 = vsel %vm6508_vm8, %v2032_v38, 0.0  ;;  %v3090_v8 = vsel %vm6509_vm14, %v3087_v40, %v6044_v42  ;;  %v2330_v49 = vadd.f32 %v5447_v17, %v2316_v13  ;;  %v2865_v9 = vmul.f32 0.25, %v2851_v54  ;;  %3685 = vst [vmem:[%s4230_s6 + $0xe0] sm:$0xff] %v3556_v62   ;;  %vm6529_vm14 = vmmov %vm6472_vm1 }
 0x1e3   : > { %v2120_v39 = vsel %vm6506_vm6, %v6505_v47, %v2119_v61  ;;  %v3581_v34 = vpack.c.bf16 %v2512_v3, %v2511_v53  ;;  %v2852_v22 = vadd.f32 %v2824_v20, %v6046_v1  ;;  %v2075_v60 = vadd.f32 %v2061_v4, %v1991_v33  ;;  %vm6528_vm6 = vmmov %vm6470_vm2 }
 0x1e4   : > { %v3205_v61 = vadd.f32 %v3176_v63, %v6039_v16  ;;  %v3121_v25 = vsel %vm5275_vm5, %v3090_v8, 0.0  ;;  %v6510_v7 = vrot.slane %v5889_v50, 4  ;;  %v6511_v51 = vrot.slane %v5785_v5, 4  ;;  %vm6513_vm5 = vmmov %vm6470_vm2 }
 0x1e5   : > { %v2344_v40 = vmax.f32 %v2330_v49, 0.0  ;;  %3690 = vst [vmem:[%s4230_s6 + $0x108] sm:$0xff] %v3581_v34   ;;  %v2787_v13 = vrot.slane %v6019_v37, 4  ;;  %v2866_v54 = vmul.f32 0.25, %v2852_v22  ;;  %v2146_v53 = vadd.f32 %v2120_v39, %v2075_v60 }
 0x1e6   : > { %v3178_v36 = vsel %vm6512_vm10, %v6511_v51, %v6510_v7  ;;  %v2437_v20 = vrot.slane %v2075_v60, 4  ;;  %v2159_v33 = vmul.f32 0.25, %v2145_v2  ;;  %v3135_v28 = vadd.f32 %v3121_v25, %v3051_v26  ;;  %vm6532_vm10 = vmmov %vm6470_vm2 }
 0x1e7   : > { %v6071_v63 = vrot.slane %v2344_v40, 7  ;;  %v2670_v46 = vmul.f32 %v5424_v44, %v2652_v32  ;;  %v3616_v59 = vpack.c.bf16 %v2866_v54, %v2865_v9  ;;  %v2160_v21 = vmul.f32 0.25, %v2146_v53  ;;  %v2301_v32 = vpop.f32.mrf.mxu0  ;;  %v3009_v22 = vpop.f32.mrf.mxu2 }
 0x1e8   : > { %v2438_v5 = vsel %vm6513_vm5, %v2435_v52, %v2437_v20  ;;  %v6514_v24 = vrot.slane %v5355_v43, 4  ;;  %v3219_v37 = vmul.f32 0.25, %v3205_v61  ;;  %v3206_v47 = vadd.f32 %v3178_v36, %v3135_v28  ;;  %vm6535_vm5 = vmmov %vm6472_vm1 }
 0x1e9   : > { %v2489_v62 = vadd.f32 %v2438_v5, %v5469_v23  ;;  %v6516_v26 = vrot.slane %v5959_v15, 4  ;;  %3697 = vst [vmem:[%s4230_s6 + $0x140] sm:$0xff] %v3616_v59   ;;  %v3551_v44 = vpack.c.bf16 %v2160_v21, %v2159_v33  ;;  %v2384_v52 = vsel %vm6472_vm1, %v5994_v48, %v6071_v63  ;;  %v3729_v48 = vld [vmem:[%s6183_s2] ss:$0 sm:$0xff] }
 0x1ea   : > { %v2486_v38 = vsel %vm6515_vm9, %v2437_v20, %v6514_v24  ;;  %v2684_v43 = vadd.f32 %v5447_v17, %v2670_v46  ;;  %v3220_v8 = vmul.f32 0.25, %v3206_v47  ;;  %v2414_v23 = vsel %vm6493_vm0, %v2384_v52, 0.0  ;;  %v2655_v17 = vpop.f32.mrf.mxu1 }
 0x1eb   : > { %v2490_v3 = vadd.f32 %v2486_v38, %v5518_v55  ;;  %v2788_v39 = vsel %vm6470_vm2, %v6516_v26, %v2787_v13  ;;  %v2503_v2 = vmul.f32 0.25, %v2489_v62  ;;  %v3141_v55 = vrot.slane %v6046_v1, 4  ;;  %3684 = vst [vmem:[%s4230_s6 + $0xd8] sm:$0xff] %v3551_v44  }
 0x1ec   : > { %v6092_v49 = vadd.f32 %v2414_v23, %v2344_v40  ;;  %v2698_v9 = vmax.f32 %v2684_v43, 0.0  ;;  %v3024_v34 = vmul.f32 %v3729_v48, %v3006_v11  ;;  %v2827_v60 = vrot.slane %v6005_v6, 4  ;;  %v3730_v40 = vld [vmem:[%s6184_s3] ss:$0 sm:$0xff] }
 0x1ed   : > { %v2504_v4 = vmul.f32 0.25, %v2490_v3  ;;  %v3651_v25 = vpack.c.bf16 %v3220_v8, %v3219_v37  ;;  %v2317_v7 = vmul.f32 %v3729_v48, %v2301_v32  ;;  %v2841_v1 = vadd.f32 %v2788_v39, %v5388_v57 }
 0x1ee   : > { %v2789_v51 = vrot.slane %v6092_v49, 4  ;;  %v2737_v36 = vrot.slane %v2698_v9, 7  ;;  %v3038_v54 = vadd.f32 %v3730_v40, %v3024_v34  ;;  %v3181_v11 = vrot.slane %v6039_v16, 4 }
 0x1ef   : > { %v3561_v61 = vpack.c.bf16 %v2504_v4, %v2503_v2  ;;  %v2331_v53 = vadd.f32 %v3730_v40, %v2317_v7  ;;  %v2671_v20 = vmul.f32 %v3729_v48, %v2655_v17  ;;  %v3025_v33 = vmul.f32 %v3729_v48, %v3009_v22  ;;  %3704 = vst [vmem:[%s4230_s6 + $0x178] sm:$0xff] %v3651_v25  }
 0x1f0   : > { %v3142_v6 = vsel %vm6517_vm4, %v2827_v60, %v3141_v55  ;;  %v2790_v28 = vsel %vm6518_vm3, %v2787_v13, %v2789_v51  ;;  %v2738_v46 = vsel %vm6519_vm15, %v6021_v41, %v2737_v36  ;;  %v3052_v59 = vmax.f32 %v3038_v54, 0.0 }
 0x1f1   : > { %3686 = vst [vmem:[%s4230_s6 + $0xe8] sm:$0xff] %v3561_v61   ;;  %v2842_v21 = vadd.f32 %v2790_v28, %v5439_v35  ;;  %v2768_v5 = vsel %vm6493_vm0, %v2738_v46, 0.0  ;;  %v2345_v24 = vmax.f32 %v2331_v53, 0.0  ;;  %v2685_v38 = vadd.f32 %v3730_v40, %v2671_v20 }
 0x1f2   : > { %v2855_v37 = vmul.f32 0.25, %v2841_v1  ;;  %v2782_v62 = vadd.f32 %v2768_v5, %v2698_v9  ;;  %v3091_v3 = vrot.slane %v3052_v59, 7  ;;  %v3039_v47 = vadd.f32 %v3730_v40, %v3025_v33 }
 0x1f3   : > { %v6520_v26 = vrot.slane %v5878_v30, 4  ;;  %v6521_v39 = vrot.slane %v5810_v58, 4  ;;  %v2856_v41 = vmul.f32 0.25, %v2842_v21  ;;  %v2385_v44 = vrot.slane %v2345_v24, 7 }
 0x1f4   : > { %v2699_v52 = vmax.f32 %v2685_v38, 0.0  ;;  %v3195_v35 = vadd.f32 %v3142_v6, %v5418_v27  ;;  %v3143_v43 = vrot.slane %v2782_v62, 4  ;;  %v3092_v32 = vsel %vm6523_vm12, %v6044_v42, %v3091_v3 }
 0x1f5   : > { %v2472_v13 = vsel %vm6522_vm7, %v6521_v39, %v6520_v26  ;;  %v3053_v2 = vmax.f32 %v3039_v47, 0.0  ;;  %v3591_v4 = vpack.c.bf16 %v2856_v41, %v2855_v37  ;;  %v6524_v8 = vrot.slane %v5892_v0, 4 }
 0x1f6   : > { %v6525_v23 = vrot.slane %v5842_v45, 4  ;;  %v2386_v9 = vsel %vm6527_vm11, %v6071_v63, %v2385_v44  ;;  %v2739_v48 = vrot.slane %v2699_v52, 7  ;;  %v2499_v34 = vadd.f32 %v2472_v13, %v6092_v49 }
 0x1f7   : > { %v3144_v17 = vsel %vm6528_vm6, %v3141_v55, %v3143_v43  ;;  %v3122_v22 = vsel %vm6493_vm0, %v3092_v32, 0.0  ;;  %v2415_v42 = vsel %vm6508_vm8, %v2386_v9, 0.0  ;;  %3692 = vst [vmem:[%s4230_s6 + $0x118] sm:$0xff] %v3591_v4   ;;  %v3093_v7 = vrot.slane %v3053_v2, 7  ;;  %vm6534_vm0 = vmmov %vm6470_vm2 }
 0x1f8   : > { %v2826_v58 = vsel %vm6526_vm13, %v6525_v23, %v6524_v8  ;;  %v3196_v61 = vadd.f32 %v3144_v17, %v5460_v29  ;;  %v2429_v45 = vadd.f32 %v2415_v42, %v2345_v24  ;;  %v2740_v25 = vsel %vm6529_vm14, %v2737_v36, %v2739_v48  ;;  %vm6536_vm9 = vmmov %vm6534_vm0 }
 0x1f9   : > { %v3209_v1 = vmul.f32 0.25, %v3195_v35  ;;  %v2853_v63 = vadd.f32 %v2826_v58, %v2782_v62  ;;  %v6530_v40 = vrot.slane %v5959_v15, 4  ;;  %v6531_v49 = vmov %v6520_v26  ;;  %vm6538_vm2 = vmmov %vm6534_vm0 }
 0x1fa   : > { %v2769_v10 = vsel %vm6508_vm8, %v2740_v25, 0.0  ;;  %v3210_v54 = vmul.f32 0.25, %v3196_v61  ;;  %v2791_v20 = vrot.slane %v2429_v45, 4  ;;  %v2513_v33 = vmul.f32 0.25, %v2499_v34  ;;  %vm6541_vm1 = vmmov %vm6534_vm0 }
 0x1fb   : > { %v2474_v55 = vsel %vm6532_vm10, %v6531_v49, %v6530_v40  ;;  %v2783_v29 = vadd.f32 %v2769_v10, %v2699_v52  ;;  %v3136_v6 = vadd.f32 %v3122_v22, %v3052_v59  ;;  %v6533_v36 = vmov %v6524_v8  ;;  %vm6542_vm4 = vmmov %vm6534_vm0 }
 0x1fc   : > { %v2500_v53 = vadd.f32 %v2474_v55, %v2429_v45  ;;  %v2828_v28 = vsel %vm6534_vm0, %v6533_v36, %v2827_v60  ;;  %v3094_v15 = vsel %vm6535_vm5, %v3091_v3, %v3093_v7  ;;  %v3626_v46 = vpack.c.bf16 %v3210_v54, %v3209_v1  ;;  %vm6544_vm3 = vmmov %vm6534_vm0 }
 0x1fd   : > { %v2792_v21 = vsel %vm6536_vm9, %v2789_v51, %v2791_v20  ;;  %v6537_v5 = vrot.slane %v5388_v57, 4  ;;  %v2854_v59 = vadd.f32 %v2828_v28, %v2783_v29  ;;  %v3145_v62 = vrot.slane %v2783_v29, 4 }
 0x1fe   : > { %v2514_v30 = vmul.f32 0.25, %v2500_v53  ;;  %v2843_v38 = vadd.f32 %v2792_v21, %v5487_v31  ;;  %v2867_v0 = vmul.f32 0.25, %v2853_v63  ;;  %3699 = vst [vmem:[%s4230_s6 + $0x150] sm:$0xff] %v3626_v46   ;;  %v6539_v60 = vrot.slane %v5928_v14, 4 }
 0x1ff   : > { %v2840_v24 = vsel %vm6538_vm2, %v2791_v20, %v6537_v5  ;;  %v6540_v3 = vrot.slane %v5889_v50, 4  ;;  %v3123_v57 = vsel %vm6508_vm8, %v3094_v15, 0.0  ;;  %v2868_v31 = vmul.f32 0.25, %v2854_v59  ;;  %vm6546_vm8 = vmmov %vm6534_vm0 }
 0x200   : > { %v2844_v37 = vadd.f32 %v2840_v24, %v5531_v19  ;;  %v3586_v51 = vpack.c.bf16 %v2514_v30, %v2513_v33  ;;  %v2857_v26 = vmul.f32 0.25, %v2843_v38  ;;  %v3146_v19 = vsel %vm6542_vm4, %v3143_v43, %v3145_v62 }
 0x201   : > { %v3180_v47 = vsel %vm6541_vm1, %v6540_v3, %v6539_v60  ;;  %v6543_v41 = vrot.slane %v5418_v27, 4  ;;  %v3197_v50 = vadd.f32 %v3146_v19, %v5510_v18  ;;  %v3137_v52 = vadd.f32 %v3123_v57, %v3053_v2 }
 0x202   : > { %v2858_v39 = vmul.f32 0.25, %v2844_v37  ;;  %v3207_v13 = vadd.f32 %v3180_v47, %v3136_v6  ;;  %3691 = vst [vmem:[%s4230_s6 + $0x110] sm:$0xff] %v3586_v51   ;;  %v3621_v35 = vpack.c.bf16 %v2868_v31, %v2867_v0  ;;  %v6545_v4 = vmov %v6539_v60 }
 0x203   : > { %v3194_v44 = vsel %vm6544_vm3, %v3145_v62, %v6543_v41  ;;  %v3182_v43 = vsel %vm6546_vm8, %v6545_v4, %v3181_v11  ;;  %v3211_v8 = vmul.f32 0.25, %v3197_v50 }
 0x204   : > { %v3596_v56 = vpack.c.bf16 %v2858_v39, %v2857_v26  ;;  %v3198_v32 = vadd.f32 %v3194_v44, %v5539_v12  ;;  %v3208_v23 = vadd.f32 %v3182_v43, %v3137_v52  ;;  %v3221_v58 = vmul.f32 0.25, %v3207_v13  ;;  %3698 = vst [vmem:[%s4230_s6 + $0x148] sm:$0xff] %v3621_v35  }
 0x206   : > { %3693 = vst [vmem:[%s4230_s6 + $0x120] sm:$0xff] %v3596_v56   ;;  %v3212_v27 = vmul.f32 0.25, %v3198_v32  ;;  %v3222_v9 = vmul.f32 0.25, %v3208_v23 }
 0x208   : > { %v3631_v18 = vpack.c.bf16 %v3212_v27, %v3211_v8  ;;  %v3656_v48 = vpack.c.bf16 %v3222_v9, %v3221_v58 }
 0x20a   : > { %3700 = vst [vmem:[%s4230_s6 + $0x158] sm:$0xff] %v3631_v18  }
 0x20b   : > { %3705 = vst [vmem:[%s4230_s6 + $0x180] sm:$0xff] %v3656_v48  }
 0x20c PF: > { %s14_s15 = sadd.s32 1, %s3737_s15  }
 0x20d   : > { %p11_p4 = scmp.ge.s32.totalorder %s14_s15, 4  }
 0x20f   :  { %13 = sbr.rel (!%p11_p4) target bundleno = 1 (0x1), region = 66 }

// kernel: forward.4
= control target key start
LH: loop header
LB: loop body
LE: loop exit
PB: predicated region body
PF: predicated region fallthrough
CT: control target
= control target key end

     0   :  { %s2406_s15 = smov 0   ;;  %s3351_s0 = inlined_call_operand.vmem [shape: bf16[416,512], index: 0, kind: input, shape index: {}]   ;;  %s3352_s1 = inlined_call_operand.vmem [shape: bf16[512,256], index: 1, kind: input, shape index: {}]   ;;  %s3353_s2 = inlined_call_operand.vmem [shape: f32[1,256], index: 2, kind: input, shape index: {}]   ;;  %s3354_s3 = inlined_call_operand.vmem [shape: f32[1,256], index: 3, kind: input, shape index: {}]   ;;  %s3355_s4 = inlined_call_operand.vmem [shape: bf16[416,256], index: 4, kind: output, shape index: {}]  }
   0x1 LB: > { %s1772_s16 = sadd.s32 4294967295, %s2379_s15   ;;  %p1776_p0 = scmp.ge.s32.totalorder %s2379_s15, 1  ;;  %s2379_s15 = sphi %s2406_s15, %s14_s15  }
   0x2   : > { %p164_p1 = scmp.lt.s32.totalorder %s2379_s15, 3 }
   0x4   : > { %p165_p2 = pnand %p1776_p0, %p164_p1 }
   0x6   : > { %168 = sbr.rel (%p165_p2) target bundleno = 600 (0x258), region = 36 }
   0xb   : > { %v2047_v0 = vld [vmem:[%s3352_s1 + $0x70] sm:$0xf]  ;;  %v2316_v1 = vld [vmem:[%s3352_s1 + $0x74] sm:$0xf0]  ;;  %v2039_v11 = vld [vmem:[%s3352_s1 + $0x60] sm:$0xf] }
   0xc   : > { %v2111_v2 = vld [vmem:[%s3352_s1 + $0xf0] sm:$0xf]  ;;  %v2048_v3 = vor.u32 %v2316_v1, %v2047_v0  ;;  %v2332_v4 = vld [vmem:[%s3352_s1 + $0xf4] sm:$0xf0]  ;;  %v2314_v13 = vld [vmem:[%s3352_s1 + $0x64] sm:$0xf0] }
   0xd   : > { %v2175_v5 = vld [vmem:[%s3352_s1 + $0x170] sm:$0xf]  ;;  %v2348_v6 = vld [vmem:[%s3352_s1 + $0x174] sm:$0xf0]  ;;  %v2112_v7 = vor.u32 %v2332_v4, %v2111_v2  ;;  %v2103_v14 = vld [vmem:[%s3352_s1 + $0xe0] sm:$0xf]  ;;  %v2040_v16 = vor.u32 %v2314_v13, %v2039_v11 }
   0xe   : > { %v2176_v8 = vor.u32 %v2348_v6, %v2175_v5  ;;  %v2239_v9 = vld [vmem:[%s3352_s1 + $0x1f0] sm:$0xf]  ;;  %v2364_v10 = vld [vmem:[%s3352_s1 + $0x1f4] sm:$0xf0]  ;;  %902 = vmatpush.bf16.msra.mxu0 %v2048_v3  ;;  %v2330_v15 = vld [vmem:[%s3352_s1 + $0xe4] sm:$0xf0] }
   0xf   : > { %v2240_v12 = vor.u32 %v2364_v10, %v2239_v9  ;;  %976 = vmatpush.bf16.msra.mxu1 %v2112_v7  ;;  %v2104_v17 = vor.u32 %v2330_v15, %v2103_v14  ;;  %v2167_v18 = vld [vmem:[%s3352_s1 + $0x160] sm:$0xf]  ;;  %v2346_v19 = vld [vmem:[%s3352_s1 + $0x164] sm:$0xf0]  ;;  %v2031_v23 = vld [vmem:[%s3352_s1 + $0x50] sm:$0xf] }
  0x10   : > { %1050 = vmatpush.bf16.msra.mxu2 %v2176_v8  ;;  %v2231_v20 = vld [vmem:[%s3352_s1 + $0x1e0] sm:$0xf]  ;;  %v2168_v21 = vor.u32 %v2346_v19, %v2167_v18  ;;  %v2362_v22 = vld [vmem:[%s3352_s1 + $0x1e4] sm:$0xf0]  ;;  %v2312_v24 = vld [vmem:[%s3352_s1 + $0x54] sm:$0xf0] }
  0x11   : > { %1124 = vmatpush.bf16.msra.mxu3 %v2240_v12  ;;  %v2232_v25 = vor.u32 %v2362_v22, %v2231_v20  ;;  %v2095_v26 = vld [vmem:[%s3352_s1 + $0xd0] sm:$0xf]  ;;  %v2328_v27 = vld [vmem:[%s3352_s1 + $0xd4] sm:$0xf0]  ;;  %v2032_v29 = vor.u32 %v2312_v24, %v2031_v23  ;;  %v2023_v35 = vld [vmem:[%s3352_s1 + $0x40] sm:$0xf] }
  0x12   : > { %v2159_v28 = vld [vmem:[%s3352_s1 + $0x150] sm:$0xf]  ;;  %903 = vmatpush.bf16.msra.mxu0 %v2040_v16  ;;  %v2344_v30 = vld [vmem:[%s3352_s1 + $0x154] sm:$0xf0]  ;;  %v2096_v33 = vor.u32 %v2328_v27, %v2095_v26  ;;  %v2310_v36 = vld [vmem:[%s3352_s1 + $0x44] sm:$0xf0] }
  0x13   : > { %v2223_v31 = vld [vmem:[%s3352_s1 + $0x1d0] sm:$0xf]  ;;  %v2360_v32 = vld [vmem:[%s3352_s1 + $0x1d4] sm:$0xf0]  ;;  %977 = vmatpush.bf16.msra.mxu1 %v2104_v17  ;;  %v2160_v34 = vor.u32 %v2344_v30, %v2159_v28  ;;  %v2087_v37 = vld [vmem:[%s3352_s1 + $0xc0] sm:$0xf]  ;;  %v2024_v44 = vor.u32 %v2310_v36, %v2023_v35 }
  0x14   : > { %1051 = vmatpush.bf16.msra.mxu2 %v2168_v21  ;;  %v2224_v38 = vor.u32 %v2360_v32, %v2223_v31  ;;  %v2326_v39 = vld [vmem:[%s3352_s1 + $0xc4] sm:$0xf0]  ;;  %v2151_v40 = vld [vmem:[%s3352_s1 + $0x140] sm:$0xf]  ;;  %v2015_v47 = vld [vmem:[%s3352_s1 + $0x30] sm:$0xf] }
  0x15   : > { %1125 = vmatpush.bf16.msra.mxu3 %v2232_v25  ;;  %v2342_v41 = vld [vmem:[%s3352_s1 + $0x144] sm:$0xf0]  ;;  %v2215_v42 = vld [vmem:[%s3352_s1 + $0x1c0] sm:$0xf]  ;;  %v2088_v45 = vor.u32 %v2326_v39, %v2087_v37  ;;  %v2308_v48 = vld [vmem:[%s3352_s1 + $0x34] sm:$0xf0] }
  0x16   : > { %v2358_v43 = vld [vmem:[%s3352_s1 + $0x1c4] sm:$0xf0]  ;;  %904 = vmatpush.bf16.msra.mxu0 %v2032_v29  ;;  %v2152_v46 = vor.u32 %v2342_v41, %v2151_v40  ;;  %v2079_v49 = vld [vmem:[%s3352_s1 + $0xb0] sm:$0xf]  ;;  %v2324_v51 = vld [vmem:[%s3352_s1 + $0xb4] sm:$0xf0]  ;;  %v2016_v56 = vor.u32 %v2308_v48, %v2015_v47 }
  0x17   : > { %978 = vmatpush.bf16.msra.mxu1 %v2096_v33  ;;  %v2216_v50 = vor.u32 %v2358_v43, %v2215_v42  ;;  %v2143_v52 = vld [vmem:[%s3352_s1 + $0x130] sm:$0xf]  ;;  %v2340_v53 = vld [vmem:[%s3352_s1 + $0x134] sm:$0xf0]  ;;  %v2080_v57 = vor.u32 %v2324_v51, %v2079_v49  ;;  %v2007_v59 = vld [vmem:[%s3352_s1 + $0x20] sm:$0xf] }
  0x18   : > { %1052 = vmatpush.bf16.msra.mxu2 %v2160_v34  ;;  %v2207_v54 = vld [vmem:[%s3352_s1 + $0x1b0] sm:$0xf]  ;;  %v2356_v55 = vld [vmem:[%s3352_s1 + $0x1b4] sm:$0xf0]  ;;  %v2144_v58 = vor.u32 %v2340_v53, %v2143_v52  ;;  %v2306_v60 = vld [vmem:[%s3352_s1 + $0x24] sm:$0xf0] }
  0x19   : > { %1126 = vmatpush.bf16.msra.mxu3 %v2224_v38  ;;  %v2071_v61 = vld [vmem:[%s3352_s1 + $0xa0] sm:$0xf]  ;;  %v2208_v62 = vor.u32 %v2356_v55, %v2207_v54  ;;  %v2322_v63 = vld [vmem:[%s3352_s1 + $0xa4] sm:$0xf0]  ;;  %v2008_v4 = vor.u32 %v2306_v60, %v2007_v59  ;;  %v1999_v5 = vld [vmem:[%s3352_s1 + $0x10] sm:$0xf] }
  0x1a   : > { %905 = vmatpush.bf16.msra.mxu0 %v2024_v44  ;;  %v2135_v0 = vld [vmem:[%s3352_s1 + $0x120] sm:$0xf]  ;;  %v2338_v1 = vld [vmem:[%s3352_s1 + $0x124] sm:$0xf0]  ;;  %v2304_v6 = vld [vmem:[%s3352_s1 + $0x14] sm:$0xf0]  ;;  %v2072_v7 = vor.u32 %v2322_v63, %v2071_v61 }
  0x1b   : > { %979 = vmatpush.bf16.msra.mxu1 %v2088_v45  ;;  %v2199_v2 = vld [vmem:[%s3352_s1 + $0x1a0] sm:$0xf]  ;;  %v2354_v3 = vld [vmem:[%s3352_s1 + $0x1a4] sm:$0xf0]  ;;  %v2136_v8 = vor.u32 %v2338_v1, %v2135_v0  ;;  %v2063_v9 = vld [vmem:[%s3352_s1 + $0x90] sm:$0xf]  ;;  %v2000_v18 = vor.u32 %v2304_v6, %v1999_v5 }
  0x1c   : > { %1053 = vmatpush.bf16.msra.mxu2 %v2152_v46  ;;  %v2320_v10 = vld [vmem:[%s3352_s1 + $0x94] sm:$0xf0]  ;;  %v2127_v11 = vld [vmem:[%s3352_s1 + $0x110] sm:$0xf]  ;;  %v2200_v12 = vor.u32 %v2354_v3, %v2199_v2  ;;  %s192_s5 = smul.u32 26, %s1772_s16 }
  0x1d   : > { %1127 = vmatpush.bf16.msra.mxu3 %v2216_v50  ;;  %v2336_v13 = vld [vmem:[%s3352_s1 + $0x114] sm:$0xf0]  ;;  %v2191_v14 = vld [vmem:[%s3352_s1 + $0x190] sm:$0xf]  ;;  %v1991_v16 = vld [vmem:[%s3352_s1] sm:$0xf]  ;;  %v2064_v21 = vor.u32 %v2320_v10, %v2063_v9 }
  0x1e   : > { %906 = vmatpush.bf16.msra.mxu0 %v2016_v56  ;;  %v2352_v15 = vld [vmem:[%s3352_s1 + $0x194] sm:$0xf0]  ;;  %v2302_v17 = vld [vmem:[%s3352_s1 + $0x4] sm:$0xf0]  ;;  %v2055_v19 = vld [vmem:[%s3352_s1 + $0x80] sm:$0xf]  ;;  %v2128_v22 = vor.u32 %v2336_v13, %v2127_v11 }
  0x1f   : > { %980 = vmatpush.bf16.msra.mxu1 %v2080_v57  ;;  %v2318_v20 = vld [vmem:[%s3352_s1 + $0x84] sm:$0xf0]  ;;  %p193_p3 = scmp.lt.s32.totalorder %s192_s5, 51  ;;  %v2119_v23 = vld [vmem:[%s3352_s1 + $0x100] sm:$0xf]  ;;  %v2192_v26 = vor.u32 %v2352_v15, %v2191_v14  ;;  %v1992_v32 = vor.u32 %v2302_v17, %v1991_v16 }
  0x20   : > { %1054 = vmatpush.bf16.msra.mxu2 %v2144_v58  ;;  %v2334_v24 = vld [vmem:[%s3352_s1 + $0x104] sm:$0xf0]  ;;  %v2183_v25 = vld [vmem:[%s3352_s1 + $0x180] sm:$0xf]  ;;  %v2347_v28 = vld [vmem:[%s3352_s1 + $0x174] sm:$0xf]  ;;  %v2056_v35 = vor.u32 %v2318_v20, %v2055_v19 }
  0x21   : > { %1128 = vmatpush.bf16.msra.mxu3 %v2208_v62  ;;  %v2350_v27 = vld [vmem:[%s3352_s1 + $0x184] sm:$0xf0]  ;;  %s3387_s5 = smov (!%p193_p3, %s192_s5), 51  ;;  %v2177_v29 = vld [vmem:[%s3352_s1 + $0x178] sm:$0xf0]  ;;  %v2120_v36 = vor.u32 %v2334_v24, %v2119_v23 }
  0x22   : > { %907 = vmatpush.bf16.msra.mxu0 %v2008_v4  ;;  %v2363_v30 = vld [vmem:[%s3352_s1 + $0x1f4] sm:$0xf]  ;;  %v2241_v31 = vld [vmem:[%s3352_s1 + $0x1f8] sm:$0xf0]  ;;  %s2247_s8 = sshll.u32 %s3387_s5, 4  ;;  %v2184_v41 = vor.u32 %v2350_v27, %v2183_v25  ;;  %v2180_v45 = vor.u32 %v2347_v28, %v2177_v29  ;;  %s2248_s21 = sshll.u32 %s3387_s5, 3 }
  0x23   : > { %981 = vmatpush.bf16.msra.mxu1 %v2072_v7  ;;  %v2315_v33 = vld [vmem:[%s3352_s1 + $0x74] sm:$0xf]  ;;  %v2049_v34 = vld [vmem:[%s3352_s1 + $0x78] sm:$0xf0]  ;;  %s2632_s16 = scalar_lea.vmem %s3351_s0, %s2247_s8  ;;  %v2345_v39 = vld [vmem:[%s3352_s1 + $0x164] sm:$0xf]  ;;  %v2244_v51 = vor.u32 %v2363_v30, %v2241_v31  ;;  %s3181_s24 = scalar_lea.vmem %s3355_s4, %s2248_s21 }
  0x24   : > { %1055 = vmatpush.bf16.msra.mxu2 %v2136_v8  ;;  %v2331_v37 = vld [vmem:[%s3352_s1 + $0xf4] sm:$0xf]  ;;  %v2113_v38 = vld [vmem:[%s3352_s1 + $0xf8] sm:$0xf0]  ;;  %v2169_v40 = vld [vmem:[%s3352_s1 + $0x168] sm:$0xf0]  ;;  %v2052_v58 = vor.u32 %v2315_v33, %v2049_v34 }
  0x25   : > { %1129 = vmatpush.bf16.msra.mxu3 %v2200_v12  ;;  %v1783_v42 = vld [vmem:[%s2632_s16] sm:$0xf]  ;;  %v2251_v43 = vld [vmem:[%s2632_s16 + $0xc] sm:$0xf0]  ;;  %v2249_v44 = vld [vmem:[%s2632_s16 + $0x4] sm:$0xf]  ;;  %v2116_v59 = vor.u32 %v2331_v37, %v2113_v38  ;;  %v2172_v60 = vor.u32 %v2345_v39, %v2169_v40 }
  0x26   : > { %908 = vmatpush.bf16.msra.mxu0 %v2000_v18  ;;  %v2361_v46 = vld [vmem:[%s3352_s1 + $0x1e4] sm:$0xf]  ;;  %v2652_v47 = vor.u32 %v2251_v43, %v1783_v42  ;;  %v1785_v48 = vld [vmem:[%s2632_s16 + $0x10] sm:$0xf0]  ;;  %v1791_v49 = vld [vmem:[%s2632_s16 + $0x8] sm:$0xf] }
  0x27   : > { %982 = vmatpush.bf16.msra.mxu1 %v2064_v21  ;;  %v2252_v50 = vld [vmem:[%s2632_s16 + $0x14] sm:$0xf0]  ;;  %v2657_v52 = vor.u32 %v2249_v44, %v1785_v48  ;;  %v2250_v54 = vld [vmem:[%s2632_s16 + $0xc] sm:$0xf]  ;;  %v1793_v55 = vld [vmem:[%s2632_s16 + $0x18] sm:$0xf0] }
  0x28   : > { %1056 = vmatpush.bf16.msra.mxu2 %v2128_v22  ;;  %v2659_v53 = vor.u32 %v2252_v50, %v1791_v49  ;;  %v2233_v56 = vld [vmem:[%s3352_s1 + $0x1e8] sm:$0xf0]  ;;  %v2666_v57 = vor.u32 %v2250_v54, %v1793_v55  ;;  %v2313_v61 = vld [vmem:[%s3352_s1 + $0x64] sm:$0xf]  ;;  %v1799_v4 = vld [vmem:[%s2632_s16 + $0x20] sm:$0xf] }
  0x29   : > { %1130 = vmatpush.bf16.msra.mxu3 %v2192_v26  ;;  %v2041_v62 = vld [vmem:[%s3352_s1 + $0x68] sm:$0xf0]  ;;  %v2236_v63 = vor.u32 %v2361_v46, %v2233_v56  ;;  %v2329_v0 = vld [vmem:[%s3352_s1 + $0xe4] sm:$0xf]  ;;  %v2255_v5 = vld [vmem:[%s2632_s16 + $0x2c] sm:$0xf0] }
  0x2a   : > { %909 = vmatpush.bf16.msra.mxu0 %v1992_v32  ;;  %v2105_v1 = vld [vmem:[%s3352_s1 + $0xe8] sm:$0xf0]  ;;  %v2044_v2 = vor.u32 %v2313_v61, %v2041_v62  ;;  %v2253_v6 = vld [vmem:[%s2632_s16 + $0x24] sm:$0xf]  ;;  %v1801_v7 = vld [vmem:[%s2632_s16 + $0x30] sm:$0xf0]  ;;  %v2692_v12 = vor.u32 %v2255_v5, %v1799_v4 }
  0x2b   : > { %983 = vmatpush.bf16.msra.mxu1 %v2056_v35  ;;  %v2108_v3 = vor.u32 %v2329_v0, %v2105_v1  ;;  %v1807_v8 = vld [vmem:[%s2632_s16 + $0x28] sm:$0xf]  ;;  %v2256_v9 = vld [vmem:[%s2632_s16 + $0x34] sm:$0xf0]  ;;  %v2254_v10 = vld [vmem:[%s2632_s16 + $0x2c] sm:$0xf]  ;;  %v2694_v13 = vor.u32 %v2253_v6, %v1801_v7 }
  0x2c   : > { %1057 = vmatpush.bf16.msra.mxu2 %v2120_v36  ;;  %v1809_v11 = vld [vmem:[%s2632_s16 + $0x38] sm:$0xf0]  ;;  %v2696_v14 = vor.u32 %v2256_v9, %v1807_v8  ;;  %v2343_v16 = vld [vmem:[%s3352_s1 + $0x154] sm:$0xf]  ;;  %v1815_v28 = vld [vmem:[%s2632_s16 + $0x40] sm:$0xf] }
  0x2d   : > { %1131 = vmatpush.bf16.msra.mxu3 %v2184_v41  ;;  %910 = vmatmul.bf16.vlgmr.msra.gmra.mxu0 %v2652_v47  ;;  %v2698_v15 = vor.u32 %v2254_v10, %v1809_v11  ;;  %v2161_v17 = vld [vmem:[%s3352_s1 + $0x158] sm:$0xf0]  ;;  %v2359_v18 = vld [vmem:[%s3352_s1 + $0x1d4] sm:$0xf]  ;;  %v2259_v29 = vld [vmem:[%s2632_s16 + $0x4c] sm:$0xf0] }
  0x2e   : > { %984 = vmatmul.bf16.vlgmr.msra.gmra.mxu1 %v2657_v52  ;;  %1198 = vmatpush.bf16.msrb.mxu0 %v2052_v58  ;;  %v2164_v19 = vor.u32 %v2343_v16, %v2161_v17  ;;  %v2225_v20 = vld [vmem:[%s3352_s1 + $0x1d8] sm:$0xf0]  ;;  %v2311_v21 = vld [vmem:[%s3352_s1 + $0x54] sm:$0xf]  ;;  %v2257_v30 = vld [vmem:[%s2632_s16 + $0x44] sm:$0xf]  ;;  %v2736_v36 = vor.u32 %v2259_v29, %v1815_v28 }
  0x2f   : > { %1058 = vmatmul.bf16.vlgmr.msra.gmra.mxu2 %v2659_v53  ;;  %1272 = vmatpush.bf16.msrb.mxu1 %v2116_v59  ;;  %v2033_v22 = vld [vmem:[%s3352_s1 + $0x58] sm:$0xf0]  ;;  %v2228_v23 = vor.u32 %v2359_v18, %v2225_v20  ;;  %v2327_v25 = vld [vmem:[%s3352_s1 + $0xd4] sm:$0xf]  ;;  %v1823_v32 = vld [vmem:[%s2632_s16 + $0x48] sm:$0xf] }
  0x30   : > { %1346 = vmatpush.bf16.msrb.mxu2 %v2180_v45  ;;  %1132 = vmatmul.bf16.vlgmr.msra.gmra.mxu3 %v2666_v57  ;;  %v2036_v24 = vor.u32 %v2311_v21, %v2033_v22  ;;  %v2097_v26 = vld [vmem:[%s3352_s1 + $0xd8] sm:$0xf0]  ;;  %v1817_v31 = vld [vmem:[%s2632_s16 + $0x50] sm:$0xf0]  ;;  %v2260_v33 = vld [vmem:[%s2632_s16 + $0x54] sm:$0xf0] }
  0x31   : > { %1420 = vmatpush.bf16.msrb.mxu3 %v2244_v51  ;;  %v2100_v27 = vor.u32 %v2327_v25, %v2097_v26  ;;  %v2258_v34 = vld [vmem:[%s2632_s16 + $0x4c] sm:$0xf]  ;;  %v1825_v35 = vld [vmem:[%s2632_s16 + $0x58] sm:$0xf0]  ;;  %v2738_v37 = vor.u32 %v2257_v30, %v1817_v31  ;;  %v2740_v38 = vor.u32 %v2260_v33, %v1823_v32  ;;  %v2341_v40 = vld [vmem:[%s3352_s1 + $0x144] sm:$0xf] }
  0x32   : > { %1199 = vmatpush.bf16.msrb.mxu0 %v2044_v2  ;;  %v2742_v39 = vor.u32 %v2258_v34, %v1825_v35  ;;  %v2153_v41 = vld [vmem:[%s3352_s1 + $0x148] sm:$0xf0]  ;;  %v1831_v43 = vld [vmem:[%s2632_s16 + $0x60] sm:$0xf]  ;;  %v2263_v44 = vld [vmem:[%s2632_s16 + $0x6c] sm:$0xf0] }
  0x33   : > { %1273 = vmatpush.bf16.msrb.mxu1 %v2108_v3  ;;  %v2156_v42 = vor.u32 %v2341_v40, %v2153_v41  ;;  %v2261_v45 = vld [vmem:[%s2632_s16 + $0x64] sm:$0xf]  ;;  %v1833_v46 = vld [vmem:[%s2632_s16 + $0x70] sm:$0xf0]  ;;  %v1839_v48 = vld [vmem:[%s2632_s16 + $0x68] sm:$0xf]  ;;  %v2762_v54 = vor.u32 %v2263_v44, %v1831_v43 }
  0x34   : > { %1347 = vmatpush.bf16.msrb.mxu2 %v2172_v60  ;;  %v2264_v49 = vld [vmem:[%s2632_s16 + $0x74] sm:$0xf0]  ;;  %v2262_v50 = vld [vmem:[%s2632_s16 + $0x6c] sm:$0xf]  ;;  %v1841_v51 = vld [vmem:[%s2632_s16 + $0x78] sm:$0xf0]  ;;  %v2764_v55 = vor.u32 %v2261_v45, %v1833_v46 }
  0x35   : > { %1421 = vmatpush.bf16.msrb.mxu3 %v2236_v63  ;;  %v2766_v56 = vor.u32 %v2264_v49, %v1839_v48  ;;  %v2768_v58 = vor.u32 %v2262_v50, %v1841_v51  ;;  %v2357_v59 = vld [vmem:[%s3352_s1 + $0x1c4] sm:$0xf]  ;;  %v2217_v60 = vld [vmem:[%s3352_s1 + $0x1c8] sm:$0xf0]  ;;  %v1847_v4 = vld [vmem:[%s2632_s16 + $0x80] sm:$0xf] }
  0x36   : > { %1200 = vmatpush.bf16.msrb.mxu0 %v2036_v24  ;;  %v2309_v61 = vld [vmem:[%s3352_s1 + $0x44] sm:$0xf]  ;;  %v2220_v62 = vor.u32 %v2357_v59, %v2217_v60  ;;  %v2025_v63 = vld [vmem:[%s3352_s1 + $0x48] sm:$0xf0]  ;;  %v2267_v5 = vld [vmem:[%s2632_s16 + $0x8c] sm:$0xf0] }
  0x37   : > { %1274 = vmatpush.bf16.msrb.mxu1 %v2100_v27  ;;  %v2325_v0 = vld [vmem:[%s3352_s1 + $0xc4] sm:$0xf]  ;;  %v2089_v1 = vld [vmem:[%s3352_s1 + $0xc8] sm:$0xf0]  ;;  %v2028_v2 = vor.u32 %v2309_v61, %v2025_v63  ;;  %v1849_v7 = vld [vmem:[%s2632_s16 + $0x90] sm:$0xf0]  ;;  %v2800_v16 = vor.u32 %v2267_v5, %v1847_v4 }
  0x38   : > { %1348 = vmatpush.bf16.msrb.mxu2 %v2164_v19  ;;  %v2092_v3 = vor.u32 %v2325_v0, %v2089_v1  ;;  %v2265_v6 = vld [vmem:[%s2632_s16 + $0x84] sm:$0xf]  ;;  %v1855_v8 = vld [vmem:[%s2632_s16 + $0x88] sm:$0xf]  ;;  %v2268_v9 = vld [vmem:[%s2632_s16 + $0x94] sm:$0xf0] }
  0x39   : > { %1422 = vmatpush.bf16.msrb.mxu3 %v2228_v23  ;;  %v2266_v10 = vld [vmem:[%s2632_s16 + $0x8c] sm:$0xf]  ;;  %v1857_v11 = vld [vmem:[%s2632_s16 + $0x98] sm:$0xf0]  ;;  %v2802_v17 = vor.u32 %v2265_v6, %v1849_v7  ;;  %v2804_v18 = vor.u32 %v2268_v9, %v1855_v8  ;;  %v2339_v20 = vld [vmem:[%s3352_s1 + $0x134] sm:$0xf] }
  0x3a   : > { %1201 = vmatpush.bf16.msrb.mxu0 %v2028_v2  ;;  %v2806_v19 = vor.u32 %v2266_v10, %v1857_v11  ;;  %v2145_v21 = vld [vmem:[%s3352_s1 + $0x138] sm:$0xf0]  ;;  %v2355_v22 = vld [vmem:[%s3352_s1 + $0x1b4] sm:$0xf]  ;;  %v1863_v32 = vld [vmem:[%s2632_s16 + $0xa0] sm:$0xf] }
  0x3b   : > { %1275 = vmatpush.bf16.msrb.mxu1 %v2092_v3  ;;  %v2148_v23 = vor.u32 %v2339_v20, %v2145_v21  ;;  %v2209_v24 = vld [vmem:[%s3352_s1 + $0x1b8] sm:$0xf0]  ;;  %v2307_v25 = vld [vmem:[%s3352_s1 + $0x34] sm:$0xf]  ;;  %v2271_v33 = vld [vmem:[%s2632_s16 + $0xac] sm:$0xf0] }
  0x3c   : > { %1349 = vmatpush.bf16.msrb.mxu2 %v2156_v42  ;;  %v2017_v26 = vld [vmem:[%s3352_s1 + $0x38] sm:$0xf0]  ;;  %v2212_v27 = vor.u32 %v2355_v22, %v2209_v24  ;;  %v2323_v29 = vld [vmem:[%s3352_s1 + $0xb4] sm:$0xf]  ;;  %v2269_v34 = vld [vmem:[%s2632_s16 + $0xa4] sm:$0xf]  ;;  %v2844_v44 = vor.u32 %v2271_v33, %v1863_v32 }
  0x3d   : > { %915 = vmatmul.bf16.gmra.mxu0 %v2692_v12  ;;  %1423 = vmatpush.bf16.msrb.mxu3 %v2220_v62  ;;  %v2020_v28 = vor.u32 %v2307_v25, %v2017_v26  ;;  %v2081_v30 = vld [vmem:[%s3352_s1 + $0xb8] sm:$0xf0]  ;;  %v1865_v35 = vld [vmem:[%s2632_s16 + $0xb0] sm:$0xf0]  ;;  %v1871_v40 = vld [vmem:[%s2632_s16 + $0xa8] sm:$0xf] }
  0x3e   : > { %989 = vmatmul.bf16.gmra.mxu1 %v2694_v13  ;;  %v2084_v31 = vor.u32 %v2323_v29, %v2081_v30  ;;  %v2272_v41 = vld [vmem:[%s2632_s16 + $0xb4] sm:$0xf0]  ;;  %v2270_v42 = vld [vmem:[%s2632_s16 + $0xac] sm:$0xf]  ;;  %v1873_v43 = vld [vmem:[%s2632_s16 + $0xb8] sm:$0xf0]  ;;  %v2846_v45 = vor.u32 %v2269_v34, %v1865_v35 }
  0x3f   : > { %1063 = vmatmul.bf16.gmra.mxu2 %v2696_v14  ;;  %1202 = vmatpush.bf16.msrb.mxu0 %v2020_v28  ;;  %v2848_v46 = vor.u32 %v2272_v41, %v1871_v40  ;;  %v2850_v48 = vor.u32 %v2270_v42, %v1873_v43  ;;  %v1879_v49 = vld [vmem:[%s2632_s16 + $0xc0] sm:$0xf]  ;;  %v2275_v50 = vld [vmem:[%s2632_s16 + $0xcc] sm:$0xf0]  ;;  %v2273_v51 = vld [vmem:[%s2632_s16 + $0xc4] sm:$0xf] }
  0x40   : > { %1137 = vmatmul.bf16.gmra.mxu3 %v2698_v15  ;;  %1350 = vmatpush.bf16.msrb.mxu2 %v2148_v23  ;;  %v1881_v59 = vld [vmem:[%s2632_s16 + $0xd0] sm:$0xf0]  ;;  %v1887_v60 = vld [vmem:[%s2632_s16 + $0xc8] sm:$0xf]  ;;  %v2276_v61 = vld [vmem:[%s2632_s16 + $0xd4] sm:$0xf0]  ;;  %v2864_v0 = vor.u32 %v2275_v50, %v1879_v49 }
  0x41   : > { %1424 = vmatpush.bf16.msrb.mxu3 %v2212_v27  ;;  %1276 = vmatpush.bf16.msrb.mxu1 %v2084_v31  ;;  %v2274_v62 = vld [vmem:[%s2632_s16 + $0xcc] sm:$0xf]  ;;  %v1889_v63 = vld [vmem:[%s2632_s16 + $0xd8] sm:$0xf0]  ;;  %v2866_v1 = vor.u32 %v2273_v51, %v1881_v59  ;;  %v2868_v2 = vor.u32 %v2276_v61, %v1887_v60  ;;  %v2337_v4 = vld [vmem:[%s3352_s1 + $0x124] sm:$0xf] }
  0x42   : > { %v2870_v3 = vor.u32 %v2274_v62, %v1889_v63  ;;  %v2137_v5 = vld [vmem:[%s3352_s1 + $0x128] sm:$0xf0]  ;;  %v1895_v7 = vld [vmem:[%s2632_s16 + $0xe0] sm:$0xf]  ;;  %v2279_v8 = vld [vmem:[%s2632_s16 + $0xec] sm:$0xf0] }
  0x43   : > { %v2140_v6 = vor.u32 %v2337_v4, %v2137_v5  ;;  %v2277_v9 = vld [vmem:[%s2632_s16 + $0xe4] sm:$0xf]  ;;  %v1897_v10 = vld [vmem:[%s2632_s16 + $0xf0] sm:$0xf0]  ;;  %v1903_v11 = vld [vmem:[%s2632_s16 + $0xe8] sm:$0xf]  ;;  %v2890_v23 = vor.u32 %v2279_v8, %v1895_v7 }
  0x44   : > { %v2280_v20 = vld [vmem:[%s2632_s16 + $0xf4] sm:$0xf0]  ;;  %v2278_v21 = vld [vmem:[%s2632_s16 + $0xec] sm:$0xf]  ;;  %v1905_v22 = vld [vmem:[%s2632_s16 + $0xf8] sm:$0xf0]  ;;  %v2892_v24 = vor.u32 %v2277_v9, %v1897_v10 }
  0x45   : > { %1351 = vmatpush.bf16.msrb.mxu2 %v2140_v6  ;;  %v2894_v25 = vor.u32 %v2280_v20, %v1903_v11  ;;  %v2353_v26 = vld [vmem:[%s3352_s1 + $0x1a4] sm:$0xf]  ;;  %v2201_v27 = vld [vmem:[%s3352_s1 + $0x1a8] sm:$0xf0]  ;;  %v2905_v29 = vor.u32 %v2278_v21, %v1905_v22  ;;  %v1911_v40 = vld [vmem:[%s2632_s16 + $0x100] sm:$0xf] }
  0x46   : > { %v2305_v28 = vld [vmem:[%s3352_s1 + $0x24] sm:$0xf]  ;;  %v2204_v30 = vor.u32 %v2353_v26, %v2201_v27  ;;  %v2009_v31 = vld [vmem:[%s3352_s1 + $0x28] sm:$0xf0]  ;;  %v2283_v41 = vld [vmem:[%s2632_s16 + $0x10c] sm:$0xf0] }
  0x47   : > { %v2321_v32 = vld [vmem:[%s3352_s1 + $0xa4] sm:$0xf]  ;;  %v2073_v33 = vld [vmem:[%s3352_s1 + $0xa8] sm:$0xf0]  ;;  %v2012_v34 = vor.u32 %v2305_v28, %v2009_v31  ;;  %v1913_v43 = vld [vmem:[%s2632_s16 + $0x110] sm:$0xf0]  ;;  %v2928_v60 = vor.u32 %v2283_v41, %v1911_v40 }
  0x48   : > { %v2076_v35 = vor.u32 %v2321_v32, %v2073_v33  ;;  %1425 = vmatpush.bf16.msrb.mxu3 %v2204_v30  ;;  %v2281_v42 = vld [vmem:[%s2632_s16 + $0x104] sm:$0xf]  ;;  %v1919_v49 = vld [vmem:[%s2632_s16 + $0x108] sm:$0xf]  ;;  %v2284_v50 = vld [vmem:[%s2632_s16 + $0x114] sm:$0xf0] }
  0x49   : > { %1203 = vmatpush.bf16.msrb.mxu0 %v2012_v34  ;;  %v2282_v51 = vld [vmem:[%s2632_s16 + $0x10c] sm:$0xf]  ;;  %v1921_v59 = vld [vmem:[%s2632_s16 + $0x118] sm:$0xf0]  ;;  %v2930_v62 = vor.u32 %v2281_v42, %v1913_v43  ;;  %v2932_v63 = vor.u32 %v2284_v50, %v1919_v49  ;;  %v2335_v11 = vld [vmem:[%s3352_s1 + $0x114] sm:$0xf] }
  0x4a   : > { %1277 = vmatpush.bf16.msrb.mxu1 %v2076_v35  ;;  %v2934_v5 = vor.u32 %v2282_v51, %v1921_v59  ;;  %v2129_v20 = vld [vmem:[%s3352_s1 + $0x118] sm:$0xf0]  ;;  %v2351_v21 = vld [vmem:[%s3352_s1 + $0x194] sm:$0xf]  ;;  %v1927_v42 = vld [vmem:[%s2632_s16 + $0x120] sm:$0xf] }
  0x4b   : > { %v2132_v26 = vor.u32 %v2335_v11, %v2129_v20  ;;  %v2193_v27 = vld [vmem:[%s3352_s1 + $0x198] sm:$0xf0]  ;;  %v2303_v28 = vld [vmem:[%s3352_s1 + $0x14] sm:$0xf]  ;;  %v2287_v43 = vld [vmem:[%s2632_s16 + $0x12c] sm:$0xf0] }
  0x4c   : > { %v2001_v30 = vld [vmem:[%s3352_s1 + $0x18] sm:$0xf0]  ;;  %v2196_v33 = vor.u32 %v2351_v21, %v2193_v27  ;;  %v2319_v35 = vld [vmem:[%s3352_s1 + $0x94] sm:$0xf]  ;;  %v2285_v49 = vld [vmem:[%s2632_s16 + $0x124] sm:$0xf] }
  0x4d   : > { %920 = vmatmul.bf16.gmra.mxu0 %v2736_v36  ;;  %v2004_v34 = vor.u32 %v2303_v28, %v2001_v30  ;;  %v2065_v40 = vld [vmem:[%s3352_s1 + $0x98] sm:$0xf0]  ;;  %1352 = vmatpush.bf16.msrb.mxu2 %v2132_v26  ;;  %v1929_v50 = vld [vmem:[%s2632_s16 + $0x130] sm:$0xf0]  ;;  %v1935_v51 = vld [vmem:[%s2632_s16 + $0x128] sm:$0xf] }
  0x4e   : > { %994 = vmatmul.bf16.gmra.mxu1 %v2738_v37  ;;  %v2068_v41 = vor.u32 %v2319_v35, %v2065_v40  ;;  %1426 = vmatpush.bf16.msrb.mxu3 %v2196_v33  ;;  %v2288_v59 = vld [vmem:[%s2632_s16 + $0x134] sm:$0xf0]  ;;  %v2976_v11 = vor.u32 %v2285_v49, %v1929_v50  ;;  %v1945_v49 = vld [vmem:[%s2632_s16 + $0x150] sm:$0xf0]  ;;  %v1951_v50 = vld [vmem:[%s2632_s16 + $0x148] sm:$0xf] }
  0x4f   : > { %1068 = vmatmul.bf16.gmra.mxu2 %v2740_v38  ;;  %1204 = vmatpush.bf16.msrb.mxu0 %v2004_v34  ;;  %v2978_v20 = vor.u32 %v2288_v59, %v1935_v51  ;;  %v2292_v51 = vld [vmem:[%s2632_s16 + $0x154] sm:$0xf0]  ;;  %v2290_v59 = vld [vmem:[%s2632_s16 + $0x14c] sm:$0xf] }
  0x50   : > { %1142 = vmatmul.bf16.gmra.mxu3 %v2742_v39  ;;  %1278 = vmatpush.bf16.msrb.mxu1 %v2068_v41  ;;  %v1943_v41 = vld [vmem:[%s2632_s16 + $0x140] sm:$0xf] }
  0x5d   : > { %925 = vmatmul.bf16.gmra.mxu0 %v2762_v54 }
  0x5e   : > { %999 = vmatmul.bf16.gmra.mxu1 %v2764_v55 }
  0x5f   : > { %1073 = vmatmul.bf16.gmra.mxu2 %v2766_v56 }
  0x60   : > { %1147 = vmatmul.bf16.gmra.mxu3 %v2768_v58 }
  0x6d   : > { %930 = vmatmul.bf16.gmra.mxu0 %v2800_v16 }
  0x6e   : > { %1004 = vmatmul.bf16.gmra.mxu1 %v2802_v17 }
  0x6f   : > { %1078 = vmatmul.bf16.gmra.mxu2 %v2804_v18 }
  0x70   : > { %1152 = vmatmul.bf16.gmra.mxu3 %v2806_v19 }
  0x7d   : > { %935 = vmatmul.bf16.gmra.mxu0 %v2844_v44 }
  0x7e   : > { %1009 = vmatmul.bf16.gmra.mxu1 %v2846_v45 }
  0x7f   : > { %1083 = vmatmul.bf16.gmra.mxu2 %v2848_v46 }
  0x80   : > { %1157 = vmatmul.bf16.gmra.mxu3 %v2850_v48 }
  0x8d   : > { %940 = vmatmul.bf16.gmra.mxu0 %v2864_v0 }
  0x8e   : > { %1014 = vmatmul.bf16.gmra.mxu1 %v2866_v1 }
  0x8f   : > { %1088 = vmatmul.bf16.gmra.mxu2 %v2868_v2 }
  0x90   : > { %1162 = vmatmul.bf16.gmra.mxu3 %v2870_v3 }
  0x9d   : > { %945 = vmatmul.bf16.gmra.mxu0 %v2890_v23 }
  0x9e   : > { %1019 = vmatmul.bf16.gmra.mxu1 %v2892_v24 }
  0x9f   : > { %1093 = vmatmul.bf16.gmra.mxu2 %v2894_v25 }
  0xa0   : > { %1167 = vmatmul.bf16.gmra.mxu3 %v2905_v29 }
  0xaa   : > { %v911_v61 = vpop.f32.mrf.mxu0 }
  0xab   : > { %v985_v4 = vpop.f32.mrf.mxu1 }
  0xac   : > { %v986_v6 = vadd.f32 %v985_v4, %v911_v61  ;;  %v2286_v61 = vld [vmem:[%s2632_s16 + $0x12c] sm:$0xf]  ;;  %v1937_v4 = vld [vmem:[%s2632_s16 + $0x138] sm:$0xf0] }
  0xad   : > { %950 = vmatmul.bf16.gmra.mxu0 %v2928_v60 }
  0xae   : > { %1024 = vmatmul.bf16.gmra.mxu1 %v2930_v62 }
  0xaf   : > { %1098 = vmatmul.bf16.gmra.mxu2 %v2932_v63 }
  0xb0   : > { %1172 = vmatmul.bf16.gmra.mxu3 %v2934_v5 }
  0xb2   : > { %v1059_v7 = vpop.f32.mrf.mxu2  ;;  %v913_v10 = vpop.f32.mrf.mxu0 }
  0xb3   : > { %v1060_v8 = vadd.f32 %v1059_v7, %v986_v6  ;;  %v1133_v9 = vpop.f32.mrf.mxu3  ;;  %v987_v22 = vpop.f32.mrf.mxu1  ;;  %v2974_v7 = vor.u32 %v2287_v43, %v1927_v42  ;;  %v2291_v42 = vld [vmem:[%s2632_s16 + $0x14c] sm:$0xf0]  ;;  %v2289_v43 = vld [vmem:[%s2632_s16 + $0x144] sm:$0xf] }
  0xb4   : > { %v988_v32 = vadd.f32 %v987_v22, %v913_v10  ;;  %v2980_v22 = vor.u32 %v2286_v61, %v1937_v4  ;;  %v1953_v61 = vld [vmem:[%s2632_s16 + $0x158] sm:$0xf0] }
  0xb5   : > { %v2958_v31 = vadd.f32 %v1133_v9, %v1060_v8 }
  0xba   : > { %v1061_v6 = vpop.f32.mrf.mxu2  ;;  %v916_v10 = vpop.f32.mrf.mxu0 }
  0xbb   : > { %v1062_v8 = vadd.f32 %v1061_v6, %v988_v32  ;;  %v1135_v9 = vpop.f32.mrf.mxu3  ;;  %v990_v21 = vpop.f32.mrf.mxu1  ;;  %v2998_v6 = vor.u32 %v2291_v42, %v1943_v41  ;;  %v2185_v41 = vld [vmem:[%s3352_s1 + $0x188] sm:$0xf0]  ;;  %v2301_v42 = vld [vmem:[%s3352_s1 + $0x4] sm:$0xf] }
  0xbc   : > { %v991_v27 = vadd.f32 %v990_v21, %v916_v10  ;;  %v3000_v21 = vor.u32 %v2289_v43, %v1945_v49 }
  0xbd   : > { %v2982_v26 = vadd.f32 %v1135_v9, %v1062_v8  ;;  %955 = vmatmul.bf16.gmra.mxu0 %v2974_v7  ;;  %3364 = vst [vmem:[#allocation2_spill] sm:$0xff] %v2998_v6 }
  0xbe   : > { %1029 = vmatmul.bf16.gmra.mxu1 %v2976_v11  ;;  %3365 = vst [vmem:[#allocation3_spill] sm:$0xff] %v3000_v21 }
  0xbf   : > { %1103 = vmatmul.bf16.gmra.mxu2 %v2978_v20 }
  0xc0   : > { %1177 = vmatmul.bf16.gmra.mxu3 %v2980_v22 }
  0xc2   : > { %v1064_v28 = vpop.f32.mrf.mxu2  ;;  %v918_v33 = vpop.f32.mrf.mxu0 }
  0xc3   : > { %v1065_v30 = vadd.f32 %v1064_v28, %v991_v27  ;;  %v1138_v32 = vpop.f32.mrf.mxu3  ;;  %v992_v34 = vpop.f32.mrf.mxu1  ;;  %v3002_v27 = vor.u32 %v2292_v51, %v1951_v50  ;;  %v2333_v28 = vld [vmem:[%s3352_s1 + $0x104] sm:$0xf]  ;;  %v1993_v51 = vld [vmem:[%s3352_s1 + $0x8] sm:$0xf0] }
  0xc4   : > { %v993_v40 = vadd.f32 %v992_v34, %v918_v33  ;;  %v3010_v33 = vor.u32 %v2290_v59, %v1953_v61  ;;  %v2317_v59 = vld [vmem:[%s3352_s1 + $0x84] sm:$0xf]  ;;  %v2057_v61 = vld [vmem:[%s3352_s1 + $0x88] sm:$0xf0] }
  0xc5   : > { %v2988_v35 = vadd.f32 %v1138_v32, %v1065_v30  ;;  %3366 = vst [vmem:[#allocation4_spill] sm:$0xff] %v3002_v27  ;;  %v2121_v30 = vld [vmem:[%s3352_s1 + $0x108] sm:$0xf0] }
  0xc6   : > { %3367 = vst [vmem:[#allocation5_spill] sm:$0xff] %v3010_v33  ;;  %v2124_v34 = vor.u32 %v2333_v28, %v2121_v30 }
  0xc8   : > { %1353 = vmatpush.bf16.msrb.mxu2 %v2124_v34 }
  0xca   : > { %v1066_v4 = vpop.f32.mrf.mxu2  ;;  %v921_v10 = vpop.f32.mrf.mxu0 }
  0xcb   : > { %v1067_v8 = vadd.f32 %v1066_v4, %v993_v40  ;;  %v1140_v9 = vpop.f32.mrf.mxu3  ;;  %v995_v32 = vpop.f32.mrf.mxu1  ;;  %v2349_v40 = vld [vmem:[%s3352_s1 + $0x184] sm:$0xf]  ;;  %v1996_v4 = vor.u32 %v2301_v42, %v1993_v51  ;;  %v2295_v42 = vld [vmem:[%s2632_s16 + $0x16c] sm:$0xf0] }
  0xcc   : > { %v996_v49 = vadd.f32 %v995_v32, %v921_v10  ;;  %v2188_v50 = vor.u32 %v2349_v40, %v2185_v41  ;;  %v1959_v41 = vld [vmem:[%s2632_s16 + $0x160] sm:$0xf]  ;;  %v2293_v51 = vld [vmem:[%s2632_s16 + $0x164] sm:$0xf] }
  0xcd   : > { %v3021_v43 = vadd.f32 %v1140_v9, %v1067_v8  ;;  %960 = vmatmul.bf16.gmra.mxu0 %v2998_v6  ;;  %v2060_v8 = vor.u32 %v2317_v59, %v2057_v61  ;;  %v1961_v59 = vld [vmem:[%s2632_s16 + $0x170] sm:$0xf0]  ;;  %v1967_v61 = vld [vmem:[%s2632_s16 + $0x168] sm:$0xf] }
  0xce   : > { %1034 = vmatmul.bf16.gmra.mxu1 %v3000_v21  ;;  %1205 = vmatpush.bf16.msrb.mxu0 %v1996_v4  ;;  %v1969_v4 = vld [vmem:[%s2632_s16 + $0x178] sm:$0xf0] }
  0xcf   : > { %3368 = vst [vmem:[#allocation6_spill] sm:$0xff] %v3021_v43  ;;  %1108 = vmatmul.bf16.gmra.mxu2 %v3002_v27  ;;  %1427 = vmatpush.bf16.msrb.mxu3 %v2188_v50  ;;  %v2294_v27 = vld [vmem:[%s2632_s16 + $0x16c] sm:$0xf]  ;;  %v3046_v50 = vor.u32 %v2295_v42, %v1959_v41 }
  0xd0   : > { %1182 = vmatmul.bf16.gmra.mxu3 %v3010_v33  ;;  %1279 = vmatpush.bf16.msrb.mxu1 %v2060_v8  ;;  %v2296_v33 = vld [vmem:[%s2632_s16 + $0x174] sm:$0xf0] }
  0xd1   : > { %3370 = vst [vmem:[#allocation8_spill] sm:$0xff] %v3046_v50  ;;  %v3050_v43 = vor.u32 %v2296_v33, %v1967_v61  ;;  %v2297_v61 = vld [vmem:[%s2632_s16 + $0x184] sm:$0xf] }
  0xd2   : > { %v1069_v9 = vpop.f32.mrf.mxu2  ;;  %v923_v30 = vpop.f32.mrf.mxu0 }
  0xd3   : > { %v1070_v10 = vadd.f32 %v1069_v9, %v996_v49  ;;  %v1143_v28 = vpop.f32.mrf.mxu3  ;;  %v997_v32 = vpop.f32.mrf.mxu1  ;;  %v3048_v9 = vor.u32 %v2293_v51, %v1961_v59  ;;  %3372 = vst [vmem:[#allocation10_spill] sm:$0xff] %v3050_v43  ;;  %v1975_v51 = vld [vmem:[%s2632_s16 + $0x180] sm:$0xf]  ;;  %v2299_v59 = vld [vmem:[%s2632_s16 + $0x18c] sm:$0xf0] }
  0xd4   : > { %v998_v40 = vadd.f32 %v997_v32, %v923_v30 }
  0xd5   : > { %v3036_v34 = vadd.f32 %v1143_v28, %v1070_v10  ;;  %3371 = vst [vmem:[#allocation9_spill] sm:$0xff] %v3048_v9  ;;  %v3052_v28 = vor.u32 %v2294_v27, %v1969_v4  ;;  %v1977_v4 = vld [vmem:[%s2632_s16 + $0x190] sm:$0xf0] }
  0xd7   : > { %3369 = vst [vmem:[#allocation7_spill] sm:$0xff] %v3036_v34 }
  0xd8   : > { %3373 = vst [vmem:[#allocation11_spill] sm:$0xff] %v3052_v28 }
  0xda   : > { %v1071_v21 = vpop.f32.mrf.mxu2  ;;  %v926_v49 = vpop.f32.mrf.mxu0 }
  0xdb   : > { %v1072_v8 = vadd.f32 %v1071_v21, %v998_v40  ;;  %v1145_v6 = vpop.f32.mrf.mxu3  ;;  %v1000_v10 = vpop.f32.mrf.mxu1 }
  0xdc   : > { %v1001_v32 = vadd.f32 %v1000_v10, %v926_v49  ;;  %v2300_v49 = vld [vmem:[%s2632_s16 + $0x194] sm:$0xf0]  ;;  %v2298_v10 = vld [vmem:[%s2632_s16 + $0x18c] sm:$0xf] }
  0xdd   : > { %v3054_v30 = vadd.f32 %v1145_v6, %v1072_v8  ;;  %965 = vmatmul.bf16.gmra.mxu0 %v3046_v50  ;;  %v1983_v8 = vld [vmem:[%s2632_s16 + $0x188] sm:$0xf]  ;;  %v3070_v50 = vor.u32 %v2299_v59, %v1975_v51 }
  0xde   : > { %1039 = vmatmul.bf16.gmra.mxu1 %v3048_v9  ;;  %v1985_v9 = vld [vmem:[%s2632_s16 + $0x198] sm:$0xf0]  ;;  %v3074_v34 = vor.u32 %v2300_v49, %v1983_v8 }
  0xdf   : > { %3374 = vst [vmem:[#allocation12_spill] sm:$0xff] %v3054_v30  ;;  %1113 = vmatmul.bf16.gmra.mxu2 %v3050_v43 }
  0xe0   : > { %1187 = vmatmul.bf16.gmra.mxu3 %v3052_v28 }
  0xe2   : > { %v1074_v21 = vpop.f32.mrf.mxu2  ;;  %v928_v40 = vpop.f32.mrf.mxu0 }
  0xe3   : > { %v1075_v27 = vadd.f32 %v1074_v21, %v1001_v32  ;;  %v1148_v33 = vpop.f32.mrf.mxu3  ;;  %v1002_v6 = vpop.f32.mrf.mxu1  ;;  %v3072_v21 = vor.u32 %v2297_v61, %v1977_v4 }
  0xe4   : > { %v1003_v42 = vadd.f32 %v1002_v6, %v928_v40 }
  0xe5   : > { %v3060_v41 = vadd.f32 %v1148_v33, %v1075_v27  ;;  %v3076_v33 = vor.u32 %v2298_v10, %v1985_v9 }
  0xea   : > { %v1076_v43 = vpop.f32.mrf.mxu2  ;;  %v931_v32 = vpop.f32.mrf.mxu0 }
  0xeb   : > { %v1077_v28 = vadd.f32 %v1076_v43, %v1003_v42  ;;  %v1150_v30 = vpop.f32.mrf.mxu3  ;;  %v1005_v27 = vpop.f32.mrf.mxu1 }
  0xec   : > { %v1006_v6 = vadd.f32 %v1005_v27, %v931_v32 }
  0xed   : > { %v3078_v40 = vadd.f32 %v1150_v30, %v1077_v28  ;;  %970 = vmatmul.bf16.gmra.mxu0 %v3070_v50 }
  0xee   : > { %1044 = vmatmul.bf16.gmra.mxu1 %v3072_v21 }
  0xef   : > { %1118 = vmatmul.bf16.gmra.mxu2 %v3074_v34 }
  0xf0   : > { %1192 = vmatmul.bf16.gmra.mxu3 %v3076_v33 }
  0xf2   : > { %v1079_v43 = vpop.f32.mrf.mxu2  ;;  %v933_v59 = vpop.f32.mrf.mxu0 }
  0xf3   : > { %v1080_v42 = vadd.f32 %v1079_v43, %v1006_v6  ;;  %v1153_v51 = vpop.f32.mrf.mxu3  ;;  %v1007_v61 = vpop.f32.mrf.mxu1 }
  0xf4   : > { %v1008_v9 = vadd.f32 %v1007_v61, %v933_v59 }
  0xf5   : > { %v3084_v4 = vadd.f32 %v1153_v51, %v1080_v42 }
  0xfa   : > { %v1081_v8 = vpop.f32.mrf.mxu2  ;;  %v936_v49 = vpop.f32.mrf.mxu0 }
  0xfb   : > { %v1082_v28 = vadd.f32 %v1081_v8, %v1008_v9  ;;  %v1155_v30 = vpop.f32.mrf.mxu3  ;;  %v1010_v10 = vpop.f32.mrf.mxu1 }
  0xfc   : > { %v1011_v27 = vadd.f32 %v1010_v10, %v936_v49 }
  0xfd   : > { %v3086_v32 = vadd.f32 %v1155_v30, %v1082_v28  ;;  %1206 = vmatmul.bf16.vlgmr.msrb.gmra.mxu0 %v2652_v47 }
  0xfe   : > { %1280 = vmatmul.bf16.vlgmr.msrb.gmra.mxu1 %v2657_v52 }
  0xff   : > { %1354 = vmatmul.bf16.vlgmr.msrb.gmra.mxu2 %v2659_v53 }
 0x100   : > { %1428 = vmatmul.bf16.vlgmr.msrb.gmra.mxu3 %v2666_v57 }
 0x102   : > { %v1084_v6 = vpop.f32.mrf.mxu2  ;;  %v938_v51 = vpop.f32.mrf.mxu0 }
 0x103   : > { %v1085_v43 = vadd.f32 %v1084_v6, %v1011_v27  ;;  %v1158_v42 = vpop.f32.mrf.mxu3  ;;  %v1012_v59 = vpop.f32.mrf.mxu1 }
 0x104   : > { %v1013_v9 = vadd.f32 %v1012_v59, %v938_v51 }
 0x105   : > { %v3092_v61 = vadd.f32 %v1158_v42, %v1085_v43 }
 0x10a   : > { %v1086_v8 = vpop.f32.mrf.mxu2  ;;  %v941_v49 = vpop.f32.mrf.mxu0 }
 0x10b   : > { %v1087_v28 = vadd.f32 %v1086_v8, %v1013_v9  ;;  %v1160_v30 = vpop.f32.mrf.mxu3  ;;  %v1015_v10 = vpop.f32.mrf.mxu1 }
 0x10c   : > { %v1016_v52 = vadd.f32 %v1015_v10, %v941_v49 }
 0x10d   : > { %v3094_v47 = vadd.f32 %v1160_v30, %v1087_v28  ;;  %1211 = vmatmul.bf16.gmra.mxu0 %v2692_v12 }
 0x10e   : > { %1285 = vmatmul.bf16.gmra.mxu1 %v2694_v13 }
 0x10f   : > { %1359 = vmatmul.bf16.gmra.mxu2 %v2696_v14 }
 0x110   : > { %1433 = vmatmul.bf16.gmra.mxu3 %v2698_v15 }
 0x112   : > { %v1089_v53 = vpop.f32.mrf.mxu2  ;;  %v943_v6 = vpop.f32.mrf.mxu0 }
 0x113   : > { %v1090_v57 = vadd.f32 %v1089_v53, %v1016_v52  ;;  %v1163_v27 = vpop.f32.mrf.mxu3  ;;  %v1017_v43 = vpop.f32.mrf.mxu1 }
 0x114   : > { %v1018_v51 = vadd.f32 %v1017_v43, %v943_v6 }
 0x115   : > { %v3100_v42 = vadd.f32 %v1163_v27, %v1090_v57 }
 0x11a   : > { %v1091_v59 = vpop.f32.mrf.mxu2  ;;  %v946_v28 = vpop.f32.mrf.mxu0 }
 0x11b   : > { %v1092_v9 = vadd.f32 %v1091_v59, %v1018_v51  ;;  %v1165_v8 = vpop.f32.mrf.mxu3  ;;  %v1020_v30 = vpop.f32.mrf.mxu1 }
 0x11c   : > { %v1021_v13 = vadd.f32 %v1020_v30, %v946_v28 }
 0x11d   : > { %v3102_v12 = vadd.f32 %v1165_v8, %v1092_v9  ;;  %1216 = vmatmul.bf16.gmra.mxu0 %v2736_v36 }
 0x11e   : > { %1290 = vmatmul.bf16.gmra.mxu1 %v2738_v37 }
 0x11f   : > { %1364 = vmatmul.bf16.gmra.mxu2 %v2740_v38 }
 0x120   : > { %1438 = vmatmul.bf16.gmra.mxu3 %v2742_v39 }
 0x122   : > { %v1094_v14 = vpop.f32.mrf.mxu2  ;;  %v948_v10 = vpop.f32.mrf.mxu0 }
 0x123   : > { %v1095_v15 = vadd.f32 %v1094_v14, %v1021_v13  ;;  %v1168_v49 = vpop.f32.mrf.mxu3  ;;  %v1022_v52 = vpop.f32.mrf.mxu1 }
 0x124   : > { %v1023_v57 = vadd.f32 %v1022_v52, %v948_v10 }
 0x125   : > { %v3108_v53 = vadd.f32 %v1168_v49, %v1095_v15 }
 0x12a   : > { %v1096_v27 = vpop.f32.mrf.mxu2  ;;  %v951_v51 = vpop.f32.mrf.mxu0 }
 0x12b   : > { %v1097_v6 = vadd.f32 %v1096_v27, %v1023_v57  ;;  %v1170_v43 = vpop.f32.mrf.mxu3  ;;  %v1025_v59 = vpop.f32.mrf.mxu1 }
 0x12c   : > { %v1026_v37 = vadd.f32 %v1025_v59, %v951_v51 }
 0x12d   : > { %v3110_v36 = vadd.f32 %v1170_v43, %v1097_v6  ;;  %1221 = vmatmul.bf16.gmra.mxu0 %v2762_v54 }
 0x12e   : > { %1295 = vmatmul.bf16.gmra.mxu1 %v2764_v55 }
 0x12f   : > { %1369 = vmatmul.bf16.gmra.mxu2 %v2766_v56 }
 0x130   : > { %1443 = vmatmul.bf16.gmra.mxu3 %v2768_v58 }
 0x132   : > { %v1099_v38 = vpop.f32.mrf.mxu2  ;;  %v953_v8 = vpop.f32.mrf.mxu0 }
 0x133   : > { %v1100_v39 = vadd.f32 %v1099_v38, %v1026_v37  ;;  %v1173_v9 = vpop.f32.mrf.mxu3  ;;  %v1027_v28 = vpop.f32.mrf.mxu1 }
 0x134   : > { %v1028_v13 = vadd.f32 %v1027_v28, %v953_v8 }
 0x135   : > { %v3116_v30 = vadd.f32 %v1173_v9, %v1100_v39 }
 0x13a   : > { %v1101_v14 = vpop.f32.mrf.mxu2  ;;  %v956_v10 = vpop.f32.mrf.mxu0 }
 0x13b   : > { %v1102_v15 = vadd.f32 %v1101_v14, %v1028_v13  ;;  %v1175_v49 = vpop.f32.mrf.mxu3  ;;  %v1030_v52 = vpop.f32.mrf.mxu1 }
 0x13c   : > { %v1031_v55 = vadd.f32 %v1030_v52, %v956_v10 }
 0x13d   : > { %v3118_v54 = vadd.f32 %v1175_v49, %v1102_v15  ;;  %1226 = vmatmul.bf16.gmra.mxu0 %v2800_v16 }
 0x13e   : > { %1300 = vmatmul.bf16.gmra.mxu1 %v2802_v17 }
 0x13f   : > { %1374 = vmatmul.bf16.gmra.mxu2 %v2804_v18 }
 0x140   : > { %1448 = vmatmul.bf16.gmra.mxu3 %v2806_v19 }
 0x142   : > { %v1104_v56 = vpop.f32.mrf.mxu2  ;;  %v958_v27 = vpop.f32.mrf.mxu0 }
 0x143   : > { %v1105_v58 = vadd.f32 %v1104_v56, %v1031_v55  ;;  %v1178_v57 = vpop.f32.mrf.mxu3  ;;  %v1032_v6 = vpop.f32.mrf.mxu1 }
 0x144   : > { %v1033_v51 = vadd.f32 %v1032_v6, %v958_v27 }
 0x145   : > { %v3124_v43 = vadd.f32 %v1178_v57, %v1105_v58 }
 0x14a   : > { %v1106_v59 = vpop.f32.mrf.mxu2  ;;  %v961_v39 = vpop.f32.mrf.mxu0 }
 0x14b   : > { %v1107_v37 = vadd.f32 %v1106_v59, %v1033_v51  ;;  %v1180_v38 = vpop.f32.mrf.mxu3  ;;  %v1035_v9 = vpop.f32.mrf.mxu1 }
 0x14c   : > { %v1036_v17 = vadd.f32 %v1035_v9, %v961_v39 }
 0x14d   : > { %v3126_v16 = vadd.f32 %v1180_v38, %v1107_v37  ;;  %1231 = vmatmul.bf16.gmra.mxu0 %v2844_v44 }
 0x14e   : > { %1305 = vmatmul.bf16.gmra.mxu1 %v2846_v45 }
 0x14f   : > { %1379 = vmatmul.bf16.gmra.mxu2 %v2848_v46 }
 0x150   : > { %1453 = vmatmul.bf16.gmra.mxu3 %v2850_v48 }
 0x152   : > { %v1109_v18 = vpop.f32.mrf.mxu2  ;;  %v963_v28 = vpop.f32.mrf.mxu0 }
 0x153   : > { %v1110_v19 = vadd.f32 %v1109_v18, %v1036_v17  ;;  %v1183_v8 = vpop.f32.mrf.mxu3  ;;  %v1037_v13 = vpop.f32.mrf.mxu1 }
 0x154   : > { %v1038_v15 = vadd.f32 %v1037_v13, %v963_v28 }
 0x155   : > { %v3132_v14 = vadd.f32 %v1183_v8, %v1110_v19 }
 0x15a   : > { %v1111_v49 = vpop.f32.mrf.mxu2  ;;  %v966_v55 = vpop.f32.mrf.mxu0 }
 0x15b   : > { %v1112_v10 = vadd.f32 %v1111_v49, %v1038_v15  ;;  %v1185_v52 = vpop.f32.mrf.mxu3  ;;  %v1040_v56 = vpop.f32.mrf.mxu1 }
 0x15c   : > { %v1041_v45 = vadd.f32 %v1040_v56, %v966_v55  ;;  %v1552_v55 = vld [vmem:[%s3354_s3] sm:$0x3] }
 0x15d   : > { %v3134_v44 = vadd.f32 %v1185_v52, %v1112_v10  ;;  %1236 = vmatmul.bf16.gmra.mxu0 %v2864_v0 }
 0x15e   : > { %1310 = vmatmul.bf16.gmra.mxu1 %v2866_v1 }
 0x15f   : > { %1384 = vmatmul.bf16.gmra.mxu2 %v2868_v2 }
 0x160   : > { %1458 = vmatmul.bf16.gmra.mxu3 %v2870_v3 }
 0x162   : > { %v1114_v46 = vpop.f32.mrf.mxu2  ;;  %v968_v57 = vpop.f32.mrf.mxu0 }
 0x163   : > { %v1115_v48 = vadd.f32 %v1114_v46, %v1041_v45  ;;  %v1188_v58 = vpop.f32.mrf.mxu3  ;;  %v1042_v27 = vpop.f32.mrf.mxu1  ;;  %v3166_v46 = vperm.slane %v1552_v55, 0 }
 0x164   : > { %v1043_v51 = vadd.f32 %v1042_v27, %v968_v57 }
 0x165   : > { %v3140_v6 = vadd.f32 %v1188_v58, %v1115_v48 }
 0x16a   : > { %v1116_v59 = vpop.f32.mrf.mxu2  ;;  %v971_v39 = vpop.f32.mrf.mxu0 }
 0x16b   : > { %v1117_v37 = vadd.f32 %v1116_v59, %v1043_v51  ;;  %v1190_v38 = vpop.f32.mrf.mxu3  ;;  %v1045_v9 = vpop.f32.mrf.mxu1 }
 0x16c   : > { %v1046_v1 = vadd.f32 %v1045_v9, %v971_v39 }
 0x16d   : > { %v3142_v0 = vadd.f32 %v1190_v38, %v1117_v37  ;;  %1241 = vmatmul.bf16.gmra.mxu0 %v2890_v23  ;;  %v1494_v23 = vld [vmem:[%s3353_s2] sm:$0x3] }
 0x16e   : > { %1315 = vmatmul.bf16.gmra.mxu1 %v2892_v24  ;;  %v3168_v58 = vperm.slane %v1494_v23, 1 }
 0x16f   : > { %1389 = vmatmul.bf16.gmra.mxu2 %v2894_v25 }
 0x170   : > { %1463 = vmatmul.bf16.gmra.mxu3 %v2905_v29  ;;  %v3156_v29 = vperm.slane %v1494_v23, 0 }
 0x172   : > { %v1119_v2 = vpop.f32.mrf.mxu2  ;;  %v973_v18 = vpop.f32.mrf.mxu0  ;;  %v1500_v45 = vmul.f32 %v3156_v29, %v2958_v31  ;;  %v1502_v39 = vmul.f32 %v3156_v29, %v2982_v26 }
 0x173   : > { %v1120_v3 = vadd.f32 %v1119_v2, %v1046_v1  ;;  %v1193_v17 = vpop.f32.mrf.mxu3  ;;  %v1047_v19 = vpop.f32.mrf.mxu1 }
 0x174   : > { %v1048_v28 = vadd.f32 %v1047_v19, %v973_v18  ;;  %v1558_v51 = vadd.f32 %v3166_v46, %v1500_v45 }
 0x175   : > { %v3148_v8 = vadd.f32 %v1193_v17, %v1120_v3 }
 0x176   : > { %v1610_v38 = vmax.f32 %v1558_v51, 0.0 }
 0x17a   : > { %v1121_v13 = vpop.f32.mrf.mxu2  ;;  %v1207_v10 = vpop.f32.mrf.mxu0 }
 0x17b   : > { %v1122_v15 = vadd.f32 %v1121_v13, %v1048_v28  ;;  %v1195_v49 = vpop.f32.mrf.mxu3  ;;  %v1281_v24 = vpop.f32.mrf.mxu1  ;;  %v1560_v28 = vadd.f32 %v3166_v46, %v1502_v39 }
 0x17c   : > { %v1282_v52 = vadd.f32 %v1281_v24, %v1207_v10 }
 0x17d   : > { %v3153_v25 = vadd.f32 %v1195_v49, %v1122_v15  ;;  %1246 = vmatmul.bf16.gmra.mxu0 %v2928_v60  ;;  %v1612_v10 = vmax.f32 %v1560_v28, 0.0 }
 0x17e   : > { %1320 = vmatmul.bf16.gmra.mxu1 %v2930_v62 }
 0x17f   : > { %1394 = vmatmul.bf16.gmra.mxu2 %v2932_v63  ;;  %v3170_v63 = vperm.slane %v1552_v55, 1 }
 0x180   : > { %1468 = vmatmul.bf16.gmra.mxu3 %v2934_v5 }
 0x182   : > { %v1355_v56 = vpop.f32.mrf.mxu2  ;;  %v1209_v62 = vpop.f32.mrf.mxu0 }
 0x183   : > { %v1356_v60 = vadd.f32 %v1355_v56, %v1282_v52  ;;  %v1429_v48 = vpop.f32.mrf.mxu3  ;;  %v1283_v57 = vpop.f32.mrf.mxu1 }
 0x184   : > { %v1284_v37 = vadd.f32 %v1283_v57, %v1209_v62 }
 0x185   : > { %v1430_v27 = vadd.f32 %v1429_v48, %v1356_v60 }
 0x187   : > { %v1501_v59 = vmul.f32 %v3168_v58, %v1430_v27  ;;  %v3375_v27 = vld [vmem:[#allocation6_spill] sm:$0xff] }
 0x189   : > { %v1559_v5 = vadd.f32 %v3170_v63, %v1501_v59 }
 0x18a   : > { %v1357_v31 = vpop.f32.mrf.mxu2  ;;  %v1212_v3 = vpop.f32.mrf.mxu0 }
 0x18b   : > { %v1611_v9 = vmax.f32 %v1559_v5, 0.0  ;;  %v1358_v1 = vadd.f32 %v1357_v31, %v1284_v37  ;;  %v1431_v2 = vpop.f32.mrf.mxu3  ;;  %v1286_v17 = vpop.f32.mrf.mxu1 }
 0x18c   : > { %v1287_v13 = vadd.f32 %v1286_v17, %v1212_v3  ;;  %v3377_v17 = vld [vmem:[#allocation3_spill] sm:$0xff] }
 0x18d   : > { %v1662_v18 = vpack.c.bf16 %v1611_v9, %v1610_v38  ;;  %v1432_v19 = vadd.f32 %v1431_v2, %v1358_v1  ;;  %1251 = vmatmul.bf16.gmra.mxu0 %v2974_v7  ;;  %v1504_v7 = vmul.f32 %v3156_v29, %v2988_v35  ;;  %v1506_v35 = vmul.f32 %v3156_v29, %v3375_v27  ;;  %v3376_v9 = vld [vmem:[#allocation2_spill] sm:$0xff] }
 0x18e   : > { %1325 = vmatmul.bf16.gmra.mxu1 %v2976_v11 }
 0x18f   : > { %1688 = vst [vmem:[%s3181_s24] sm:$0xff] %v1662_v18  ;;  %v1503_v26 = vmul.f32 %v3168_v58, %v1432_v19  ;;  %1399 = vmatmul.bf16.gmra.mxu2 %v2978_v20  ;;  %v1562_v11 = vadd.f32 %v3166_v46, %v1504_v7  ;;  %v1564_v1 = vadd.f32 %v3166_v46, %v1506_v35  ;;  %v3378_v18 = vld [vmem:[#allocation4_spill] sm:$0xff]  ;;  %v3379_v19 = vld [vmem:[#allocation5_spill] sm:$0xff] }
 0x190   : > { %1473 = vmatmul.bf16.gmra.mxu3 %v2980_v22 }
 0x191   : > { %v1561_v15 = vadd.f32 %v3170_v63, %v1503_v26  ;;  %v1614_v57 = vmax.f32 %v1562_v11, 0.0 }
 0x192   : > { %v1360_v49 = vpop.f32.mrf.mxu2  ;;  %v1214_v55 = vpop.f32.mrf.mxu0 }
 0x193   : > { %v1613_v23 = vmax.f32 %v1561_v15, 0.0  ;;  %v1361_v24 = vadd.f32 %v1360_v49, %v1287_v13  ;;  %v1434_v52 = vpop.f32.mrf.mxu3  ;;  %v1288_v56 = vpop.f32.mrf.mxu1  ;;  %v1616_v13 = vmax.f32 %v1564_v1, 0.0  ;;  %v3380_v15 = vld [vmem:[#allocation7_spill] sm:$0xff] }
 0x194   : > { %v1289_v48 = vadd.f32 %v1288_v56, %v1214_v55  ;;  %v1508_v49 = vmul.f32 %v3156_v29, %v3380_v15 }
 0x195   : > { %v1663_v45 = vpack.c.bf16 %v1613_v23, %v1612_v10  ;;  %v1435_v60 = vadd.f32 %v1434_v52, %v1361_v24 }
 0x197   : > { %1689 = vst [vmem:[%s3181_s24 + $0x8] sm:$0xff] %v1663_v45  ;;  %v1505_v20 = vmul.f32 %v3168_v58, %v1435_v60  ;;  %v1566_v45 = vadd.f32 %v3166_v46, %v1508_v49 }
 0x199   : > { %v1563_v22 = vadd.f32 %v3170_v63, %v1505_v20 }
 0x19a   : > { %v1362_v62 = vpop.f32.mrf.mxu2  ;;  %v1217_v37 = vpop.f32.mrf.mxu0 }
 0x19b   : > { %v1615_v51 = vmax.f32 %v1563_v22, 0.0  ;;  %v1363_v59 = vadd.f32 %v1362_v62, %v1289_v48  ;;  %v1436_v5 = vpop.f32.mrf.mxu3  ;;  %v1291_v31 = vpop.f32.mrf.mxu1  ;;  %v1618_v48 = vmax.f32 %v1566_v45, 0.0  ;;  %v3381_v62 = vld [vmem:[#allocation12_spill] sm:$0xff] }
 0x19c   : > { %v1292_v3 = vadd.f32 %v1291_v31, %v1217_v37 }
 0x19d   : > { %v1664_v38 = vpack.c.bf16 %v1615_v51, %v1614_v57  ;;  %v1437_v39 = vadd.f32 %v1436_v5, %v1363_v59  ;;  %1256 = vmatmul.bf16.gmra.mxu0 %v3376_v9  ;;  %v1510_v57 = vmul.f32 %v3156_v29, %v3381_v62 }
 0x19e   : > { %1330 = vmatmul.bf16.gmra.mxu1 %v3377_v17  ;;  %v3385_v17 = vld [vmem:[#allocation11_spill] sm:$0xff] }
 0x19f   : > { %1690 = vst [vmem:[%s3181_s24 + $0x10] sm:$0xff] %v1664_v38  ;;  %v1507_v2 = vmul.f32 %v3168_v58, %v1437_v39  ;;  %1404 = vmatmul.bf16.gmra.mxu2 %v3378_v18  ;;  %v3382_v38 = vld [vmem:[#allocation8_spill] sm:$0xff]  ;;  %v1568_v39 = vadd.f32 %v3166_v46, %v1510_v57 }
 0x1a0   : > { %1478 = vmatmul.bf16.gmra.mxu3 %v3379_v19 }
 0x1a1   : > { %v1565_v28 = vadd.f32 %v3170_v63, %v1507_v2  ;;  %v3383_v2 = vld [vmem:[#allocation9_spill] sm:$0xff] }
 0x1a2   : > { %v1365_v26 = vpop.f32.mrf.mxu2  ;;  %v1219_v24 = vpop.f32.mrf.mxu0 }
 0x1a3   : > { %v1617_v10 = vmax.f32 %v1565_v28, 0.0  ;;  %v1366_v7 = vadd.f32 %v1365_v26, %v1292_v3  ;;  %v1439_v23 = vpop.f32.mrf.mxu3  ;;  %v1293_v52 = vpop.f32.mrf.mxu1  ;;  %v3384_v3 = vld [vmem:[#allocation10_spill] sm:$0xff]  ;;  %v1620_v28 = vmax.f32 %v1568_v39, 0.0  ;;  %v1512_v26 = vmul.f32 %v3156_v29, %v3060_v41 }
 0x1a4   : > { %v1294_v20 = vadd.f32 %v1293_v52, %v1219_v24  ;;  %v1514_v41 = vmul.f32 %v3156_v29, %v3078_v40 }
 0x1a5   : > { %v1665_v55 = vpack.c.bf16 %v1617_v10, %v1616_v13  ;;  %v1440_v56 = vadd.f32 %v1439_v23, %v1366_v7  ;;  %v1570_v52 = vadd.f32 %v3166_v46, %v1512_v26 }
 0x1a7   : > { %1691 = vst [vmem:[%s3181_s24 + $0x18] sm:$0xff] %v1665_v55  ;;  %v1509_v60 = vmul.f32 %v3168_v58, %v1440_v56 }
 0x1a9   : > { %v1567_v11 = vadd.f32 %v3170_v63, %v1509_v60 }
 0x1aa   : > { %v1367_v22 = vpop.f32.mrf.mxu2  ;;  %v1222_v59 = vpop.f32.mrf.mxu0 }
 0x1ab   : > { %v1619_v27 = vmax.f32 %v1567_v11, 0.0  ;;  %v1368_v35 = vadd.f32 %v1367_v22, %v1294_v20  ;;  %v1441_v51 = vpop.f32.mrf.mxu3  ;;  %v1296_v5 = vpop.f32.mrf.mxu1  ;;  %v1622_v11 = vmax.f32 %v1570_v52, 0.0 }
 0x1ac   : > { %v1297_v1 = vadd.f32 %v1296_v5, %v1222_v59 }
 0x1ad   : > { %v1666_v37 = vpack.c.bf16 %v1619_v27, %v1618_v48  ;;  %v1442_v31 = vadd.f32 %v1441_v51, %v1368_v35  ;;  %1261 = vmatmul.bf16.gmra.mxu0 %v3382_v38  ;;  %v1572_v51 = vadd.f32 %v3166_v46, %v1514_v41 }
 0x1ae   : > { %1335 = vmatmul.bf16.gmra.mxu1 %v3383_v2 }
 0x1af   : > { %1692 = vst [vmem:[%s3181_s24 + $0x20] sm:$0xff] %v1666_v37  ;;  %v1511_v9 = vmul.f32 %v3168_v58, %v1442_v31  ;;  %1409 = vmatmul.bf16.gmra.mxu2 %v3384_v3  ;;  %v1624_v31 = vmax.f32 %v1572_v51, 0.0 }
 0x1b0   : > { %1483 = vmatmul.bf16.gmra.mxu3 %v3385_v17 }
 0x1b1   : > { %v1569_v18 = vadd.f32 %v3170_v63, %v1511_v9 }
 0x1b2   : > { %v1370_v19 = vpop.f32.mrf.mxu2  ;;  %v1224_v10 = vpop.f32.mrf.mxu0 }
 0x1b3   : > { %v1621_v13 = vmax.f32 %v1569_v18, 0.0  ;;  %v1371_v15 = vadd.f32 %v1370_v19, %v1297_v1  ;;  %v1444_v49 = vpop.f32.mrf.mxu3  ;;  %v1298_v7 = vpop.f32.mrf.mxu1 }
 0x1b4   : > { %v1299_v45 = vadd.f32 %v1298_v7, %v1224_v10 }
 0x1b5   : > { %v1667_v23 = vpack.c.bf16 %v1621_v13, %v1620_v28  ;;  %v1445_v24 = vadd.f32 %v1444_v49, %v1371_v15 }
 0x1b7   : > { %1693 = vst [vmem:[%s3181_s24 + $0x28] sm:$0xff] %v1667_v23  ;;  %v1513_v55 = vmul.f32 %v3168_v58, %v1445_v24 }
 0x1b9   : > { %v1571_v56 = vadd.f32 %v3170_v63, %v1513_v55 }
 0x1ba   : > { %v1372_v60 = vpop.f32.mrf.mxu2  ;;  %v1227_v62 = vpop.f32.mrf.mxu0 }
 0x1bb   : > { %v1623_v20 = vmax.f32 %v1571_v56, 0.0  ;;  %v1373_v22 = vadd.f32 %v1372_v60, %v1299_v45  ;;  %v1446_v48 = vpop.f32.mrf.mxu3  ;;  %v1301_v57 = vpop.f32.mrf.mxu1 }
 0x1bc   : > { %v1302_v5 = vadd.f32 %v1301_v57, %v1227_v62 }
 0x1bd   : > { %v1668_v27 = vpack.c.bf16 %v1623_v20, %v1622_v11  ;;  %v1447_v35 = vadd.f32 %v1446_v48, %v1373_v22  ;;  %1266 = vmatmul.bf16.gmra.mxu0 %v3070_v50  ;;  %v1516_v50 = vmul.f32 %v3156_v29, %v3084_v4  ;;  %v1518_v4 = vmul.f32 %v3156_v29, %v3086_v32 }
 0x1be   : > { %1340 = vmatmul.bf16.gmra.mxu1 %v3072_v21  ;;  %v1520_v32 = vmul.f32 %v3156_v29, %v3092_v61  ;;  %v1522_v61 = vmul.f32 %v3156_v29, %v3094_v47  ;;  %v1524_v47 = vmul.f32 %v3156_v29, %v3100_v42  ;;  %v1526_v42 = vmul.f32 %v3156_v29, %v3102_v12 }
 0x1bf   : > { %1694 = vst [vmem:[%s3181_s24 + $0x30] sm:$0xff] %v1668_v27  ;;  %v1515_v59 = vmul.f32 %v3168_v58, %v1447_v35  ;;  %1414 = vmatmul.bf16.gmra.mxu2 %v3074_v34  ;;  %v1574_v21 = vadd.f32 %v3166_v46, %v1516_v50  ;;  %v1576_v24 = vadd.f32 %v3166_v46, %v1518_v4 }
 0x1c0   : > { %1488 = vmatmul.bf16.gmra.mxu3 %v3076_v33  ;;  %v1578_v27 = vadd.f32 %v3166_v46, %v1520_v32  ;;  %v1528_v12 = vmul.f32 %v3156_v29, %v3108_v53  ;;  %v1530_v53 = vmul.f32 %v3156_v29, %v3110_v36  ;;  %v1532_v36 = vmul.f32 %v3156_v29, %v3116_v30 }
 0x1c1   : > { %v1573_v40 = vadd.f32 %v3170_v63, %v1515_v59  ;;  %v1626_v28 = vmax.f32 %v1574_v21, 0.0  ;;  %v1628_v60 = vmax.f32 %v1576_v24, 0.0  ;;  %v1534_v30 = vmul.f32 %v3156_v29, %v3118_v54 }
 0x1c2   : > { %v1375_v37 = vpop.f32.mrf.mxu2  ;;  %v1229_v1 = vpop.f32.mrf.mxu0  ;;  %v1536_v54 = vmul.f32 %v3156_v29, %v3124_v43  ;;  %v1538_v43 = vmul.f32 %v3156_v29, %v3126_v16  ;;  %v1540_v16 = vmul.f32 %v3156_v29, %v3132_v14  ;;  %v1542_v14 = vmul.f32 %v3156_v29, %v3134_v44 }
 0x1c3   : > { %v1625_v38 = vmax.f32 %v1573_v40, 0.0  ;;  %v1376_v39 = vadd.f32 %v1375_v37, %v1302_v5  ;;  %v1449_v9 = vpop.f32.mrf.mxu3  ;;  %v1303_v2 = vpop.f32.mrf.mxu1  ;;  %v1630_v40 = vmax.f32 %v1578_v27, 0.0  ;;  %v1544_v44 = vmul.f32 %v3156_v29, %v3140_v6 }
 0x1c4   : > { %v1304_v18 = vadd.f32 %v1303_v2, %v1229_v1  ;;  %v1580_v2 = vadd.f32 %v3166_v46, %v1522_v61  ;;  %v1546_v6 = vmul.f32 %v3156_v29, %v3142_v0  ;;  %v1548_v0 = vmul.f32 %v3156_v29, %v3148_v8 }
 0x1c5   : > { %v1669_v3 = vpack.c.bf16 %v1625_v38, %v1624_v31  ;;  %v1450_v17 = vadd.f32 %v1449_v9, %v1376_v39  ;;  %v1550_v8 = vmul.f32 %v3156_v29, %v3153_v25 }
 0x1c7   : > { %1695 = vst [vmem:[%s3181_s24 + $0x38] sm:$0xff] %v1669_v3  ;;  %v1517_v34 = vmul.f32 %v3168_v58, %v1450_v17 }
 0x1c9   : > { %v1575_v33 = vadd.f32 %v3170_v63, %v1517_v34 }
 0x1ca   : > { %v1377_v19 = vpop.f32.mrf.mxu2  ;;  %v1232_v49 = vpop.f32.mrf.mxu0 }
 0x1cb   : > { %v1627_v26 = vmax.f32 %v1575_v33, 0.0  ;;  %v1378_v13 = vadd.f32 %v1377_v19, %v1304_v18  ;;  %v1451_v15 = vpop.f32.mrf.mxu3  ;;  %v1306_v10 = vpop.f32.mrf.mxu1  ;;  %v1632_v33 = vmax.f32 %v1580_v2, 0.0 }
 0x1cc   : > { %v1307_v55 = vadd.f32 %v1306_v10, %v1232_v49  ;;  %v1582_v49 = vadd.f32 %v3166_v46, %v1524_v47 }
 0x1cd   : > { %v1670_v7 = vpack.c.bf16 %v1627_v26, %v1626_v28  ;;  %v1452_v23 = vadd.f32 %v1451_v15, %v1378_v13 }
 0x1cf   : > { %1696 = vst [vmem:[%s3181_s24 + $0x40] sm:$0xff] %v1670_v7  ;;  %v1519_v52 = vmul.f32 %v3168_v58, %v1452_v23 }
 0x1d1   : > { %v1577_v56 = vadd.f32 %v3170_v63, %v1519_v52  ;;  %v1634_v52 = vmax.f32 %v1582_v49, 0.0 }
 0x1d2   : > { %v1380_v45 = vpop.f32.mrf.mxu2  ;;  %v1234_v22 = vpop.f32.mrf.mxu0 }
 0x1d3   : > { %v1629_v11 = vmax.f32 %v1577_v56, 0.0  ;;  %v1381_v41 = vadd.f32 %v1380_v45, %v1307_v55  ;;  %v1454_v20 = vpop.f32.mrf.mxu3  ;;  %v1308_v48 = vpop.f32.mrf.mxu1 }
 0x1d4   : > { %v1309_v59 = vadd.f32 %v1308_v48, %v1234_v22 }
 0x1d5   : > { %v1671_v62 = vpack.c.bf16 %v1629_v11, %v1628_v60  ;;  %v1455_v57 = vadd.f32 %v1454_v20, %v1381_v41  ;;  %v1584_v20 = vadd.f32 %v3166_v46, %v1526_v42  ;;  %v1590_v42 = vadd.f32 %v3166_v46, %v1532_v36 }
 0x1d7   : > { %1697 = vst [vmem:[%s3181_s24 + $0x48] sm:$0xff] %v1671_v62  ;;  %v1521_v35 = vmul.f32 %v3168_v58, %v1455_v57  ;;  %v1636_v27 = vmax.f32 %v1584_v20, 0.0 }
 0x1d9   : > { %v1579_v51 = vadd.f32 %v3170_v63, %v1521_v35 }
 0x1da   : > { %v1382_v5 = vpop.f32.mrf.mxu2  ;;  %v1237_v38 = vpop.f32.mrf.mxu0 }
 0x1db   : > { %v1631_v37 = vmax.f32 %v1579_v51, 0.0  ;;  %v1383_v31 = vadd.f32 %v1382_v5, %v1309_v59  ;;  %v1456_v50 = vpop.f32.mrf.mxu3  ;;  %v1311_v39 = vpop.f32.mrf.mxu1 }
 0x1dc   : > { %v1312_v17 = vadd.f32 %v1311_v39, %v1237_v38 }
 0x1dd   : > { %v1672_v9 = vpack.c.bf16 %v1631_v37, %v1630_v40  ;;  %v1457_v1 = vadd.f32 %v1456_v50, %v1383_v31  ;;  %v1586_v31 = vadd.f32 %v3166_v46, %v1528_v12 }
 0x1df   : > { %1698 = vst [vmem:[%s3181_s24 + $0x50] sm:$0xff] %v1672_v9  ;;  %v1523_v3 = vmul.f32 %v3168_v58, %v1457_v1  ;;  %v1638_v1 = vmax.f32 %v1586_v31, 0.0 }
 0x1e1   : > { %v1581_v21 = vadd.f32 %v3170_v63, %v1523_v3 }
 0x1e2   : > { %v1385_v34 = vpop.f32.mrf.mxu2  ;;  %v1239_v4 = vpop.f32.mrf.mxu0 }
 0x1e3   : > { %v1633_v18 = vmax.f32 %v1581_v21, 0.0  ;;  %v1386_v19 = vadd.f32 %v1385_v34, %v1312_v17  ;;  %v1459_v28 = vpop.f32.mrf.mxu3  ;;  %v1313_v26 = vpop.f32.mrf.mxu1 }
 0x1e4   : > { %v1314_v23 = vadd.f32 %v1313_v26, %v1239_v4 }
 0x1e5   : > { %v1673_v13 = vpack.c.bf16 %v1633_v18, %v1632_v33  ;;  %v1460_v15 = vadd.f32 %v1459_v28, %v1386_v19  ;;  %v1588_v18 = vadd.f32 %v3166_v46, %v1530_v53 }
 0x1e7   : > { %1699 = vst [vmem:[%s3181_s24 + $0x58] sm:$0xff] %v1673_v13  ;;  %v1525_v10 = vmul.f32 %v3168_v58, %v1460_v15  ;;  %v1640_v13 = vmax.f32 %v1588_v18, 0.0 }
 0x1e9   : > { %v1583_v7 = vadd.f32 %v3170_v63, %v1525_v10 }
 0x1ea   : > { %v1387_v24 = vpop.f32.mrf.mxu2  ;;  %v1242_v60 = vpop.f32.mrf.mxu0 }
 0x1eb   : > { %v1635_v55 = vmax.f32 %v1583_v7, 0.0  ;;  %v1388_v56 = vadd.f32 %v1387_v24, %v1314_v23  ;;  %v1461_v45 = vpop.f32.mrf.mxu3  ;;  %v1316_v32 = vpop.f32.mrf.mxu1 }
 0x1ec   : > { %v1317_v48 = vadd.f32 %v1316_v32, %v1242_v60  ;;  %v1642_v32 = vmax.f32 %v1590_v42, 0.0 }
 0x1ed   : > { %v1674_v11 = vpack.c.bf16 %v1635_v55, %v1634_v52  ;;  %v1462_v41 = vadd.f32 %v1461_v45, %v1388_v56 }
 0x1ef   : > { %1700 = vst [vmem:[%s3181_s24 + $0x60] sm:$0xff] %v1674_v11  ;;  %v1527_v22 = vmul.f32 %v3168_v58, %v1462_v41 }
 0x1f1   : > { %v1585_v62 = vadd.f32 %v3170_v63, %v1527_v22 }
 0x1f2   : > { %v1390_v57 = vpop.f32.mrf.mxu2  ;;  %v1244_v5 = vpop.f32.mrf.mxu0 }
 0x1f3   : > { %v1637_v35 = vmax.f32 %v1585_v62, 0.0  ;;  %v1391_v51 = vadd.f32 %v1390_v57, %v1317_v48  ;;  %v1464_v59 = vpop.f32.mrf.mxu3  ;;  %v1318_v40 = vpop.f32.mrf.mxu1 }
 0x1f4   : > { %v1319_v39 = vadd.f32 %v1318_v40, %v1244_v5 }
 0x1f5   : > { %v1675_v61 = vpack.c.bf16 %v1637_v35, %v1636_v27  ;;  %v1465_v37 = vadd.f32 %v1464_v59, %v1391_v51  ;;  %v1592_v27 = vadd.f32 %v3166_v46, %v1534_v30 }
 0x1f7   : > { %1701 = vst [vmem:[%s3181_s24 + $0x68] sm:$0xff] %v1675_v61  ;;  %v1529_v50 = vmul.f32 %v3168_v58, %v1465_v37  ;;  %v1644_v5 = vmax.f32 %v1592_v27, 0.0 }
 0x1f9   : > { %v1587_v38 = vadd.f32 %v3170_v63, %v1529_v50 }
 0x1fa   : > { %v1392_v9 = vpop.f32.mrf.mxu2  ;;  %v1247_v21 = vpop.f32.mrf.mxu0 }
 0x1fb   : > { %v1639_v2 = vmax.f32 %v1587_v38, 0.0  ;;  %v1393_v3 = vadd.f32 %v1392_v9, %v1319_v39  ;;  %v1466_v17 = vpop.f32.mrf.mxu3  ;;  %v1321_v34 = vpop.f32.mrf.mxu1  ;;  %v1594_v9 = vadd.f32 %v3166_v46, %v1536_v54 }
 0x1fc   : > { %v1322_v28 = vadd.f32 %v1321_v34, %v1247_v21 }
 0x1fd   : > { %v1676_v33 = vpack.c.bf16 %v1639_v2, %v1638_v1  ;;  %v1467_v47 = vadd.f32 %v1466_v17, %v1393_v3  ;;  %v1646_v17 = vmax.f32 %v1594_v9, 0.0  ;;  %v1602_v9 = vadd.f32 %v3166_v46, %v1544_v44 }
 0x1ff   : > { %1702 = vst [vmem:[%s3181_s24 + $0x70] sm:$0xff] %v1676_v33  ;;  %v1531_v19 = vmul.f32 %v3168_v58, %v1467_v47 }
 0x201   : > { %v1589_v4 = vadd.f32 %v3170_v63, %v1531_v19 }
 0x202   : > { %v1395_v26 = vpop.f32.mrf.mxu2  ;;  %v1249_v7 = vpop.f32.mrf.mxu0 }
 0x203   : > { %v1641_v15 = vmax.f32 %v1589_v4, 0.0  ;;  %v1396_v49 = vadd.f32 %v1395_v26, %v1322_v28  ;;  %v1469_v10 = vpop.f32.mrf.mxu3  ;;  %v1323_v23 = vpop.f32.mrf.mxu1  ;;  %v1596_v4 = vadd.f32 %v3166_v46, %v1538_v43 }
 0x204   : > { %v1324_v45 = vadd.f32 %v1323_v23, %v1249_v7 }
 0x205   : > { %v1677_v24 = vpack.c.bf16 %v1641_v15, %v1640_v13  ;;  %v1470_v52 = vadd.f32 %v1469_v10, %v1396_v49  ;;  %v1648_v49 = vmax.f32 %v1596_v4, 0.0 }
 0x207   : > { %1703 = vst [vmem:[%s3181_s24 + $0x78] sm:$0xff] %v1677_v24  ;;  %v1533_v55 = vmul.f32 %v3168_v58, %v1470_v52 }
 0x209   : > { %v1591_v56 = vadd.f32 %v3170_v63, %v1533_v55 }
 0x20a   : > { %v1397_v60 = vpop.f32.mrf.mxu2  ;;  %v1252_v22 = vpop.f32.mrf.mxu0 }
 0x20b   : > { %v1643_v11 = vmax.f32 %v1591_v56, 0.0  ;;  %v1398_v41 = vadd.f32 %v1397_v60, %v1324_v45  ;;  %v1471_v20 = vpop.f32.mrf.mxu3  ;;  %v1326_v48 = vpop.f32.mrf.mxu1  ;;  %v1598_v56 = vadd.f32 %v3166_v46, %v1540_v16 }
 0x20c   : > { %v1327_v35 = vadd.f32 %v1326_v48, %v1252_v22 }
 0x20d   : > { %v1678_v62 = vpack.c.bf16 %v1643_v11, %v1642_v32  ;;  %v1472_v57 = vadd.f32 %v1471_v20, %v1398_v41  ;;  %v1650_v11 = vmax.f32 %v1598_v56, 0.0 }
 0x20f   : > { %1704 = vst [vmem:[%s3181_s24 + $0x80] sm:$0xff] %v1678_v62  ;;  %v1535_v12 = vmul.f32 %v3168_v58, %v1472_v57 }
 0x211   : > { %v1593_v51 = vadd.f32 %v3170_v63, %v1535_v12  ;;  %v1600_v12 = vadd.f32 %v3166_v46, %v1542_v14 }
 0x212   : > { %v1400_v59 = vpop.f32.mrf.mxu2  ;;  %v1254_v31 = vpop.f32.mrf.mxu0 }
 0x213   : > { %v1645_v40 = vmax.f32 %v1593_v51, 0.0  ;;  %v1401_v61 = vadd.f32 %v1400_v59, %v1327_v35  ;;  %v1474_v37 = vpop.f32.mrf.mxu3  ;;  %v1328_v50 = vpop.f32.mrf.mxu1  ;;  %v1652_v54 = vmax.f32 %v1600_v12, 0.0 }
 0x214   : > { %v1329_v2 = vadd.f32 %v1328_v50, %v1254_v31 }
 0x215   : > { %v1679_v38 = vpack.c.bf16 %v1645_v40, %v1644_v5  ;;  %v1475_v39 = vadd.f32 %v1474_v37, %v1401_v61 }
 0x217   : > { %1705 = vst [vmem:[%s3181_s24 + $0x88] sm:$0xff] %v1679_v38  ;;  %v1537_v1 = vmul.f32 %v3168_v58, %v1475_v39 }
 0x219   : > { %v1595_v53 = vadd.f32 %v3170_v63, %v1537_v1 }
 0x21a   : > { %v1402_v3 = vpop.f32.mrf.mxu2  ;;  %v1257_v47 = vpop.f32.mrf.mxu0 }
 0x21b   : > { %v1647_v21 = vmax.f32 %v1595_v53, 0.0  ;;  %v1403_v34 = vadd.f32 %v1402_v3, %v1329_v2  ;;  %v1476_v33 = vpop.f32.mrf.mxu3  ;;  %v1331_v18 = vpop.f32.mrf.mxu1 }
 0x21c   : > { %v1332_v13 = vadd.f32 %v1331_v18, %v1257_v47 }
 0x21d   : > { %v1680_v19 = vpack.c.bf16 %v1647_v21, %v1646_v17  ;;  %v1477_v28 = vadd.f32 %v1476_v33, %v1403_v34  ;;  %v1654_v17 = vmax.f32 %v1602_v9, 0.0 }
 0x21f   : > { %1706 = vst [vmem:[%s3181_s24 + $0x90] sm:$0xff] %v1680_v19  ;;  %v1539_v26 = vmul.f32 %v3168_v58, %v1477_v28  ;;  %v1604_v28 = vadd.f32 %v3166_v46, %v1546_v6 }
 0x221   : > { %v1597_v36 = vadd.f32 %v3170_v63, %v1539_v26 }
 0x222   : > { %v1405_v15 = vpop.f32.mrf.mxu2  ;;  %v1259_v24 = vpop.f32.mrf.mxu0 }
 0x223   : > { %v1649_v10 = vmax.f32 %v1597_v36, 0.0  ;;  %v1406_v7 = vadd.f32 %v1405_v15, %v1332_v13  ;;  %v1479_v23 = vpop.f32.mrf.mxu3  ;;  %v1333_v52 = vpop.f32.mrf.mxu1  ;;  %v1656_v15 = vmax.f32 %v1604_v28, 0.0 }
 0x224   : > { %v1334_v32 = vadd.f32 %v1333_v52, %v1259_v24 }
 0x225   : > { %v1681_v42 = vpack.c.bf16 %v1649_v10, %v1648_v49  ;;  %v1480_v55 = vadd.f32 %v1479_v23, %v1406_v7 }
 0x227   : > { %1707 = vst [vmem:[%s3181_s24 + $0x98] sm:$0xff] %v1681_v42  ;;  %v1541_v45 = vmul.f32 %v3168_v58, %v1480_v55  ;;  %v1606_v42 = vadd.f32 %v3166_v46, %v1548_v0 }
 0x229   : > { %v1599_v60 = vadd.f32 %v3170_v63, %v1541_v45 }
 0x22a   : > { %v1407_v30 = vpop.f32.mrf.mxu2  ;;  %v1262_v48 = vpop.f32.mrf.mxu0 }
 0x22b   : > { %v1651_v41 = vmax.f32 %v1599_v60, 0.0  ;;  %v1408_v20 = vadd.f32 %v1407_v30, %v1334_v32  ;;  %v1481_v22 = vpop.f32.mrf.mxu3  ;;  %v1336_v62 = vpop.f32.mrf.mxu1  ;;  %v1658_v32 = vmax.f32 %v1606_v42, 0.0 }
 0x22c   : > { %v1337_v51 = vadd.f32 %v1336_v62, %v1262_v48 }
 0x22d   : > { %v1682_v57 = vpack.c.bf16 %v1651_v41, %v1650_v11  ;;  %v1482_v27 = vadd.f32 %v1481_v22, %v1408_v20  ;;  %v1608_v22 = vadd.f32 %v3166_v46, %v1550_v8 }
 0x22f   : > { %1708 = vst [vmem:[%s3181_s24 + $0xa0] sm:$0xff] %v1682_v57  ;;  %v1543_v35 = vmul.f32 %v3168_v58, %v1482_v27  ;;  %v1660_v57 = vmax.f32 %v1608_v22, 0.0 }
 0x231   : > { %v1601_v59 = vadd.f32 %v3170_v63, %v1543_v35 }
 0x232   : > { %v1410_v5 = vpop.f32.mrf.mxu2  ;;  %v1264_v31 = vpop.f32.mrf.mxu0 }
 0x233   : > { %v1653_v40 = vmax.f32 %v1601_v59, 0.0  ;;  %v1411_v61 = vadd.f32 %v1410_v5, %v1337_v51  ;;  %v1484_v37 = vpop.f32.mrf.mxu3  ;;  %v1338_v50 = vpop.f32.mrf.mxu1 }
 0x234   : > { %v1339_v2 = vadd.f32 %v1338_v50, %v1264_v31 }
 0x235   : > { %v1683_v38 = vpack.c.bf16 %v1653_v40, %v1652_v54  ;;  %v1485_v39 = vadd.f32 %v1484_v37, %v1411_v61 }
 0x237   : > { %1709 = vst [vmem:[%s3181_s24 + $0xa8] sm:$0xff] %v1683_v38  ;;  %v1545_v1 = vmul.f32 %v3168_v58, %v1485_v39 }
 0x239   : > { %v1603_v53 = vadd.f32 %v3170_v63, %v1545_v1 }
 0x23a   : > { %v1412_v3 = vpop.f32.mrf.mxu2  ;;  %v1267_v33 = vpop.f32.mrf.mxu0 }
 0x23b   : > { %v1655_v43 = vmax.f32 %v1603_v53, 0.0  ;;  %v1413_v21 = vadd.f32 %v1412_v3, %v1339_v2  ;;  %v1486_v34 = vpop.f32.mrf.mxu3  ;;  %v1341_v47 = vpop.f32.mrf.mxu1 }
 0x23c   : > { %v1342_v26 = vadd.f32 %v1341_v47, %v1267_v33 }
 0x23d   : > { %v1684_v18 = vpack.c.bf16 %v1655_v43, %v1654_v17  ;;  %v1487_v19 = vadd.f32 %v1486_v34, %v1413_v21 }
 0x23f   : > { %1710 = vst [vmem:[%s3181_s24 + $0xb0] sm:$0xff] %v1684_v18  ;;  %v1547_v4 = vmul.f32 %v3168_v58, %v1487_v19 }
 0x241   : > { %v1605_v13 = vadd.f32 %v3170_v63, %v1547_v4 }
 0x242   : > { %v1415_v36 = vpop.f32.mrf.mxu2  ;;  %v1269_v24 = vpop.f32.mrf.mxu0 }
 0x243   : > { %v1657_v49 = vmax.f32 %v1605_v13, 0.0  ;;  %v1416_v16 = vadd.f32 %v1415_v36, %v1342_v26  ;;  %v1489_v10 = vpop.f32.mrf.mxu3  ;;  %v1343_v52 = vpop.f32.mrf.mxu1 }
 0x244   : > { %v1344_v45 = vadd.f32 %v1343_v52, %v1269_v24 }
 0x245   : > { %v1685_v7 = vpack.c.bf16 %v1657_v49, %v1656_v15  ;;  %v1490_v23 = vadd.f32 %v1489_v10, %v1416_v16 }
 0x247   : > { %1711 = vst [vmem:[%s3181_s24 + $0xb8] sm:$0xff] %v1685_v7  ;;  %v1549_v55 = vmul.f32 %v3168_v58, %v1490_v23 }
 0x249   : > { %v1607_v56 = vadd.f32 %v3170_v63, %v1549_v55 }
 0x24a   : > { %v1417_v60 = vpop.f32.mrf.mxu2 }
 0x24b   : > { %v1659_v30 = vmax.f32 %v1607_v56, 0.0  ;;  %v1418_v11 = vadd.f32 %v1417_v60, %v1344_v45  ;;  %v1491_v14 = vpop.f32.mrf.mxu3 }
 0x24d   : > { %v1686_v41 = vpack.c.bf16 %v1659_v30, %v1658_v32  ;;  %v1492_v20 = vadd.f32 %v1491_v14, %v1418_v11 }
 0x24f   : > { %1712 = vst [vmem:[%s3181_s24 + $0xc0] sm:$0xff] %v1686_v41  ;;  %v1551_v48 = vmul.f32 %v3168_v58, %v1492_v20 }
 0x251   : > { %v1609_v62 = vadd.f32 %v3170_v63, %v1551_v48 }
 0x253   : > { %v1661_v27 = vmax.f32 %v1609_v62, 0.0 }
 0x255   : > { %v1687_v12 = vpack.c.bf16 %v1661_v27, %v1660_v57 }
 0x257   : > { %1713 = vst [vmem:[%s3181_s24 + $0xc8] sm:$0xff] %v1687_v12 }
 0x258 PF: > { %s14_s15 = sadd.s32 1, %s2379_s15  }
 0x259   : > { %p11_p4 = scmp.ge.s32.totalorder %s14_s15, 4  }
 0x25b   :  { %13 = sbr.rel (!%p11_p4) target bundleno = 1 (0x1), region = 66 }

// kernel: forward.5
= control target key start
LH: loop header
LB: loop body
LE: loop exit
PB: predicated region body
PF: predicated region fallthrough
CT: control target
= control target key end

     0   :  { %11 = vsyncpa [#allocation3], 0  ;;  %s8980_s0 = inlined_call_operand.vmem [shape: bf16[2,9,2304], index: 0, kind: input, shape index: {}]   ;;  %s8981_s1 = inlined_call_operand.vmem [shape: bf16[2304,256], index: 1, kind: input, shape index: {}]   ;;  %s8982_s2 = inlined_call_operand.vmem [shape: f32[1,256], index: 2, kind: input, shape index: {}]   ;;  %s8983_s3 = inlined_call_operand.vmem [shape: f32[1,256], index: 3, kind: input, shape index: {}]   ;;  %s8984_s4 = inlined_call_operand.vmem [shape: bf16[2304,128], index: 4, kind: input, shape index: {}]   ;;  %s8985_s5 = inlined_call_operand.vmem [shape: f32[1,128], index: 5, kind: input, shape index: {}]   ;;  %s8986_s6 = inlined_call_operand.hbm [shape: f32[2,1,128], index: 6, kind: output, shape index: {}]  }
   0x1   :  { %13 = vsyncpa [#allocation3 + $0x1], 0  ;;  %s6522_s21 = smov 0   ;;  %s6524_s22 = smov 0  }
   0x2   :  { %s6526_s23 = smov 0   ;;  %s6528_s24 = smov 0  }
   0x3 LB: > { %s6543_s25 = sadd.s32 4294967295, %s6485_s24   ;;  %s4126_s26 = sadd.s32 4294967294, %s6485_s24   ;;  %s6485_s24 = sphi %s6528_s24, %s8992_s24   ;;  %s6481_s23 = sphi %s6526_s23, %s8991_s23   ;;  %s6477_s22 = sphi %s6524_s22, %s8990_s22   ;;  %s6473_s21 = sphi %s6522_s21, %s8989_s21  }
   0x4   : > { %s6547_s27 = sadd.s32 1, %s6485_s24   ;;  %s157_s28 = sadd.s32 1, %s6481_s23 }
   0x5   : > { %s154_s29 = ssub.s32 %s6485_s24, %s6547_s27  ;;  %p167_p0 = scmp.ne.s32.totalorder %s6481_s23, %s6477_s22 }
   0x6   : > { %p155_p1 = scmp.eq.s32.totalorder %s154_s29, 0  ;;  %p168_p2 = scmp.eq.s32.totalorder %s6543_s25, 1 }
   0x7   : > { %p173_p3 = scmp.ne.s32.totalorder %s6477_s22, %s6473_s21  ;;  %p174_p4 = scmp.eq.s32.totalorder %s4126_s26, 1 }
   0x8   : > { %s6558_s30 = scalar_select %p155_p1, %s6481_s23, %s157_s28  }
   0x9   : > { %p6560_p5 = por %p168_p2, %p167_p0  ;;  %p6564_p6 = por %p174_p4, %p173_p3 }
   0xa   : > { %p4129_p7 = scmp.ge.s32.totalorder %s6485_s24, 1  ;;  %p215_p8 = scmp.lt.s32.totalorder %s6485_s24, 3 }
   0xc   : > { %p216_p9 = pnand %p4129_p7, %p215_p8 }
   0xd   : > { %p244_p10 = scmp.lt.s32.totalorder (!%p216_p9), %s6543_s25, 1  ;;  %s242_s28 = sand.u32 (!%p216_p9), 1, %s6477_s22  }
   0xe   : > { %219 = sbr.rel (%p216_p9) target bundleno = 689 (0x2b1), region = 44  ;;  %s243_s12 = scalar_lea.vmem (!%p216_p9), [#allocation2], %s242_s28 }
   0xf   : > { %s4069_s13 = sshll.u32 (!%p216_p9), %s243_s12, 4  ;;  %s4059_s16 = scalar_lea.sflag (!%p216_p9), [#allocation3], %s242_s28  ;;  %s4070_s13 = int_to_ptr.vmem [resolvable:$true] %s4069_s13 }
  0x10   : > { %s6443_s19 = scalar_lea.hbm (!%p216_p9), %s8986_s6, 2 }
  0x13   : > { %v4261_v0 = vld [vmem:[%s8981_s1 + $0x70] sm:$0xf]  ;;  %v5966_v1 = vld [vmem:[%s8981_s1 + $0x74] sm:$0xf0]  ;;  %v4253_v11 = vld [vmem:[%s8981_s1 + $0x60] sm:$0xf] }
  0x14   : > { %v4325_v2 = vld [vmem:[%s8981_s1 + $0xf0] sm:$0xf]  ;;  %v4262_v3 = vor.u32 %v5966_v1, %v4261_v0  ;;  %v5982_v4 = vld [vmem:[%s8981_s1 + $0xf4] sm:$0xf0]  ;;  %v5964_v13 = vld [vmem:[%s8981_s1 + $0x64] sm:$0xf0] }
  0x15   : > { %v4389_v5 = vld [vmem:[%s8981_s1 + $0x170] sm:$0xf]  ;;  %v5998_v6 = vld [vmem:[%s8981_s1 + $0x174] sm:$0xf0]  ;;  %v4326_v7 = vor.u32 %v5982_v4, %v4325_v2  ;;  %v4317_v14 = vld [vmem:[%s8981_s1 + $0xe0] sm:$0xf]  ;;  %v4254_v16 = vor.u32 %v5964_v13, %v4253_v11 }
  0x16   : > { %v4390_v8 = vor.u32 %v5998_v6, %v4389_v5  ;;  %v4453_v9 = vld [vmem:[%s8981_s1 + $0x1f0] sm:$0xf]  ;;  %v6014_v10 = vld [vmem:[%s8981_s1 + $0x1f4] sm:$0xf0]  ;;  %2085 = vmatpush.bf16.msra.mxu0 %v4262_v3  ;;  %v5980_v15 = vld [vmem:[%s8981_s1 + $0xe4] sm:$0xf0] }
  0x17   : > { %v4454_v12 = vor.u32 %v6014_v10, %v4453_v9  ;;  %2099 = vmatpush.bf16.msra.mxu1 %v4326_v7  ;;  %v4318_v17 = vor.u32 %v5980_v15, %v4317_v14  ;;  %v4381_v18 = vld [vmem:[%s8981_s1 + $0x160] sm:$0xf]  ;;  %v5996_v19 = vld [vmem:[%s8981_s1 + $0x164] sm:$0xf0]  ;;  %v4245_v23 = vld [vmem:[%s8981_s1 + $0x50] sm:$0xf] }
  0x18   : > { %2113 = vmatpush.bf16.msra.mxu2 %v4390_v8  ;;  %v4445_v20 = vld [vmem:[%s8981_s1 + $0x1e0] sm:$0xf]  ;;  %v4382_v21 = vor.u32 %v5996_v19, %v4381_v18  ;;  %v6012_v22 = vld [vmem:[%s8981_s1 + $0x1e4] sm:$0xf0]  ;;  %v5962_v24 = vld [vmem:[%s8981_s1 + $0x54] sm:$0xf0] }
  0x19   : > { %2127 = vmatpush.bf16.msra.mxu3 %v4454_v12  ;;  %v4446_v25 = vor.u32 %v6012_v22, %v4445_v20  ;;  %v4309_v26 = vld [vmem:[%s8981_s1 + $0xd0] sm:$0xf]  ;;  %v5978_v27 = vld [vmem:[%s8981_s1 + $0xd4] sm:$0xf0]  ;;  %v4246_v29 = vor.u32 %v5962_v24, %v4245_v23  ;;  %v4237_v35 = vld [vmem:[%s8981_s1 + $0x40] sm:$0xf] }
  0x1a   : > { %v4373_v28 = vld [vmem:[%s8981_s1 + $0x150] sm:$0xf]  ;;  %2086 = vmatpush.bf16.msra.mxu0 %v4254_v16  ;;  %v5994_v30 = vld [vmem:[%s8981_s1 + $0x154] sm:$0xf0]  ;;  %v4310_v33 = vor.u32 %v5978_v27, %v4309_v26  ;;  %v5960_v36 = vld [vmem:[%s8981_s1 + $0x44] sm:$0xf0] }
  0x1b   : > { %v4437_v31 = vld [vmem:[%s8981_s1 + $0x1d0] sm:$0xf]  ;;  %v6010_v32 = vld [vmem:[%s8981_s1 + $0x1d4] sm:$0xf0]  ;;  %2100 = vmatpush.bf16.msra.mxu1 %v4318_v17  ;;  %v4374_v34 = vor.u32 %v5994_v30, %v4373_v28  ;;  %v4301_v37 = vld [vmem:[%s8981_s1 + $0xc0] sm:$0xf]  ;;  %v4238_v44 = vor.u32 %v5960_v36, %v4237_v35 }
  0x1c   : > { %2114 = vmatpush.bf16.msra.mxu2 %v4382_v21  ;;  %v4438_v38 = vor.u32 %v6010_v32, %v4437_v31  ;;  %v5976_v39 = vld [vmem:[%s8981_s1 + $0xc4] sm:$0xf0]  ;;  %v4365_v40 = vld [vmem:[%s8981_s1 + $0x140] sm:$0xf]  ;;  %v4229_v47 = vld [vmem:[%s8981_s1 + $0x30] sm:$0xf] }
  0x1d   : > { %2128 = vmatpush.bf16.msra.mxu3 %v4446_v25  ;;  %v5992_v41 = vld [vmem:[%s8981_s1 + $0x144] sm:$0xf0]  ;;  %v4429_v42 = vld [vmem:[%s8981_s1 + $0x1c0] sm:$0xf]  ;;  %v4302_v45 = vor.u32 %v5976_v39, %v4301_v37  ;;  %v5958_v48 = vld [vmem:[%s8981_s1 + $0x34] sm:$0xf0] }
  0x1e   : > { %v6008_v43 = vld [vmem:[%s8981_s1 + $0x1c4] sm:$0xf0]  ;;  %2087 = vmatpush.bf16.msra.mxu0 %v4246_v29  ;;  %v4366_v46 = vor.u32 %v5992_v41, %v4365_v40  ;;  %v4293_v49 = vld [vmem:[%s8981_s1 + $0xb0] sm:$0xf]  ;;  %v5974_v51 = vld [vmem:[%s8981_s1 + $0xb4] sm:$0xf0]  ;;  %v4230_v56 = vor.u32 %v5958_v48, %v4229_v47 }
  0x1f   : > { %2101 = vmatpush.bf16.msra.mxu1 %v4310_v33  ;;  %v4430_v50 = vor.u32 %v6008_v43, %v4429_v42  ;;  %v4357_v52 = vld [vmem:[%s8981_s1 + $0x130] sm:$0xf]  ;;  %v5990_v53 = vld [vmem:[%s8981_s1 + $0x134] sm:$0xf0]  ;;  %v4294_v57 = vor.u32 %v5974_v51, %v4293_v49  ;;  %v4221_v59 = vld [vmem:[%s8981_s1 + $0x20] sm:$0xf] }
  0x20   : > { %2115 = vmatpush.bf16.msra.mxu2 %v4374_v34  ;;  %v4421_v54 = vld [vmem:[%s8981_s1 + $0x1b0] sm:$0xf]  ;;  %v6006_v55 = vld [vmem:[%s8981_s1 + $0x1b4] sm:$0xf0]  ;;  %v4358_v58 = vor.u32 %v5990_v53, %v4357_v52  ;;  %v5956_v60 = vld [vmem:[%s8981_s1 + $0x24] sm:$0xf0] }
  0x21   : > { %2129 = vmatpush.bf16.msra.mxu3 %v4438_v38  ;;  %v4285_v61 = vld [vmem:[%s8981_s1 + $0xa0] sm:$0xf]  ;;  %v4422_v62 = vor.u32 %v6006_v55, %v4421_v54  ;;  %v5972_v63 = vld [vmem:[%s8981_s1 + $0xa4] sm:$0xf0]  ;;  %v4222_v4 = vor.u32 %v5956_v60, %v4221_v59  ;;  %v4213_v7 = vld [vmem:[%s8981_s1 + $0x10] sm:$0xf] }
  0x22   : > { %2088 = vmatpush.bf16.msra.mxu0 %v4238_v44  ;;  %v4349_v0 = vld [vmem:[%s8981_s1 + $0x120] sm:$0xf]  ;;  %v5988_v1 = vld [vmem:[%s8981_s1 + $0x124] sm:$0xf0]  ;;  %v4286_v5 = vor.u32 %v5972_v63, %v4285_v61  ;;  %v5954_v8 = vld [vmem:[%s8981_s1 + $0x14] sm:$0xf0] }
  0x23   : > { %2102 = vmatpush.bf16.msra.mxu1 %v4302_v45  ;;  %v4413_v2 = vld [vmem:[%s8981_s1 + $0x1a0] sm:$0xf]  ;;  %v6004_v3 = vld [vmem:[%s8981_s1 + $0x1a4] sm:$0xf0]  ;;  %v4350_v6 = vor.u32 %v5988_v1, %v4349_v0  ;;  %v4277_v9 = vld [vmem:[%s8981_s1 + $0x90] sm:$0xf]  ;;  %v4214_v16 = vor.u32 %v5954_v8, %v4213_v7 }
  0x24   : > { %2116 = vmatpush.bf16.msra.mxu2 %v4366_v46  ;;  %v4414_v10 = vor.u32 %v6004_v3, %v4413_v2  ;;  %v5970_v11 = vld [vmem:[%s8981_s1 + $0x94] sm:$0xf0]  ;;  %v4341_v12 = vld [vmem:[%s8981_s1 + $0x110] sm:$0xf]  ;;  %v4205_v17 = vld [vmem:[%s8981_s1] sm:$0xf] }
  0x25   : > { %2130 = vmatpush.bf16.msra.mxu3 %v4430_v50  ;;  %v5986_v13 = vld [vmem:[%s8981_s1 + $0x114] sm:$0xf0]  ;;  %v4405_v14 = vld [vmem:[%s8981_s1 + $0x190] sm:$0xf]  ;;  %v5952_v18 = vld [vmem:[%s8981_s1 + $0x4] sm:$0xf0]  ;;  %v4278_v19 = vor.u32 %v5970_v11, %v4277_v9 }
  0x26   : > { %2089 = vmatpush.bf16.msra.mxu0 %v4230_v56  ;;  %v6002_v15 = vld [vmem:[%s8981_s1 + $0x194] sm:$0xf0]  ;;  %v4342_v20 = vor.u32 %v5986_v13, %v4341_v12  ;;  %v4269_v21 = vld [vmem:[%s8981_s1 + $0x80] sm:$0xf]  ;;  %v5968_v22 = vld [vmem:[%s8981_s1 + $0x84] sm:$0xf0]  ;;  %v4206_v31 = vor.u32 %v5952_v18, %v4205_v17 }
  0x27   : > { %2103 = vmatpush.bf16.msra.mxu1 %v4294_v57  ;;  %v4333_v23 = vld [vmem:[%s8981_s1 + $0x100] sm:$0xf]  ;;  %v4406_v24 = vor.u32 %v6002_v15, %v4405_v14  ;;  %v5984_v25 = vld [vmem:[%s8981_s1 + $0x104] sm:$0xf0]  ;;  %v4517_v28 = vld [vmem:[%s8981_s1 + $0x270] sm:$0xf]  ;;  %v4270_v35 = vor.u32 %v5968_v22, %v4269_v21 }
  0x28   : > { %2117 = vmatpush.bf16.msra.mxu2 %v4358_v58  ;;  %v4397_v26 = vld [vmem:[%s8981_s1 + $0x180] sm:$0xf]  ;;  %v6000_v27 = vld [vmem:[%s8981_s1 + $0x184] sm:$0xf0]  ;;  %v6030_v29 = vld [vmem:[%s8981_s1 + $0x274] sm:$0xf0]  ;;  %v4334_v36 = vor.u32 %v5984_v25, %v4333_v23 }
  0x29   : > { %2131 = vmatpush.bf16.msra.mxu3 %v4422_v62  ;;  %v4581_v30 = vld [vmem:[%s8981_s1 + $0x2f0] sm:$0xf]  ;;  %v6046_v32 = vld [vmem:[%s8981_s1 + $0x2f4] sm:$0xf0]  ;;  %v4398_v39 = vor.u32 %v6000_v27, %v4397_v26  ;;  %v4518_v40 = vor.u32 %v6030_v29, %v4517_v28  ;;  %v4509_v43 = vld [vmem:[%s8981_s1 + $0x260] sm:$0xf] }
  0x2a   : > { %2090 = vmatpush.bf16.msra.mxu0 %v4222_v4  ;;  %v4645_v33 = vld [vmem:[%s8981_s1 + $0x370] sm:$0xf]  ;;  %v6062_v34 = vld [vmem:[%s8981_s1 + $0x374] sm:$0xf0]  ;;  %v4582_v41 = vor.u32 %v6046_v32, %v4581_v30  ;;  %v6028_v44 = vld [vmem:[%s8981_s1 + $0x264] sm:$0xf0] }
  0x2b   : > { %2104 = vmatpush.bf16.msra.mxu1 %v4286_v5  ;;  %v4709_v37 = vld [vmem:[%s8981_s1 + $0x3f0] sm:$0xf]  ;;  %v6078_v38 = vld [vmem:[%s8981_s1 + $0x3f4] sm:$0xf0]  ;;  %v4646_v42 = vor.u32 %v6062_v34, %v4645_v33  ;;  %v4573_v45 = vld [vmem:[%s8981_s1 + $0x2e0] sm:$0xf]  ;;  %v4510_v52 = vor.u32 %v6028_v44, %v4509_v43 }
  0x2c   : > { %2118 = vmatpush.bf16.msra.mxu2 %v4350_v6  ;;  %v4710_v46 = vor.u32 %v6078_v38, %v4709_v37  ;;  %v6044_v47 = vld [vmem:[%s8981_s1 + $0x2e4] sm:$0xf0]  ;;  %v4637_v48 = vld [vmem:[%s8981_s1 + $0x360] sm:$0xf]  ;;  %v4501_v53 = vld [vmem:[%s8981_s1 + $0x250] sm:$0xf] }
  0x2d   : > { %2132 = vmatpush.bf16.msra.mxu3 %v4414_v10  ;;  %v6060_v49 = vld [vmem:[%s8981_s1 + $0x364] sm:$0xf0]  ;;  %v4701_v50 = vld [vmem:[%s8981_s1 + $0x3e0] sm:$0xf]  ;;  %v6026_v54 = vld [vmem:[%s8981_s1 + $0x254] sm:$0xf0]  ;;  %v4574_v56 = vor.u32 %v6044_v47, %v4573_v45 }
  0x2e   : > { %2091 = vmatpush.bf16.msra.mxu0 %v4214_v16  ;;  %v6076_v51 = vld [vmem:[%s8981_s1 + $0x3e4] sm:$0xf0]  ;;  %v4565_v55 = vld [vmem:[%s8981_s1 + $0x2d0] sm:$0xf]  ;;  %v4638_v57 = vor.u32 %v6060_v49, %v4637_v48  ;;  %v6042_v58 = vld [vmem:[%s8981_s1 + $0x2d4] sm:$0xf0]  ;;  %v4502_v2 = vor.u32 %v6026_v54, %v4501_v53 }
  0x2f   : > { %2105 = vmatpush.bf16.msra.mxu1 %v4278_v19  ;;  %v4629_v59 = vld [vmem:[%s8981_s1 + $0x350] sm:$0xf]  ;;  %s245_s14 = scalar_select %p244_p10, %s6543_s25, 1  ;;  %v4702_v60 = vor.u32 %v6076_v51, %v4701_v50  ;;  %v6058_v61 = vld [vmem:[%s8981_s1 + $0x354] sm:$0xf0]  ;;  %v4566_v6 = vor.u32 %v6042_v58, %v4565_v55 }
  0x30   : > { %2119 = vmatpush.bf16.msra.mxu2 %v4342_v20  ;;  %v4693_v62 = vld [vmem:[%s8981_s1 + $0x3d0] sm:$0xf]  ;;  %v6074_v63 = vld [vmem:[%s8981_s1 + $0x3d4] sm:$0xf0]  ;;  %v4493_v0 = vld [vmem:[%s8981_s1 + $0x240] sm:$0xf]  ;;  %v4630_v7 = vor.u32 %v6058_v61, %v4629_v59 }
  0x31   : > { %2133 = vmatpush.bf16.msra.mxu3 %v4406_v24  ;;  %v6024_v1 = vld [vmem:[%s8981_s1 + $0x244] sm:$0xf0]  ;;  %s6383_s10 = smul.u32 144, %s245_s14  ;;  %v4557_v3 = vld [vmem:[%s8981_s1 + $0x2c0] sm:$0xf]  ;;  %v4694_v11 = vor.u32 %v6074_v63, %v4693_v62 }
  0x32   : > { %2092 = vmatpush.bf16.msra.mxu0 %v4206_v31  ;;  %v6040_v4 = vld [vmem:[%s8981_s1 + $0x2c4] sm:$0xf0]  ;;  %v4621_v5 = vld [vmem:[%s8981_s1 + $0x340] sm:$0xf]  ;;  %v4494_v19 = vor.u32 %v6024_v1, %v4493_v0  ;;  %v4485_v26 = vld [vmem:[%s8981_s1 + $0x230] sm:$0xf] }
  0x33   : > { %2106 = vmatpush.bf16.msra.mxu1 %v4270_v35  ;;  %v6056_v8 = vld [vmem:[%s8981_s1 + $0x344] sm:$0xf0]  ;;  %v4685_v9 = vld [vmem:[%s8981_s1 + $0x3c0] sm:$0xf]  ;;  %s6863_s11 = scalar_lea.vmem %s8980_s0, %s6383_s10  ;;  %v4558_v24 = vor.u32 %v6040_v4, %v4557_v3  ;;  %v6022_v27 = vld [vmem:[%s8981_s1 + $0x234] sm:$0xf0]  ;;  %s4067_s10 = scalar_lea.hbm %s8986_s6, %s6543_s25 }
  0x34   : > { %2120 = vmatpush.bf16.msra.mxu2 %v4334_v36  ;;  %v6072_v10 = vld [vmem:[%s8981_s1 + $0x3c4] sm:$0xf0]  ;;  %v4133_v12 = vld [vmem:[%s6863_s11] sm:$0xf]  ;;  %v5943_v16 = vld [vmem:[%s6863_s11 + $0x4c] sm:$0x10]  ;;  %v4622_v25 = vor.u32 %v6056_v8, %v4621_v5  ;;  %v4486_v36 = vor.u32 %v6022_v27, %v4485_v26 }
  0x35   : > { %2134 = vmatpush.bf16.msra.mxu3 %v4398_v39  ;;  %v5942_v13 = vld [vmem:[%s6863_s11 + $0x44] sm:$0x10]  ;;  %v5933_v17 = vld [vmem:[%s6863_s11 + $0x4] sm:$0xf]  ;;  %v4135_v18 = vld [vmem:[%s6863_s11 + $0x48] sm:$0x10]  ;;  %v4686_v30 = vor.u32 %v6072_v10, %v4685_v9 }
  0x36   : > { %2141 = vmatpush.bf16.msrb.mxu0 %v4518_v40  ;;  %v4141_v14 = vld [vmem:[%s6863_s11 + $0x8] sm:$0xf]  ;;  %v6868_v15 = vor.u32 %v5942_v13, %v4133_v12  ;;  %v6875_v21 = vor.u32 %v5933_v17, %v4135_v18  ;;  %v5934_v22 = vld [vmem:[%s6863_s11 + $0xc] sm:$0xf]  ;;  %v4143_v23 = vld [vmem:[%s6863_s11 + $0x50] sm:$0x10] }
  0x37   : > { %2155 = vmatpush.bf16.msrb.mxu1 %v4582_v41  ;;  %v6873_v20 = vor.u32 %v5943_v16, %v4141_v14  ;;  %v4549_v28 = vld [vmem:[%s8981_s1 + $0x2b0] sm:$0xf]  ;;  %v6888_v29 = vor.u32 %v5934_v22, %v4143_v23  ;;  %v6038_v31 = vld [vmem:[%s8981_s1 + $0x2b4] sm:$0xf0]  ;;  %v4477_v39 = vld [vmem:[%s8981_s1 + $0x220] sm:$0xf] }
  0x38   : > { %2169 = vmatpush.bf16.msrb.mxu2 %v4646_v42  ;;  %2093 = vmatmul.bf16.vlgmr.msra.gmra.mxu0 %v6868_v15  ;;  %v4613_v32 = vld [vmem:[%s8981_s1 + $0x330] sm:$0xf]  ;;  %v6054_v33 = vld [vmem:[%s8981_s1 + $0x334] sm:$0xf0]  ;;  %v4550_v37 = vor.u32 %v6038_v31, %v4549_v28  ;;  %v6020_v40 = vld [vmem:[%s8981_s1 + $0x224] sm:$0xf0] }
  0x39   : > { %2183 = vmatpush.bf16.msrb.mxu3 %v4710_v46  ;;  %2121 = vmatmul.bf16.vlgmr.msra.gmra.mxu2 %v6873_v20  ;;  %v4677_v34 = vld [vmem:[%s8981_s1 + $0x3b0] sm:$0xf]  ;;  %v6070_v35 = vld [vmem:[%s8981_s1 + $0x3b4] sm:$0xf0]  ;;  %v4614_v38 = vor.u32 %v6054_v33, %v4613_v32  ;;  %v4541_v41 = vld [vmem:[%s8981_s1 + $0x2a0] sm:$0xf]  ;;  %v4478_v48 = vor.u32 %v6020_v40, %v4477_v39 }
  0x3a   : > { %2142 = vmatpush.bf16.msrb.mxu0 %v4510_v52  ;;  %2107 = vmatmul.bf16.vlgmr.msra.gmra.mxu1 %v6875_v21  ;;  %v4678_v42 = vor.u32 %v6070_v35, %v4677_v34  ;;  %v6036_v43 = vld [vmem:[%s8981_s1 + $0x2a4] sm:$0xf0]  ;;  %v4605_v44 = vld [vmem:[%s8981_s1 + $0x320] sm:$0xf]  ;;  %v4469_v49 = vld [vmem:[%s8981_s1 + $0x210] sm:$0xf] }
  0x3b   : > { %2156 = vmatpush.bf16.msrb.mxu1 %v4574_v56  ;;  %2135 = vmatmul.bf16.vlgmr.msra.gmra.mxu3 %v6888_v29  ;;  %v6052_v45 = vld [vmem:[%s8981_s1 + $0x324] sm:$0xf0]  ;;  %v4669_v46 = vld [vmem:[%s8981_s1 + $0x3a0] sm:$0xf]  ;;  %v4542_v50 = vor.u32 %v6036_v43, %v4541_v41  ;;  %v6018_v52 = vld [vmem:[%s8981_s1 + $0x214] sm:$0xf0] }
  0x3c   : > { %2170 = vmatpush.bf16.msrb.mxu2 %v4638_v57  ;;  %v6068_v47 = vld [vmem:[%s8981_s1 + $0x3a4] sm:$0xf0]  ;;  %v4606_v51 = vor.u32 %v6052_v45, %v4605_v44  ;;  %v4533_v53 = vld [vmem:[%s8981_s1 + $0x290] sm:$0xf]  ;;  %v6034_v54 = vld [vmem:[%s8981_s1 + $0x294] sm:$0xf0]  ;;  %v4470_v62 = vor.u32 %v6018_v52, %v4469_v49 }
  0x3d   : > { %2184 = vmatpush.bf16.msrb.mxu3 %v4702_v60  ;;  %v4670_v55 = vor.u32 %v6068_v47, %v4669_v46  ;;  %v4597_v56 = vld [vmem:[%s8981_s1 + $0x310] sm:$0xf]  ;;  %v6050_v57 = vld [vmem:[%s8981_s1 + $0x314] sm:$0xf0]  ;;  %v4461_v60 = vld [vmem:[%s8981_s1 + $0x200] sm:$0xf]  ;;  %v4534_v3 = vor.u32 %v6034_v54, %v4533_v53 }
  0x3e   : > { %2143 = vmatpush.bf16.msrb.mxu0 %v4502_v2  ;;  %v4661_v58 = vld [vmem:[%s8981_s1 + $0x390] sm:$0xf]  ;;  %v6066_v59 = vld [vmem:[%s8981_s1 + $0x394] sm:$0xf0]  ;;  %v6016_v61 = vld [vmem:[%s8981_s1 + $0x204] sm:$0xf0]  ;;  %v4598_v4 = vor.u32 %v6050_v57, %v4597_v56 }
  0x3f   : > { %2157 = vmatpush.bf16.msrb.mxu1 %v4566_v6  ;;  %v4525_v63 = vld [vmem:[%s8981_s1 + $0x280] sm:$0xf]  ;;  %v6032_v0 = vld [vmem:[%s8981_s1 + $0x284] sm:$0xf0]  ;;  %v4662_v8 = vor.u32 %v6066_v59, %v4661_v58  ;;  %v6094_v9 = vld [vmem:[%s8981_s1 + $0x474] sm:$0xf0]  ;;  %v4462_v16 = vor.u32 %v6016_v61, %v4461_v60 }
  0x40   : > { %2171 = vmatpush.bf16.msrb.mxu2 %v4630_v7  ;;  %v4589_v1 = vld [vmem:[%s8981_s1 + $0x300] sm:$0xf]  ;;  %v6048_v2 = vld [vmem:[%s8981_s1 + $0x304] sm:$0xf0]  ;;  %v4773_v7 = vld [vmem:[%s8981_s1 + $0x470] sm:$0xf]  ;;  %v4526_v22 = vor.u32 %v6032_v0, %v4525_v63 }
  0x41   : > { %2185 = vmatpush.bf16.msrb.mxu3 %v4694_v11  ;;  %v4653_v5 = vld [vmem:[%s8981_s1 + $0x380] sm:$0xf]  ;;  %v6064_v6 = vld [vmem:[%s8981_s1 + $0x384] sm:$0xf0]  ;;  %v4837_v10 = vld [vmem:[%s8981_s1 + $0x4f0] sm:$0xf]  ;;  %v4590_v23 = vor.u32 %v6048_v2, %v4589_v1  ;;  %v4774_v28 = vor.u32 %v6094_v9, %v4773_v7 }
  0x42   : > { %2144 = vmatpush.bf16.msrb.mxu0 %v4494_v19  ;;  %v6110_v11 = vld [vmem:[%s8981_s1 + $0x4f4] sm:$0xf0]  ;;  %v4901_v12 = vld [vmem:[%s8981_s1 + $0x570] sm:$0xf]  ;;  %v5935_v26 = vld [vmem:[%s6863_s11 + $0x14] sm:$0xf]  ;;  %v4654_v27 = vor.u32 %v6064_v6, %v4653_v5 }
  0x43   : > { %2158 = vmatpush.bf16.msrb.mxu1 %v4558_v24  ;;  %v6126_v13 = vld [vmem:[%s8981_s1 + $0x574] sm:$0xf0]  ;;  %v4965_v14 = vld [vmem:[%s8981_s1 + $0x5f0] sm:$0xf]  ;;  %v5936_v31 = vld [vmem:[%s6863_s11 + $0x1c] sm:$0xf]  ;;  %v4838_v33 = vor.u32 %v6110_v11, %v4837_v10 }
  0x44   : > { %2172 = vmatpush.bf16.msrb.mxu2 %v4622_v25  ;;  %v6142_v17 = vld [vmem:[%s8981_s1 + $0x5f4] sm:$0xf0]  ;;  %v4149_v18 = vld [vmem:[%s6863_s11 + $0x10] sm:$0xf]  ;;  %v5945_v25 = vld [vmem:[%s6863_s11 + $0x5c] sm:$0x10]  ;;  %v4902_v34 = vor.u32 %v6126_v13, %v4901_v12 }
  0x45   : > { %2186 = vmatpush.bf16.msrb.mxu3 %v4686_v30  ;;  %v5944_v19 = vld [vmem:[%s6863_s11 + $0x54] sm:$0x10]  ;;  %v4151_v30 = vld [vmem:[%s6863_s11 + $0x58] sm:$0x10]  ;;  %v4159_v32 = vld [vmem:[%s6863_s11 + $0x60] sm:$0x10] }
  0x46   : > { %2145 = vmatpush.bf16.msrb.mxu0 %v4486_v36  ;;  %v4157_v24 = vld [vmem:[%s6863_s11 + $0x18] sm:$0xf]  ;;  %v4765_v35 = vld [vmem:[%s8981_s1 + $0x460] sm:$0xf]  ;;  %v6092_v36 = vld [vmem:[%s8981_s1 + $0x464] sm:$0xf0]  ;;  %v7022_v39 = vor.u32 %v5944_v19, %v4149_v18  ;;  %v7035_v44 = vor.u32 %v5935_v26, %v4151_v30  ;;  %v7043_v47 = vor.u32 %v5936_v31, %v4159_v32 }
  0x47   : > { %2159 = vmatpush.bf16.msrb.mxu1 %v4550_v37  ;;  %v4829_v37 = vld [vmem:[%s8981_s1 + $0x4e0] sm:$0xf]  ;;  %v6108_v40 = vld [vmem:[%s8981_s1 + $0x4e4] sm:$0xf0]  ;;  %v7033_v43 = vor.u32 %v5945_v25, %v4157_v24  ;;  %v6090_v52 = vld [vmem:[%s8981_s1 + $0x454] sm:$0xf0] }
  0x48   : > { %2173 = vmatpush.bf16.msrb.mxu2 %v4614_v38  ;;  %v4966_v38 = vor.u32 %v6142_v17, %v4965_v14  ;;  %v4893_v41 = vld [vmem:[%s8981_s1 + $0x560] sm:$0xf]  ;;  %v6140_v46 = vld [vmem:[%s8981_s1 + $0x5e4] sm:$0xf0]  ;;  %v4830_v49 = vor.u32 %v6108_v40, %v4829_v37  ;;  %v4821_v53 = vld [vmem:[%s8981_s1 + $0x4d0] sm:$0xf] }
  0x49   : > { %2187 = vmatpush.bf16.msrb.mxu3 %v4678_v42  ;;  %v6124_v42 = vld [vmem:[%s8981_s1 + $0x564] sm:$0xf0]  ;;  %v4957_v45 = vld [vmem:[%s8981_s1 + $0x5e0] sm:$0xf]  ;;  %v4885_v56 = vld [vmem:[%s8981_s1 + $0x550] sm:$0xf] }
  0x4a   : > { %2146 = vmatpush.bf16.msrb.mxu0 %v4478_v48  ;;  %v4766_v48 = vor.u32 %v6092_v36, %v4765_v35  ;;  %v4958_v54 = vor.u32 %v6140_v46, %v4957_v45  ;;  %v6122_v57 = vld [vmem:[%s8981_s1 + $0x554] sm:$0xf0]  ;;  %v4949_v58 = vld [vmem:[%s8981_s1 + $0x5d0] sm:$0xf]  ;;  %v4749_v63 = vld [vmem:[%s8981_s1 + $0x440] sm:$0xf] }
  0x4b   : > { %2160 = vmatpush.bf16.msrb.mxu1 %v4542_v50  ;;  %v4894_v50 = vor.u32 %v6124_v42, %v4893_v41  ;;  %v6138_v59 = vld [vmem:[%s8981_s1 + $0x5d4] sm:$0xf0]  ;;  %v6088_v0 = vld [vmem:[%s8981_s1 + $0x444] sm:$0xf0]  ;;  %v4813_v1 = vld [vmem:[%s8981_s1 + $0x4c0] sm:$0xf] }
  0x4c   : > { %2174 = vmatpush.bf16.msrb.mxu2 %v4606_v51  ;;  %v4757_v51 = vld [vmem:[%s8981_s1 + $0x450] sm:$0xf]  ;;  %v4950_v2 = vor.u32 %v6138_v59, %v4949_v58  ;;  %v6120_v5 = vld [vmem:[%s8981_s1 + $0x544] sm:$0xf0]  ;;  %v4941_v6 = vld [vmem:[%s8981_s1 + $0x5c0] sm:$0xf] }
  0x4d   : > { %2188 = vmatpush.bf16.msrb.mxu3 %v4670_v55  ;;  %v6106_v55 = vld [vmem:[%s8981_s1 + $0x4d4] sm:$0xf0]  ;;  %v4758_v60 = vor.u32 %v6090_v52, %v4757_v51  ;;  %v6136_v7 = vld [vmem:[%s8981_s1 + $0x5c4] sm:$0xf0]  ;;  %v4741_v11 = vld [vmem:[%s8981_s1 + $0x430] sm:$0xf] }
  0x4e   : > { %2147 = vmatpush.bf16.msrb.mxu0 %v4470_v62  ;;  %v4822_v61 = vor.u32 %v6106_v55, %v4821_v53  ;;  %v4886_v62 = vor.u32 %v6122_v57, %v4885_v56  ;;  %v6086_v12 = vld [vmem:[%s8981_s1 + $0x434] sm:$0xf0]  ;;  %v4805_v13 = vld [vmem:[%s8981_s1 + $0x4b0] sm:$0xf]  ;;  %v4942_v14 = vor.u32 %v6136_v7, %v4941_v6  ;;  %v4733_v26 = vld [vmem:[%s8981_s1 + $0x420] sm:$0xf] }
  0x4f   : > { %2161 = vmatpush.bf16.msrb.mxu1 %v4534_v3  ;;  %v6104_v3 = vld [vmem:[%s8981_s1 + $0x4c4] sm:$0xf0]  ;;  %v4869_v17 = vld [vmem:[%s8981_s1 + $0x530] sm:$0xf]  ;;  %v6118_v18 = vld [vmem:[%s8981_s1 + $0x534] sm:$0xf0] }
  0x50   : > { %2175 = vmatpush.bf16.msrb.mxu2 %v4598_v4  ;;  %v4877_v4 = vld [vmem:[%s8981_s1 + $0x540] sm:$0xf]  ;;  %v4814_v9 = vor.u32 %v6104_v3, %v4813_v1  ;;  %v4933_v19 = vld [vmem:[%s8981_s1 + $0x5b0] sm:$0xf]  ;;  %v4870_v25 = vor.u32 %v6118_v18, %v4869_v17  ;;  %v6100_v31 = vld [vmem:[%s8981_s1 + $0x4a4] sm:$0xf0] }
  0x51   : > { %2189 = vmatpush.bf16.msrb.mxu3 %v4662_v8  ;;  %v4750_v8 = vor.u32 %v6088_v0, %v4749_v63  ;;  %v4878_v10 = vor.u32 %v6120_v5, %v4877_v4  ;;  %v4861_v32 = vld [vmem:[%s8981_s1 + $0x520] sm:$0xf]  ;;  %v6132_v35 = vld [vmem:[%s8981_s1 + $0x5a4] sm:$0xf0]  ;;  %v4725_v37 = vld [vmem:[%s8981_s1 + $0x410] sm:$0xf] }
  0x52   : > { %2148 = vmatpush.bf16.msrb.mxu0 %v4462_v16  ;;  %v6102_v16 = vld [vmem:[%s8981_s1 + $0x4b4] sm:$0xf0]  ;;  %v4789_v42 = vld [vmem:[%s8981_s1 + $0x490] sm:$0xf]  ;;  %v4717_v52 = vld [vmem:[%s8981_s1 + $0x400] sm:$0xf] }
  0x53   : > { %2162 = vmatpush.bf16.msrb.mxu1 %v4526_v22  ;;  %v6134_v22 = vld [vmem:[%s8981_s1 + $0x5b4] sm:$0xf0]  ;;  %v4806_v24 = vor.u32 %v6102_v16, %v4805_v13  ;;  %v6080_v53 = vld [vmem:[%s8981_s1 + $0x404] sm:$0xf0]  ;;  %v4781_v55 = vld [vmem:[%s8981_s1 + $0x480] sm:$0xf] }
  0x54   : > { %2176 = vmatpush.bf16.msrb.mxu2 %v4590_v23  ;;  %v4742_v23 = vor.u32 %v6086_v12, %v4741_v11  ;;  %v4934_v30 = vor.u32 %v6134_v22, %v4933_v19  ;;  %v6082_v41 = vld [vmem:[%s8981_s1 + $0x414] sm:$0xf0]  ;;  %v6096_v56 = vld [vmem:[%s8981_s1 + $0x484] sm:$0xf0]  ;;  %v4845_v57 = vld [vmem:[%s8981_s1 + $0x500] sm:$0xf]  ;;  %v4718_v7 = vor.u32 %v6080_v53, %v4717_v52 }
  0x55   : > { %2190 = vmatpush.bf16.msrb.mxu3 %v4654_v27  ;;  %2149 = vmatmul.bf16.vlgmr.msrb.gmra.mxu0 %v7022_v39  ;;  %v6084_v27 = vld [vmem:[%s8981_s1 + $0x424] sm:$0xf0]  ;;  %v6098_v45 = vld [vmem:[%s8981_s1 + $0x494] sm:$0xf0]  ;;  %v5029_v63 = vld [vmem:[%s8981_s1 + $0x670] sm:$0xf]  ;;  %v4782_v11 = vor.u32 %v6096_v56, %v4781_v55 }
  0x56   : > { %2197 = vmatpush.bf16.msra.mxu0 %v4774_v28  ;;  %2163 = vmatmul.bf16.vlgmr.msrb.gmra.mxu1 %v7035_v44  ;;  %v4797_v28 = vld [vmem:[%s8981_s1 + $0x4a0] sm:$0xf]  ;;  %v4734_v36 = vor.u32 %v6084_v27, %v4733_v26  ;;  %v6130_v51 = vld [vmem:[%s8981_s1 + $0x594] sm:$0xf0]  ;;  %v6112_v58 = vld [vmem:[%s8981_s1 + $0x504] sm:$0xf0]  ;;  %v4790_v59 = vor.u32 %v6098_v45, %v4789_v42 }
  0x57   : > { %2211 = vmatpush.bf16.msra.mxu1 %v4838_v33  ;;  %2177 = vmatmul.bf16.vlgmr.msrb.gmra.mxu2 %v7033_v43  ;;  %v6116_v33 = vld [vmem:[%s8981_s1 + $0x524] sm:$0xf0]  ;;  %v6158_v1 = vld [vmem:[%s8981_s1 + $0x674] sm:$0xf0]  ;;  %v5157_v4 = vld [vmem:[%s8981_s1 + $0x770] sm:$0xf]  ;;  %v4846_v12 = vor.u32 %v6112_v58, %v4845_v57 }
  0x58   : > { %2225 = vmatpush.bf16.msra.mxu2 %v4902_v34  ;;  %2191 = vmatmul.bf16.vlgmr.msrb.gmra.mxu3 %v7043_v47  ;;  %v4925_v34 = vld [vmem:[%s8981_s1 + $0x5a0] sm:$0xf]  ;;  %v4862_v40 = vor.u32 %v6116_v33, %v4861_v32  ;;  %v6174_v3 = vld [vmem:[%s8981_s1 + $0x6f4] sm:$0xf0]  ;;  %v5221_v6 = vld [vmem:[%s8981_s1 + $0x7f0] sm:$0xf]  ;;  %v5030_v18 = vor.u32 %v6158_v1, %v5029_v63 }
  0x59   : > { %2239 = vmatpush.bf16.msra.mxu3 %v4966_v38  ;;  %v4798_v38 = vor.u32 %v6100_v31, %v4797_v28  ;;  %v4926_v46 = vor.u32 %v6132_v35, %v4925_v34  ;;  %v6190_v5 = vld [vmem:[%s8981_s1 + $0x774] sm:$0xf0]  ;;  %v4173_v13 = vld [vmem:[%s6863_s11 + $0x28] sm:$0xf]  ;;  %v5937_v16 = vld [vmem:[%s6863_s11 + $0x24] sm:$0xf] }
  0x5a   : > { %2198 = vmatpush.bf16.msra.mxu0 %v4766_v48  ;;  %v4853_v48 = vld [vmem:[%s8981_s1 + $0x510] sm:$0xf]  ;;  %v4167_v19 = vld [vmem:[%s6863_s11 + $0x68] sm:$0x10]  ;;  %v5021_v26 = vld [vmem:[%s8981_s1 + $0x660] sm:$0xf] }
  0x5b   : > { %2212 = vmatpush.bf16.msra.mxu1 %v4830_v49  ;;  %v6114_v49 = vld [vmem:[%s8981_s1 + $0x514] sm:$0xf0]  ;;  %v5938_v22 = vld [vmem:[%s6863_s11 + $0x2c] sm:$0xf]  ;;  %v6156_v27 = vld [vmem:[%s8981_s1 + $0x664] sm:$0xf0] }
  0x5c   : > { %2226 = vmatpush.bf16.msra.mxu2 %v4894_v50  ;;  %v4917_v50 = vld [vmem:[%s8981_s1 + $0x590] sm:$0xf]  ;;  %v5085_v28 = vld [vmem:[%s8981_s1 + $0x6e0] sm:$0xf]  ;;  %v6172_v32 = vld [vmem:[%s8981_s1 + $0x6e4] sm:$0xf0] }
  0x5d   : > { %2240 = vmatpush.bf16.msra.mxu3 %v4958_v54  ;;  %v4726_v54 = vor.u32 %v6082_v41, %v4725_v37  ;;  %v4918_v0 = vor.u32 %v6130_v51, %v4917_v50  ;;  %v5149_v33 = vld [vmem:[%s8981_s1 + $0x760] sm:$0xf]  ;;  %v6188_v34 = vld [vmem:[%s8981_s1 + $0x764] sm:$0xf0]  ;;  %v5022_v41 = vor.u32 %v6156_v27, %v5021_v26  ;;  %v5086_v42 = vor.u32 %v6172_v32, %v5085_v28  ;;  %v6170_v51 = vld [vmem:[%s8981_s1 + $0x6d4] sm:$0xf0] }
  0x5e   : > { %2199 = vmatpush.bf16.msra.mxu0 %v4758_v60  ;;  %v4854_v60 = vor.u32 %v6114_v49, %v4853_v48  ;;  %v5213_v37 = vld [vmem:[%s8981_s1 + $0x7e0] sm:$0xf]  ;;  %v5150_v45 = vor.u32 %v6188_v34, %v5149_v33  ;;  %v6154_v48 = vld [vmem:[%s8981_s1 + $0x654] sm:$0xf0]  ;;  %v5077_v49 = vld [vmem:[%s8981_s1 + $0x6d0] sm:$0xf] }
  0x5f   : > { %2213 = vmatpush.bf16.msra.mxu1 %v4822_v61  ;;  %v4909_v61 = vld [vmem:[%s8981_s1 + $0x580] sm:$0xf]  ;;  %v5141_v52 = vld [vmem:[%s8981_s1 + $0x750] sm:$0xf]  ;;  %v6186_v53 = vld [vmem:[%s8981_s1 + $0x754] sm:$0xf0]  ;;  %v5078_v57 = vor.u32 %v6170_v51, %v5077_v49 }
  0x60   : > { %2227 = vmatpush.bf16.msra.mxu2 %v4886_v62  ;;  %v6128_v62 = vld [vmem:[%s8981_s1 + $0x584] sm:$0xf0]  ;;  %v6202_v55 = vld [vmem:[%s8981_s1 + $0x7d4] sm:$0xf0]  ;;  %v5142_v58 = vor.u32 %v6186_v53, %v5141_v52  ;;  %v5117_v27 = vld [vmem:[%s8981_s1 + $0x720] sm:$0xf] }
  0x61   : > { %2241 = vmatpush.bf16.msra.mxu3 %v4950_v2  ;;  %v5093_v2 = vld [vmem:[%s8981_s1 + $0x6f0] sm:$0xf]  ;;  %v4910_v17 = vor.u32 %v6128_v62, %v4909_v61  ;;  %v5069_v61 = vld [vmem:[%s8981_s1 + $0x6c0] sm:$0xf]  ;;  %v6168_v63 = vld [vmem:[%s8981_s1 + $0x6c4] sm:$0xf0] }
  0x62   : > { %2200 = vmatpush.bf16.msra.mxu0 %v4750_v8  ;;  %v6206_v8 = vld [vmem:[%s8981_s1 + $0x7f4] sm:$0xf0]  ;;  %v6184_v1 = vld [vmem:[%s8981_s1 + $0x744] sm:$0xf0]  ;;  %v4981_v34 = vld [vmem:[%s8981_s1 + $0x610] sm:$0xf] }
  0x63   : > { %2214 = vmatpush.bf16.msra.mxu1 %v4814_v9  ;;  %v4165_v9 = vld [vmem:[%s6863_s11 + $0x20] sm:$0xf]  ;;  %v6164_v26 = vld [vmem:[%s8981_s1 + $0x6a4] sm:$0xf0]  ;;  %v6178_v49 = vld [vmem:[%s8981_s1 + $0x714] sm:$0xf0] }
  0x64   : > { %2228 = vmatpush.bf16.msra.mxu2 %v4878_v10  ;;  %v5946_v10 = vld [vmem:[%s6863_s11 + $0x64] sm:$0x10]  ;;  %v6194_v51 = vld [vmem:[%s8981_s1 + $0x794] sm:$0xf0]  ;;  %v4973_v52 = vld [vmem:[%s8981_s1 + $0x600] sm:$0xf] }
  0x65   : > { %2242 = vmatpush.bf16.msra.mxu3 %v4942_v14  ;;  %v5947_v14 = vld [vmem:[%s6863_s11 + $0x6c] sm:$0x10]  ;;  %v7234_v31 = vor.u32 %v5946_v10, %v4165_v9  ;;  %v6180_v28 = vld [vmem:[%s8981_s1 + $0x724] sm:$0xf0]  ;;  %s4071_s15 = sshll.u32 %s4067_s10, 4  ;;  %s4072_s15 = int_to_ptr.hbm [resolvable:$true] %s4071_s15 }
  0x66   : > { %2201 = vmatpush.bf16.msra.mxu0 %v4742_v23  ;;  %v4175_v23 = vld [vmem:[%s6863_s11 + $0x70] sm:$0x10]  ;;  %v7245_v35 = vor.u32 %v5947_v14, %v4173_v13  ;;  %v5061_v9 = vld [vmem:[%s8981_s1 + $0x6b0] sm:$0xf]  ;;  %v6182_v13 = vld [vmem:[%s8981_s1 + $0x734] sm:$0xf0] }
  0x67   : > { %2215 = vmatpush.bf16.msra.mxu1 %v4806_v24  ;;  %v5094_v24 = vor.u32 %v6174_v3, %v5093_v2  ;;  %v5197_v2 = vld [vmem:[%s8981_s1 + $0x7c0] sm:$0xf]  ;;  %v6200_v3 = vld [vmem:[%s8981_s1 + $0x7c4] sm:$0xf0]  ;;  %v5189_v14 = vld [vmem:[%s8981_s1 + $0x7b0] sm:$0xf] }
  0x68   : > { %2229 = vmatpush.bf16.msra.mxu2 %v4870_v25  ;;  %v5158_v25 = vor.u32 %v6190_v5, %v5157_v4  ;;  %v5070_v5 = vor.u32 %v6168_v63, %v5069_v61  ;;  %v5198_v10 = vor.u32 %v6200_v3, %v5197_v2  ;;  %v6196_v32 = vld [vmem:[%s8981_s1 + $0x7a4] sm:$0xf0]  ;;  %v5165_v61 = vld [vmem:[%s8981_s1 + $0x780] sm:$0xf]  ;;  %v5285_v63 = vld [vmem:[%s8981_s1 + $0x870] sm:$0xf] }
  0x69   : > { %2243 = vmatpush.bf16.msra.mxu3 %v4934_v30  ;;  %v5222_v30 = vor.u32 %v6206_v8, %v5221_v6  ;;  %v6150_v8 = vld [vmem:[%s8981_s1 + $0x634] sm:$0xf0]  ;;  %v6144_v53 = vld [vmem:[%s8981_s1 + $0x604] sm:$0xf0]  ;;  %v5349_v2 = vld [vmem:[%s8981_s1 + $0x8f0] sm:$0xf] }
  0x6a   : > { %2202 = vmatpush.bf16.msra.mxu0 %v4734_v36  ;;  %v7247_v36 = vor.u32 %v5937_v16, %v4167_v19  ;;  %v6198_v16 = vld [vmem:[%s8981_s1 + $0x7b4] sm:$0xf0]  ;;  %s6437_s17 = sshra.s32 %s4072_s15, 4  ;;  %s6438_s17 = int_to_ptr.hbm [resolvable:$true] %s6437_s17 }
  0x6b   : > { %2216 = vmatpush.bf16.msra.mxu1 %v4798_v38  ;;  %v6204_v38 = vld [vmem:[%s8981_s1 + $0x7e4] sm:$0xf0]  ;;  %v6238_v3 = vld [vmem:[%s8981_s1 + $0x8f4] sm:$0xf0]  ;;  %s6439_s18 = scalar_lea.hbm %s6438_s17, 1  ;;  %p6444_p0 = scmp.lt.s32.totalorder %s6438_s17, %s8986_s6 }
  0x6c   : > { %2230 = vmatpush.bf16.msra.mxu2 %v4862_v40  ;;  %v7255_v40 = vor.u32 %v5938_v22, %v4175_v23  ;;  %v5214_v50 = vor.u32 %v6204_v38, %v5213_v37  ;;  %v4989_v22 = vld [vmem:[%s8981_s1 + $0x620] sm:$0xf]  ;;  %v6148_v23 = vld [vmem:[%s8981_s1 + $0x624] sm:$0xf0]  ;;  %v5118_v38 = vor.u32 %v6180_v28, %v5117_v27  ;;  %p6440_p11 = scmp.ne.s32.totalorder %s6438_s17, %s6439_s18  ;;  %p6445_p1 = scmp.lt.s32.totalorder %s6443_s19, %s6439_s18 }
  0x6d   : > { %2244 = vmatpush.bf16.msra.mxu3 %v4926_v46  ;;  %v5013_v46 = vld [vmem:[%s8981_s1 + $0x650] sm:$0xf]  ;;  %v4990_v33 = vor.u32 %v6148_v23, %v4989_v22  ;;  %v5940_v22 = vld [vmem:[%s6863_s11 + $0x3c] sm:$0xf]  ;;  %v4191_v23 = vld [vmem:[%s6863_s11 + $0x80] sm:$0x10] }
  0x6e   : > { %2203 = vmatpush.bf16.msra.mxu0 %v4726_v54  ;;  %v5205_v54 = vld [vmem:[%s8981_s1 + $0x7d0] sm:$0xf]  ;;  %v5014_v56 = vor.u32 %v6154_v48, %v5013_v46  ;;  %v6220_v27 = vld [vmem:[%s8981_s1 + $0x864] sm:$0xf0]  ;;  %v5341_v28 = vld [vmem:[%s8981_s1 + $0x8e0] sm:$0xf]  ;;  %p6441_p12 = pnand %p6440_p11, %p6560_p5  ;;  %p6446_p2 = por %p6445_p1, %p6444_p0 }
  0x6f   : > { %2217 = vmatpush.bf16.msra.mxu1 %v4790_v59  ;;  %v5005_v59 = vld [vmem:[%s8981_s1 + $0x640] sm:$0xf]  ;;  %v5206_v62 = vor.u32 %v6202_v55, %v5205_v54  ;;  %v5109_v48 = vld [vmem:[%s8981_s1 + $0x710] sm:$0xf] }
  0x70   : > { %2231 = vmatpush.bf16.msra.mxu2 %v4854_v60  ;;  %v6152_v60 = vld [vmem:[%s8981_s1 + $0x644] sm:$0xf0]  ;;  %v5037_v55 = vld [vmem:[%s8981_s1 + $0x680] sm:$0xf]  ;;  %p6442_p13 = pneg %p6441_p12 }
  0x71   : > { %2245 = vmatpush.bf16.msra.mxu3 %v4918_v0  ;;  %v5133_v0 = vld [vmem:[%s8981_s1 + $0x740] sm:$0xf]  ;;  %v5006_v4 = vor.u32 %v6152_v60, %v5005_v59  ;;  %v5110_v60 = vor.u32 %v6178_v49, %v5109_v48 }
  0x72   : > { %2204 = vmatpush.bf16.msra.mxu0 %v4718_v7  ;;  %v5134_v6 = vor.u32 %v6184_v1, %v5133_v0  ;;  %v4997_v7 = vld [vmem:[%s8981_s1 + $0x630] sm:$0xf]  ;;  %v6222_v1 = vld [vmem:[%s8981_s1 + $0x874] sm:$0xf0]  ;;  %p6447_p3 = pnand %p6446_p2, %p6442_p13 }
  0x73   : > { %2218 = vmatpush.bf16.msra.mxu1 %v4782_v11  ;;  %v6166_v11 = vld [vmem:[%s8981_s1 + $0x6b4] sm:$0xf0] }
  0x74   : > { %2232 = vmatpush.bf16.msra.mxu2 %v4846_v12  ;;  %v5125_v12 = vld [vmem:[%s8981_s1 + $0x730] sm:$0xf] }
  0x75   : > { %2246 = vmatpush.bf16.msra.mxu3 %v4910_v17  ;;  %2205 = vmatmul.bf16.vlgmr.msra.gmra.mxu0 %v7234_v31  ;;  %v4998_v17 = vor.u32 %v6150_v8, %v4997_v7  ;;  %v5126_v19 = vor.u32 %v6182_v13, %v5125_v12  ;;  %v4974_v7 = vor.u32 %v6144_v53, %v4973_v52  ;;  %v4327_v8 = vld [vmem:[%s8981_s1 + $0xf8] sm:$0xf0]  ;;  %v4189_v13 = vld [vmem:[%s6863_s11 + $0x38] sm:$0xf]  ;;  %v5333_v53 = vld [vmem:[%s8981_s1 + $0x8d0] sm:$0xf] }
  0x76   : > { %2253 = vmatpush.bf16.msrb.mxu0 %v5030_v18  ;;  %2219 = vmatmul.bf16.vlgmr.msra.gmra.mxu1 %v7247_v36  ;;  %v5062_v18 = vor.u32 %v6166_v11, %v5061_v9  ;;  %v4181_v9 = vld [vmem:[%s6863_s11 + $0x30] sm:$0xf]  ;;  %v6218_v52 = vld [vmem:[%s8981_s1 + $0x854] sm:$0xf0] }
  0x77   : > { %2267 = vmatpush.bf16.msrb.mxu1 %v5094_v24  ;;  %2233 = vmatmul.bf16.vlgmr.msra.gmra.mxu2 %v7245_v35  ;;  %v5053_v24 = vld [vmem:[%s8981_s1 + $0x6a0] sm:$0xf] }
  0x78   : > { %2281 = vmatpush.bf16.msrb.mxu2 %v5158_v25  ;;  %2247 = vmatmul.bf16.vlgmr.msra.gmra.mxu3 %v7255_v40  ;;  %v5190_v25 = vor.u32 %v6198_v16, %v5189_v14  ;;  %v5054_v37 = vor.u32 %v6164_v26, %v5053_v24  ;;  %v5949_v14 = vld [vmem:[%s6863_s11 + $0x7c] sm:$0x10]  ;;  %v5939_v16 = vld [vmem:[%s6863_s11 + $0x34] sm:$0xf]  ;;  %v5350_v24 = vor.u32 %v6238_v3, %v5349_v2  ;;  %v6232_v3 = vld [vmem:[%s8981_s1 + $0x8c4] sm:$0xf0] }
  0x79   : > { %2295 = vmatpush.bf16.msrb.mxu3 %v5222_v30  ;;  %v5181_v30 = vld [vmem:[%s8981_s1 + $0x7a0] sm:$0xf] }
  0x7a   : > { %2254 = vmatpush.bf16.msrb.mxu0 %v5022_v41  ;;  %v6146_v41 = vld [vmem:[%s8981_s1 + $0x614] sm:$0xf0]  ;;  %v5182_v46 = vor.u32 %v6196_v32, %v5181_v30  ;;  %v5277_v26 = vld [vmem:[%s8981_s1 + $0x860] sm:$0xf] }
  0x7b   : > { %2268 = vmatpush.bf16.msrb.mxu1 %v5086_v42  ;;  %v5045_v42 = vld [vmem:[%s8981_s1 + $0x690] sm:$0xf]  ;;  %v4982_v54 = vor.u32 %v6146_v41, %v4981_v34  ;;  %v5963_v34 = vld [vmem:[%s8981_s1 + $0x64] sm:$0xf]  ;;  %v5278_v48 = vor.u32 %v6220_v27, %v5277_v26  ;;  %v5245_v26 = vld [vmem:[%s8981_s1 + $0x820] sm:$0xf] }
  0x7c   : > { %2282 = vmatpush.bf16.msrb.mxu2 %v5150_v45  ;;  %v6162_v45 = vld [vmem:[%s8981_s1 + $0x694] sm:$0xf0]  ;;  %v6212_v27 = vld [vmem:[%s8981_s1 + $0x824] sm:$0xf0] }
  0x7d   : > { %2296 = vmatpush.bf16.msrb.mxu3 %v5214_v50  ;;  %v5173_v50 = vld [vmem:[%s8981_s1 + $0x790] sm:$0xf]  ;;  %v5046_v59 = vor.u32 %v6162_v45, %v5045_v42  ;;  %v5979_v42 = vld [vmem:[%s8981_s1 + $0xe4] sm:$0xf]  ;;  %v4319_v45 = vld [vmem:[%s8981_s1 + $0xe8] sm:$0xf0] }
  0x7e   : > { %2255 = vmatpush.bf16.msrb.mxu0 %v5014_v56  ;;  %v6160_v56 = vld [vmem:[%s8981_s1 + $0x684] sm:$0xf0]  ;;  %v5174_v0 = vor.u32 %v6194_v51, %v5173_v50  ;;  %v5269_v51 = vld [vmem:[%s8981_s1 + $0x850] sm:$0xf] }
  0x7f   : > { %2269 = vmatpush.bf16.msrb.mxu1 %v5078_v57  ;;  %v5101_v57 = vld [vmem:[%s8981_s1 + $0x700] sm:$0xf]  ;;  %v5038_v11 = vor.u32 %v6160_v56, %v5037_v55  ;;  %v6234_v55 = vld [vmem:[%s8981_s1 + $0x8d4] sm:$0xf0]  ;;  %v5961_v56 = vld [vmem:[%s8981_s1 + $0x54] sm:$0xf] }
  0x80   : > { %2283 = vmatpush.bf16.msrb.mxu2 %v5142_v58  ;;  %v6176_v58 = vld [vmem:[%s8981_s1 + $0x704] sm:$0xf0] }
  0x81   : > { %2297 = vmatpush.bf16.msrb.mxu3 %v5206_v62  ;;  %v6192_v62 = vld [vmem:[%s8981_s1 + $0x784] sm:$0xf0]  ;;  %v5102_v12 = vor.u32 %v6176_v58, %v5101_v57  ;;  %v4247_v57 = vld [vmem:[%s8981_s1 + $0x58] sm:$0xf0]  ;;  %v5977_v58 = vld [vmem:[%s8981_s1 + $0xd4] sm:$0xf] }
  0x82   : > { %2256 = vmatpush.bf16.msrb.mxu0 %v5006_v4  ;;  %v5965_v4 = vld [vmem:[%s8981_s1 + $0x74] sm:$0xf] }
  0x83   : > { %2270 = vmatpush.bf16.msrb.mxu1 %v5070_v5  ;;  %v4263_v5 = vld [vmem:[%s8981_s1 + $0x78] sm:$0xf0] }
  0x84   : > { %2284 = vmatpush.bf16.msrb.mxu2 %v5134_v6  ;;  %v5981_v6 = vld [vmem:[%s8981_s1 + $0xf4] sm:$0xf] }
  0x85   : > { %2298 = vmatpush.bf16.msrb.mxu3 %v5198_v10  ;;  %v5948_v10 = vld [vmem:[%s6863_s11 + $0x74] sm:$0x10]  ;;  %v4330_v30 = vor.u32 %v5981_v6, %v4327_v8  ;;  %v5975_v6 = vld [vmem:[%s8981_s1 + $0xc4] sm:$0xf] }
  0x86   : > { %2257 = vmatpush.bf16.msrb.mxu0 %v4998_v17  ;;  %v5166_v17 = vor.u32 %v6192_v62, %v5165_v61  ;;  %v7446_v32 = vor.u32 %v5948_v10, %v4181_v9  ;;  %v5334_v61 = vor.u32 %v6234_v55, %v5333_v53  ;;  %v4250_v62 = vor.u32 %v5961_v56, %v4247_v57  ;;  %v5301_v53 = vld [vmem:[%s8981_s1 + $0x890] sm:$0xf]  ;;  %v6226_v55 = vld [vmem:[%s8981_s1 + $0x894] sm:$0xf0]  ;;  %v5953_v56 = vld [vmem:[%s8981_s1 + $0x14] sm:$0xf] }
  0x87   : > { %2271 = vmatpush.bf16.msrb.mxu1 %v5062_v18  ;;  %v5286_v18 = vor.u32 %v6222_v1, %v5285_v63  ;;  %v5261_v63 = vld [vmem:[%s8981_s1 + $0x840] sm:$0xf]  ;;  %v4215_v57 = vld [vmem:[%s8981_s1 + $0x18] sm:$0xf0] }
  0x88   : > { %2285 = vmatpush.bf16.msrb.mxu2 %v5126_v19  ;;  %v4183_v19 = vld [vmem:[%s6863_s11 + $0x78] sm:$0x10]  ;;  %v5325_v1 = vld [vmem:[%s8981_s1 + $0x8c0] sm:$0xf] }
  0x89   : > { %2299 = vmatpush.bf16.msrb.mxu3 %v5190_v25  ;;  %v4266_v25 = vor.u32 %v5965_v4, %v4263_v5  ;;  %v7459_v41 = vor.u32 %v5939_v16, %v4183_v19  ;;  %v5959_v4 = vld [vmem:[%s8981_s1 + $0x44] sm:$0xf]  ;;  %v4239_v5 = vld [vmem:[%s8981_s1 + $0x48] sm:$0xf0]  ;;  %v5326_v9 = vor.u32 %v6232_v3, %v5325_v1  ;;  %v6230_v16 = vld [vmem:[%s8981_s1 + $0x8b4] sm:$0xf0]  ;;  %v4218_v1 = vor.u32 %v5953_v56, %v4215_v57 }
  0x8a   : > { %2258 = vmatpush.bf16.msrb.mxu0 %v4990_v33  ;;  %v6236_v33 = vld [vmem:[%s8981_s1 + $0x8e4] sm:$0xf0]  ;;  %v4242_v10 = vor.u32 %v5959_v4, %v4239_v5  ;;  %v5973_v19 = vld [vmem:[%s8981_s1 + $0xb4] sm:$0xf]  ;;  %v5951_v3 = vld [vmem:[%s8981_s1 + $0x4] sm:$0xf] }
  0x8b   : > { %2272 = vmatpush.bf16.msrb.mxu1 %v5054_v37  ;;  %v4255_v37 = vld [vmem:[%s8981_s1 + $0x68] sm:$0xf0]  ;;  %v5342_v49 = vor.u32 %v6236_v33, %v5341_v28  ;;  %v5309_v28 = vld [vmem:[%s8981_s1 + $0x8a0] sm:$0xf]  ;;  %v6228_v33 = vld [vmem:[%s8981_s1 + $0x8a4] sm:$0xf0] }
  0x8c   : > { %2286 = vmatpush.bf16.msrb.mxu2 %v5118_v38  ;;  %v7457_v38 = vor.u32 %v5949_v14, %v4189_v13  ;;  %v4258_v50 = vor.u32 %v5963_v34, %v4255_v37  ;;  %v5317_v13 = vld [vmem:[%s8981_s1 + $0x8b0] sm:$0xf]  ;;  %v5955_v34 = vld [vmem:[%s8981_s1 + $0x24] sm:$0xf]  ;;  %v4223_v37 = vld [vmem:[%s8981_s1 + $0x28] sm:$0xf0] }
  0x8d   : > { %2300 = vmatpush.bf16.msrb.mxu3 %v5182_v46  ;;  %v7467_v46 = vor.u32 %v5940_v22, %v4191_v23  ;;  %v4295_v22 = vld [vmem:[%s8981_s1 + $0xb8] sm:$0xf0]  ;;  %v4207_v4 = vld [vmem:[%s8981_s1 + $0x8] sm:$0xf0]  ;;  %v5993_v57 = vld [vmem:[%s8981_s1 + $0x154] sm:$0xf] }
  0x8e   : > { %2259 = vmatpush.bf16.msrb.mxu0 %v4982_v54  ;;  %v4322_v54 = vor.u32 %v5979_v42, %v4319_v45  ;;  %v5971_v42 = vld [vmem:[%s8981_s1 + $0xa4] sm:$0xf]  ;;  %v4287_v45 = vld [vmem:[%s8981_s1 + $0xa8] sm:$0xf0] }
  0x8f   : > { %2273 = vmatpush.bf16.msrb.mxu1 %v5046_v59  ;;  %v4311_v59 = vld [vmem:[%s8981_s1 + $0xd8] sm:$0xf0] }
  0x90   : > { %2287 = vmatpush.bf16.msrb.mxu2 %v5110_v60  ;;  %v5270_v60 = vor.u32 %v6218_v52, %v5269_v51  ;;  %v4314_v2 = vor.u32 %v5977_v58, %v4311_v59  ;;  %v5237_v51 = vld [vmem:[%s8981_s1 + $0x810] sm:$0xf]  ;;  %v6210_v52 = vld [vmem:[%s8981_s1 + $0x814] sm:$0xf0]  ;;  %v5969_v58 = vld [vmem:[%s8981_s1 + $0x94] sm:$0xf] }
  0x91   : > { %2301 = vmatpush.bf16.msrb.mxu3 %v5174_v0  ;;  %v6216_v0 = vld [vmem:[%s8981_s1 + $0x844] sm:$0xf0]  ;;  %v4279_v59 = vld [vmem:[%s8981_s1 + $0x98] sm:$0xf0] }
  0x92   : > { %2260 = vmatpush.bf16.msrb.mxu0 %v4974_v7  ;;  %v4303_v7 = vld [vmem:[%s8981_s1 + $0xc8] sm:$0xf0]  ;;  %v5262_v8 = vor.u32 %v6216_v0, %v5261_v63  ;;  %v5293_v63 = vld [vmem:[%s8981_s1 + $0x880] sm:$0xf]  ;;  %v5302_v0 = vor.u32 %v6226_v55, %v5301_v53  ;;  %v4282_v5 = vor.u32 %v5969_v58, %v4279_v59  ;;  %v4375_v58 = vld [vmem:[%s8981_s1 + $0x158] sm:$0xf0] }
  0x93   : > { %2274 = vmatpush.bf16.msrb.mxu1 %v5038_v11  ;;  %v5253_v11 = vld [vmem:[%s8981_s1 + $0x830] sm:$0xf]  ;;  %v4306_v14 = vor.u32 %v5975_v6, %v4303_v7  ;;  %v5967_v6 = vld [vmem:[%s8981_s1 + $0x84] sm:$0xf]  ;;  %v4271_v7 = vld [vmem:[%s8981_s1 + $0x88] sm:$0xf0] }
  0x94   : > { %2288 = vmatpush.bf16.msrb.mxu2 %v5102_v12  ;;  %v6214_v12 = vld [vmem:[%s8981_s1 + $0x834] sm:$0xf0]  ;;  %v4575_v53 = vld [vmem:[%s8981_s1 + $0x2e8] sm:$0xf0]  ;;  %v6009_v59 = vld [vmem:[%s8981_s1 + $0x1d4] sm:$0xf] }
  0x95   : > { %2302 = vmatpush.bf16.msrb.mxu3 %v5166_v17  ;;  %2261 = vmatmul.bf16.vlgmr.msrb.gmra.mxu0 %v7446_v32  ;;  %v5957_v17 = vld [vmem:[%s8981_s1 + $0x34] sm:$0xf]  ;;  %v5254_v23 = vor.u32 %v6214_v12, %v5253_v11  ;;  %v4455_v11 = vld [vmem:[%s8981_s1 + $0x1f8] sm:$0xf0] }
  0x96   : > { %2309 = vmatpush.bf16.msra.mxu0 %v5286_v18  ;;  %2275 = vmatmul.bf16.vlgmr.msrb.gmra.mxu1 %v7459_v41  ;;  %v4231_v18 = vld [vmem:[%s8981_s1 + $0x38] sm:$0xf0] }
  0x97   : > { %2323 = vmatpush.bf16.msra.mxu1 %v5350_v24  ;;  %2289 = vmatmul.bf16.vlgmr.msrb.gmra.mxu2 %v7457_v38  ;;  %v5318_v24 = vor.u32 %v6230_v16, %v5317_v13  ;;  %v6029_v13 = vld [vmem:[%s8981_s1 + $0x274] sm:$0xf] }
  0x98   : > { %2337 = vmatpush.bf16.msra.mxu2 %v4266_v25  ;;  %2303 = vmatmul.bf16.vlgmr.msrb.gmra.mxu3 %v7467_v46  ;;  %v4234_v25 = vor.u32 %v5957_v17, %v4231_v18  ;;  %v6045_v16 = vld [vmem:[%s8981_s1 + $0x2f4] sm:$0xf]  ;;  %v4210_v18 = vor.u32 %v5951_v3, %v4207_v4 }
  0x99   : > { %2351 = vmatpush.bf16.msra.mxu3 %v4330_v30  ;;  %v4298_v30 = vor.u32 %v5973_v19, %v4295_v22  ;;  %v4583_v19 = vld [vmem:[%s8981_s1 + $0x2f8] sm:$0xf0]  ;;  %v4197_v22 = vld [vmem:[%s6863_s11 + $0x40] sm:$0xf] }
  0x9a   : > { %2310 = vmatpush.bf16.msra.mxu0 %v5278_v48  ;;  %v5246_v48 = vor.u32 %v6212_v27, %v5245_v26  ;;  %v5941_v26 = vld [vmem:[%s6863_s11 + $0x44] sm:$0xf]  ;;  %v4199_v27 = vld [vmem:[%s6863_s11 + $0x88] sm:$0x10] }
  0x9b   : > { %2324 = vmatpush.bf16.msra.mxu1 %v5342_v49  ;;  %v5310_v49 = vor.u32 %v6228_v33, %v5309_v28  ;;  %v5995_v33 = vld [vmem:[%s8981_s1 + $0x164] sm:$0xf] }
  0x9c   : > { %2338 = vmatpush.bf16.msra.mxu2 %v4258_v50  ;;  %v4226_v50 = vor.u32 %v5955_v34, %v4223_v37  ;;  %v4383_v34 = vld [vmem:[%s8981_s1 + $0x168] sm:$0xf0]  ;;  %v6011_v37 = vld [vmem:[%s8981_s1 + $0x1e4] sm:$0xf] }
  0x9d   : > { %2352 = vmatpush.bf16.msra.mxu3 %v4322_v54  ;;  %v4290_v54 = vor.u32 %v5971_v42, %v4287_v45  ;;  %v4586_v42 = vor.u32 %v6045_v16, %v4583_v19  ;;  %v5989_v16 = vld [vmem:[%s8981_s1 + $0x134] sm:$0xf] }
  0x9e   : > { %2311 = vmatpush.bf16.msra.mxu0 %v5270_v60  ;;  %v5238_v60 = vor.u32 %v6210_v52, %v5237_v51  ;;  %v7665_v51 = vor.u32 %v5941_v26, %v4199_v27  ;;  %v6043_v52 = vld [vmem:[%s8981_s1 + $0x2e4] sm:$0xf]  ;;  %v4551_v26 = vld [vmem:[%s8981_s1 + $0x2b8] sm:$0xf0] }
  0x9f   : > { %2325 = vmatpush.bf16.msra.mxu1 %v5334_v61  ;;  %v5229_v61 = vld [vmem:[%s8981_s1 + $0x800] sm:$0xf] }
  0xa0   : > { %2339 = vmatpush.bf16.msra.mxu2 %v4250_v62  ;;  %v6208_v62 = vld [vmem:[%s8981_s1 + $0x804] sm:$0xf0] }
  0xa1   : > { %2353 = vmatpush.bf16.msra.mxu3 %v4314_v2  ;;  %v6224_v2 = vld [vmem:[%s8981_s1 + $0x884] sm:$0xf0]  ;;  %v5230_v12 = vor.u32 %v6208_v62, %v5229_v61  ;;  %v4439_v61 = vld [vmem:[%s8981_s1 + $0x1d8] sm:$0xf0]  ;;  %v6025_v62 = vld [vmem:[%s8981_s1 + $0x254] sm:$0xf] }
  0xa2   : > { %2312 = vmatpush.bf16.msra.mxu0 %v5262_v8  ;;  %v5997_v8 = vld [vmem:[%s8981_s1 + $0x174] sm:$0xf]  ;;  %v5294_v17 = vor.u32 %v6224_v2, %v5293_v63  ;;  %v4503_v63 = vld [vmem:[%s8981_s1 + $0x258] sm:$0xf0]  ;;  %v4378_v2 = vor.u32 %v5993_v57, %v4375_v58  ;;  %v4442_v3 = vor.u32 %v6009_v59, %v4439_v61 }
  0xa3   : > { %2326 = vmatpush.bf16.msra.mxu1 %v5326_v9  ;;  %v4391_v9 = vld [vmem:[%s8981_s1 + $0x178] sm:$0xf0]  ;;  %v4506_v4 = vor.u32 %v6025_v62, %v4503_v63  ;;  %v5985_v59 = vld [vmem:[%s8981_s1 + $0x114] sm:$0xf] }
  0xa4   : > { %2340 = vmatpush.bf16.msra.mxu2 %v4242_v10  ;;  %v6013_v10 = vld [vmem:[%s8981_s1 + $0x1f4] sm:$0xf] }
  0xa5   : > { %2354 = vmatpush.bf16.msra.mxu3 %v4306_v14  ;;  %v4519_v14 = vld [vmem:[%s8981_s1 + $0x278] sm:$0xf0]  ;;  %v4458_v28 = vor.u32 %v6013_v10, %v4455_v11  ;;  %v6039_v10 = vld [vmem:[%s8981_s1 + $0x2c4] sm:$0xf]  ;;  %v4559_v11 = vld [vmem:[%s8981_s1 + $0x2c8] sm:$0xf0] }
  0xa6   : > { %2313 = vmatpush.bf16.msra.mxu0 %v5254_v23  ;;  %v5950_v23 = vld [vmem:[%s6863_s11 + $0x84] sm:$0x10]  ;;  %v4562_v19 = vor.u32 %v6039_v10, %v4559_v11  ;;  %v6001_v61 = vld [vmem:[%s8981_s1 + $0x194] sm:$0xf]  ;;  %v6015_v10 = vld [vmem:[%s8981_s1 + $0x204] sm:$0xf] }
  0xa7   : > { %2327 = vmatpush.bf16.msra.mxu1 %v5318_v24  ;;  %v4274_v24 = vor.u32 %v5967_v6, %v4271_v7  ;;  %v7654_v45 = vor.u32 %v5950_v23, %v4197_v22  ;;  %v4367_v6 = vld [vmem:[%s8981_s1 + $0x148] sm:$0xf0]  ;;  %v4423_v22 = vld [vmem:[%s8981_s1 + $0x1b8] sm:$0xf0]  ;;  %v6021_v23 = vld [vmem:[%s8981_s1 + $0x234] sm:$0xf] }
  0xa8   : > { %2341 = vmatpush.bf16.msra.mxu2 %v4234_v25  ;;  %v4394_v25 = vor.u32 %v5997_v8, %v4391_v9  ;;  %v6023_v8 = vld [vmem:[%s8981_s1 + $0x244] sm:$0xf]  ;;  %v4495_v9 = vld [vmem:[%s8981_s1 + $0x248] sm:$0xf0] }
  0xa9   : > { %2355 = vmatpush.bf16.msra.mxu3 %v4298_v30  ;;  %v4522_v30 = vor.u32 %v6029_v13, %v4519_v14  ;;  %v4498_v14 = vor.u32 %v6023_v8, %v4495_v9  ;;  %v5999_v8 = vld [vmem:[%s8981_s1 + $0x184] sm:$0xf]  ;;  %v4399_v9 = vld [vmem:[%s8981_s1 + $0x188] sm:$0xf0] }
  0xaa   : > { %2314 = vmatpush.bf16.msra.mxu0 %v5246_v48  ;;  %v4447_v48 = vld [vmem:[%s8981_s1 + $0x1e8] sm:$0xf0] }
  0xab   : > { %2328 = vmatpush.bf16.msra.mxu1 %v5310_v49  ;;  %v6027_v49 = vld [vmem:[%s8981_s1 + $0x264] sm:$0xf]  ;;  %v4450_v55 = vor.u32 %v6011_v37, %v4447_v48  ;;  %v4415_v48 = vld [vmem:[%s8981_s1 + $0x1a8] sm:$0xf0] }
  0xac   : > { %2342 = vmatpush.bf16.msra.mxu2 %v4226_v50  ;;  %v4511_v50 = vld [vmem:[%s8981_s1 + $0x268] sm:$0xf0]  ;;  %v6003_v37 = vld [vmem:[%s8981_s1 + $0x1a4] sm:$0xf] }
  0xad   : > { %2356 = vmatpush.bf16.msra.mxu3 %v4290_v54  ;;  %v4386_v54 = vor.u32 %v5995_v33, %v4383_v34  ;;  %v4514_v56 = vor.u32 %v6027_v49, %v4511_v50  ;;  %v5987_v33 = vld [vmem:[%s8981_s1 + $0x124] sm:$0xf]  ;;  %v4351_v34 = vld [vmem:[%s8981_s1 + $0x128] sm:$0xf0]  ;;  %v4418_v57 = vor.u32 %v6003_v37, %v4415_v48 }
  0xae   : > { %2315 = vmatpush.bf16.msra.mxu0 %v5238_v60  ;;  %v4578_v60 = vor.u32 %v6043_v52, %v4575_v53  ;;  %v6019_v49 = vld [vmem:[%s8981_s1 + $0x224] sm:$0xf]  ;;  %v4479_v50 = vld [vmem:[%s8981_s1 + $0x228] sm:$0xf0] }
  0xaf   : > { %2329 = vmatpush.bf16.msra.mxu1 %v5302_v0  ;;  %v6041_v0 = vld [vmem:[%s8981_s1 + $0x2d4] sm:$0xf]  ;;  %v6035_v52 = vld [vmem:[%s8981_s1 + $0x2a4] sm:$0xf]  ;;  %v4543_v53 = vld [vmem:[%s8981_s1 + $0x2a8] sm:$0xf0]  ;;  %v4482_v58 = vor.u32 %v6019_v49, %v4479_v50 }
  0xb0   : > { %2343 = vmatpush.bf16.msra.mxu2 %v4218_v1  ;;  %v4567_v1 = vld [vmem:[%s8981_s1 + $0x2d8] sm:$0xf0]  ;;  %v4546_v63 = vor.u32 %v6035_v52, %v4543_v53  ;;  %v6059_v53 = vld [vmem:[%s8981_s1 + $0x364] sm:$0xf] }
  0xb1   : > { %2357 = vmatpush.bf16.msra.mxu3 %v4282_v5  ;;  %v5991_v5 = vld [vmem:[%s8981_s1 + $0x144] sm:$0xf]  ;;  %v4570_v7 = vor.u32 %v6041_v0, %v4567_v1  ;;  %v4407_v0 = vld [vmem:[%s8981_s1 + $0x198] sm:$0xf0]  ;;  %v6017_v1 = vld [vmem:[%s8981_s1 + $0x214] sm:$0xf] }
  0xb2   : > { %2316 = vmatpush.bf16.msra.mxu0 %v5230_v12  ;;  %v4370_v12 = vor.u32 %v5991_v5, %v4367_v6  ;;  %v5983_v6 = vld [vmem:[%s8981_s1 + $0x104] sm:$0xf] }
  0xb3   : > { %2330 = vmatpush.bf16.msra.mxu1 %v5294_v17  ;;  %v4359_v17 = vld [vmem:[%s8981_s1 + $0x138] sm:$0xf0] }
  0xb4   : > { %2344 = vmatpush.bf16.msra.mxu2 %v4210_v18  ;;  %v6005_v18 = vld [vmem:[%s8981_s1 + $0x1b4] sm:$0xf]  ;;  %v4362_v27 = vor.u32 %v5989_v16, %v4359_v17 }
  0xb5   : > { %2358 = vmatpush.bf16.msra.mxu3 %v4274_v24  ;;  %2317 = vmatmul.bf16.vlgmr.msra.gmra.mxu0 %v7654_v45  ;;  %v4487_v24 = vld [vmem:[%s8981_s1 + $0x238] sm:$0xf0]  ;;  %v6061_v17 = vld [vmem:[%s8981_s1 + $0x374] sm:$0xf] }
  0xb6   : > { %2365 = vmatpush.bf16.msrb.mxu0 %v4394_v25  ;;  %2331 = vmatmul.bf16.vlgmr.msra.gmra.mxu1 %v7665_v51  ;;  %v6037_v25 = vld [vmem:[%s8981_s1 + $0x2b4] sm:$0xf] }
  0xb7   : > { %2379 = vmatpush.bf16.msrb.mxu1 %v4458_v28  ;;  %2345 = vmatmul.bf16.vlgmr.msra.gmra.mxu2 %v6868_v15  ;;  %v6007_v15 = vld [vmem:[%s8981_s1 + $0x1c4] sm:$0xf]  ;;  %v4426_v28 = vor.u32 %v6005_v18, %v4423_v22  ;;  %v4647_v18 = vld [vmem:[%s8981_s1 + $0x378] sm:$0xf0] }
  0xb8   : > { %2393 = vmatpush.bf16.msrb.mxu2 %v4522_v30  ;;  %2359 = vmatmul.bf16.vlgmr.msra.gmra.mxu3 %v6875_v21  ;;  %v4431_v21 = vld [vmem:[%s8981_s1 + $0x1c8] sm:$0xf0]  ;;  %v4490_v30 = vor.u32 %v6021_v23, %v4487_v24  ;;  %v4711_v24 = vld [vmem:[%s8981_s1 + $0x3f8] sm:$0xf0]  ;;  %v4650_v48 = vor.u32 %v6061_v17, %v4647_v18 }
  0xb9   : > { %2407 = vmatpush.bf16.msrb.mxu3 %v4586_v42  ;;  %v4434_v13 = vor.u32 %v6007_v15, %v4431_v21  ;;  %v4554_v42 = vor.u32 %v6037_v25, %v4551_v26  ;;  %v4335_v15 = vld [vmem:[%s8981_s1 + $0x108] sm:$0xf0]  ;;  %v6093_v25 = vld [vmem:[%s8981_s1 + $0x474] sm:$0xf]  ;;  %v4775_v26 = vld [vmem:[%s8981_s1 + $0x478] sm:$0xf0] }
  0xba   : > { %2366 = vmatpush.bf16.msrb.mxu0 %v4386_v54  ;;  %v4354_v54 = vor.u32 %v5987_v33, %v4351_v34  ;;  %v4338_v23 = vor.u32 %v5983_v6, %v4335_v15  ;;  %v6109_v33 = vld [vmem:[%s8981_s1 + $0x4f4] sm:$0xf]  ;;  %v4839_v34 = vld [vmem:[%s8981_s1 + $0x4f8] sm:$0xf0]  ;;  %v4778_v50 = vor.u32 %v6093_v25, %v4775_v26  ;;  %v4751_v17 = vld [vmem:[%s8981_s1 + $0x448] sm:$0xf0] }
  0xbb   : > { %2380 = vmatpush.bf16.msrb.mxu1 %v4450_v55  ;;  %v2094_v55 = vpop.f32.mrf.mxu0  ;;  %v4695_v6 = vld [vmem:[%s8981_s1 + $0x3d8] sm:$0xf0]  ;;  %v6089_v15 = vld [vmem:[%s8981_s1 + $0x454] sm:$0xf] }
  0xbc   : > { %2394 = vmatpush.bf16.msrb.mxu2 %v4514_v56  ;;  %v2108_v56 = vpop.f32.mrf.mxu1  ;;  %v2122_v16 = vpop.f32.mrf.mxu2 }
  0xbd   : > { %2408 = vmatpush.bf16.msrb.mxu3 %v4578_v60  ;;  %v4343_v60 = vld [vmem:[%s8981_s1 + $0x118] sm:$0xf0]  ;;  %v2109_v62 = vadd.f32 %v2108_v56, %v2094_v55  ;;  %v6075_v55 = vld [vmem:[%s8981_s1 + $0x3e4] sm:$0xf]  ;;  %v4842_v56 = vor.u32 %v6109_v33, %v4839_v34  ;;  %v6069_v34 = vld [vmem:[%s8981_s1 + $0x3b4] sm:$0xf] }
  0xbe   : > { %2367 = vmatpush.bf16.msrb.mxu0 %v4378_v2  ;;  %v4471_v2 = vld [vmem:[%s8981_s1 + $0x218] sm:$0xf0]  ;;  %v4346_v5 = vor.u32 %v5985_v59, %v4343_v60  ;;  %v4767_v59 = vld [vmem:[%s8981_s1 + $0x468] sm:$0xf0] }
  0xbf   : > { %2381 = vmatpush.bf16.msrb.mxu1 %v4442_v3  ;;  %v6033_v3 = vld [vmem:[%s8981_s1 + $0x294] sm:$0xf]  ;;  %v4474_v21 = vor.u32 %v6017_v1, %v4471_v2  ;;  %v2123_v22 = vadd.f32 %v2122_v16, %v2109_v62  ;;  %v4831_v62 = vld [vmem:[%s8981_s1 + $0x4e8] sm:$0xf0]  ;;  %v6087_v16 = vld [vmem:[%s8981_s1 + $0x444] sm:$0xf] }
  0xc0   : > { %2395 = vmatpush.bf16.msrb.mxu2 %v4506_v4  ;;  %v4535_v4 = vld [vmem:[%s8981_s1 + $0x298] sm:$0xf0]  ;;  %v6057_v2 = vld [vmem:[%s8981_s1 + $0x354] sm:$0xf] }
  0xc1   : > { %2409 = vmatpush.bf16.msrb.mxu3 %v4570_v7  ;;  %v4410_v7 = vor.u32 %v6001_v61, %v4407_v0  ;;  %v4538_v11 = vor.u32 %v6033_v3, %v4535_v4  ;;  %v6107_v61 = vld [vmem:[%s8981_s1 + $0x4e4] sm:$0xf]  ;;  %v4631_v3 = vld [vmem:[%s8981_s1 + $0x358] sm:$0xf0]  ;;  %v6073_v4 = vld [vmem:[%s8981_s1 + $0x3d4] sm:$0xf] }
  0xc2   : > { %2368 = vmatpush.bf16.msrb.mxu0 %v4370_v12  ;;  %v4463_v12 = vld [vmem:[%s8981_s1 + $0x208] sm:$0xf0]  ;;  %v4615_v33 = vld [vmem:[%s8981_s1 + $0x338] sm:$0xf0] }
  0xc3   : > { %2382 = vmatpush.bf16.msrb.mxu1 %v4434_v13  ;;  %v6031_v13 = vld [vmem:[%s8981_s1 + $0x284] sm:$0xf]  ;;  %v2096_v52 = vpop.f32.mrf.mxu0 }
  0xc4   : > { %2396 = vmatpush.bf16.msrb.mxu2 %v4498_v14  ;;  %v4527_v14 = vld [vmem:[%s8981_s1 + $0x288] sm:$0xf0]  ;;  %v2110_v60 = vpop.f32.mrf.mxu1 }
  0xc5   : > { %2410 = vmatpush.bf16.msrb.mxu3 %v4562_v19  ;;  %v6077_v19 = vld [vmem:[%s8981_s1 + $0x3f4] sm:$0xf]  ;;  %v2111_v18 = vadd.f32 %v2110_v60, %v2096_v52  ;;  %v6067_v60 = vld [vmem:[%s8981_s1 + $0x3a4] sm:$0xf] }
  0xc6   : > { %2369 = vmatpush.bf16.msrb.mxu0 %v4362_v27  ;;  %v2136_v27 = vpop.f32.mrf.mxu3  ;;  %v4714_v49 = vor.u32 %v6077_v19, %v4711_v24 }
  0xc7   : > { %2383 = vmatpush.bf16.msrb.mxu1 %v4426_v28  ;;  %v4402_v28 = vor.u32 %v5999_v8, %v4399_v9  ;;  %v2137_v37 = vadd.f32 %v2136_v27, %v2123_v22  ;;  %v4634_v8 = vor.u32 %v6057_v2, %v4631_v3  ;;  %v2124_v9 = vpop.f32.mrf.mxu2  ;;  %v6103_v22 = vld [vmem:[%s8981_s1 + $0x4c4] sm:$0xf] }
  0xc8   : > { %2397 = vmatpush.bf16.msrb.mxu2 %v4490_v30  ;;  %v4466_v30 = vor.u32 %v6015_v10, %v4463_v12  ;;  %v4698_v10 = vor.u32 %v6073_v4, %v4695_v6  ;;  %v4623_v12 = vld [vmem:[%s8981_s1 + $0x348] sm:$0xf0]  ;;  %v2125_v52 = vadd.f32 %v2124_v9, %v2111_v18  ;;  %v6099_v6 = vld [vmem:[%s8981_s1 + $0x4a4] sm:$0xf] }
  0xc9   : > { %2411 = vmatpush.bf16.msrb.mxu3 %v4554_v42  ;;  %v4530_v42 = vor.u32 %v6031_v13, %v4527_v14  ;;  %v4687_v14 = vld [vmem:[%s8981_s1 + $0x3c8] sm:$0xf0] }
  0xca   : > { %2370 = vmatpush.bf16.msrb.mxu0 %v4354_v54  ;;  %v4639_v54 = vld [vmem:[%s8981_s1 + $0x368] sm:$0xf0] }
  0xcb   : > { %2384 = vmatpush.bf16.msrb.mxu1 %v4418_v57  ;;  %v4703_v57 = vld [vmem:[%s8981_s1 + $0x3e8] sm:$0xf0] }
  0xcc   : > { %2398 = vmatpush.bf16.msrb.mxu2 %v4482_v58  ;;  %v6091_v58 = vld [vmem:[%s8981_s1 + $0x464] sm:$0xf]  ;;  %v4706_v0 = vor.u32 %v6075_v55, %v4703_v57 }
  0xcd   : > { %2412 = vmatpush.bf16.msrb.mxu3 %v4546_v63  ;;  %v4642_v63 = vor.u32 %v6059_v53, %v4639_v54  ;;  %v4770_v1 = vor.u32 %v6091_v58, %v4767_v59  ;;  %v6101_v53 = vld [vmem:[%s8981_s1 + $0x4b4] sm:$0xf]  ;;  %v4807_v54 = vld [vmem:[%s8981_s1 + $0x4b8] sm:$0xf0]  ;;  %v4607_v59 = vld [vmem:[%s8981_s1 + $0x328] sm:$0xf0] }
  0xce   : > { %2371 = vmatpush.bf16.msrb.mxu0 %v4346_v5  ;;  %v4834_v5 = vor.u32 %v6107_v61, %v4831_v62  ;;  %v4671_v61 = vld [vmem:[%s8981_s1 + $0x3a8] sm:$0xf0]  ;;  %v4810_v62 = vor.u32 %v6101_v53, %v4807_v54  ;;  %v6141_v53 = vld [vmem:[%s8981_s1 + $0x5f4] sm:$0xf] }
  0xcf   : > { %2385 = vmatpush.bf16.msrb.mxu1 %v4410_v7  ;;  %v4759_v7 = vld [vmem:[%s8981_s1 + $0x458] sm:$0xf0] }
  0xd0   : > { %2399 = vmatpush.bf16.msrb.mxu2 %v4474_v21  ;;  %v4823_v21 = vld [vmem:[%s8981_s1 + $0x4d8] sm:$0xf0] }
  0xd1   : > { %2413 = vmatpush.bf16.msrb.mxu3 %v4538_v11  ;;  %v4762_v11 = vor.u32 %v6089_v15, %v4759_v7  ;;  %v4799_v15 = vld [vmem:[%s8981_s1 + $0x4a8] sm:$0xf0] }
  0xd2   : > { %2372 = vmatpush.bf16.msrb.mxu0 %v4338_v23  ;;  %v2150_v19 = vpop.f32.mrf.mxu0  ;;  %v4815_v23 = vld [vmem:[%s8981_s1 + $0x4c8] sm:$0xf0] }
  0xd3   : > { %2386 = vmatpush.bf16.msrb.mxu1 %v4402_v28  ;;  %v2151_v24 = vadd.f32 %v2150_v19, %v2137_v37  ;;  %v2164_v26 = vpop.f32.mrf.mxu1  ;;  %v4754_v28 = vor.u32 %v6087_v16, %v4751_v17  ;;  %v4818_v37 = vor.u32 %v6103_v22, %v4815_v23  ;;  %v6097_v16 = vld [vmem:[%s8981_s1 + $0x494] sm:$0xf]  ;;  %v4791_v17 = vld [vmem:[%s8981_s1 + $0x498] sm:$0xf0]  ;;  %v6047_v19 = vld [vmem:[%s8981_s1 + $0x304] sm:$0xf] }
  0xd4   : > { %2400 = vmatpush.bf16.msrb.mxu2 %v4466_v30  ;;  %v6053_v30 = vld [vmem:[%s8981_s1 + $0x334] sm:$0xf]  ;;  %v4591_v22 = vld [vmem:[%s8981_s1 + $0x308] sm:$0xf0] }
  0xd5   : > { %2414 = vmatpush.bf16.msrb.mxu3 %v4530_v42  ;;  %2373 = vmatmul.bf16.vlgmr.msrb.gmra.mxu0 %v6873_v20  ;;  %v6105_v20 = vld [vmem:[%s8981_s1 + $0x4d4] sm:$0xf]  ;;  %v2165_v42 = vadd.f32 %v2164_v26, %v2151_v24  ;;  %v4618_v55 = vor.u32 %v6053_v30, %v4615_v33  ;;  %v6063_v26 = vld [vmem:[%s8981_s1 + $0x384] sm:$0xf]  ;;  %v4794_v30 = vor.u32 %v6097_v16, %v4791_v17  ;;  %v5015_v17 = vld [vmem:[%s8981_s1 + $0x658] sm:$0xf0] }
  0xd6   : > { %2421 = vmatpush.bf16.msra.mxu0 %v4650_v48  ;;  %2387 = vmatmul.bf16.vlgmr.msrb.gmra.mxu1 %v6888_v29  ;;  %v6055_v29 = vld [vmem:[%s8981_s1 + $0x344] sm:$0xf]  ;;  %v4826_v13 = vor.u32 %v6105_v20, %v4823_v21  ;;  %v4679_v48 = vld [vmem:[%s8981_s1 + $0x3b8] sm:$0xf0]  ;;  %v4674_v20 = vor.u32 %v6067_v60, %v4671_v61  ;;  %v4594_v54 = vor.u32 %v6047_v19, %v4591_v22  ;;  %v6173_v61 = vld [vmem:[%s8981_s1 + $0x6f4] sm:$0xf] }
  0xd7   : > { %2435 = vmatpush.bf16.msra.mxu1 %v4714_v49  ;;  %2401 = vmatmul.bf16.vlgmr.msrb.gmra.mxu2 %v7022_v39  ;;  %v2138_v39 = vpop.f32.mrf.mxu3  ;;  %v4626_v25 = vor.u32 %v6055_v29, %v4623_v12  ;;  %v6085_v49 = vld [vmem:[%s8981_s1 + $0x434] sm:$0xf]  ;;  %v4682_v57 = vor.u32 %v6069_v34, %v4679_v48  ;;  %v4802_v29 = vor.u32 %v6099_v6, %v4799_v15  ;;  %v4719_v34 = vld [vmem:[%s8981_s1 + $0x408] sm:$0xf0] }
  0xd8   : > { %2449 = vmatpush.bf16.msra.mxu2 %v4778_v50  ;;  %2415 = vmatmul.bf16.vlgmr.msrb.gmra.mxu3 %v7035_v44  ;;  %v6071_v44 = vld [vmem:[%s8981_s1 + $0x3c4] sm:$0xf]  ;;  %v4743_v50 = vld [vmem:[%s8981_s1 + $0x438] sm:$0xf0]  ;;  %v2139_v2 = vadd.f32 %v2138_v39, %v2125_v52  ;;  %v6065_v39 = vld [vmem:[%s8981_s1 + $0x394] sm:$0xf] }
  0xd9   : > { %2463 = vmatpush.bf16.msra.mxu3 %v4842_v56  ;;  %v4690_v27 = vor.u32 %v6071_v44, %v4687_v14  ;;  %v6051_v56 = vld [vmem:[%s8981_s1 + $0x324] sm:$0xf]  ;;  %v4746_v58 = vor.u32 %v6085_v49, %v4743_v50  ;;  %v4663_v44 = vld [vmem:[%s8981_s1 + $0x398] sm:$0xf0]  ;;  %v6125_v50 = vld [vmem:[%s8981_s1 + $0x574] sm:$0xf] }
  0xda   : > { %2422 = vmatpush.bf16.msra.mxu0 %v4642_v63  ;;  %v2178_v63 = vpop.f32.mrf.mxu2  ;;  %v2152_v4 = vpop.f32.mrf.mxu0  ;;  %v4610_v7 = vor.u32 %v6051_v56, %v4607_v59  ;;  %v4727_v14 = vld [vmem:[%s8981_s1 + $0x418] sm:$0xf0]  ;;  %v4666_v24 = vor.u32 %v6065_v39, %v4663_v44  ;;  %v6157_v56 = vld [vmem:[%s8981_s1 + $0x674] sm:$0xf]  ;;  %v4959_v15 = vld [vmem:[%s8981_s1 + $0x5e8] sm:$0xf0] }
  0xdb   : > { %2436 = vmatpush.bf16.msra.mxu1 %v4706_v0  ;;  %v6083_v0 = vld [vmem:[%s8981_s1 + $0x424] sm:$0xf]  ;;  %v2179_v3 = vadd.f32 %v2178_v63, %v2165_v42  ;;  %v2153_v21 = vadd.f32 %v2152_v4, %v2139_v2  ;;  %v2166_v12 = vpop.f32.mrf.mxu1  ;;  %v4783_v42 = vld [vmem:[%s8981_s1 + $0x488] sm:$0xf0]  ;;  %v4903_v52 = vld [vmem:[%s8981_s1 + $0x578] sm:$0xf0] }
  0xdc   : > { %2450 = vmatpush.bf16.msra.mxu2 %v4770_v1  ;;  %v4735_v1 = vld [vmem:[%s8981_s1 + $0x428] sm:$0xf0]  ;;  %v6137_v44 = vld [vmem:[%s8981_s1 + $0x5d4] sm:$0xf] }
  0xdd   : > { %2464 = vmatpush.bf16.msra.mxu3 %v4834_v5  ;;  %v4738_v9 = vor.u32 %v6083_v0, %v4735_v1  ;;  %v2167_v23 = vadd.f32 %v2166_v12, %v2153_v21  ;;  %v4906_v0 = vor.u32 %v6125_v50, %v4903_v52  ;;  %v4895_v4 = vld [vmem:[%s8981_s1 + $0x568] sm:$0xf0]  ;;  %v6171_v21 = vld [vmem:[%s8981_s1 + $0x6e4] sm:$0xf]  ;;  %v4887_v12 = vld [vmem:[%s8981_s1 + $0x558] sm:$0xf0] }
  0xde   : > { %2423 = vmatpush.bf16.msra.mxu0 %v4634_v8  ;;  %v6153_v16 = vld [vmem:[%s8981_s1 + $0x654] sm:$0xf]  ;;  %v4871_v52 = vld [vmem:[%s8981_s1 + $0x538] sm:$0xf0] }
  0xdf   : > { %2437 = vmatpush.bf16.msra.mxu1 %v4698_v10  ;;  %v2192_v5 = vpop.f32.mrf.mxu3  ;;  %v6049_v10 = vld [vmem:[%s8981_s1 + $0x314] sm:$0xf] }
  0xe0   : > { %2451 = vmatpush.bf16.msra.mxu2 %v4762_v11  ;;  %v7969_v8 = vadd.f32 %v2192_v5, %v2179_v3  ;;  %v4599_v11 = vld [vmem:[%s8981_s1 + $0x318] sm:$0xf0]  ;;  %v6123_v3 = vld [vmem:[%s8981_s1 + $0x564] sm:$0xf]  ;;  %v6117_v50 = vld [vmem:[%s8981_s1 + $0x534] sm:$0xf] }
  0xe1   : > { %2465 = vmatpush.bf16.msra.mxu3 %v4826_v13  ;;  %v6081_v13 = vld [vmem:[%s8981_s1 + $0x414] sm:$0xf]  ;;  %v4602_v18 = vor.u32 %v6049_v10, %v4599_v11  ;;  %v6139_v5 = vld [vmem:[%s8981_s1 + $0x5e4] sm:$0xf]  ;;  %v4898_v10 = vor.u32 %v6123_v3, %v4895_v4 }
  0xe2   : > { %2424 = vmatpush.bf16.msra.mxu0 %v4626_v25  ;;  %v4730_v25 = vor.u32 %v6081_v13, %v4727_v14  ;;  %v2180_v33 = vpop.f32.mrf.mxu2  ;;  %v4962_v11 = vor.u32 %v6139_v5, %v4959_v15  ;;  %v4951_v14 = vld [vmem:[%s8981_s1 + $0x5d8] sm:$0xf0]  ;;  %v4927_v5 = vld [vmem:[%s8981_s1 + $0x5a8] sm:$0xf0] }
  0xe3   : > { %2438 = vmatpush.bf16.msra.mxu1 %v4690_v27  ;;  %v4655_v27 = vld [vmem:[%s8981_s1 + $0x388] sm:$0xf0]  ;;  %v2181_v48 = vadd.f32 %v2180_v33, %v2167_v23  ;;  %v4954_v22 = vor.u32 %v6137_v44, %v4951_v14  ;;  %v5018_v23 = vor.u32 %v6153_v16, %v5015_v17  ;;  %v6113_v14 = vld [vmem:[%s8981_s1 + $0x514] sm:$0xf]  ;;  %v4855_v16 = vld [vmem:[%s8981_s1 + $0x518] sm:$0xf0] }
  0xe4   : > { %2452 = vmatpush.bf16.msra.mxu2 %v4754_v28  ;;  %v6079_v28 = vld [vmem:[%s8981_s1 + $0x404] sm:$0xf]  ;;  %v4658_v59 = vor.u32 %v6063_v26, %v4655_v27  ;;  %v5007_v27 = vld [vmem:[%s8981_s1 + $0x648] sm:$0xf0] }
  0xe5   : > { %2466 = vmatpush.bf16.msra.mxu3 %v4818_v37  ;;  %v6095_v37 = vld [vmem:[%s8981_s1 + $0x484] sm:$0xf]  ;;  %v4722_v60 = vor.u32 %v6079_v28, %v4719_v34  ;;  %v5071_v33 = vld [vmem:[%s8981_s1 + $0x6c8] sm:$0xf0] }
  0xe6   : > { %2425 = vmatpush.bf16.msra.mxu0 %v4618_v55  ;;  %v4967_v55 = vld [vmem:[%s8981_s1 + $0x5f8] sm:$0xf0]  ;;  %v4786_v63 = vor.u32 %v6095_v37, %v4783_v42  ;;  %v6151_v26 = vld [vmem:[%s8981_s1 + $0x644] sm:$0xf]  ;;  %v4991_v15 = vld [vmem:[%s8981_s1 + $0x628] sm:$0xf0] }
  0xe7   : > { %2439 = vmatpush.bf16.msra.mxu1 %v4682_v57  ;;  %v2194_v49 = vpop.f32.mrf.mxu3  ;;  %v5031_v57 = vld [vmem:[%s8981_s1 + $0x678] sm:$0xf0]  ;;  %v4970_v1 = vor.u32 %v6141_v53, %v4967_v55  ;;  %v6133_v53 = vld [vmem:[%s8981_s1 + $0x5b4] sm:$0xf] }
  0xe8   : > { %2453 = vmatpush.bf16.msra.mxu2 %v4746_v58  ;;  %v8037_v58 = vadd.f32 %v2194_v49, %v2181_v48  ;;  %v5034_v2 = vor.u32 %v6157_v56, %v5031_v57  ;;  %v5010_v49 = vor.u32 %v6151_v26, %v5007_v27  ;;  %v4935_v55 = vld [vmem:[%s8981_s1 + $0x5b8] sm:$0xf0]  ;;  %v6149_v56 = vld [vmem:[%s8981_s1 + $0x634] sm:$0xf]  ;;  %v6127_v27 = vld [vmem:[%s8981_s1 + $0x584] sm:$0xf] }
  0xe9   : > { %2467 = vmatpush.bf16.msra.mxu3 %v4810_v62  ;;  %v5095_v62 = vld [vmem:[%s8981_s1 + $0x6f8] sm:$0xf0] }
  0xea   : > { %2426 = vmatpush.bf16.msra.mxu0 %v4610_v7  ;;  %v5098_v6 = vor.u32 %v6173_v61, %v5095_v62  ;;  %v6155_v7 = vld [vmem:[%s8981_s1 + $0x664] sm:$0xf]  ;;  %v4999_v57 = vld [vmem:[%s8981_s1 + $0x638] sm:$0xf0]  ;;  %v4874_v61 = vor.u32 %v6117_v50, %v4871_v52  ;;  %v4938_v62 = vor.u32 %v6133_v53, %v4935_v55  ;;  %v6189_v52 = vld [vmem:[%s8981_s1 + $0x774] sm:$0xf] }
  0xeb   : > { %2440 = vmatpush.bf16.msra.mxu1 %v4674_v20  ;;  %v5023_v20 = vld [vmem:[%s8981_s1 + $0x668] sm:$0xf0]  ;;  %v5159_v53 = vld [vmem:[%s8981_s1 + $0x778] sm:$0xf0] }
  0xec   : > { %2454 = vmatpush.bf16.msra.mxu2 %v4738_v9  ;;  %v5087_v9 = vld [vmem:[%s8981_s1 + $0x6e8] sm:$0xf0]  ;;  %v5026_v39 = vor.u32 %v6155_v7, %v5023_v20  ;;  %v5223_v55 = vld [vmem:[%s8981_s1 + $0x7f8] sm:$0xf0] }
  0xed   : > { %2468 = vmatpush.bf16.msra.mxu3 %v4802_v29  ;;  %v6121_v29 = vld [vmem:[%s8981_s1 + $0x554] sm:$0xf]  ;;  %v5090_v13 = vor.u32 %v6171_v21, %v5087_v9  ;;  %v6163_v9 = vld [vmem:[%s8981_s1 + $0x6a4] sm:$0xf] }
  0xee   : > { %2427 = vmatpush.bf16.msra.mxu0 %v4602_v18  ;;  %v5079_v18 = vld [vmem:[%s8981_s1 + $0x6d8] sm:$0xf0]  ;;  %v4890_v19 = vor.u32 %v6121_v29, %v4887_v12 }
  0xef   : > { %2441 = vmatpush.bf16.msra.mxu1 %v4666_v24  ;;  %v6135_v24 = vld [vmem:[%s8981_s1 + $0x5c4] sm:$0xf] }
  0xf0   : > { %2455 = vmatpush.bf16.msra.mxu2 %v4730_v25  ;;  %v4943_v25 = vld [vmem:[%s8981_s1 + $0x5c8] sm:$0xf0] }
  0xf1   : > { %2469 = vmatpush.bf16.msra.mxu3 %v4794_v30  ;;  %v6167_v30 = vld [vmem:[%s8981_s1 + $0x6c4] sm:$0xf]  ;;  %v4946_v48 = vor.u32 %v6135_v24, %v4943_v25 }
  0xf2   : > { %2428 = vmatpush.bf16.msra.mxu0 %v4594_v54  ;;  %v2206_v28 = vpop.f32.mrf.mxu0  ;;  %v6111_v24 = vld [vmem:[%s8981_s1 + $0x504] sm:$0xf] }
  0xf3   : > { %2442 = vmatpush.bf16.msra.mxu1 %v4658_v59  ;;  %v2207_v34 = vadd.f32 %v2206_v28, %v7969_v8  ;;  %v2220_v42 = vpop.f32.mrf.mxu1  ;;  %v5074_v8 = vor.u32 %v6167_v30, %v5071_v33  ;;  %v6165_v59 = vld [vmem:[%s8981_s1 + $0x6b4] sm:$0xf]  ;;  %v4911_v28 = vld [vmem:[%s8981_s1 + $0x588] sm:$0xf0]  ;;  %v6143_v30 = vld [vmem:[%s8981_s1 + $0x604] sm:$0xf] }
  0xf4   : > { %2456 = vmatpush.bf16.msra.mxu2 %v4722_v60  ;;  %v5063_v60 = vld [vmem:[%s8981_s1 + $0x6b8] sm:$0xf0] }
  0xf5   : > { %2470 = vmatpush.bf16.msra.mxu3 %v4786_v63  ;;  %2429 = vmatmul.bf16.vlgmr.msra.gmra.mxu0 %v7033_v43  ;;  %v6169_v43 = vld [vmem:[%s8981_s1 + $0x6d4] sm:$0xf]  ;;  %v2221_v54 = vadd.f32 %v2220_v42, %v2207_v34  ;;  %v5002_v63 = vor.u32 %v6149_v56, %v4999_v57  ;;  %v5066_v3 = vor.u32 %v6165_v59, %v5063_v60  ;;  %v6159_v42 = vld [vmem:[%s8981_s1 + $0x684] sm:$0xf]  ;;  %v5287_v57 = vld [vmem:[%s8981_s1 + $0x878] sm:$0xf0] }
  0xf6   : > { %2477 = vmatpush.bf16.msrb.mxu0 %v4906_v0  ;;  %2443 = vmatmul.bf16.vlgmr.msra.gmra.mxu1 %v7043_v47  ;;  %v6119_v47 = vld [vmem:[%s8981_s1 + $0x544] sm:$0xf]  ;;  %v6221_v56 = vld [vmem:[%s8981_s1 + $0x874] sm:$0xf]  ;;  %v4914_v60 = vor.u32 %v6127_v27, %v4911_v28  ;;  %v5327_v27 = vld [vmem:[%s8981_s1 + $0x8c8] sm:$0xf0] }
  0xf7   : > { %2491 = vmatpush.bf16.msrb.mxu1 %v4970_v1  ;;  %2457 = vmatmul.bf16.vlgmr.msra.gmra.mxu2 %v7234_v31  ;;  %v4879_v31 = vld [vmem:[%s8981_s1 + $0x548] sm:$0xf0]  ;;  %v6115_v0 = vld [vmem:[%s8981_s1 + $0x524] sm:$0xf] }
  0xf8   : > { %2505 = vmatpush.bf16.msrb.mxu2 %v5034_v2  ;;  %2471 = vmatmul.bf16.vlgmr.msra.gmra.mxu3 %v7247_v36  ;;  %v5082_v36 = vor.u32 %v6169_v43, %v5079_v18  ;;  %v4882_v37 = vor.u32 %v6119_v47, %v4879_v31  ;;  %v4863_v1 = vld [vmem:[%s8981_s1 + $0x528] sm:$0xf0]  ;;  %v6131_v2 = vld [vmem:[%s8981_s1 + $0x5a4] sm:$0xf]  ;;  %v4919_v18 = vld [vmem:[%s8981_s1 + $0x598] sm:$0xf0]  ;;  %v4858_v31 = vor.u32 %v6113_v14, %v4855_v16 }
  0xf9   : > { %2519 = vmatpush.bf16.msrb.mxu3 %v5098_v6  ;;  %v6147_v6 = vld [vmem:[%s8981_s1 + $0x624] sm:$0xf]  ;;  %v4930_v44 = vor.u32 %v6131_v2, %v4927_v5  ;;  %v5047_v47 = vld [vmem:[%s8981_s1 + $0x698] sm:$0xf0]  ;;  %v5151_v5 = vld [vmem:[%s8981_s1 + $0x768] sm:$0xf0] }
  0xfa   : > { %2478 = vmatpush.bf16.msrb.mxu0 %v4898_v10  ;;  %v2234_v4 = vpop.f32.mrf.mxu2  ;;  %v2208_v20 = vpop.f32.mrf.mxu0  ;;  %v5055_v10 = vld [vmem:[%s8981_s1 + $0x6a8] sm:$0xf0]  ;;  %v6201_v14 = vld [vmem:[%s8981_s1 + $0x7d4] sm:$0xf] }
  0xfb   : > { %2492 = vmatpush.bf16.msrb.mxu1 %v4962_v11  ;;  %v2235_v7 = vadd.f32 %v2234_v4, %v2221_v54  ;;  %v2248_v21 = vpop.f32.mrf.mxu3  ;;  %v2209_v11 = vadd.f32 %v2208_v20, %v8037_v58  ;;  %v2222_v29 = vpop.f32.mrf.mxu1  ;;  %v6129_v58 = vld [vmem:[%s8981_s1 + $0x594] sm:$0xf]  ;;  %v5058_v17 = vor.u32 %v6163_v9, %v5055_v10  ;;  %v6187_v4 = vld [vmem:[%s8981_s1 + $0x764] sm:$0xf]  ;;  %v5343_v10 = vld [vmem:[%s8981_s1 + $0x8e8] sm:$0xf0] }
  0xfc   : > { %2506 = vmatpush.bf16.msrb.mxu2 %v5026_v39  ;;  %v4866_v39 = vor.u32 %v6115_v0, %v4863_v1  ;;  %v4922_v25 = vor.u32 %v6129_v58, %v4919_v18  ;;  %v5162_v1 = vor.u32 %v6189_v52, %v5159_v53  ;;  %v6219_v20 = vld [vmem:[%s8981_s1 + $0x864] sm:$0xf]  ;;  %v5207_v58 = vld [vmem:[%s8981_s1 + $0x7d8] sm:$0xf0]  ;;  %v6213_v53 = vld [vmem:[%s8981_s1 + $0x834] sm:$0xf] }
  0xfd   : > { %2520 = vmatpush.bf16.msrb.mxu3 %v5090_v13  ;;  %v8171_v12 = vadd.f32 %v2248_v21, %v2235_v7  ;;  %v4994_v13 = vor.u32 %v6147_v6, %v4991_v15  ;;  %v2223_v43 = vadd.f32 %v2222_v29, %v2209_v11  ;;  %v6203_v6 = vld [vmem:[%s8981_s1 + $0x7e4] sm:$0xf]  ;;  %v5215_v7 = vld [vmem:[%s8981_s1 + $0x7e8] sm:$0xf0]  ;;  %v5154_v11 = vor.u32 %v6187_v4, %v5151_v5  ;;  %v5335_v18 = vld [vmem:[%s8981_s1 + $0x8d8] sm:$0xf0] }
  0xfe   : > { %2479 = vmatpush.bf16.msrb.mxu0 %v4890_v19  ;;  %v6145_v19 = vld [vmem:[%s8981_s1 + $0x614] sm:$0xf]  ;;  %v5279_v21 = vld [vmem:[%s8981_s1 + $0x868] sm:$0xf0]  ;;  %v6235_v9 = vld [vmem:[%s8981_s1 + $0x8e4] sm:$0xf] }
  0xff   : > { %2493 = vmatpush.bf16.msrb.mxu1 %v4954_v22  ;;  %v4983_v22 = vld [vmem:[%s8981_s1 + $0x618] sm:$0xf0]  ;;  %v5282_v29 = vor.u32 %v6219_v20, %v5279_v21  ;;  %v5346_v16 = vor.u32 %v6235_v9, %v5343_v10  ;;  %v5247_v4 = vld [vmem:[%s8981_s1 + $0x828] sm:$0xf0] }
 0x100   : > { %2507 = vmatpush.bf16.msrb.mxu2 %v5018_v23  ;;  %v6161_v23 = vld [vmem:[%s8981_s1 + $0x694] sm:$0xf]  ;;  %v4986_v26 = vor.u32 %v6145_v19, %v4983_v22  ;;  %v5210_v22 = vor.u32 %v6201_v14, %v5207_v58  ;;  %v5191_v52 = vld [vmem:[%s8981_s1 + $0x7b8] sm:$0xf0]  ;;  %v5311_v20 = vld [vmem:[%s8981_s1 + $0x8a8] sm:$0xf0] }
 0x101   : > { %2521 = vmatpush.bf16.msrb.mxu3 %v5082_v36  ;;  %v4847_v36 = vld [vmem:[%s8981_s1 + $0x508] sm:$0xf0]  ;;  %v5050_v33 = vor.u32 %v6161_v23, %v5047_v47  ;;  %v6199_v47 = vld [vmem:[%s8981_s1 + $0x7c4] sm:$0xf]  ;;  %v6193_v14 = vld [vmem:[%s8981_s1 + $0x794] sm:$0xf] }
 0x102   : > { %2480 = vmatpush.bf16.msrb.mxu0 %v4882_v37  ;;  %v2236_v34 = vpop.f32.mrf.mxu2  ;;  %v4975_v37 = vld [vmem:[%s8981_s1 + $0x608] sm:$0xf0]  ;;  %v4850_v54 = vor.u32 %v6111_v24, %v4847_v36  ;;  %v6215_v24 = vld [vmem:[%s8981_s1 + $0x844] sm:$0xf]  ;;  %v5175_v58 = vld [vmem:[%s8981_s1 + $0x798] sm:$0xf0] }
 0x103   : > { %2494 = vmatpush.bf16.msrb.mxu1 %v4946_v48  ;;  %v5039_v48 = vld [vmem:[%s8981_s1 + $0x688] sm:$0xf0]  ;;  %v2250_v50 = vpop.f32.mrf.mxu3 }
 0x104   : > { %2508 = vmatpush.bf16.msrb.mxu2 %v5010_v49  ;;  %v2237_v49 = vadd.f32 %v2236_v34, %v2223_v43  ;;  %v5042_v0 = vor.u32 %v6159_v42, %v5039_v48  ;;  %v5271_v43 = vld [vmem:[%s8981_s1 + $0x858] sm:$0xf0]  ;;  %v5263_v36 = vld [vmem:[%s8981_s1 + $0x848] sm:$0xf0]  ;;  %v6181_v42 = vld [vmem:[%s8981_s1 + $0x734] sm:$0xf] }
 0x105   : > { %2522 = vmatpush.bf16.msrb.mxu3 %v5074_v8  ;;  %v6205_v8 = vld [vmem:[%s8981_s1 + $0x7f4] sm:$0xf]  ;;  %v5127_v48 = vld [vmem:[%s8981_s1 + $0x738] sm:$0xf0] }
 0x106   : > { %2481 = vmatpush.bf16.msrb.mxu0 %v4874_v61  ;;  %v8239_v59 = vadd.f32 %v2250_v50, %v2237_v49  ;;  %v4978_v61 = vor.u32 %v6143_v30, %v4975_v37  ;;  %v5226_v2 = vor.u32 %v6205_v8, %v5223_v55  ;;  %v5266_v37 = vor.u32 %v6215_v24, %v5263_v36  ;;  %v6197_v49 = vld [vmem:[%s8981_s1 + $0x7b4] sm:$0xf]  ;;  %v5255_v8 = vld [vmem:[%s8981_s1 + $0x838] sm:$0xf0]  ;;  %v5167_v24 = vld [vmem:[%s8981_s1 + $0x788] sm:$0xf0] }
 0x107   : > { %2495 = vmatpush.bf16.msrb.mxu1 %v4938_v62  ;;  %v6237_v62 = vld [vmem:[%s8981_s1 + $0x8f4] sm:$0xf]  ;;  %v5319_v55 = vld [vmem:[%s8981_s1 + $0x8b8] sm:$0xf0]  ;;  %v6207_v36 = vld [vmem:[%s8981_s1 + $0x804] sm:$0xf] }
 0x108   : > { %2509 = vmatpush.bf16.msrb.mxu2 %v5002_v63  ;;  %v5351_v63 = vld [vmem:[%s8981_s1 + $0x8f8] sm:$0xf0] }
 0x109   : > { %2523 = vmatpush.bf16.msrb.mxu3 %v5066_v3  ;;  %v5290_v3 = vor.u32 %v6221_v56, %v5287_v57  ;;  %v5354_v15 = vor.u32 %v6237_v62, %v5351_v63  ;;  %v5130_v56 = vor.u32 %v6181_v42, %v5127_v48  ;;  %v5194_v57 = vor.u32 %v6197_v49, %v5191_v52  ;;  %v5119_v62 = vld [vmem:[%s8981_s1 + $0x728] sm:$0xf0]  ;;  %v6195_v63 = vld [vmem:[%s8981_s1 + $0x7a4] sm:$0xf] }
 0x10a   : > { %2482 = vmatpush.bf16.msrb.mxu0 %v4866_v39  ;;  %v5218_v39 = vor.u32 %v6203_v6, %v5215_v7  ;;  %v6227_v7 = vld [vmem:[%s8981_s1 + $0x8a4] sm:$0xf] }
 0x10b   : > { %2496 = vmatpush.bf16.msrb.mxu1 %v4930_v44  ;;  %v6185_v44 = vld [vmem:[%s8981_s1 + $0x754] sm:$0xf] }
 0x10c   : > { %2510 = vmatpush.bf16.msrb.mxu2 %v4994_v13  ;;  %v5143_v13 = vld [vmem:[%s8981_s1 + $0x758] sm:$0xf0] }
 0x10d   : > { %2524 = vmatpush.bf16.msrb.mxu3 %v5058_v17  ;;  %v6217_v17 = vld [vmem:[%s8981_s1 + $0x854] sm:$0xf]  ;;  %v5146_v19 = vor.u32 %v6185_v44, %v5143_v13  ;;  %v5111_v13 = vld [vmem:[%s8981_s1 + $0x718] sm:$0xf0] }
 0x10e   : > { %2483 = vmatpush.bf16.msrb.mxu0 %v4858_v31  ;;  %v5274_v23 = vor.u32 %v6217_v17, %v5271_v43  ;;  %v5199_v31 = vld [vmem:[%s8981_s1 + $0x7c8] sm:$0xf0]  ;;  %v6177_v44 = vld [vmem:[%s8981_s1 + $0x714] sm:$0xf]  ;;  %v5239_v43 = vld [vmem:[%s8981_s1 + $0x818] sm:$0xf0] }
 0x10f   : > { %2497 = vmatpush.bf16.msrb.mxu1 %v4922_v25  ;;  %v5202_v34 = vor.u32 %v6199_v47, %v5199_v31  ;;  %v6209_v17 = vld [vmem:[%s8981_s1 + $0x814] sm:$0xf]  ;;  %v6191_v47 = vld [vmem:[%s8981_s1 + $0x784] sm:$0xf] }
 0x110   : > { %2511 = vmatpush.bf16.msrb.mxu2 %v4986_v26  ;;  %v6231_v26 = vld [vmem:[%s8981_s1 + $0x8c4] sm:$0xf] }
 0x111   : > { %2525 = vmatpush.bf16.msrb.mxu3 %v5050_v33 }
 0x112   : > { %2484 = vmatpush.bf16.msrb.mxu0 %v4850_v54  ;;  %v2262_v25 = vpop.f32.mrf.mxu0  ;;  %v6229_v54 = vld [vmem:[%s8981_s1 + $0x8b4] sm:$0xf] }
 0x113   : > { %2498 = vmatpush.bf16.msrb.mxu1 %v4914_v60  ;;  %v2263_v28 = vadd.f32 %v2262_v25, %v8171_v12  ;;  %v2276_v33 = vpop.f32.mrf.mxu1  ;;  %v5330_v12 = vor.u32 %v6231_v26, %v5327_v27  ;;  %v5258_v60 = vor.u32 %v6213_v53, %v5255_v8  ;;  %v5231_v25 = vld [vmem:[%s8981_s1 + $0x808] sm:$0xf0]  ;;  %v8432_v8 = vld [vmem:[%s8982_s2] sm:$0x3] }
 0x114   : > { %2512 = vmatpush.bf16.msrb.mxu2 %v4978_v61  ;;  %v6179_v61 = vld [vmem:[%s8981_s1 + $0x724] sm:$0xf]  ;;  %v5234_v42 = vor.u32 %v6207_v36, %v5231_v25  ;;  %v6250_v36 = vld [vmem:[%s8984_s4 + $0x58] sm:$0xff] }
 0x115   : > { %2526 = vmatpush.bf16.msrb.mxu3 %v5042_v0  ;;  %2485 = vmatmul.bf16.vlgmr.msrb.gmra.mxu0 %v7245_v35  ;;  %v6233_v35 = vld [vmem:[%s8981_s1 + $0x8d4] sm:$0xf]  ;;  %v2277_v50 = vadd.f32 %v2276_v33, %v2263_v28  ;;  %v5322_v0 = vor.u32 %v6229_v54, %v5319_v55  ;;  %v5122_v9 = vor.u32 %v6179_v61, %v5119_v62  ;;  %v6223_v28 = vld [vmem:[%s8981_s1 + $0x884] sm:$0xf] }
 0x116   : > { %2533 = vmatpush.bf16.msra.mxu0 %v5162_v1  ;;  %2499 = vmatmul.bf16.vlgmr.msrb.gmra.mxu1 %v7255_v40  ;;  %v6183_v40 = vld [vmem:[%s8981_s1 + $0x744] sm:$0xf] }
 0x117   : > { %2547 = vmatpush.bf16.msra.mxu1 %v5226_v2  ;;  %2513 = vmatmul.bf16.vlgmr.msrb.gmra.mxu2 %v7446_v32  ;;  %v5135_v32 = vld [vmem:[%s8981_s1 + $0x748] sm:$0xf0] }
 0x118   : > { %2561 = vmatpush.bf16.msra.mxu2 %v5290_v3  ;;  %2527 = vmatmul.bf16.vlgmr.msrb.gmra.mxu3 %v7459_v41  ;;  %v5338_v41 = vor.u32 %v6233_v35, %v5335_v18  ;;  %v5138_v30 = vor.u32 %v6183_v40, %v5135_v32  ;;  %v5183_v2 = vld [vmem:[%s8981_s1 + $0x7a8] sm:$0xf0]  ;;  %v6211_v3 = vld [vmem:[%s8981_s1 + $0x824] sm:$0xf]  ;;  %v6225_v35 = vld [vmem:[%s8981_s1 + $0x894] sm:$0xf] }
 0x119   : > { %2575 = vmatpush.bf16.msra.mxu3 %v5354_v15  ;;  %v5303_v18 = vld [vmem:[%s8981_s1 + $0x898] sm:$0xf0]  ;;  %v6175_v40 = vld [vmem:[%s8981_s1 + $0x704] sm:$0xf]  ;;  %v5103_v32 = vld [vmem:[%s8981_s1 + $0x708] sm:$0xf0] }
 0x11a   : > { %2534 = vmatpush.bf16.msra.mxu0 %v5154_v11  ;;  %v2290_v1 = vpop.f32.mrf.mxu2  ;;  %v2264_v6 = vpop.f32.mrf.mxu0  ;;  %v5106_v33 = vor.u32 %v6175_v40, %v5103_v32  ;;  %v6259_v40 = vld [vmem:[%s8984_s4 + $0xa0] sm:$0xff] }
 0x11b   : > { %2548 = vmatpush.bf16.msra.mxu1 %v5218_v39  ;;  %v2291_v5 = vadd.f32 %v2290_v1, %v2277_v50  ;;  %v2304_v15 = vpop.f32.mrf.mxu3  ;;  %v2265_v21 = vadd.f32 %v2264_v6, %v8239_v59  ;;  %v2278_v10 = vpop.f32.mrf.mxu1  ;;  %v5186_v39 = vor.u32 %v6195_v63, %v5183_v2  ;;  %v5314_v59 = vor.u32 %v6227_v7, %v5311_v20  ;;  %v6267_v32 = vld [vmem:[%s8984_s4 + $0xe0] sm:$0xff] }
 0x11c   : > { %2562 = vmatpush.bf16.msra.mxu2 %v5282_v29  ;;  %v5250_v29 = vor.u32 %v6211_v3, %v5247_v4 }
 0x11d   : > { %2576 = vmatpush.bf16.msra.mxu3 %v5346_v16  ;;  %v2305_v11 = vadd.f32 %v2304_v15, %v2291_v5  ;;  %v2279_v16 = vadd.f32 %v2278_v10, %v2265_v21  ;;  %v6246_v10 = vld [vmem:[%s8984_s4 + $0x38] sm:$0xff] }
 0x11e   : > { %2535 = vmatpush.bf16.msra.mxu0 %v5146_v19  ;;  %v5114_v19 = vor.u32 %v6177_v44, %v5111_v13  ;;  %v6245_v13 = vld [vmem:[%s8984_s4 + $0x30] sm:$0xff] }
 0x11f   : > { %2549 = vmatpush.bf16.msra.mxu1 %v5210_v22  ;;  %v5178_v22 = vor.u32 %v6193_v14, %v5175_v58  ;;  %v6253_v14 = vld [vmem:[%s8984_s4 + $0x70] sm:$0xff] }
 0x120   : > { %2563 = vmatpush.bf16.msra.mxu2 %v5274_v23  ;;  %v5242_v23 = vor.u32 %v6209_v17, %v5239_v43  ;;  %v6244_v17 = vld [vmem:[%s8984_s4 + $0x28] sm:$0xff] }
 0x121   : > { %2577 = vmatpush.bf16.msra.mxu3 %v5338_v41  ;;  %v5306_v41 = vor.u32 %v6225_v35, %v5303_v18  ;;  %v6252_v43 = vld [vmem:[%s8984_s4 + $0x68] sm:$0xff] }
 0x122   : > { %2536 = vmatpush.bf16.msra.mxu0 %v5138_v30  ;;  %v2292_v31 = vpop.f32.mrf.mxu2  ;;  %v5295_v30 = vld [vmem:[%s8981_s1 + $0x888] sm:$0xf0] }
 0x123   : > { %2550 = vmatpush.bf16.msra.mxu1 %v5202_v34  ;;  %v2293_v26 = vadd.f32 %v2292_v31, %v2279_v16  ;;  %v2306_v27 = vpop.f32.mrf.mxu3  ;;  %v5298_v48 = vor.u32 %v6223_v28, %v5295_v30  ;;  %v6269_v16 = vld [vmem:[%s8984_s4 + $0xf0] sm:$0xff]  ;;  %v6260_v18 = vld [vmem:[%s8984_s4 + $0xa8] sm:$0xff]  ;;  %v6266_v28 = vld [vmem:[%s8984_s4 + $0xd8] sm:$0xff] }
 0x124   : > { %2564 = vmatpush.bf16.msra.mxu2 %v5266_v37  ;;  %v5170_v37 = vor.u32 %v6191_v47, %v5167_v24  ;;  %v6242_v24 = vld [vmem:[%s8984_s4 + $0x18] sm:$0xff] }
 0x125   : > { %2578 = vmatpush.bf16.msra.mxu3 %v5330_v12  ;;  %v2307_v34 = vadd.f32 %v2306_v27, %v2293_v26  ;;  %v6258_v27 = vld [vmem:[%s8984_s4 + $0x98] sm:$0xff] }
 0x126   : > { %2537 = vmatpush.bf16.msra.mxu0 %v5130_v56 }
 0x127   : > { %2551 = vmatpush.bf16.msra.mxu1 %v5194_v57 }
 0x128   : > { %2565 = vmatpush.bf16.msra.mxu2 %v5258_v60 }
 0x129   : > { %2579 = vmatpush.bf16.msra.mxu3 %v5322_v0 }
 0x12a   : > { %2538 = vmatpush.bf16.msra.mxu0 %v5122_v9 }
 0x12b   : > { %2552 = vmatpush.bf16.msra.mxu1 %v5186_v39  ;;  %v6262_v39 = vld [vmem:[%s8984_s4 + $0xb8] sm:$0xff] }
 0x12c   : > { %2566 = vmatpush.bf16.msra.mxu2 %v5250_v29  ;;  %v6270_v29 = vld [vmem:[%s8984_s4 + $0xf8] sm:$0xff] }
 0x12d   : > { %2580 = vmatpush.bf16.msra.mxu3 %v5314_v59  ;;  %v6261_v59 = vld [vmem:[%s8984_s4 + $0xb0] sm:$0xff] }
 0x12e   : > { %2539 = vmatpush.bf16.msra.mxu0 %v5114_v19  ;;  %v6268_v19 = vld [vmem:[%s8984_s4 + $0xe8] sm:$0xff] }
 0x12f   : > { %2553 = vmatpush.bf16.msra.mxu1 %v5178_v22  ;;  %v6243_v22 = vld [vmem:[%s8984_s4 + $0x20] sm:$0xff] }
 0x130   : > { %2567 = vmatpush.bf16.msra.mxu2 %v5242_v23  ;;  %v6251_v23 = vld [vmem:[%s8984_s4 + $0x60] sm:$0xff] }
 0x131   : > { %2581 = vmatpush.bf16.msra.mxu3 %v5306_v41 }
 0x132   : > { %2540 = vmatpush.bf16.msra.mxu0 %v5106_v33  ;;  %v2318_v49 = vpop.f32.mrf.mxu0  ;;  %v6241_v33 = vld [vmem:[%s8984_s4 + $0x10] sm:$0xff] }
 0x133   : > { %2554 = vmatpush.bf16.msra.mxu1 %v5170_v37  ;;  %v2319_v12 = vadd.f32 %v2318_v49, %v2305_v11  ;;  %v2332_v50 = vpop.f32.mrf.mxu1  ;;  %v6254_v11 = vld [vmem:[%s8984_s4 + $0x78] sm:$0xff]  ;;  %v6257_v37 = vld [vmem:[%s8984_s4 + $0x90] sm:$0xff] }
 0x134   : > { %2568 = vmatpush.bf16.msra.mxu2 %v5234_v42  ;;  %v6265_v42 = vld [vmem:[%s8984_s4 + $0xd0] sm:$0xff] }
 0x135   : > { %2582 = vmatpush.bf16.msra.mxu3 %v5298_v48  ;;  %2541 = vmatmul.bf16.vlgmr.msra.gmra.mxu0 %v7457_v38  ;;  %v8425_v52 = vadd.f32 %v2332_v50, %v2319_v12  ;;  %v6240_v50 = vld [vmem:[%s8984_s4 + $0x8] sm:$0xff] }
 0x136   : > { %2555 = vmatmul.bf16.vlgmr.msra.gmra.mxu1 %v7467_v46  ;;  %2751 = vmatpush.bf16.msrb.mxu0 %v6246_v10  ;;  %v6301_v10 = vld [vmem:[%s8984_s4 + $0x1f0] sm:$0xff] }
 0x137   : > { %2569 = vmatmul.bf16.vlgmr.msra.gmra.mxu2 %v7654_v45  ;;  %v8439_v45 = vld [vmem:[%s8983_s3] sm:$0x3]  ;;  %2764 = vmatpush.bf16.msrb.mxu1 %v6254_v11  ;;  %v6276_v11 = vld [vmem:[%s8984_s4 + $0x128] sm:$0xff] }
 0x138   : > { %2583 = vmatmul.bf16.vlgmr.msra.gmra.mxu3 %v7665_v51  ;;  %v2591_v51 = vperm.slane %v8432_v8, 0  ;;  %v2601_v57 = vperm.slane %v8439_v45, 0  ;;  %2914 = vmatpush.bf16.msrb.mxu2 %v6262_v39 }
 0x139   : > { %2927 = vmatpush.bf16.msrb.mxu3 %v6270_v29  ;;  %v6292_v29 = vld [vmem:[%s8984_s4 + $0x1a8] sm:$0xff] }
 0x13a   : > { %v8427_v53 = vpop.f32.mrf.mxu2  ;;  %v2320_v54 = vpop.f32.mrf.mxu0  ;;  %2752 = vmatpush.bf16.msrb.mxu0 %v6245_v13 }
 0x13b   : > { %v8434_v38 = vpop.f32.mrf.mxu3  ;;  %v2321_v46 = vadd.f32 %v2320_v54, %v2307_v34  ;;  %v2334_v55 = vpop.f32.mrf.mxu1  ;;  %2765 = vmatpush.bf16.msrb.mxu1 %v6253_v14  ;;  %v6249_v34 = vld [vmem:[%s8984_s4 + $0x50] sm:$0xff]  ;;  %v6248_v54 = vld [vmem:[%s8984_s4 + $0x48] sm:$0xff] }
 0x13c   : > { %2915 = vmatpush.bf16.msrb.mxu2 %v6261_v59  ;;  %v6275_v59 = vld [vmem:[%s8984_s4 + $0x120] sm:$0xff] }
 0x13d   : > { %v2335_v56 = vadd.f32 %v2334_v55, %v2321_v46  ;;  %2928 = vmatpush.bf16.msrb.mxu3 %v6269_v16  ;;  %v6256_v46 = vld [vmem:[%s8984_s4 + $0x88] sm:$0xff]  ;;  %v6283_v16 = vld [vmem:[%s8984_s4 + $0x160] sm:$0xff] }
 0x13e   : > { %2753 = vmatpush.bf16.msrb.mxu0 %v6244_v17  ;;  %v6264_v55 = vld [vmem:[%s8984_s4 + $0xc8] sm:$0xff] }
 0x13f   : > { %v2597_v60 = vmul.f32 %v2591_v51, %v2335_v56  ;;  %2766 = vmatpush.bf16.msrb.mxu1 %v6252_v43  ;;  %v6299_v43 = vld [vmem:[%s8984_s4 + $0x1e0] sm:$0xff] }
 0x140   : > { %2916 = vmatpush.bf16.msrb.mxu2 %v6260_v18 }
 0x141   : > { %v8447_v61 = vadd.f32 %v2601_v57, %v2597_v60  ;;  %2929 = vmatpush.bf16.msrb.mxu3 %v6268_v19  ;;  %v6239_v60 = vld [vmem:[%s8984_s4] sm:$0xff] }
 0x142   : > { %v2348_v62 = vpop.f32.mrf.mxu2  ;;  %2754 = vmatpush.bf16.msrb.mxu0 %v6243_v22  ;;  %v6274_v22 = vld [vmem:[%s8984_s4 + $0x118] sm:$0xff] }
 0x143   : > { %v2362_v63 = vpop.f32.mrf.mxu3  ;;  %2767 = vmatpush.bf16.msrb.mxu1 %v6251_v23 }
 0x144   : > { %v2363_v0 = vadd.f32 %v2362_v63, %v2348_v62  ;;  %2917 = vmatpush.bf16.msrb.mxu2 %v6259_v40  ;;  %v6247_v62 = vld [vmem:[%s8984_s4 + $0x40] sm:$0xff]  ;;  %v2361_v63 = vadd.f32 %v8434_v38, %v8427_v53  ;;  %v6294_v53 = vld [vmem:[%s8984_s4 + $0x1b8] sm:$0xff] }
 0x145   : > { %2930 = vmatpush.bf16.msrb.mxu3 %v6267_v32  ;;  %v6302_v38 = vld [vmem:[%s8984_s4 + $0x1f8] sm:$0xff] }
 0x146   : > { %2755 = vmatpush.bf16.msrb.mxu0 %v6242_v24  ;;  %v6298_v24 = vld [vmem:[%s8984_s4 + $0x1d8] sm:$0xff] }
 0x147   : > { %2768 = vmatpush.bf16.msrb.mxu1 %v6250_v36 }
 0x148   : > { %2918 = vmatpush.bf16.msrb.mxu2 %v6258_v27  ;;  %v6281_v27 = vld [vmem:[%s8984_s4 + $0x150] sm:$0xff] }
 0x149   : > { %2931 = vmatpush.bf16.msrb.mxu3 %v6266_v28 }
 0x14a   : > { %2756 = vmatpush.bf16.msrb.mxu0 %v6241_v33 }
 0x14b   : > { %2769 = vmatpush.bf16.msrb.mxu1 %v6249_v34  ;;  %v6272_v34 = vld [vmem:[%s8984_s4 + $0x108] sm:$0xff] }
 0x14c   : > { %2919 = vmatpush.bf16.msrb.mxu2 %v6257_v37 }
 0x14d   : > { %2932 = vmatpush.bf16.msrb.mxu3 %v6265_v42 }
 0x14e   : > { %2757 = vmatpush.bf16.msrb.mxu0 %v6240_v50 }
 0x14f   : > { %2770 = vmatpush.bf16.msrb.mxu1 %v6248_v54 }
 0x150   : > { %2920 = vmatpush.bf16.msrb.mxu2 %v6256_v46  ;;  %v6271_v46 = vld [vmem:[%s8984_s4 + $0x100] sm:$0xff] }
 0x151   : > { %2933 = vmatpush.bf16.msrb.mxu3 %v6264_v55  ;;  %v6287_v55 = vld [vmem:[%s8984_s4 + $0x180] sm:$0xff] }
 0x152   : > { %v8449_v1 = vpop.f32.mrf.mxu0  ;;  %2758 = vmatpush.bf16.msrb.mxu0 %v6239_v60 }
 0x153   : > { %v8451_v2 = vpop.f32.mrf.mxu1  ;;  %2771 = vmatpush.bf16.msrb.mxu1 %v6247_v62 }
 0x15a   : > { %v8453_v3 = vpop.f32.mrf.mxu2  ;;  %v2376_v4 = vpop.f32.mrf.mxu0 }
 0x15b   : > { %v8455_v5 = vpop.f32.mrf.mxu3  ;;  %v2377_v6 = vadd.f32 %v2376_v4, %v2363_v0  ;;  %v2390_v15 = vpop.f32.mrf.mxu1  ;;  %v6278_v0 = vld [vmem:[%s8984_s4 + $0x138] sm:$0xff] }
 0x15c   : > { %v6286_v4 = vld [vmem:[%s8984_s4 + $0x178] sm:$0xff]  ;;  %3073 = vmatpush.bf16.msra.mxu0 %v6278_v0 }
 0x15d   : > { %v2391_v7 = vadd.f32 %v2390_v15, %v2377_v6  ;;  %v6255_v6 = vld [vmem:[%s8984_s4 + $0x80] sm:$0xff]  ;;  %3086 = vmatpush.bf16.msra.mxu1 %v6286_v4 }
 0x15e   : > { %v6263_v15 = vld [vmem:[%s8984_s4 + $0xc0] sm:$0xff]  ;;  %2921 = vmatpush.bf16.msrb.mxu2 %v6255_v6 }
 0x15f   : > { %2934 = vmatpush.bf16.msrb.mxu3 %v6263_v15 }
 0x162   : > { %v2404_v20 = vpop.f32.mrf.mxu2  ;;  %3232 = vmatpush.bf16.msra.mxu2 %v6294_v53 }
 0x163   : > { %v2405_v21 = vadd.f32 %v2404_v20, %v2391_v7  ;;  %v2418_v9 = vpop.f32.mrf.mxu3  ;;  %v2375_v7 = vadd.f32 %v8449_v1, %v2361_v63  ;;  %v6277_v20 = vld [vmem:[%s8984_s4 + $0x130] sm:$0xff]  ;;  %3245 = vmatpush.bf16.msra.mxu3 %v6302_v38  ;;  %v2595_v38 = vmul.f32 %v2591_v51, %v8425_v52 }
 0x164   : > { %3074 = vmatpush.bf16.msra.mxu0 %v6277_v20  ;;  %v6293_v1 = vld [vmem:[%s8984_s4 + $0x1b0] sm:$0xff] }
 0x165   : > { %v2419_v44 = vadd.f32 %v2418_v9, %v2405_v21  ;;  %v6285_v21 = vld [vmem:[%s8984_s4 + $0x170] sm:$0xff]  ;;  %v2389_v9 = vadd.f32 %v8451_v2, %v2375_v7  ;;  %v6284_v2 = vld [vmem:[%s8984_s4 + $0x168] sm:$0xff] }
 0x166   : > { %3087 = vmatpush.bf16.msra.mxu1 %v6285_v21  ;;  %3233 = vmatpush.bf16.msra.mxu2 %v6293_v1  ;;  %v2592_v21 = vperm.slane %v8432_v8, 1 }
 0x167   : > { %3246 = vmatpush.bf16.msra.mxu3 %v6301_v10  ;;  %v2403_v13 = vadd.f32 %v8453_v3, %v2389_v9  ;;  %v6291_v3 = vld [vmem:[%s8984_s4 + $0x1a0] sm:$0xff]  ;;  %v2602_v10 = vperm.slane %v8439_v45, 1  ;;  %v6318_v45 = vld [vmem:[%s8984_s4 + $0x278] sm:$0xff] }
 0x168   : > { %3075 = vmatpush.bf16.msra.mxu0 %v6276_v11 }
 0x169   : > { %v2417_v17 = vadd.f32 %v8455_v5, %v2403_v13  ;;  %v6282_v5 = vld [vmem:[%s8984_s4 + $0x158] sm:$0xff] }
 0x16a   : > { %3088 = vmatpush.bf16.msra.mxu1 %v6284_v2  ;;  %3234 = vmatpush.bf16.msra.mxu2 %v6292_v29  ;;  %v2605_v2 = vadd.f32 %v2601_v57, %v2595_v38  ;;  %v6311_v38 = vld [vmem:[%s8984_s4 + $0x240] sm:$0xff] }
 0x16c   : > { %3076 = vmatpush.bf16.msra.mxu0 %v6275_v59  ;;  %v2609_v59 = vmax.f32 %v2605_v2, 0.0  ;;  %v6349_v2 = vld [vmem:[%s8984_s4 + $0x370] sm:$0xff] }
 0x16e   : > { %3089 = vmatpush.bf16.msra.mxu1 %v6283_v16  ;;  %3235 = vmatpush.bf16.msra.mxu2 %v6291_v3 }
 0x170   : > { %3077 = vmatpush.bf16.msra.mxu0 %v6274_v22 }
 0x172   : > { %v8481_v58 = vpop.f32.mrf.mxu0  ;;  %3090 = vmatpush.bf16.msra.mxu1 %v6282_v5 }
 0x173   : > { %v8489_v35 = vpop.f32.mrf.mxu1  ;;  %v2431_v18 = vadd.f32 %v8481_v58, %v2417_v17  ;;  %v6290_v58 = vld [vmem:[%s8984_s4 + $0x198] sm:$0xff] }
 0x174   : > { %3236 = vmatpush.bf16.msra.mxu2 %v6290_v58 }
 0x175   : > { %v2445_v36 = vadd.f32 %v8489_v35, %v2431_v18  ;;  %v6297_v35 = vld [vmem:[%s8984_s4 + $0x1d0] sm:$0xff] }
 0x176   : > { %3091 = vmatpush.bf16.msra.mxu1 %v6281_v27  ;;  %v6333_v27 = vld [vmem:[%s8984_s4 + $0x2f0] sm:$0xff] }
 0x17a   : > { %v8509_v47 = vpop.f32.mrf.mxu2  ;;  %v2432_v41 = vpop.f32.mrf.mxu0 }
 0x17b   : > { %v8511_v31 = vpop.f32.mrf.mxu3  ;;  %v2433_v25 = vadd.f32 %v2432_v41, %v2419_v44  ;;  %v2446_v26 = vpop.f32.mrf.mxu1  ;;  %v6300_v44 = vld [vmem:[%s8984_s4 + $0x1e8] sm:$0xff]  ;;  %v2459_v28 = vadd.f32 %v8509_v47, %v2445_v36  ;;  %v6309_v36 = vld [vmem:[%s8984_s4 + $0x230] sm:$0xff] }
 0x17c   : > { %3247 = vmatpush.bf16.msra.mxu3 %v6300_v44  ;;  %v6280_v47 = vld [vmem:[%s8984_s4 + $0x148] sm:$0xff] }
 0x17d   : > { %v2447_v30 = vadd.f32 %v2446_v26, %v2433_v25  ;;  %v6273_v26 = vld [vmem:[%s8984_s4 + $0x110] sm:$0xff]  ;;  %3092 = vmatpush.bf16.msra.mxu1 %v6280_v47  ;;  %v6315_v47 = vld [vmem:[%s8984_s4 + $0x260] sm:$0xff] }
 0x17e   : > { %3078 = vmatpush.bf16.msra.mxu0 %v6273_v26  ;;  %v6325_v26 = vld [vmem:[%s8984_s4 + $0x2b0] sm:$0xff] }
 0x180   : > { %3248 = vmatpush.bf16.msra.mxu3 %v6299_v43 }
 0x182   : > { %v2460_v48 = vpop.f32.mrf.mxu2  ;;  %3079 = vmatpush.bf16.msra.mxu0 %v6272_v34  ;;  %v6307_v34 = vld [vmem:[%s8984_s4 + $0x220] sm:$0xff] }
 0x183   : > { %v2461_v49 = vadd.f32 %v2460_v48, %v2447_v30  ;;  %v2474_v12 = vpop.f32.mrf.mxu3  ;;  %v6289_v30 = vld [vmem:[%s8984_s4 + $0x190] sm:$0xff]  ;;  %v2473_v48 = vadd.f32 %v8511_v31, %v2459_v28  ;;  %v6279_v31 = vld [vmem:[%s8984_s4 + $0x140] sm:$0xff]  ;;  %v6308_v28 = vld [vmem:[%s8984_s4 + $0x228] sm:$0xff] }
 0x184   : > { %3249 = vmatpush.bf16.msra.mxu3 %v6298_v24  ;;  %3237 = vmatpush.bf16.msra.mxu2 %v6289_v30  ;;  %v6316_v30 = vld [vmem:[%s8984_s4 + $0x268] sm:$0xff] }
 0x185   : > { %v2475_v56 = vadd.f32 %v2474_v12, %v2461_v49  ;;  %v6288_v49 = vld [vmem:[%s8984_s4 + $0x188] sm:$0xff]  ;;  %3093 = vmatpush.bf16.msra.mxu1 %v6279_v31 }
 0x186   : > { %v6296_v12 = vld [vmem:[%s8984_s4 + $0x1c8] sm:$0xff]  ;;  %3080 = vmatpush.bf16.msra.mxu0 %v6271_v46  ;;  %v6330_v46 = vld [vmem:[%s8984_s4 + $0x2d8] sm:$0xff] }
 0x188   : > { %3250 = vmatpush.bf16.msra.mxu3 %v6297_v35  ;;  %3238 = vmatpush.bf16.msra.mxu2 %v6288_v49  ;;  %v6324_v35 = vld [vmem:[%s8984_s4 + $0x2a8] sm:$0xff]  ;;  %v6314_v49 = vld [vmem:[%s8984_s4 + $0x258] sm:$0xff] }
 0x18c   : > { %3251 = vmatpush.bf16.msra.mxu3 %v6296_v12  ;;  %3239 = vmatpush.bf16.msra.mxu2 %v6287_v55 }
 0x192   : > { %v2486_v39 = vpop.f32.mrf.mxu0 }
 0x193   : > { %v2500_v14 = vpop.f32.mrf.mxu1  ;;  %v2487_v54 = vadd.f32 %v2486_v39, %v2473_v48  ;;  %v6306_v48 = vld [vmem:[%s8984_s4 + $0x218] sm:$0xff] }
 0x195   : > { %v2501_v60 = vadd.f32 %v2500_v14, %v2487_v54  ;;  %v6322_v54 = vld [vmem:[%s8984_s4 + $0x298] sm:$0xff] }
 0x19a   : > { %v2514_v19 = vpop.f32.mrf.mxu2  ;;  %v2488_v23 = vpop.f32.mrf.mxu0 }
 0x19b   : > { %v2528_v40 = vpop.f32.mrf.mxu3  ;;  %v2489_v32 = vadd.f32 %v2488_v23, %v2475_v56  ;;  %v2502_v41 = vpop.f32.mrf.mxu1  ;;  %v6295_v56 = vld [vmem:[%s8984_s4 + $0x1c0] sm:$0xff]  ;;  %v2515_v62 = vadd.f32 %v2514_v19, %v2501_v60  ;;  %v6310_v19 = vld [vmem:[%s8984_s4 + $0x238] sm:$0xff]  ;;  %v6313_v60 = vld [vmem:[%s8984_s4 + $0x250] sm:$0xff] }
 0x19c   : > { %3252 = vmatpush.bf16.msra.mxu3 %v6295_v56  ;;  %v6326_v23 = vld [vmem:[%s8984_s4 + $0x2b8] sm:$0xff]  ;;  %v6305_v56 = vld [vmem:[%s8984_s4 + $0x210] sm:$0xff] }
 0x19d   : > { %v2503_v25 = vadd.f32 %v2502_v41, %v2489_v32  ;;  %v2529_v63 = vadd.f32 %v2528_v40, %v2515_v62  ;;  %v6334_v40 = vld [vmem:[%s8984_s4 + $0x2f8] sm:$0xff]  ;;  %v2611_v32 = vmax.f32 %v8447_v61, 0.0  ;;  %v6317_v61 = vld [vmem:[%s8984_s4 + $0x270] sm:$0xff] }
 0x19e   : > { %v6321_v62 = vld [vmem:[%s8984_s4 + $0x290] sm:$0xff] }
 0x1a2   : > { %v2516_v33 = vpop.f32.mrf.mxu2 }
 0x1a3   : > { %v2517_v37 = vadd.f32 %v2516_v33, %v2503_v25  ;;  %v2530_v42 = vpop.f32.mrf.mxu3  ;;  %v6332_v33 = vld [vmem:[%s8984_s4 + $0x2e8] sm:$0xff] }
 0x1a5   : > { %v2531_v50 = vadd.f32 %v2530_v42, %v2517_v37  ;;  %v6323_v37 = vld [vmem:[%s8984_s4 + $0x2a0] sm:$0xff] }
 0x1a6   : > { %v6331_v42 = vld [vmem:[%s8984_s4 + $0x2e0] sm:$0xff] }
 0x1b2   : > { %v2542_v0 = vpop.f32.mrf.mxu0 }
 0x1b3   : > { %v2543_v4 = vadd.f32 %v2542_v0, %v2529_v63  ;;  %v2556_v6 = vpop.f32.mrf.mxu1  ;;  %v6329_v63 = vld [vmem:[%s8984_s4 + $0x2d0] sm:$0xff]  ;;  %v6304_v0 = vld [vmem:[%s8984_s4 + $0x208] sm:$0xff] }
 0x1b5   : > { %v2557_v15 = vadd.f32 %v2556_v6, %v2543_v4  ;;  %v6312_v4 = vld [vmem:[%s8984_s4 + $0x248] sm:$0xff] }
 0x1b6   : > { %v6320_v6 = vld [vmem:[%s8984_s4 + $0x288] sm:$0xff] }
 0x1ba   : > { %v2570_v53 = vpop.f32.mrf.mxu2  ;;  %v2544_v9 = vpop.f32.mrf.mxu0 }
 0x1bb   : > { %v2571_v7 = vadd.f32 %v2570_v53, %v2557_v15  ;;  %v2584_v20 = vpop.f32.mrf.mxu3  ;;  %v2545_v11 = vadd.f32 %v2544_v9, %v2531_v50  ;;  %v2558_v29 = vpop.f32.mrf.mxu1  ;;  %v6328_v15 = vld [vmem:[%s8984_s4 + $0x2c8] sm:$0xff]  ;;  %v6303_v53 = vld [vmem:[%s8984_s4 + $0x200] sm:$0xff] }
 0x1bc   : > { %v6327_v9 = vld [vmem:[%s8984_s4 + $0x2c0] sm:$0xff] }
 0x1bd   : > { %v2585_v1 = vadd.f32 %v2584_v20, %v2571_v7  ;;  %v2559_v13 = vadd.f32 %v2558_v29, %v2545_v11  ;;  %v6342_v7 = vld [vmem:[%s8984_s4 + $0x338] sm:$0xff]  ;;  %v6341_v11 = vld [vmem:[%s8984_s4 + $0x330] sm:$0xff] }
 0x1be   : > { %v6350_v20 = vld [vmem:[%s8984_s4 + $0x378] sm:$0xff] }
 0x1bf   : > { %v2596_v39 = vmul.f32 %v2592_v21, %v2585_v1  ;;  %v6358_v1 = vld [vmem:[%s8984_s4 + $0x3b8] sm:$0xff] }
 0x1c1   : > { %v2606_v44 = vadd.f32 %v2602_v10, %v2596_v39 }
 0x1c2   : > { %v2572_v14 = vpop.f32.mrf.mxu2 }
 0x1c3   : > { %v2610_v16 = vmax.f32 %v2606_v44, 0.0  ;;  %v2573_v52 = vadd.f32 %v2572_v14, %v2559_v13  ;;  %v2586_v51 = vpop.f32.mrf.mxu3  ;;  %v6357_v44 = vld [vmem:[%s8984_s4 + $0x3b0] sm:$0xff] }
 0x1c4   : > { %v6365_v13 = vld [vmem:[%s8984_s4 + $0x3f0] sm:$0xff] }
 0x1c5   : > { %v2613_v17 = vpack.c.bf16 %v2610_v16, %v2609_v59  ;;  %v2587_v3 = vadd.f32 %v2586_v51, %v2573_v52  ;;  %v6340_v16 = vld [vmem:[%s8984_s4 + $0x328] sm:$0xff] }
 0x1c6   : > { %v6348_v52 = vld [vmem:[%s8984_s4 + $0x368] sm:$0xff] }
 0x1c7   : > { %v2649_v8 = vunpack.c.l.b16 %v2613_v17  ;;  %v2650_v43 = vunpack.c.h.b16 %v2613_v17  ;;  %v2598_v18 = vmul.f32 %v2592_v21, %v2587_v3  ;;  %v6319_v21 = vld [vmem:[%s8984_s4 + $0x280] sm:$0xff]  ;;  %v6356_v51 = vld [vmem:[%s8984_s4 + $0x3a8] sm:$0xff] }
 0x1c8   : > { %v6364_v17 = vld [vmem:[%s8984_s4 + $0x3e8] sm:$0xff]  ;;  %v6339_v3 = vld [vmem:[%s8984_s4 + $0x320] sm:$0xff] }
 0x1c9   : > { %v8680_v57 = vpack.c.b16 %v2649_v8, %v2649_v8  ;;  %v8682_v22 = vpack.c.b16 %v2650_v43, %v2650_v43  ;;  %v2608_v5 = vadd.f32 %v2602_v10, %v2598_v18  ;;  %v6366_v10 = vld [vmem:[%s8984_s4 + $0x3f8] sm:$0xff]  ;;  %v6347_v8 = vld [vmem:[%s8984_s4 + $0x360] sm:$0xff] }
 0x1ca   : > { %v6355_v43 = vld [vmem:[%s8984_s4 + $0x3a0] sm:$0xff] }
 0x1cb   : > { %v2612_v41 = vmax.f32 %v2608_v5, 0.0  ;;  %2759 = vmatmul.bf16.vlgmr.msrb.gmra.mxu0 %v8680_v57  ;;  %2772 = vmatmul.bf16.vlgmr.msrb.gmra.mxu1 %v8682_v22  ;;  %v8694_v58 = vshrl.u32 %v8680_v57, 16  ;;  %v8697_v24 = vshrl.u32 %v8682_v22, 16  ;;  %v2973_v12 = vrot.slane %v8680_v57, 1  ;;  %v6363_v18 = vld [vmem:[%s8984_s4 + $0x3e0] sm:$0xff]  ;;  %v6354_v5 = vld [vmem:[%s8984_s4 + $0x398] sm:$0xff] }
 0x1cc   : > { %3391 = vmatpush.bf16.msrb.mxu0 %v6310_v19  ;;  %3404 = vmatpush.bf16.msrb.mxu1 %v6318_v45  ;;  %v2974_v50 = vrot.slane %v8682_v22, 1  ;;  %v3291_v39 = vrot.slane %v8680_v57, 2  ;;  %v3292_v29 = vrot.slane %v8682_v22, 2  ;;  %v6338_v19 = vld [vmem:[%s8984_s4 + $0x318] sm:$0xff] }
 0x1cd   : > { %v8705_v25 = vpack.c.bf16 %v2612_v41, %v2611_v32  ;;  %2922 = vmatmul.bf16.vlgmr.msrb.gmra.mxu2 %v8694_v58  ;;  %2935 = vmatmul.bf16.vlgmr.msrb.gmra.mxu3 %v8697_v24  ;;  %v3132_v31 = vrot.slane %v8694_v58, 1  ;;  %v3133_v55 = vrot.slane %v8697_v24, 1  ;;  %v3450_v14 = vrot.slane %v8694_v58, 2  ;;  %v6346_v45 = vld [vmem:[%s8984_s4 + $0x358] sm:$0xff]  ;;  %v6345_v32 = vld [vmem:[%s8984_s4 + $0x350] sm:$0xff] }
 0x1ce   : > { %3550 = vmatpush.bf16.msrb.mxu2 %v6326_v23  ;;  %3563 = vmatpush.bf16.msrb.mxu3 %v6334_v40  ;;  %v3451_v59 = vrot.slane %v8697_v24, 2  ;;  %v6362_v23 = vld [vmem:[%s8984_s4 + $0x3d8] sm:$0xff]  ;;  %v6337_v40 = vld [vmem:[%s8984_s4 + $0x310] sm:$0xff] }
 0x1cf   : > { %v6353_v41 = vld [vmem:[%s8984_s4 + $0x390] sm:$0xff] }
 0x1d0   : > { %3392 = vmatpush.bf16.msrb.mxu0 %v6309_v36  ;;  %3405 = vmatpush.bf16.msrb.mxu1 %v6317_v61  ;;  %v6361_v36 = vld [vmem:[%s8984_s4 + $0x3d0] sm:$0xff]  ;;  %v6336_v61 = vld [vmem:[%s8984_s4 + $0x308] sm:$0xff] }
 0x1d2   : > { %3551 = vmatpush.bf16.msrb.mxu2 %v6325_v26  ;;  %3564 = vmatpush.bf16.msrb.mxu3 %v6333_v27  ;;  %v6344_v26 = vld [vmem:[%s8984_s4 + $0x348] sm:$0xff] }
 0x1d3   : > { %v6352_v27 = vld [vmem:[%s8984_s4 + $0x388] sm:$0xff] }
 0x1d4   : > { %3393 = vmatpush.bf16.msrb.mxu0 %v6308_v28  ;;  %3406 = vmatpush.bf16.msrb.mxu1 %v6316_v30  ;;  %v6360_v28 = vld [vmem:[%s8984_s4 + $0x3c8] sm:$0xff]  ;;  %v6335_v30 = vld [vmem:[%s8984_s4 + $0x300] sm:$0xff] }
 0x1d6   : > { %3552 = vmatpush.bf16.msrb.mxu2 %v6324_v35  ;;  %3565 = vmatpush.bf16.msrb.mxu3 %v6332_v33  ;;  %v6343_v35 = vld [vmem:[%s8984_s4 + $0x340] sm:$0xff]  ;;  %v6374_v33 = vld [vmem:[%s8984_s4 + $0x438] sm:$0xff] }
 0x1d8   : > { %3394 = vmatpush.bf16.msrb.mxu0 %v6307_v34  ;;  %3407 = vmatpush.bf16.msrb.mxu1 %v6315_v47  ;;  %v6382_v34 = vld [vmem:[%s8984_s4 + $0x478] sm:$0xff]  ;;  %v6351_v47 = vld [vmem:[%s8984_s4 + $0x380] sm:$0xff] }
 0x1da   : > { %3553 = vmatpush.bf16.msrb.mxu2 %v6323_v37  ;;  %3566 = vmatpush.bf16.msrb.mxu3 %v6331_v42  ;;  %v6359_v37 = vld [vmem:[%s8984_s4 + $0x3c0] sm:$0xff]  ;;  %v3609_v42 = vrot.slane %v8680_v57, 3  ;;  %v6372_v57 = vld [vmem:[%s8984_s4 + $0x428] sm:$0xff] }
 0x1db   : > { %3081 = vmatmul.bf16.vlgmr.msra.gmra.mxu0 %v2973_v12  ;;  %3094 = vmatmul.bf16.vlgmr.msra.gmra.mxu1 %v2974_v50  ;;  %v6381_v12 = vld [vmem:[%s8984_s4 + $0x470] sm:$0xff]  ;;  %v3768_v50 = vrot.slane %v8694_v58, 3  ;;  %v6371_v58 = vld [vmem:[%s8984_s4 + $0x420] sm:$0xff] }
 0x1dc   : > { %3395 = vmatpush.bf16.msrb.mxu0 %v6306_v48  ;;  %3408 = vmatpush.bf16.msrb.mxu1 %v6314_v49  ;;  %v3610_v48 = vrot.slane %v8682_v22, 3  ;;  %v6373_v49 = vld [vmem:[%s8984_s4 + $0x430] sm:$0xff]  ;;  %v6380_v22 = vld [vmem:[%s8984_s4 + $0x468] sm:$0xff] }
 0x1dd   : > { %3240 = vmatmul.bf16.vlgmr.msra.gmra.mxu2 %v3132_v31  ;;  %3253 = vmatmul.bf16.vlgmr.msra.gmra.mxu3 %v3133_v55  ;;  %v6378_v31 = vld [vmem:[%s8984_s4 + $0x458] sm:$0xff]  ;;  %v6369_v55 = vld [vmem:[%s8984_s4 + $0x410] sm:$0xff] }
 0x1de   : > { %3554 = vmatpush.bf16.msrb.mxu2 %v6322_v54  ;;  %3567 = vmatpush.bf16.msrb.mxu3 %v6330_v46  ;;  %v3769_v54 = vrot.slane %v8697_v24, 3  ;;  %v6379_v24 = vld [vmem:[%s8984_s4 + $0x460] sm:$0xff]  ;;  %v6370_v46 = vld [vmem:[%s8984_s4 + $0x418] sm:$0xff] }
 0x1e0   : > { %3396 = vmatpush.bf16.msrb.mxu0 %v6305_v56  ;;  %3409 = vmatpush.bf16.msrb.mxu1 %v6313_v60  ;;  %v6377_v56 = vld [vmem:[%s8984_s4 + $0x450] sm:$0xff]  ;;  %v6368_v60 = vld [vmem:[%s8984_s4 + $0x408] sm:$0xff] }
 0x1e2   : > { %3555 = vmatpush.bf16.msrb.mxu2 %v6321_v62  ;;  %3568 = vmatpush.bf16.msrb.mxu3 %v6329_v63  ;;  %v6376_v62 = vld [vmem:[%s8984_s4 + $0x448] sm:$0xff]  ;;  %v6367_v63 = vld [vmem:[%s8984_s4 + $0x400] sm:$0xff] }
 0x1e4   : > { %3397 = vmatpush.bf16.msrb.mxu0 %v6304_v0  ;;  %3410 = vmatpush.bf16.msrb.mxu1 %v6312_v4  ;;  %v6375_v0 = vld [vmem:[%s8984_s4 + $0x440] sm:$0xff]  ;;  %v3928_v4 = vunpack.c.l.b16 %v8705_v25 }
 0x1e6   : > { %3556 = vmatpush.bf16.msrb.mxu2 %v6320_v6  ;;  %3569 = vmatpush.bf16.msrb.mxu3 %v6328_v15  ;;  %v3929_v6 = vunpack.c.h.b16 %v8705_v25  ;;  %v3930_v15 = vpack.c.b16 %v3928_v4, %v3928_v4 }
 0x1e8   : > { %3398 = vmatpush.bf16.msrb.mxu0 %v6303_v53  ;;  %3411 = vmatpush.bf16.msrb.mxu1 %v6311_v38  ;;  %v3931_v53 = vpack.c.b16 %v3929_v6, %v3929_v6 }
 0x1ea   : > { %3557 = vmatpush.bf16.msrb.mxu2 %v6319_v21  ;;  %3570 = vmatpush.bf16.msrb.mxu3 %v6327_v9  ;;  %v2615_v21 = vld [vmem:[%s8985_s5] sm:$0x1] }
 0x1eb   : > { %3399 = vmatmul.bf16.vlgmr.msrb.gmra.mxu0 %v3291_v39  ;;  %3412 = vmatmul.bf16.vlgmr.msrb.gmra.mxu1 %v3292_v29 }
 0x1ec   : > { %3709 = vmatpush.bf16.msra.mxu0 %v6342_v7  ;;  %3722 = vmatpush.bf16.msra.mxu1 %v6350_v20 }
 0x1ed   : > { %3558 = vmatmul.bf16.vlgmr.msrb.gmra.mxu2 %v3450_v14  ;;  %3571 = vmatmul.bf16.vlgmr.msrb.gmra.mxu3 %v3451_v59 }
 0x1ee   : > { %3868 = vmatpush.bf16.msra.mxu2 %v6358_v1  ;;  %3881 = vmatpush.bf16.msra.mxu3 %v6366_v10 }
 0x1f0   : > { %3710 = vmatpush.bf16.msra.mxu0 %v6341_v11  ;;  %3723 = vmatpush.bf16.msra.mxu1 %v6349_v2 }
 0x1f2   : > { %3869 = vmatpush.bf16.msra.mxu2 %v6357_v44  ;;  %3882 = vmatpush.bf16.msra.mxu3 %v6365_v13 }
 0x1f4   : > { %3711 = vmatpush.bf16.msra.mxu0 %v6340_v16  ;;  %3724 = vmatpush.bf16.msra.mxu1 %v6348_v52 }
 0x1f6   : > { %3870 = vmatpush.bf16.msra.mxu2 %v6356_v51  ;;  %3883 = vmatpush.bf16.msra.mxu3 %v6364_v17 }
 0x1f8   : > { %3712 = vmatpush.bf16.msra.mxu0 %v6339_v3  ;;  %3725 = vmatpush.bf16.msra.mxu1 %v6347_v8 }
 0x1fa   : > { %3871 = vmatpush.bf16.msra.mxu2 %v6355_v43  ;;  %3884 = vmatpush.bf16.msra.mxu3 %v6363_v18 }
 0x1fc   : > { %3713 = vmatpush.bf16.msra.mxu0 %v6338_v19  ;;  %3726 = vmatpush.bf16.msra.mxu1 %v6346_v45 }
 0x1fe   : > { %3872 = vmatpush.bf16.msra.mxu2 %v6354_v5  ;;  %3885 = vmatpush.bf16.msra.mxu3 %v6362_v23 }
 0x200   : > { %3714 = vmatpush.bf16.msra.mxu0 %v6337_v40  ;;  %3727 = vmatpush.bf16.msra.mxu1 %v6345_v32 }
 0x202   : > { %3873 = vmatpush.bf16.msra.mxu2 %v6353_v41  ;;  %3886 = vmatpush.bf16.msra.mxu3 %v6361_v36 }
 0x204   : > { %3715 = vmatpush.bf16.msra.mxu0 %v6336_v61  ;;  %3728 = vmatpush.bf16.msra.mxu1 %v6344_v26 }
 0x206   : > { %3874 = vmatpush.bf16.msra.mxu2 %v6352_v27  ;;  %3887 = vmatpush.bf16.msra.mxu3 %v6360_v28 }
 0x208   : > { %3716 = vmatpush.bf16.msra.mxu0 %v6335_v30  ;;  %3729 = vmatpush.bf16.msra.mxu1 %v6343_v35 }
 0x20a   : > { %3875 = vmatpush.bf16.msra.mxu2 %v6351_v47  ;;  %3888 = vmatpush.bf16.msra.mxu3 %v6359_v37 }
 0x20b   : > { %3717 = vmatmul.bf16.vlgmr.msra.gmra.mxu0 %v3609_v42  ;;  %3730 = vmatmul.bf16.vlgmr.msra.gmra.mxu1 %v3610_v48 }
 0x20c   : > { %4030 = vmatpush.bf16.msrb.mxu0 %v6374_v33  ;;  %4043 = vmatpush.bf16.msrb.mxu1 %v6382_v34 }
 0x20d   : > { %3876 = vmatmul.bf16.vlgmr.msra.gmra.mxu2 %v3768_v50  ;;  %3889 = vmatmul.bf16.vlgmr.msra.gmra.mxu3 %v3769_v54 }
 0x210   : > { %4031 = vmatpush.bf16.msrb.mxu0 %v6373_v49  ;;  %4044 = vmatpush.bf16.msrb.mxu1 %v6381_v12 }
 0x214   : > { %4032 = vmatpush.bf16.msrb.mxu0 %v6372_v57  ;;  %4045 = vmatpush.bf16.msrb.mxu1 %v6380_v22 }
 0x218   : > { %4033 = vmatpush.bf16.msrb.mxu0 %v6371_v58  ;;  %4046 = vmatpush.bf16.msrb.mxu1 %v6379_v24 }
 0x21c   : > { %4034 = vmatpush.bf16.msrb.mxu0 %v6370_v46  ;;  %4047 = vmatpush.bf16.msrb.mxu1 %v6378_v31 }
 0x220   : > { %4035 = vmatpush.bf16.msrb.mxu0 %v6369_v55  ;;  %4048 = vmatpush.bf16.msrb.mxu1 %v6377_v56 }
 0x224   : > { %4036 = vmatpush.bf16.msrb.mxu0 %v6368_v60  ;;  %4049 = vmatpush.bf16.msrb.mxu1 %v6376_v62 }
 0x228   : > { %4037 = vmatpush.bf16.msrb.mxu0 %v6367_v63  ;;  %4050 = vmatpush.bf16.msrb.mxu1 %v6375_v0 }
 0x22b   : > { %4038 = vmatmul.bf16.vlgmr.msrb.gmra.mxu0 %v3930_v15  ;;  %4051 = vmatmul.bf16.vlgmr.msrb.gmra.mxu1 %v3931_v53 }
 0x248   : > { %v2760_v38 = vpop.f32.mrf.mxu0  ;;  %v2773_v7 = vpop.f32.mrf.mxu1 }
 0x249   : > { %v2774_v20 = vadd.f32 %v2773_v7, %v2760_v38 }
 0x24b   : > { %v2777_v2 = vadd.f32 %v2774_v20, %v2615_v21 }
 0x250   : > { %v2762_v9 = vpop.f32.mrf.mxu0  ;;  %v2775_v1 = vpop.f32.mrf.mxu1 }
 0x251   : > { %v2923_v10 = vpop.f32.mrf.mxu2  ;;  %v2936_v11 = vpop.f32.mrf.mxu3 }
 0x252   : > { %v2937_v39 = vadd.f32 %v2936_v11, %v2923_v10 }
 0x254   : > { %v2940_v25 = vadd.f32 %v2937_v39, %v2777_v2 }
 0x258   : > { %v3082_v29 = vpop.f32.mrf.mxu0  ;;  %v3095_v44 = vpop.f32.mrf.mxu1 }
 0x259   : > { %v2925_v13 = vpop.f32.mrf.mxu2  ;;  %v2938_v14 = vpop.f32.mrf.mxu3  ;;  %v3096_v28 = vadd.f32 %v3095_v44, %v3082_v29 }
 0x25b   : > { %v3099_v34 = vadd.f32 %v3096_v28, %v2940_v25 }
 0x260   : > { %v3084_v59 = vpop.f32.mrf.mxu0  ;;  %v3097_v16 = vpop.f32.mrf.mxu1 }
 0x261   : > { %v3241_v52 = vpop.f32.mrf.mxu2  ;;  %v3254_v51 = vpop.f32.mrf.mxu3 }
 0x262   : > { %v3255_v33 = vadd.f32 %v3254_v51, %v3241_v52 }
 0x264   : > { %v3258_v37 = vadd.f32 %v3255_v33, %v3099_v34 }
 0x268   : > { %v3400_v8 = vpop.f32.mrf.mxu0  ;;  %v3413_v43 = vpop.f32.mrf.mxu1 }
 0x269   : > { %v3243_v17 = vpop.f32.mrf.mxu2  ;;  %v3256_v3 = vpop.f32.mrf.mxu3  ;;  %v3414_v47 = vadd.f32 %v3413_v43, %v3400_v8 }
 0x26b   : > { %v3417_v48 = vadd.f32 %v3414_v47, %v3258_v37 }
 0x270   : > { %v3402_v45 = vpop.f32.mrf.mxu0  ;;  %v3415_v5 = vpop.f32.mrf.mxu1 }
 0x271   : > { %v3559_v18 = vpop.f32.mrf.mxu2  ;;  %v3572_v19 = vpop.f32.mrf.mxu3 }
 0x272   : > { %v3573_v42 = vadd.f32 %v3572_v19, %v3559_v18 }
 0x274   : > { %v3576_v12 = vadd.f32 %v3573_v42, %v3417_v48 }
 0x279   : > { %v3561_v23 = vpop.f32.mrf.mxu2  ;;  %v3574_v40 = vpop.f32.mrf.mxu3 }
 0x288   : > { %v3718_v32 = vpop.f32.mrf.mxu0  ;;  %v3731_v41 = vpop.f32.mrf.mxu1 }
 0x289   : > { %v3732_v49 = vadd.f32 %v3731_v41, %v3718_v32 }
 0x28b   : > { %v3735_v54 = vadd.f32 %v3732_v49, %v3576_v12 }
 0x290   : > { %v3720_v36 = vpop.f32.mrf.mxu0  ;;  %v3733_v61 = vpop.f32.mrf.mxu1 }
 0x291   : > { %v3877_v26 = vpop.f32.mrf.mxu2  ;;  %v3890_v27 = vpop.f32.mrf.mxu3 }
 0x292   : > { %v3891_v50 = vadd.f32 %v3890_v27, %v3877_v26 }
 0x294   : > { %v3894_v58 = vadd.f32 %v3891_v50, %v3735_v54 }
 0x299   : > { %v3879_v30 = vpop.f32.mrf.mxu2  ;;  %v3892_v35 = vpop.f32.mrf.mxu3 }
 0x2a8   : > { %v4039_v57 = vpop.f32.mrf.mxu0  ;;  %v4052_v22 = vpop.f32.mrf.mxu1 }
 0x2a9   : > { %v4053_v24 = vadd.f32 %v4052_v22, %v4039_v57 }
 0x2ab   : > { %v4056_v46 = vadd.f32 %v4053_v24, %v3894_v58 }
 0x2ad   : > { %4057 = vst [vmem:[%s243_s12] sm:$0x1] %v4056_v46 }
 0x2ae   : > { %6450 = shalt.err (!%p6447_p3)
}
 0x2af   : > { %6384 = dma.vmem_to_hbm [thread:$0]  (%p6560_p5), %s4070_s13, 16, %s4072_s15, %s4059_s16  }
 0x2b0   : > { %v4041_v31 = vpop.f32.mrf.mxu0  ;;  %v4054_v55 = vpop.f32.mrf.mxu1 }
 0x2b1 PF: > { %p6390_p4 = scmp.ge.s32.totalorder %s6485_s24, 2  ;;  %s4083_s26 = sand.u32 1, %s6473_s21  }
 0x2b2   : > { %s4084_s28 = scalar_lea.sflag [#allocation3], %s4083_s26 }
 0x2b3   : > { %p6387_p7 = pnand %p6390_p4, %p6564_p6 }
 0x2b5   : > { %p6388_p8 = pneg %p6387_p7 }
 0x2b7   : > { %6468 = dma.done.wait (%p6388_p8), %s4084_s28, 16  }
 0x2b8   : > { %6470 = vsyncadd (%p6388_p8), %s4084_s28, 4294967280  ;;  %p16_p5 = scmp.ge.s32.totalorder %s6547_s27, 4   ;;  %s8989_s21 = smov %s6477_s22 }
 0x2b9   : > { %s8990_s22 = smov %s6481_s23  ;;  %s8991_s23 = smov %s6558_s30 }
 0x2ba   : > { %s8992_s24 = smov %s6547_s27  ;;  %18 = sbr.rel (!%p16_p5) target bundleno = 3 (0x3), region = 79 }
 0x2bf   :  { %4089 = vsyncpa [#allocation3], 1 }
 0x2c0   :  { %4091 = vsyncpa [#allocation3 + $0x1], 1 }

</bundles_post_ra>
